<compile_context>
chip_gen: v6e
topology: v6e:2x2x1
jax: 0.10.0
libtpu: 0.0.40
codegen_flags: <defaults>
</compile_context>

<pallas_src>
import functools

import numpy as np
import jax
import jax.numpy as jnp
from jax import lax
from jax.experimental import pallas as pl
from jax.experimental.pallas import tpu as pltpu

BN_EPS = 1e-5

# Per-dimension kernel-tap indices for the (even, odd) output parity classes
# (derived from out[o] = sum_i x[i] * w[o - 2*i + 1]):
#   even: out[2m]   = xp[m]*w[3] + xp[m+1]*w[1]
#   odd : out[2m-1] = xp[m]*w[2] + xp[m+1]*w[0]        (xp = zero-padded input)
_TAP = ((3, 1), (2, 0))


# ------------------------------ Pallas kernel -------------------------------

def _upconv_kernel(x_ref, w_ref, shift_ref, o_ref, *, tap_offsets, tile_m):
    # x_ref:     (1, 1, spp_tile, cin_p)   bf16  flattened haloed input tile
    # w_ref:     (8*cin_p, 8*cout_p)       bf16  BN-scale-folded, class-packed weights
    # shift_ref: (1, 8*cout_p)             f32   folded BN shift (+ conv bias)
    # o_ref:     (1, 1, tile_m, 8*cout_p)  bf16
    cols = [x_ref[0, 0, t:t + tile_m, :] for t in tap_offsets]   # 8 x (tile_m, cin_p)
    patch = jnp.concatenate(cols, axis=-1)                       # (tile_m, 8*cin_p)
    acc = jnp.dot(patch, w_ref[...], preferred_element_type=jnp.float32)
    y = jnp.maximum(acc + shift_ref[...], 0.0)                   # fused shift + ReLU
    o_ref[0, 0] = y.astype(o_ref.dtype)                          # bf16 writeback


# ------------------------------- JAX wrapper --------------------------------

def _pack_weights(w, scale, cin_p, cout_p):
    """w: (Cin, Cout, 4, 4, 4) -> (8*cin_p, 8*cout_p), class-packed along lanes.

    Rows are tap-major (tap*cin_p + cin); columns are class-major (class*cout_p + ch).
    The BatchNorm scale is folded into the columns in f32.
    """
    cin, cout = w.shape[0], w.shape[1]
    ws = w.astype(jnp.float32) * scale.astype(jnp.float32)[None, :, None, None, None]
    w_pad = jnp.zeros((cin_p, cout_p, 4, 4, 4), jnp.float32).at[:cin, :cout].set(ws)
    blocks = []
    for rd in range(2):
        for rh in range(2):
            for rw in range(2):
                taps = [w_pad[:, :, _TAP[rd][a], _TAP[rh][b], _TAP[rw][c]]
                        for a in range(2) for b in range(2) for c in range(2)]
                blocks.append(jnp.stack(taps, axis=0).reshape(8 * cin_p, cout_p))
    return jnp.concatenate(blocks, axis=1)           # (8*cin_p, 8*cout_p), f32


@jax.jit
def upconv_block_forward(x, w, bias, gamma, beta, mean, var):
    """x: (N, Cin, D, H, W); w: (Cin, Cout, 4, 4, 4) (PyTorch ConvTranspose3d layout).

    Returns (N, Cout, 2D+1, 2H+1, 2W+1) = ConvTranspose3d(4,2,1,op=1)+bias+BN+ReLU.
    """
    n, cin, d, h, wd = x.shape
    cout = w.shape[1]
    cin_p = 16 * ((cin + 15) // 16)        # K = 8*cin_p -> multiple of 128
    cout_p = 16 * ((cout + 15) // 16)      # lanes = 8*cout_p -> multiple of 128
    lanes = 8 * cout_p

    # ---- folded BN (+ conv bias) parameters, scale folded into the weights ----
    scale = gamma / jnp.sqrt(var + BN_EPS)
    shift = beta + (bias - mean) * scale
    w_packed = _pack_weights(w, scale, cin_p, cout_p).astype(jnp.bfloat16)
    shift_packed = jnp.tile(jnp.pad(shift, (0, cout_p - cout)), 8)
    shift_packed = shift_packed.reshape(1, lanes).astype(jnp.float32)

    # ---- channels-last, zero-padded, haloed depth tiles, flattened spatial ----
    hp, wp = h + 2, wd + 2
    base_d = d + 1                                   # valid base positions per dim
    tile_d = max(1, min(base_d, 2048 // (hp * wp)))  # ~2k matmul rows per grid step
    n_td = -(-base_d // tile_d)
    need_d = n_td * tile_d + 2                       # +1 halo tap, +1 overhang slice
    xt = jnp.transpose(x, (0, 2, 3, 4, 1))
    xp = jnp.pad(xt, ((0, 0), (1, need_d - d - 1), (1, 1), (1, 1), (0, cin_p - cin)))
    idx = jnp.arange(n_td)[:, None] * tile_d + jnp.arange(tile_d + 2)[None, :]
    xh = xp[:, idx]                                  # (n, n_td, tile_d+2, hp, wp, cin_p)
    spp_tile = (tile_d + 2) * hp * wp
    xh = xh.reshape(n, n_td, spp_tile, cin_p).astype(jnp.bfloat16)

    tile_m = tile_d * hp * wp
    tap_offsets = tuple(a * hp * wp + b * wp + c
                        for a in range(2) for b in range(2) for c in range(2))

    kernel = functools.partial(_upconv_kernel, tap_offsets=tap_offsets, tile_m=tile_m)
    y = pl.pallas_call(
        kernel,
        out_shape=jax.ShapeDtypeStruct((n, n_td, tile_m, lanes), jnp.bfloat16),
        grid=(n, n_td),
        in_specs=[
            pl.BlockSpec((1, 1, spp_tile, cin_p), lambda i, t: (i, t, 0, 0)),
            pl.BlockSpec((8 * cin_p, lanes), lambda i, t: (0, 0)),     # fetched once
            pl.BlockSpec((1, lanes), lambda i, t: (0, 0)),             # fetched once
        ],
        out_specs=pl.BlockSpec((1, 1, tile_m, lanes), lambda i, t: (i, t, 0, 0)),
        compiler_params=pltpu.CompilerParams(
            dimension_semantics=("parallel", "parallel")),
    )(xh, w_packed, shift_packed)

    # ---- de-interleave the 8 parity classes (bf16, real channels only) ----
    y = y.reshape(n, n_td * tile_d, hp, wp, 8, cout_p)
    y = y[:, :d + 1, :h + 1, :wd + 1, :, :cout]      # drop halo/garbage/pad channels
    y = y.reshape(n, d + 1, h + 1, wd + 1, 2, 2, 2, cout)
    y = jnp.flip(y, axis=(4, 5, 6))                  # odd class first in each pair
    y = jnp.transpose(y, (0, 1, 4, 2, 5, 3, 6, 7))
    y = y.reshape(n, 2 * (d + 1), 2 * (h + 1), 2 * (wd + 1), cout)
    y = y[:, 1:2 * d + 2, 1:2 * h + 2, 1:2 * wd + 2, :]
    return jnp.transpose(y, (0, 4, 1, 2, 3)).astype(jnp.float32)     # NCDHW, f32


# ------------------------- pure-JAX reference check -------------------------

def reference_forward(x, w, bias, gamma, beta, mean, var,
                      precision=lax.Precision.HIGHEST):
    # ConvTranspose3d(k=4, s=2, p=1, output_padding=1) == lhs-dilated conv with the
    # spatially flipped, (Cout, Cin, ...)-transposed kernel, padding (2, 3).
    wt = jnp.flip(jnp.transpose(w, (1, 0, 2, 3, 4)), axis=(2, 3, 4))
    y = lax.conv_general_dilated(
        x, wt, window_strides=(1, 1, 1), padding=[(2, 3)] * 3,
        lhs_dilation=(2, 2, 2),
        dimension_numbers=('NCDHW', 'OIDHW', 'NCDHW'),
        precision=precision)
    y = y + bias.reshape(1, -1, 1, 1, 1)
    scale = gamma / jnp.sqrt(var + BN_EPS)
    shift = beta - mean * scale
    sh = (1, -1, 1, 1, 1)
    return jnp.maximum(y * scale.reshape(sh) + shift.reshape(sh), 0.0)


if __name__ == "__main__":
    key = jax.random.PRNGKey(0)
    k1, k2, k3, k4, k5, k6, k7 = jax.random.split(key, 7)

    N, C_IN, C_OUT = 2, 8, 16
    D = H = W = 8
    x = jax.random.normal(k1, (N, C_IN, D, H, W), jnp.float32)
    w = jax.random.normal(k2, (C_IN, C_OUT, 4, 4, 4), jnp.float32) / np.sqrt(C_IN * 64)
    bias = 0.1 * jax.random.normal(k7, (C_OUT,), jnp.float32)
    gamma = 0.5 + jax.random.uniform(k3, (C_OUT,), jnp.float32)
    beta = 0.1 * jax.random.normal(k4, (C_OUT,), jnp.float32)
    mean = 0.1 * jax.random.normal(k5, (C_OUT,), jnp.float32)
    var = 0.5 + jax.random.uniform(k6, (C_OUT,), jnp.float32)

    y = upconv_block_forward(x, w, bias, gamma, beta, mean, var)
    y = jax.block_until_ready(y)
    assert y.shape == (N, C_OUT, 2 * D + 1, 2 * H + 1, 2 * W + 1), y.shape

    # Algorithmic check: reference on the same bf16-rounded inputs.  Tolerance accounts
    # for the bf16 output store and the bf16 cast of the scale-folded weights.
    xb = x.astype(jnp.bfloat16).astype(jnp.float32)
    wb = w.astype(jnp.bfloat16).astype(jnp.float32)
    err_alg = float(jnp.max(jnp.abs(
        y - reference_forward(xb, wb, bias, gamma, beta, mean, var))))
    assert err_alg < 3e-2, err_alg

    # End-to-end check against the full-f32 reference (adds bf16 input/weight rounding).
    err_f32 = float(jnp.max(jnp.abs(
        y - reference_forward(x, w, bias, gamma, beta, mean, var))))
    assert err_f32 < 7e-2, err_f32

    print("KERNEL_OK")
</pallas_src>

<mosaic_0001>
module attributes {stable_mosaic.version = 11 : i64} {
  func.func @_upconv_kernel(%arg0: i32, %arg1: i32, %arg2: memref<1x1x1100x16xbf16, #tpu.memory_space<vmem>>, %arg3: memref<128x128xbf16, #tpu.memory_space<vmem>>, %arg4: memref<1x128xf32, #tpu.memory_space<vmem>>, %arg5: memref<1x1x900x128xbf16, #tpu.memory_space<vmem>>) attributes {dimension_semantics = [#tpu.dimension_semantics<parallel>, #tpu.dimension_semantics<parallel>], iteration_bounds = array<i64: 2, 1>, scalar_prefetch = 0 : i64, scratch_operands = 0 : i64, tpu.core_type = #tpu.core_type<tc>, window_params = [{transform_indices = @transform_0, window_bounds = array<i64: 1, 1, 1100, 16>}, {pipeline_mode = #tpu.pipeline_mode<synchronous>, transform_indices = @transform_1, window_bounds = array<i64: 128, 128>}, {pipeline_mode = #tpu.pipeline_mode<synchronous>, transform_indices = @transform_2, window_bounds = array<i64: 1, 128>}, {transform_indices = @transform_3, window_bounds = array<i64: 1, 1, 900, 128>}]} {
    %c0 = arith.constant 0 : index
    %c0_0 = arith.constant 0 : index
    %c0_1 = arith.constant 0 : index
    %c0_2 = arith.constant 0 : index
    %0 = vector.load %arg2[%c0, %c0_0, %c0_1, %c0_2] : memref<1x1x1100x16xbf16, #tpu.memory_space<vmem>>, vector<1x1x900x16xbf16>
    %1 = vector.shape_cast %0 : vector<1x1x900x16xbf16> to vector<900x16xbf16>
    %c0_3 = arith.constant 0 : index
    %c0_4 = arith.constant 0 : index
    %c1 = arith.constant 1 : index
    %c0_5 = arith.constant 0 : index
    %2 = vector.load %arg2[%c0_3, %c0_4, %c1, %c0_5] : memref<1x1x1100x16xbf16, #tpu.memory_space<vmem>>, vector<1x1x900x16xbf16>
    %3 = vector.shape_cast %2 : vector<1x1x900x16xbf16> to vector<900x16xbf16>
    %c0_6 = arith.constant 0 : index
    %c0_7 = arith.constant 0 : index
    %c10 = arith.constant 10 : index
    %c0_8 = arith.constant 0 : index
    %4 = vector.load %arg2[%c0_6, %c0_7, %c10, %c0_8] : memref<1x1x1100x16xbf16, #tpu.memory_space<vmem>>, vector<1x1x900x16xbf16>
    %5 = vector.shape_cast %4 : vector<1x1x900x16xbf16> to vector<900x16xbf16>
    %c0_9 = arith.constant 0 : index
    %c0_10 = arith.constant 0 : index
    %c11 = arith.constant 11 : index
    %c0_11 = arith.constant 0 : index
    %6 = vector.load %arg2[%c0_9, %c0_10, %c11, %c0_11] : memref<1x1x1100x16xbf16, #tpu.memory_space<vmem>>, vector<1x1x900x16xbf16>
    %7 = vector.shape_cast %6 : vector<1x1x900x16xbf16> to vector<900x16xbf16>
    %c0_12 = arith.constant 0 : index
    %c0_13 = arith.constant 0 : index
    %c100 = arith.constant 100 : index
    %c0_14 = arith.constant 0 : index
    %8 = vector.load %arg2[%c0_12, %c0_13, %c100, %c0_14] : memref<1x1x1100x16xbf16, #tpu.memory_space<vmem>>, vector<1x1x900x16xbf16>
    %9 = vector.shape_cast %8 : vector<1x1x900x16xbf16> to vector<900x16xbf16>
    %c0_15 = arith.constant 0 : index
    %c0_16 = arith.constant 0 : index
    %c101 = arith.constant 101 : index
    %c0_17 = arith.constant 0 : index
    %10 = vector.load %arg2[%c0_15, %c0_16, %c101, %c0_17] : memref<1x1x1100x16xbf16, #tpu.memory_space<vmem>>, vector<1x1x900x16xbf16>
    %11 = vector.shape_cast %10 : vector<1x1x900x16xbf16> to vector<900x16xbf16>
    %c0_18 = arith.constant 0 : index
    %c0_19 = arith.constant 0 : index
    %c110 = arith.constant 110 : index
    %c0_20 = arith.constant 0 : index
    %12 = vector.load %arg2[%c0_18, %c0_19, %c110, %c0_20] : memref<1x1x1100x16xbf16, #tpu.memory_space<vmem>>, vector<1x1x900x16xbf16>
    %13 = vector.shape_cast %12 : vector<1x1x900x16xbf16> to vector<900x16xbf16>
    %c0_21 = arith.constant 0 : index
    %c0_22 = arith.constant 0 : index
    %c111 = arith.constant 111 : index
    %c0_23 = arith.constant 0 : index
    %14 = vector.load %arg2[%c0_21, %c0_22, %c111, %c0_23] : memref<1x1x1100x16xbf16, #tpu.memory_space<vmem>>, vector<1x1x900x16xbf16>
    %15 = vector.shape_cast %14 : vector<1x1x900x16xbf16> to vector<900x16xbf16>
    %16 = tpu.concatenate %1, %3, %5, %7, %9, %11, %13, %15 in 1 : vector<900x16xbf16>, vector<900x16xbf16>, vector<900x16xbf16>, vector<900x16xbf16>, vector<900x16xbf16>, vector<900x16xbf16>, vector<900x16xbf16>, vector<900x16xbf16> -> vector<900x128xbf16>
    %c0_24 = arith.constant 0 : index
    %c0_25 = arith.constant 0 : index
    %17 = vector.load %arg3[%c0_24, %c0_25] : memref<128x128xbf16, #tpu.memory_space<vmem>>, vector<128x128xbf16>
    %cst = arith.constant dense<0.000000e+00> : vector<900x128xf32>
    %18 = tpu.matmul %16, %17, %cst {dimension_numbers = #tpu.dot_dimension_numbers<[1], [0], [0], [1], [0, 0, 1, 1], [], []>} : vector<900x128xbf16>, vector<128x128xbf16>, vector<900x128xf32> -> vector<900x128xf32>
    %c0_26 = arith.constant 0 : index
    %c0_27 = arith.constant 0 : index
    %19 = vector.load %arg4[%c0_26, %c0_27] : memref<1x128xf32, #tpu.memory_space<vmem>>, vector<1x128xf32>
    %20 = vector.broadcast %19 : vector<1x128xf32> to vector<900x128xf32>
    %21 = arith.addf %18, %20 : vector<900x128xf32>
    %cst_28 = arith.constant 0.000000e+00 : f32
    %22 = vector.broadcast %cst_28 : f32 to vector<900x128xf32>
    %23 = arith.maximumf %21, %22 : vector<900x128xf32>
    %24 = arith.truncf %23 : vector<900x128xf32> to vector<900x128xbf16>
    %c0_29 = arith.constant 0 : index
    %c0_30 = arith.constant 0 : index
    %c0_31 = arith.constant 0 : index
    %c0_32 = arith.constant 0 : index
    %25 = vector.load %arg5[%c0_29, %c0_30, %c0_31, %c0_32] : memref<1x1x900x128xbf16, #tpu.memory_space<vmem>>, vector<1x1x900x128xbf16>
    %26 = vector.shape_cast %25 : vector<1x1x900x128xbf16> to vector<900x128xbf16>
    %27 = vector.shape_cast %24 : vector<900x128xbf16> to vector<1x1x900x128xbf16>
    tpu.vector_store %arg5[%c0_29, %c0_30, %c0_31, %c0_32], %27 {strides = array<i32>} : memref<1x1x900x128xbf16, #tpu.memory_space<vmem>>, vector<1x1x900x128xbf16>,
    return
  }
  func.func @transform_0(%arg0: i32, %arg1: i32) -> (i32, i32, i32, i32) {
    %c0_i32 = arith.constant 0 : i32
    %c0_i32_0 = arith.constant 0 : i32
    %c0_i32_1 = arith.constant 0 : i32
    return %arg0, %arg1, %c0_i32, %c0_i32_0 : i32, i32, i32, i32
  }
  func.func @transform_1(%arg0: i32, %arg1: i32) -> (i32, i32) {
    %c0_i32 = arith.constant 0 : i32
    %c0_i32_0 = arith.constant 0 : i32
    %c0_i32_1 = arith.constant 0 : i32
    return %c0_i32, %c0_i32_0 : i32, i32
  }
  func.func @transform_2(%arg0: i32, %arg1: i32) -> (i32, i32) {
    %c0_i32 = arith.constant 0 : i32
    %c0_i32_0 = arith.constant 0 : i32
    %c0_i32_1 = arith.constant 0 : i32
    return %c0_i32, %c0_i32_0 : i32, i32
  }
  func.func @transform_3(%arg0: i32, %arg1: i32) -> (i32, i32, i32, i32) {
    %c0_i32 = arith.constant 0 : i32
    %c0_i32_0 = arith.constant 0 : i32
    %c0_i32_1 = arith.constant 0 : i32
    return %arg0, %arg1, %c0_i32, %c0_i32_0 : i32, i32, i32, i32
  }
}

</mosaic_0001>

<bundles_post_ra>
// kernel: tile.9
= control target key start
LH: loop header
LB: loop body
LE: loop exit
PB: predicated region body
PF: predicated region fallthrough
CT: control target
= control target key end

     0   :  { %s69_s10 = smov 112   ;;  %s70_s11 = smov 80   ;;  %vm3_vm0 = vcmask 130048   ;;  %vm9_vm1 = vcmask 1048448   ;;  %vm15_vm2 = vcmask 917248   ;;  %vm21_vm3 = vcmask 786048   ;;  %s113_s0 = inlined_call_operand.vmem [shape: f32[8,16], index: 0, kind: input, shape index: {}]   ;;  %s114_s1 = inlined_call_operand.vmem [shape: f32[1,128], index: 1, kind: output, shape index: {}]  }
   0x1   :  { %v55_v0 = vld [vmem:[%s113_s0 + $0x7] sm:$0x1]   ;;  %v57_v1 = vld [vmem:[%s113_s0 + $0x5] sm:$0x1]   ;;  %v56_v2 = vld [vmem:[%s113_s0 + $0x6] sm:$0x1]  }
   0x2   :  { %7 = vrot.lane.b32.xlu0 %v55_v0, %s69_s10  ;;  %19 = vrot.lane.b32.xlu1 %v57_v1, %s70_s11  ;;  %v58_v3 = vld [vmem:[%s113_s0 + $0x4] sm:$0x1]   ;;  %v2_v4 = vld [vmem:[%s113_s0] sm:$0x1]   ;;  %s71_s18 = smov 96   ;;  %s72_s19 = smov 64  }
   0x3   :  { %4 = vst.msk [vmem:[#allocation0] sm:$0x1] %vm3_vm0, %v2_v4   ;;  %v59_v5 = vld [vmem:[%s113_s0 + $0x3] sm:$0x1]   ;;  %v60_v6 = vld [vmem:[%s113_s0 + $0x2] sm:$0x1]  }
   0x4   :  { %s73_s24 = smov 48   ;;  %s74_s25 = smov 32   ;;  %v61_v7 = vld [vmem:[%s113_s0 + $0x1] sm:$0x1]   ;;  %vm27_vm4 = vcmask 654848   ;;  %vm33_vm5 = vcmask 523648  }
   0x5   :  { %s75_s0 = smov 16   ;;  %vm39_vm6 = vcmask 392448   ;;  %vm45_vm7 = vcmask 261248  }
   0x6   :  { %13 = vrot.lane.b32.xlu0 %v56_v2, %s71_s18  ;;  %25 = vrot.lane.b32.xlu1 %v58_v3, %s72_s19 }
   0xa   :  { %31 = vrot.lane.b32.xlu0 %v59_v5, %s73_s24  ;;  %37 = vrot.lane.b32.xlu1 %v60_v6, %s74_s25 }
   0xe   :  { %43 = vrot.lane.b32.xlu0 %v61_v7, %s75_s0 }
  0x74   :  { %v8_v8 = vpop.permute.xlu0 %7   ;;  %v20_v9 = vpop.permute.xlu1 %19  }
  0x75   :  { %10 = vst.msk [vmem:[#allocation0] sm:$0x1] %vm9_vm1, %v8_v8  }
  0x78   :  { %v14_v10 = vpop.permute.xlu0 %13   ;;  %v26_v11 = vpop.permute.xlu1 %25  }
  0x79   :  { %16 = vst.msk [vmem:[#allocation0] sm:$0x1] %vm15_vm2, %v14_v10  }
  0x7a   :  { %22 = vst.msk [vmem:[#allocation0] sm:$0x1] %vm21_vm3, %v20_v9  }
  0x7b   :  { %28 = vst.msk [vmem:[#allocation0] sm:$0x1] %vm27_vm4, %v26_v11  }
  0x7c   :  { %v32_v12 = vpop.permute.xlu0 %31   ;;  %v38_v13 = vpop.permute.xlu1 %37  }
  0x7d   :  { %34 = vst.msk [vmem:[#allocation0] sm:$0x1] %vm33_vm5, %v32_v12  }
  0x7e   :  { %40 = vst.msk [vmem:[#allocation0] sm:$0x1] %vm39_vm6, %v38_v13  }
  0x80   :  { %v44_v14 = vpop.permute.xlu0 %43  }
  0x81   :  { %46 = vst.msk [vmem:[#allocation0] sm:$0x1] %vm45_vm7, %v44_v14  }
  0x88   :  { %v51_v15 = vld [vmem:[#allocation0] sm:$0x1] }
  0x89   :  { %54 = vst [vmem:[%s114_s1] sm:$0x1] %v51_v15 }

// kernel: tile.8
= control target key start
LH: loop header
LB: loop body
LE: loop exit
PB: predicated region body
PF: predicated region fallthrough
CT: control target
= control target key end

     0   :  { %s22_s0 = inlined_call_operand.vmem [shape: f32[16], index: 0, kind: input, shape index: {}]   ;;  %s23_s1 = inlined_call_operand.vmem [shape: f32[8,16], index: 1, kind: output, shape index: {}]  }
   0x1   :  { %v4_v0 = vld [vmem:[%s22_s0] ss:$0 sm:$0xff] }
   0x2   :  { %5 = vst [vmem:[%s23_s1] sm:$0xff] %v4_v0 }

// kernel: upconv_block_forward.1
= control target key start
LH: loop header
LB: loop body
LE: loop exit
PB: predicated region body
PF: predicated region fallthrough
CT: control target
= control target key end

     0   :  { %s6880_s12 = smov 0   ;;  %s6882_s13 = smov 0   ;;  %s11748_s0 = inlined_call_operand.vmem [shape: bf16[2,1,1100,16], index: 0, kind: input, shape index: {}]   ;;  %s11749_s1 = inlined_call_operand.vmem [shape: bf16[128,128], index: 1, kind: input, shape index: {}]   ;;  %s11750_s2 = inlined_call_operand.vmem [shape: f32[1,128], index: 2, kind: input, shape index: {}]   ;;  %s11751_s3 = inlined_call_operand.vmem [shape: bf16[2,1,900,128], index: 3, kind: output, shape index: {}]  }
   0x1   :  { %s6884_s14 = smov 0  }
   0x2 LB: > { %s25_s15 = sadd.s32 1, %s6845_s13  ;;  %p5589_p0 = scmp.ge.s32.totalorder %s6849_s14, 1  ;;  %s6849_s14 = sphi %s6884_s14, %s13_s14   ;;  %s6845_s13 = sphi %s6882_s13, %s13055_s13   ;;  %s6841_s12 = sphi %s6880_s12, %s13054_s12  }
   0x3   : > { %p27_p1 = scmp.ge.s32.totalorder %s25_s15, 2  ;;  %p157_p2 = scmp.lt.s32.totalorder %s6849_s14, 3 }
   0x5   : > { %s13057_s15 = smov (%p27_p1, %s25_s15), 0  ;;  %p158_p3 = pnand %p5589_p0, %p157_p2 }
   0x7   : > { %161 = sbr.rel (%p158_p3) target bundleno = 1142 (0x476), region = 32 }
   0xc   : > { %p189_p4 = scmp.lt.s32.totalorder %s6841_s12, 1  ;;  %vm629_vm0 = vsmask.f32 7424  ;;  %s6851_s20 = smov 16   ;;  %vm1262_vm1 = vcmask 1046528   ;;  %vm2152_vm4 = vcmask 1045504  }
   0xd   : > { %s6852_s21 = smov 32   ;;  %vm1493_vm2 = vsmask.f32 6400  ;;  %s6853_s22 = smov 48   ;;  %vm3010_vm3 = vsmask.f32 4352 }
   0xe   : > { %s13059_s12 = smov (!%p189_p4, %s6841_s12), 1  ;;  %vm2779_vm5 = vcmask 1044480   ;;  %vm6855_vm6 = vmmov 0   ;;  %vm2383_vm7 = vsmask.f32 5376  ;;  %s6857_s17 = smov 96  }
   0xf   : > { %s6623_s16 = smul.u32 552, %s13059_s12  ;;  %s6858_s18 = smov 80   ;;  %vm3392_vm8 = vcmask 130048   ;;  %vm3508_vm9 = vcmask 261120   ;;  %vm3623_vm10 = vcmask 392192   ;;  %vm3738_vm11 = vcmask 523264  }
  0x10   : > { %vm3853_vm12 = vcmask 654336   ;;  %vm3968_vm13 = vcmask 785408   ;;  %vm4083_vm14 = vcmask 916480   ;;  %s6624_s24 = smul.u32 452, %s13059_s12 }
  0x11   : > { %s6904_s19 = scalar_lea.vmem %s11748_s0, %s6623_s16  ;;  %s6856_s16 = smov 64  }
  0x12   : > { %v212_v0 = vld [vmem:[%s6904_s19 + $0x10] sm:$0xf]  ;;  %v213_v1 = vld [vmem:[%s6904_s19 + $0x14] sm:$0xf]  ;;  %v214_v2 = vld [vmem:[%s6904_s19 + $0x18] sm:$0xf]  ;;  %s10497_s26 = scalar_lea.vmem %s11751_s3, %s6624_s24 }
  0x13   : > { %v215_v3 = vld [vmem:[%s6904_s19 + $0x1c] sm:$0xf]  ;;  %v6910_v4 = vcombine.low %v212_v0, %v213_v1  ;;  %v6912_v5 = vcombine.low %v213_v1, %v214_v2  ;;  %v6917_v7 = vld [vmem:[%s6904_s19 + $0x8] sm:$0xf]  ;;  %v211_v8 = vld [vmem:[%s6904_s19 + $0xc] sm:$0xf] }
  0x14   : > { %v6914_v6 = vcombine.low %v214_v2, %v215_v3  ;;  %v6660_v9 = vld [vmem:[%s6904_s19] sm:$0xff]   ;;  %v6924_v12 = vcombine.low %v6917_v7, %v211_v8  ;;  %v6928_v15 = vcombine.low %v211_v8, %v212_v0  ;;  %v218_v20 = vld [vmem:[%s6904_s19 + $0x28] sm:$0xf]  ;;  %v219_v25 = vld [vmem:[%s6904_s19 + $0x2c] sm:$0xf] }
  0x15   : > { %12099 = vst [vmem:[#allocation2_spill] sm:$0xff] %v6910_v4  ;;  %12100 = vst [vmem:[#allocation3_spill] sm:$0xff] %v6912_v5  ;;  %v646_v10 = vshll.u32 %v6910_v4, 16  ;;  %v650_v11 = vshrl.u32 %v6910_v4, 16  ;;  %v216_v13 = vld [vmem:[%s6904_s19 + $0x20] sm:$0xf]  ;;  %v6942_v30 = vcombine.low %v218_v20, %v219_v25 }
  0x16   : > { %12101 = vst [vmem:[#allocation4_spill] sm:$0xff] %v6914_v6  ;;  %12102 = vst [vmem:[#allocation5_spill] sm:$0xff] %v6924_v12  ;;  %v217_v14 = vld [vmem:[%s6904_s19 + $0x24] sm:$0xf]  ;;  %v654_v16 = vshll.u32 %v6914_v6, 16  ;;  %v631_v17 = vshrl.u32 %v6660_v9, 16  ;;  %v6949_v36 = vcombine.low %v215_v3, %v216_v13 }
  0x17   : > { %v633_v18 = vshll.u32 %v6660_v9, 16  ;;  %v6931_v19 = vcombine.low %v216_v13, %v217_v14  ;;  %v648_v21 = vrot.slane %v646_v10, 1  ;;  %v638_v22 = vshll.u32 %v6924_v12, 16  ;;  %v6940_v29 = vld [vmem:[%s6904_s19 + $0x30] sm:$0xf]  ;;  %12105 = vst [vmem:[#allocation8_spill] sm:$0xff] %v6942_v30 }
  0x18   : > { %v658_v23 = vshrl.u32 %v6914_v6, 16  ;;  %v642_v24 = vshrl.u32 %v6924_v12, 16  ;;  %v656_v26 = vrot.slane %v654_v16, 1  ;;  %12104 = vst [vmem:[#allocation7_spill] sm:$0xff] %v6940_v29  ;;  %v221_v33 = vld [vmem:[%s6904_s19 + $0x34] sm:$0xf] }
  0x19   : > { %12103 = vst [vmem:[#allocation6_spill] sm:$0xff] %v6931_v19  ;;  %v635_v27 = vrot.slane %v633_v18, 1  ;;  %v662_v28 = vshll.u32 %v6931_v19, 16  ;;  %v652_v31 = vor.u32 %v650_v11, %v648_v21  ;;  %v640_v32 = vrot.slane %v638_v22, 1  ;;  %v6947_v35 = vld [vmem:[%s6904_s19 + $0x38] sm:$0xf] }
  0x1a   : > { %v666_v34 = vshrl.u32 %v6931_v19, 16  ;;  %12106 = vst [vmem:[#allocation9_spill] sm:$0xff] %v6947_v35  ;;  %12107 = vst [vmem:[#allocation10_spill] sm:$0xff] %v6949_v36  ;;  %v660_v38 = vor.u32 %v658_v23, %v656_v26  ;;  %v6952_v40 = vcombine.low %v6940_v29, %v221_v33  ;;  %v6955_v41 = vld [vmem:[%s6904_s19 + $0x3c] sm:$0xf]  ;;  %v670_v45 = vshll.u32 %v6942_v30, 16 }
  0x1b   : > { %v636_v37 = vor.u32 %v635_v27, %v631_v17  ;;  %v664_v39 = vrot.slane %v662_v28, 1  ;;  %12109 = vst [vmem:[#allocation12_spill] sm:$0xff] %v6955_v41  ;;  %v6958_v42 = vld [vmem:[%s6904_s19 + $0x40] sm:$0xf]  ;;  %v657_v43 = vsel %vm629_vm0, %v652_v31, %v656_v26  ;;  %v644_v44 = vor.u32 %v642_v24, %v640_v32  ;;  %v6964_v47 = vld [vmem:[%s6904_s19 + $0x44] sm:$0xf] }
  0x1c   : > { %12108 = vst [vmem:[#allocation11_spill] sm:$0xff] %v6952_v40  ;;  %12110 = vst [vmem:[#allocation13_spill] sm:$0xff] %v6958_v42  ;;  %v674_v46 = vshrl.u32 %v6942_v30, 16  ;;  %v6967_v48 = vld [vmem:[%s6904_s19 + $0x48] sm:$0xf]  ;;  %1089 = vrot.lane.b32.xlu1 %v657_v43, %s6851_s20  ;;  %v678_v51 = vshll.u32 %v6952_v40, 16  ;;  %v6983_v57 = vcombine.low %v6947_v35, %v6955_v41  ;;  %v6987_v58 = vcombine.low %v6958_v42, %v6964_v47 }
  0x1d   : > { %12111 = vst [vmem:[#allocation14_spill] sm:$0xff] %v6964_v47  ;;  %12112 = vst [vmem:[#allocation15_spill] sm:$0xff] %v6967_v48  ;;  %v641_v49 = vsel %vm629_vm0, %v636_v37, %v640_v32  ;;  %v665_v50 = vsel %vm629_vm0, %v660_v38, %v664_v39  ;;  %v668_v52 = vor.u32 %v666_v34, %v664_v39  ;;  %v6974_v53 = vld [vmem:[%s6904_s19 + $0x4c] sm:$0xf]  ;;  %v6977_v54 = vld [vmem:[%s6904_s19 + $0x50] sm:$0xf] }
  0x1e   : > { %12113 = vst [vmem:[#allocation16_spill] sm:$0xff] %v6974_v53  ;;  %12114 = vst [vmem:[#allocation17_spill] sm:$0xff] %v6977_v54  ;;  %1085 = vrot.lane.b32.xlu0 %v641_v49, %s6851_s20  ;;  %v649_v55 = vsel %vm629_vm0, %v644_v44, %v648_v21  ;;  %v672_v56 = vrot.slane %v670_v45, 1  ;;  %v6990_v59 = vld [vmem:[%s6904_s19 + $0x54] sm:$0xf]  ;;  %v680_v60 = vrot.slane %v678_v51, 1  ;;  %v6995_v62 = vcombine.low %v6967_v48, %v6974_v53 }
  0x1f   : > { %12115 = vst [vmem:[#allocation18_spill] sm:$0xff] %v6983_v57  ;;  %12116 = vst [vmem:[#allocation19_spill] sm:$0xff] %v6987_v58  ;;  %v682_v61 = vshrl.u32 %v6952_v40, 16  ;;  %v6999_v63 = vcombine.low %v6977_v54, %v6990_v59  ;;  %v7002_v0 = vld [vmem:[%s6904_s19 + $0x58] sm:$0xf]  ;;  %v11762_v8 = vshll.u32 %v6983_v57, 16 }
  0x20   : > { %12117 = vst [vmem:[#allocation20_spill] sm:$0xff] %v6990_v59  ;;  %12118 = vst [vmem:[#allocation21_spill] sm:$0xff] %v6995_v62  ;;  %v7005_v1 = vld [vmem:[%s6904_s19 + $0x5c] sm:$0xf]  ;;  %v676_v2 = vor.u32 %v674_v46, %v672_v56  ;;  %v673_v3 = vsel %vm629_vm0, %v668_v52, %v672_v56  ;;  %v11765_v9 = vshrl.u32 %v6983_v57, 16  ;;  %1091 = vrot.lane.b32.xlu1 %v665_v50, %s6851_s20  ;;  %v11758_v13 = vshll.u32 %v6987_v58, 16 }
  0x21   : > { %12119 = vst [vmem:[#allocation22_spill] sm:$0xff] %v6999_v63  ;;  %12120 = vst [vmem:[#allocation23_spill] sm:$0xff] %v7002_v0  ;;  %v7011_v10 = vld [vmem:[%s6904_s19 + $0x60] sm:$0xf]  ;;  %v7014_v11 = vld [vmem:[%s6904_s19 + $0x64] sm:$0xf]  ;;  %v684_v14 = vor.u32 %v682_v61, %v680_v60  ;;  %v7032_v25 = vcombine.low %v7002_v0, %v7005_v1 }
  0x22   : > { %12121 = vst [vmem:[#allocation24_spill] sm:$0xff] %v7005_v1  ;;  %12122 = vst [vmem:[#allocation25_spill] sm:$0xff] %v7011_v10  ;;  %v11756_v16 = vshll.u32 %v6995_v62, 16  ;;  %v11757_v17 = vshrl.u32 %v6995_v62, 16  ;;  %1087 = vrot.lane.b32.xlu0 %v649_v55, %s6851_s20  ;;  %v681_v18 = vsel %vm629_vm0, %v676_v2, %v680_v60  ;;  %v688_v20 = vrot.slane %v11762_v8, 1 }
  0x23   : > { %12123 = vst [vmem:[#allocation26_spill] sm:$0xff] %v7014_v11  ;;  %v11755_v21 = vshll.u32 %v6999_v63, 16  ;;  %v11760_v22 = vshrl.u32 %v6987_v58, 16  ;;  %v696_v23 = vrot.slane %v11758_v13, 1  ;;  %12124 = vst [vmem:[#allocation27_spill] sm:$0xff] %v7032_v25  ;;  %v7036_v26 = vcombine.low %v7011_v10, %v7014_v11 }
  0x24   : > { %v704_v24 = vrot.slane %v11756_v16, 1  ;;  %v7039_v27 = vld [vmem:[%s6904_s19 + $0x68] sm:$0xf]  ;;  %v7042_v28 = vld [vmem:[%s6904_s19 + $0x6c] sm:$0xf]  ;;  %v692_v31 = vor.u32 %v11765_v9, %v688_v20  ;;  %1095 = vrot.lane.b32.xlu1 %v681_v18, %s6851_s20  ;;  %v689_v34 = vsel %vm629_vm0, %v684_v14, %v688_v20  ;;  %v11752_v38 = vshll.u32 %v7032_v25, 16 }
  0x25   : > { %12125 = vst [vmem:[#allocation28_spill] sm:$0xff] %v7036_v26  ;;  %12126 = vst [vmem:[#allocation29_spill] sm:$0xff] %v7039_v27  ;;  %v7047_v32 = vld [vmem:[%s6904_s19 + $0x70] sm:$0xf]  ;;  %v7050_v33 = vld [vmem:[%s6904_s19 + $0x74] sm:$0xf]  ;;  %v7065_v46 = vcombine.low %v7039_v27, %v7042_v28  ;;  %v700_v51 = vor.u32 %v11760_v22, %v696_v23 }
  0x26   : > { %12127 = vst [vmem:[#allocation30_spill] sm:$0xff] %v7042_v28  ;;  %12128 = vst [vmem:[#allocation31_spill] sm:$0xff] %v7047_v32  ;;  %v712_v37 = vrot.slane %v11755_v21, 1  ;;  %v11753_v39 = vshrl.u32 %v7032_v25, 16  ;;  %1093 = vrot.lane.b32.xlu0 %v673_v3, %s6851_s20  ;;  %v697_v43 = vsel %vm629_vm0, %v692_v31, %v696_v23  ;;  %v708_v44 = vor.u32 %v11757_v17, %v704_v24  ;;  %v7068_v49 = vld [vmem:[%s6904_s19 + $0x78] sm:$0xf] }
  0x27   : > { %12129 = vst [vmem:[#allocation32_spill] sm:$0xff] %v7050_v33  ;;  %v11754_v45 = vshll.u32 %v7036_v26, 16  ;;  %12130 = vst [vmem:[#allocation33_spill] sm:$0xff] %v7065_v46  ;;  %v239_v50 = vld [vmem:[%s6904_s19 + $0x7c] sm:$0xf]  ;;  %v720_v52 = vrot.slane %v11752_v38, 1  ;;  %v7078_v56 = vcombine.low %v7047_v32, %v7050_v33 }
  0x28   : > { %12131 = vst [vmem:[#allocation34_spill] sm:$0xff] %v7068_v49  ;;  %v11761_v55 = vshrl.u32 %v6999_v63, 16  ;;  %v7081_v60 = vld [vmem:[%s6904_s19 + $0x80] sm:$0xf]  ;;  %v241_v61 = vld [vmem:[%s6904_s19 + $0x84] sm:$0xf]  ;;  %1099 = vrot.lane.b32.xlu1 %v697_v43, %s6851_s20  ;;  %v7092_v20 = vcombine.low %v7068_v49, %v239_v50  ;;  %v713_v38 = vsel %vm629_vm0, %v708_v44, %v712_v37  ;;  %v705_v50 = vsel %vm629_vm0, %v700_v51, %v704_v24 }
  0x29   : > { %12132 = vst [vmem:[#allocation35_spill] sm:$0xff] %v7078_v56  ;;  %12133 = vst [vmem:[#allocation36_spill] sm:$0xff] %v7081_v60  ;;  %v11759_v2 = vshll.u32 %v7065_v46, 16  ;;  %v724_v3 = vor.u32 %v11753_v39, %v720_v52  ;;  %v728_v14 = vrot.slane %v11754_v45, 1  ;;  %v11763_v18 = vshll.u32 %v7078_v56, 16 }
  0x2a   : > { %12134 = vst [vmem:[#allocation37_spill] sm:$0xff] %v7092_v20  ;;  %v242_v23 = vld [vmem:[%s6904_s19 + $0x88] sm:$0xf]  ;;  %v243_v31 = vld [vmem:[%s6904_s19 + $0x8c] sm:$0xf]  ;;  %1097 = vrot.lane.b32.xlu0 %v689_v34, %s6851_s20  ;;  %v11764_v39 = vshrl.u32 %v7065_v46, 16  ;;  %v7102_v45 = vcombine.low %v7081_v60, %v241_v61  ;;  %v716_v17 = vor.u32 %v11761_v55, %v712_v37 }
  0x2b   : > { %v736_v43 = vrot.slane %v11759_v2, 1  ;;  %v244_v21 = vld [vmem:[%s6904_s19 + $0x90] sm:$0xf]  ;;  %v245_v16 = vld [vmem:[%s6904_s19 + $0x94] sm:$0xf]  ;;  %v11767_v34 = vshrl.u32 %v7036_v26, 16  ;;  %v7111_v13 = vcombine.low %v242_v23, %v243_v31  ;;  %v729_v61 = vsel %vm629_vm0, %v724_v3, %v728_v14 }
  0x2c   : > { %12135 = vst [vmem:[#allocation38_spill] sm:$0xff] %v7102_v45  ;;  %v11766_v44 = vshll.u32 %v7092_v20, 16  ;;  %v246_v2 = vld [vmem:[%s6904_s19 + $0x98] sm:$0xf]  ;;  %v247_v22 = vld [vmem:[%s6904_s19 + $0x9c] sm:$0xf]  ;;  %1103 = vrot.lane.b32.xlu1 %v713_v38, %s6851_s20  ;;  %v7120_v51 = vcombine.low %v244_v21, %v245_v16 }
  0x2d   : > { %12136 = vst [vmem:[#allocation39_spill] sm:$0xff] %v7111_v13  ;;  %v744_v24 = vrot.slane %v11763_v18, 1  ;;  %v11769_v37 = vshrl.u32 %v7092_v20, 16  ;;  %v248_v55 = vld [vmem:[%s6904_s19 + $0xa0] sm:$0xf]  ;;  %v740_v23 = vor.u32 %v11764_v39, %v736_v43  ;;  %v11768_v3 = vshll.u32 %v7111_v13, 16 }
  0x2e   : > { %12137 = vst [vmem:[#allocation40_spill] sm:$0xff] %v7120_v51  ;;  %1101 = vrot.lane.b32.xlu0 %v705_v50, %s6851_s20  ;;  %v752_v38 = vrot.slane %v11766_v44, 1  ;;  %v249_v8 = vld [vmem:[%s6904_s19 + $0xa4] sm:$0xf]  ;;  %v721_v18 = vsel %vm629_vm0, %v716_v17, %v720_v52  ;;  %v732_v16 = vor.u32 %v11767_v34, %v728_v14  ;;  %v11771_v21 = vshrl.u32 %v7078_v56, 16 }
  0x2f   : > { %v7135_v50 = vcombine.low %v246_v2, %v247_v22  ;;  %v250_v39 = vld [vmem:[%s6904_s19 + $0xa8] sm:$0xf]  ;;  %v251_v9 = vld [vmem:[%s6904_s19 + $0xac] sm:$0xf]  ;;  %v768_v17 = vrot.slane %v11768_v3, 1  ;;  %v7144_v31 = vcombine.low %v248_v55, %v249_v8  ;;  %v745_v22 = vsel %vm629_vm0, %v740_v23, %v744_v24 }
  0x30   : > { %1107 = vrot.lane.b32.xlu1 %v729_v61, %s6851_s20  ;;  %v756_v2 = vor.u32 %v11769_v37, %v752_v38  ;;  %v12140_v34 = vshll.u32 %v7102_v45, 16  ;;  %v7154_v44 = vld [vmem:[%s6904_s19 + $0xb0] sm:$0xf]  ;;  %v253_v3 = vld [vmem:[%s6904_s19 + $0xb4] sm:$0xf]  ;;  %v7157_v52 = vcombine.low %v250_v39, %v251_v9  ;;  %v737_v8 = vsel %vm629_vm0, %v732_v16, %v736_v43 }
  0x31   : > { %12138 = vst [vmem:[#allocation41_spill] sm:$0xff] %v7135_v50  ;;  %12139 = vst [vmem:[#allocation42_spill] sm:$0xff] %v7144_v31  ;;  %v748_v55 = vor.u32 %v11771_v21, %v744_v24  ;;  %v254_v23 = vld [vmem:[%s6904_s19 + $0xb8] sm:$0xf]  ;;  %v255_v14 = vld [vmem:[%s6904_s19 + $0xbc] sm:$0xf]  ;;  %v7175_v21 = vcombine.low %v7154_v44, %v253_v3 }
  0x32   : > { %1105 = vrot.lane.b32.xlu0 %v721_v18, %s6851_s20  ;;  %v760_v61 = vrot.slane %v12140_v34, 1  ;;  %12141 = vst [vmem:[#allocation43_spill] sm:$0xff] %v7154_v44  ;;  %12142 = vst [vmem:[#allocation44_spill] sm:$0xff] %v7157_v52  ;;  %v12143_v37 = vshll.u32 %v7120_v51, 16  ;;  %v12144_v9 = vshrl.u32 %v7111_v13, 16  ;;  %v12145_v43 = vshll.u32 %v7135_v50, 16 }
  0x33   : > { %12146 = vst [vmem:[#allocation45_spill] sm:$0xff] %v7175_v21  ;;  %v7178_v18 = vld [vmem:[%s6904_s19 + $0xc8] sm:$0xf]  ;;  %v12149_v16 = vshrl.u32 %v7102_v45, 16  ;;  %v7191_v19 = vld [vmem:[%s6904_s19 + $0xc0] sm:$0xf] }
  0x34   : > { %v776_v40 = vrot.slane %v12143_v37, 1  ;;  %1111 = vrot.lane.b32.xlu1 %v745_v22, %s6851_s20  ;;  %v772_v39 = vor.u32 %v12144_v9, %v768_v17  ;;  %v784_v24 = vrot.slane %v12145_v43, 1  ;;  %12147 = vst [vmem:[#allocation46_spill] sm:$0xff] %v7178_v18  ;;  %v259_v37 = vld [vmem:[%s6904_s19 + $0xcc] sm:$0xf]  ;;  %v761_v22 = vsel %vm629_vm0, %v756_v2, %v760_v61  ;;  %12150 = vst [vmem:[#allocation48_spill] sm:$0xff] %v7191_v19 }
  0x35   : > { %v7184_v9 = vcombine.low %v254_v23, %v255_v14  ;;  %v753_v43 = vsel %vm629_vm0, %v748_v55, %v752_v38  ;;  %v764_v30 = vor.u32 %v12149_v16, %v760_v61  ;;  %v7194_v6 = vld [vmem:[%s6904_s19 + $0xc4] sm:$0xf]  ;;  %v7200_v2 = vcombine.low %v7178_v18, %v259_v37  ;;  %v7210_v3 = vld [vmem:[%s6904_s19 + $0xd4] sm:$0xf]  ;;  %v7213_v34 = vld [vmem:[%s6904_s19 + $0xd8] sm:$0xf] }
  0x36   : > { %1109 = vrot.lane.b32.xlu0 %v737_v8, %s6851_s20  ;;  %12151 = vst [vmem:[#allocation49_spill] sm:$0xff] %v7194_v6  ;;  %v7197_v8 = vld [vmem:[%s6904_s19 + $0xd0] sm:$0xf]  ;;  %v777_v14 = vsel %vm629_vm0, %v772_v39, %v776_v40  ;;  %v12154_v38 = vshrl.u32 %v7135_v50, 16  ;;  %v12155_v61 = vshll.u32 %v7144_v31, 16  ;;  %12156 = vst [vmem:[#allocation52_spill] sm:$0xff] %v7210_v3 }
  0x37   : > { %12148 = vst [vmem:[#allocation47_spill] sm:$0xff] %v7184_v9  ;;  %12152 = vst [vmem:[#allocation50_spill] sm:$0xff] %v7197_v8  ;;  %v12158_v37 = vshll.u32 %v7157_v52, 16  ;;  %v7225_v50 = vld [vmem:[%s6904_s19 + $0xdc] sm:$0xf]  ;;  %v769_v16 = vsel %vm629_vm0, %v764_v30, %v768_v17  ;;  %v12160_v13 = vshrl.u32 %v7120_v51, 16 }
  0x38   : > { %12153 = vst [vmem:[#allocation51_spill] sm:$0xff] %v7200_v2  ;;  %1115 = vrot.lane.b32.xlu1 %v761_v22, %s6851_s20  ;;  %v788_v55 = vor.u32 %v12154_v38, %v784_v24  ;;  %v792_v23 = vrot.slane %v12155_v61, 1  ;;  %12157 = vst [vmem:[#allocation53_spill] sm:$0xff] %v7213_v34  ;;  %v7221_v38 = vcombine.low %v7191_v19, %v7194_v6  ;;  %v12162_v45 = vshll.u32 %v7175_v21, 16  ;;  %v7241_v17 = vld [vmem:[%s6904_s19 + $0xe0] sm:$0xf] }
  0x39   : > { %v800_v22 = vrot.slane %v12158_v37, 1  ;;  %v780_v4 = vor.u32 %v12160_v13, %v776_v40  ;;  %v7233_v37 = vcombine.low %v7197_v8, %v7210_v3  ;;  %v7245_v40 = vcombine.low %v7213_v34, %v7225_v50  ;;  %v7255_v12 = vld [vmem:[%s6904_s19 + $0xe4] sm:$0xf]  ;;  %v7287_v46 = vld [vmem:[%s6904_s19 + $0xf4] sm:$0xf] }
  0x3a   : > { %1113 = vrot.lane.b32.xlu0 %v753_v43, %s6851_s20  ;;  %12159 = vst [vmem:[#allocation54_spill] sm:$0xff] %v7221_v38  ;;  %v793_v61 = vsel %vm629_vm0, %v788_v55, %v792_v23  ;;  %v808_v30 = vrot.slane %v12162_v45, 1  ;;  %v12164_v13 = vshrl.u32 %v7157_v52, 16  ;;  %v12165_v39 = vshll.u32 %v7184_v9, 16  ;;  %12166 = vst [vmem:[#allocation57_spill] sm:$0xff] %v7255_v12 }
  0x3b   : > { %12161 = vst [vmem:[#allocation55_spill] sm:$0xff] %v7233_v37  ;;  %12163 = vst [vmem:[#allocation56_spill] sm:$0xff] %v7245_v40  ;;  %v785_v45 = vsel %vm629_vm0, %v780_v4, %v784_v24  ;;  %v12167_v20 = vshrl.u32 %v7144_v31, 16  ;;  %v7262_v52 = vld [vmem:[%s6904_s19 + $0xe8] sm:$0xf]  ;;  %v7274_v4 = vcombine.low %v7241_v17, %v7255_v12  ;;  %v12172_v55 = vshll.u32 %v7221_v38, 16 }
  0x3c   : > { %1119 = vrot.lane.b32.xlu1 %v777_v14, %s6851_s20  ;;  %v804_v43 = vor.u32 %v12164_v13, %v800_v22  ;;  %v816_v51 = vrot.slane %v12165_v39, 1  ;;  %12168 = vst [vmem:[#allocation58_spill] sm:$0xff] %v7262_v52  ;;  %v7265_v13 = vld [vmem:[%s6904_s19 + $0xec] sm:$0xf]  ;;  %v12169_v39 = vshll.u32 %v7200_v2, 16  ;;  %v12175_v26 = vshrl.u32 %v7200_v2, 16 }
  0x3d   : > { %v796_v56 = vor.u32 %v12167_v20, %v792_v23  ;;  %12170 = vst [vmem:[#allocation59_spill] sm:$0xff] %v7274_v4  ;;  %v12171_v23 = vshrl.u32 %v7184_v9, 16  ;;  %v7284_v31 = vld [vmem:[%s6904_s19 + $0xf0] sm:$0xf]  ;;  %v7298_v9 = vld [vmem:[%s6904_s19 + $0xf8] sm:$0xf] }
  0x3e   : > { %1117 = vrot.lane.b32.xlu0 %v769_v16, %s6851_s20  ;;  %v832_v14 = vrot.slane %v12169_v39, 1  ;;  %v809_v24 = vsel %vm629_vm0, %v804_v43, %v808_v30  ;;  %v824_v16 = vrot.slane %v12172_v55, 1  ;;  %v7301_v55 = vld [vmem:[%s6904_s19 + $0xfc] sm:$0xf]  ;;  %v12176_v63 = vshll.u32 %v7233_v37, 16 }
  0x3f   : > { %v820_v39 = vor.u32 %v12171_v23, %v816_v51  ;;  %v801_v20 = vsel %vm629_vm0, %v796_v56, %v800_v22  ;;  %v12177_v56 = vshll.u32 %v7245_v40, 16  ;;  %v7314_v23 = vcombine.low %v7284_v31, %v7287_v46  ;;  %v7341_v57 = vld [vmem:[%s6904_s19 + $0x110] sm:$0xf]  ;;  %v7399_v18 = vld [vmem:[%s6904_s19 + $0x124] sm:$0xf] }
  0x40   : > { %1123 = vrot.lane.b32.xlu1 %v793_v61, %s6851_s20  ;;  %v7291_v61 = vcombine.low %v7262_v52, %v7265_v13  ;;  %v836_v25 = vor.u32 %v12175_v26, %v832_v14  ;;  %v840_v62 = vrot.slane %v12176_v63, 1  ;;  %v12180_v2 = vshrl.u32 %v7221_v38, 16  ;;  %v7337_v63 = vld [vmem:[%s6904_s19 + $0x104] sm:$0xf]  ;;  %v7369_v38 = vld [vmem:[%s6904_s19 + $0x11c] sm:$0xf] }
  0x41   : > { %v848_v22 = vrot.slane %v12177_v56, 1  ;;  %12178 = vst [vmem:[#allocation61_spill] sm:$0xff] %v7314_v23  ;;  %v825_v26 = vsel %vm629_vm0, %v820_v39, %v824_v16  ;;  %v7324_v56 = vld [vmem:[%s6904_s19 + $0x108] sm:$0xf]  ;;  %v7334_v39 = vld [vmem:[%s6904_s19 + $0x100] sm:$0xf] }
  0x42   : > { %1121 = vrot.lane.b32.xlu0 %v785_v45, %s6851_s20  ;;  %12173 = vst [vmem:[#allocation60_spill] sm:$0xff] %v7291_v61  ;;  %v12174_v45 = vshrl.u32 %v7175_v21, 16  ;;  %v828_v21 = vor.u32 %v12180_v2, %v824_v16  ;;  %v841_v58 = vsel %vm629_vm0, %v836_v25, %v840_v62  ;;  %v12181_v12 = vshrl.u32 %v7245_v40, 16  ;;  %v7350_v16 = vld [vmem:[%s6904_s19 + $0x114] sm:$0xf] }
  0x43   : > { %v7357_v25 = vld [vmem:[%s6904_s19 + $0x118] sm:$0xf]  ;;  %v12186_v34 = vshrl.u32 %v7233_v37, 16  ;;  %v12192_v19 = vshrl.u32 %v7274_v4, 16  ;;  %v7464_v28 = vld [vmem:[%s6904_s19 + $0x148] sm:$0xf] }
  0x44   : > { %v812_v43 = vor.u32 %v12174_v45, %v808_v30  ;;  %1127 = vrot.lane.b32.xlu1 %v809_v24, %s6851_s20  ;;  %v7321_v24 = vcombine.low %v7298_v9, %v7301_v55  ;;  %v7327_v30 = vld [vmem:[%s6904_s19 + $0x10c] sm:$0xf]  ;;  %v852_v52 = vor.u32 %v12181_v12, %v848_v22  ;;  %v833_v3 = vsel %vm629_vm0, %v828_v21, %v832_v14  ;;  %v7385_v14 = vld [vmem:[%s6904_s19 + $0x120] sm:$0xf]  ;;  %v7442_v60 = vld [vmem:[%s6904_s19 + $0x138] sm:$0xf] }
  0x45   : > { %v844_v8 = vor.u32 %v12186_v34, %v840_v62  ;;  %v12188_v12 = vshll.u32 %v7314_v23, 16  ;;  %v7389_v62 = vcombine.low %v7357_v25, %v7369_v38  ;;  %v12190_v34 = vshrl.u32 %v7291_v61, 16  ;;  %v7481_v1 = vld [vmem:[%s6904_s19 + $0x144] sm:$0xf]  ;;  %v7487_v10 = vld [vmem:[%s6904_s19 + $0x154] sm:$0xf] }
  0x46   : > { %1125 = vrot.lane.b32.xlu0 %v801_v20, %s6851_s20  ;;  %12179 = vst [vmem:[#allocation62_spill] sm:$0xff] %v7321_v24  ;;  %v817_v45 = vsel %vm629_vm0, %v812_v43, %v816_v51  ;;  %v12182_v51 = vshll.u32 %v7274_v4, 16  ;;  %v7354_v20 = vcombine.low %v7324_v56, %v7327_v30  ;;  %v7504_v59 = vld [vmem:[%s6904_s19 + $0x15c] sm:$0xf]  ;;  %v7549_v41 = vld [vmem:[%s6904_s19 + $0x16c] sm:$0xf] }
  0x47   : > { %v872_v6 = vrot.slane %v12188_v12, 1  ;;  %12189 = vst [vmem:[#allocation66_spill] sm:$0xff] %v7389_v62  ;;  %v849_v21 = vsel %vm629_vm0, %v844_v8, %v848_v22  ;;  %v7431_v8 = vld [vmem:[%s6904_s19 + $0x134] sm:$0xf]  ;;  %12208 = vst [vmem:[#allocation72_spill] sm:$0xff] %v7504_v59 }
  0x48   : > { %1131 = vrot.lane.b32.xlu1 %v825_v26, %s6851_s20  ;;  %v856_v43 = vrot.slane %v12182_v51, 1  ;;  %12183 = vst [vmem:[#allocation63_spill] sm:$0xff] %v7354_v20  ;;  %v12184_v26 = vshll.u32 %v7291_v61, 16  ;;  %v7365_v51 = vcombine.low %v7334_v39, %v7337_v63  ;;  %v7406_v61 = vld [vmem:[%s6904_s19 + $0x128] sm:$0xf]  ;;  %v12193_v12 = vshll.u32 %v7354_v20, 16 }
  0x49   : > { %v12200_v32 = vshrl.u32 %v7354_v20, 16  ;;  %12220 = vst [vmem:[#allocation79_spill] sm:$0xff] %v7549_v41 }
  0x4a   : > { %1129 = vrot.lane.b32.xlu0 %v817_v45, %s6851_s20  ;;  %v864_v40 = vrot.slane %v12184_v26, 1  ;;  %12185 = vst [vmem:[#allocation64_spill] sm:$0xff] %v7365_v51  ;;  %v7377_v26 = vcombine.low %v7341_v57, %v7350_v16  ;;  %v857_v2 = vsel %vm629_vm0, %v852_v52, %v856_v43  ;;  %v860_v44 = vor.u32 %v12192_v19, %v856_v43 }
  0x4b   : > { %v896_v52 = vrot.slane %v12193_v12, 1  ;;  %v7418_v19 = vcombine.low %v7385_v14, %v7399_v18  ;;  %v7428_v12 = vld [vmem:[%s6904_s19 + $0x130] sm:$0xf]  ;;  %v12204_v20 = vshrl.u32 %v7365_v51, 16 }
  0x4c   : > { %12187 = vst [vmem:[#allocation65_spill] sm:$0xff] %v7377_v26  ;;  %1135 = vrot.lane.b32.xlu1 %v841_v58, %s6851_s20  ;;  %v868_v45 = vor.u32 %v12190_v34, %v864_v40  ;;  %v12191_v58 = vshll.u32 %v7321_v24, 16  ;;  %v7409_v34 = vld [vmem:[%s6904_s19 + $0x12c] sm:$0xf]  ;;  %v12199_v33 = vshll.u32 %v7377_v26, 16  ;;  %v12211_v0 = vshrl.u32 %v7377_v26, 16 }
  0x4d   : > { %12194 = vst [vmem:[#allocation67_spill] sm:$0xff] %v7418_v19  ;;  %v7435_v22 = vcombine.low %v7406_v61, %v7409_v34  ;;  %v12221_v42 = vshrl.u32 %v7418_v19, 16 }
  0x4e   : > { %1133 = vrot.lane.b32.xlu0 %v833_v3, %s6851_s20  ;;  %v880_v37 = vrot.slane %v12191_v58, 1  ;;  %v873_v43 = vsel %vm629_vm0, %v868_v45, %v872_v6  ;;  %v12195_v58 = vshrl.u32 %v7321_v24, 16  ;;  %v12198_v45 = vshrl.u32 %v7314_v23, 16  ;;  %v7467_v23 = vld [vmem:[%s6904_s19 + $0x14c] sm:$0xf] }
  0x4f   : > { %12197 = vst [vmem:[#allocation68_spill] sm:$0xff] %v7435_v22  ;;  %v904_v49 = vrot.slane %v12199_v33, 1  ;;  %v7461_v33 = vld [vmem:[%s6904_s19 + $0x140] sm:$0xf] }
  0x50   : > { %1139 = vrot.lane.b32.xlu1 %v857_v2, %s6851_s20  ;;  %v884_v3 = vor.u32 %v12195_v58, %v880_v37  ;;  %v12196_v2 = vshll.u32 %v7365_v51, 16  ;;  %v876_v24 = vor.u32 %v12198_v45, %v872_v6  ;;  %v12201_v6 = vshll.u32 %v7389_v62, 16  ;;  %v7501_v51 = vld [vmem:[%s6904_s19 + $0x158] sm:$0xf] }
  0x51   : > { %v7458_v58 = vcombine.low %v7428_v12, %v7431_v8  ;;  %v908_v53 = vor.u32 %v12211_v0, %v904_v49  ;;  %v7529_v47 = vcombine.low %v7501_v51, %v7504_v59 }
  0x52   : > { %1137 = vrot.lane.b32.xlu0 %v849_v21, %s6851_s20  ;;  %v888_v4 = vrot.slane %v12196_v2, 1  ;;  %v865_v21 = vsel %vm629_vm0, %v860_v44, %v864_v40  ;;  %v7445_v2 = vld [vmem:[%s6904_s19 + $0x13c] sm:$0xf]  ;;  %v900_v44 = vor.u32 %v12200_v32, %v896_v52  ;;  %v912_v40 = vrot.slane %v12201_v6, 1 }
  0x53   : > { %12202 = vst [vmem:[#allocation69_spill] sm:$0xff] %v7458_v58  ;;  %v7474_v6 = vcombine.low %v7442_v60, %v7445_v2  ;;  %v881_v45 = vsel %vm629_vm0, %v876_v24, %v880_v37  ;;  %v12206_v37 = vshrl.u32 %v7389_v62, 16  ;;  %v12207_v24 = vshll.u32 %v7418_v19, 16  ;;  %v7525_v62 = vld [vmem:[%s6904_s19 + $0x160] sm:$0xf]  ;;  %12214 = vst [vmem:[#allocation76_spill] sm:$0xff] %v7529_v47 }
  0x54   : > { %1143 = vrot.lane.b32.xlu1 %v873_v43, %s6851_s20  ;;  %v889_v32 = vsel %vm629_vm0, %v884_v3, %v888_v4  ;;  %v892_v11 = vor.u32 %v12204_v20, %v888_v4  ;;  %v7491_v3 = vcombine.low %v7464_v28, %v7467_v23  ;;  %v905_v43 = vsel %vm629_vm0, %v900_v44, %v904_v49  ;;  %v7582_v19 = vld [vmem:[%s6904_s19 + $0x178] sm:$0xf] }
  0x55   : > { %12203 = vst [vmem:[#allocation70_spill] sm:$0xff] %v7474_v6  ;;  %v916_v4 = vor.u32 %v12206_v37, %v912_v40  ;;  %v920_v20 = vrot.slane %v12207_v24, 1  ;;  %v7512_v37 = vcombine.low %v7461_v33, %v7481_v1  ;;  %12213 = vst [vmem:[#allocation75_spill] sm:$0xff] %v7525_v62  ;;  %v12215_v0 = vshll.u32 %v7458_v58, 16 }
  0x56   : > { %1141 = vrot.lane.b32.xlu0 %v865_v21, %s6851_s20  ;;  %v7484_v21 = vld [vmem:[%s6904_s19 + $0x150] sm:$0xf]  ;;  %12205 = vst [vmem:[#allocation71_spill] sm:$0xff] %v7491_v3  ;;  %v897_v27 = vsel %vm629_vm0, %v892_v11, %v896_v52  ;;  %v7536_v52 = vld [vmem:[%s6904_s19 + $0x164] sm:$0xf]  ;;  %v12219_v26 = vshll.u32 %v7474_v6, 16 }
  0x57   : > { %12210 = vst [vmem:[#allocation73_spill] sm:$0xff] %v7512_v37  ;;  %v7521_v54 = vcombine.low %v7484_v21, %v7487_v10  ;;  %v921_v11 = vsel %vm629_vm0, %v916_v4, %v920_v20  ;;  %v936_v49 = vrot.slane %v12215_v0, 1  ;;  %12216 = vst [vmem:[#allocation77_spill] sm:$0xff] %v7536_v52  ;;  %v913_v0 = vsel %vm629_vm0, %v908_v53, %v912_v40  ;;  %v7566_v40 = vld [vmem:[%s6904_s19 + $0x170] sm:$0xf] }
  0x58   : > { %1147 = vrot.lane.b32.xlu1 %v889_v32, %s6851_s20  ;;  %v12209_v32 = vshll.u32 %v7435_v22, 16  ;;  %v944_v48 = vrot.slane %v12219_v26, 1  ;;  %v924_v35 = vor.u32 %v12221_v42, %v920_v20  ;;  %v7561_v4 = vcombine.low %v7525_v62, %v7536_v52  ;;  %v7569_v42 = vld [vmem:[%s6904_s19 + $0x174] sm:$0xf]  ;;  %v7622_v62 = vld [vmem:[%s6904_s19 + $0x188] sm:$0xf] }
  0x59   : > { %12212 = vst [vmem:[#allocation74_spill] sm:$0xff] %v7521_v54  ;;  %12224 = vst [vmem:[#allocation81_spill] sm:$0xff] %v7569_v42  ;;  %v12232_v29 = vshll.u32 %v7529_v47, 16 }
  0x5a   : > { %1145 = vrot.lane.b32.xlu0 %v881_v45, %s6851_s20  ;;  %v928_v44 = vrot.slane %v12209_v32, 1  ;;  %v7539_v45 = vld [vmem:[%s6904_s19 + $0x168] sm:$0xf]  ;;  %v12218_v32 = vshrl.u32 %v7435_v22, 16  ;;  %v12222_v22 = vshll.u32 %v7491_v3, 16  ;;  %12223 = vst [vmem:[#allocation80_spill] sm:$0xff] %v7561_v4 }
  0x5b   : > { %12217 = vst [vmem:[#allocation78_spill] sm:$0xff] %v7539_v45  ;;  %v7573_v20 = vcombine.low %v7539_v45, %v7549_v41  ;;  %v12229_v41 = vshrl.u32 %v7458_v58, 16  ;;  %v976_v59 = vrot.slane %v12232_v29, 1 }
  0x5c   : > { %1151 = vrot.lane.b32.xlu1 %v905_v43, %s6851_s20  ;;  %v932_v24 = vor.u32 %v12218_v32, %v928_v44  ;;  %v960_v26 = vrot.slane %v12222_v22, 1  ;;  %v12226_v43 = vshrl.u32 %v7474_v6, 16  ;;  %v929_v52 = vsel %vm629_vm0, %v924_v35, %v928_v44 }
  0x5d   : > { %12225 = vst [vmem:[#allocation82_spill] sm:$0xff] %v7573_v20  ;;  %v940_v45 = vor.u32 %v12229_v41, %v936_v49  ;;  %v11880_v6 = vshrl.u32 %v7512_v37, 16  ;;  %v7602_v41 = vcombine.low %v7566_v40, %v7569_v42 }
  0x5e   : > { %1149 = vrot.lane.b32.xlu0 %v897_v27, %s6851_s20  ;;  %v937_v22 = vsel %vm629_vm0, %v932_v24, %v936_v49  ;;  %v948_v32 = vor.u32 %v12226_v43, %v944_v48  ;;  %v12227_v27 = vshll.u32 %v7512_v37, 16  ;;  %v12231_v43 = vshrl.u32 %v7491_v3, 16  ;;  %v7625_v3 = vld [vmem:[%s6904_s19 + $0x18c] sm:$0xf] }
  0x5f   : > { %12233 = vst [vmem:[#allocation84_spill] sm:$0xff] %v7602_v41  ;;  %12237 = vst [vmem:[#allocation88_spill] sm:$0xff] %v7625_v3  ;;  %v1266_v37 = vrot.slane %v6912_v5, 1  ;;  %v12249_v5 = vrot.slane %v6928_v15, 1 }
  0x60   : > { %1155 = vrot.lane.b32.xlu1 %v921_v11, %s6851_s20  ;;  %v952_v53 = vrot.slane %v12227_v27, 1  ;;  %v7585_v11 = vld [vmem:[%s6904_s19 + $0x17c] sm:$0xf]  ;;  %v964_v27 = vor.u32 %v12231_v43, %v960_v26  ;;  %v7615_v43 = vld [vmem:[%s6904_s19 + $0x184] sm:$0xf] }
  0x61   : > { %12228 = vst [vmem:[#allocation83_spill] sm:$0xff] %v7585_v11  ;;  %v7607_v49 = vcombine.low %v7582_v19, %v7585_v11  ;;  %12236 = vst [vmem:[#allocation87_spill] sm:$0xff] %v7615_v43  ;;  %v12239_v11 = vshll.u32 %v7561_v4, 16 }
  0x62   : > { %1153 = vrot.lane.b32.xlu0 %v913_v0, %s6851_s20  ;;  %v12230_v0 = vshll.u32 %v7521_v54, 16  ;;  %v953_v29 = vsel %vm629_vm0, %v948_v32, %v952_v53  ;;  %v956_v35 = vor.u32 %v11880_v6, %v952_v53  ;;  %v12238_v32 = vshrl.u32 %v7529_v47, 16  ;;  %v7637_v53 = vld [vmem:[%s6904_s19 + $0x194] sm:$0xf] }
  0x63   : > { %12234 = vst [vmem:[#allocation85_spill] sm:$0xff] %v7607_v49  ;;  %v984_v42 = vrot.slane %v12239_v11, 1  ;;  %12240 = vst [vmem:[#allocation89_spill] sm:$0xff] %v7637_v53  ;;  %v12241_v6 = vshll.u32 %v7573_v20, 16  ;;  %v7649_v11 = vld [vmem:[%s6904_s19 + $0x198] sm:$0xf] }
  0x64   : > { %v968_v24 = vrot.slane %v12230_v0, 1  ;;  %1159 = vrot.lane.b32.xlu1 %v937_v22, %s6851_s20  ;;  %v7612_v0 = vld [vmem:[%s6904_s19 + $0x180] sm:$0xf]  ;;  %v945_v22 = vsel %vm629_vm0, %v940_v45, %v944_v48  ;;  %v980_v58 = vor.u32 %v12238_v32, %v976_v59  ;;  %v7634_v45 = vld [vmem:[%s6904_s19 + $0x190] sm:$0xf]  ;;  %12243 = vst [vmem:[#allocation91_spill] sm:$0xff] %v7649_v11  ;;  %v7654_v48 = vcombine.low %v7622_v62, %v7625_v3 }
  0x65   : > { %12235 = vst [vmem:[#allocation86_spill] sm:$0xff] %v7612_v0  ;;  %v992_v44 = vrot.slane %v12241_v6, 1  ;;  %v11894_v47 = vrot.slane %v6949_v36, 1  ;;  %v12246_v32 = vshrl.u32 %v7521_v54, 16  ;;  %v7668_v3 = vcombine.low %v7634_v45, %v7637_v53  ;;  %v7687_v36 = vld [vmem:[%s6904_s19 + $0x1a0] sm:$0xf] }
  0x66   : > { %1157 = vrot.lane.b32.xlu0 %v929_v52, %s6851_s20  ;;  %v969_v52 = vsel %vm629_vm0, %v964_v27, %v968_v24  ;;  %v7645_v27 = vcombine.low %v7612_v0, %v7615_v43  ;;  %12244 = vst [vmem:[#allocation92_spill] sm:$0xff] %v7654_v48  ;;  %v961_v43 = vsel %vm629_vm0, %v956_v35, %v960_v26  ;;  %12253 = vst [vmem:[#allocation97_spill] sm:$0xff] %v7687_v36  ;;  %v7732_v53 = vld [vmem:[%s6904_s19 + $0x1b4] sm:$0xf] }
  0x67   : > { %v972_v0 = vor.u32 %v12246_v32, %v968_v24  ;;  %12247 = vst [vmem:[#allocation94_spill] sm:$0xff] %v7668_v3  ;;  %v7673_v6 = vsel %vm1262_vm1, %v1266_v37, %v11894_v47  ;;  %v7678_v26 = vsel %vm1262_vm1, %v12249_v5, %v1266_v37  ;;  %v12251_v24 = vshrl.u32 %v7573_v20, 16  ;;  %12263 = vst [vmem:[#allocation103_spill] sm:$0xff] %v7732_v53 }
  0x68   : > { %1163 = vrot.lane.b32.xlu1 %v953_v29, %s6851_s20  ;;  %12242 = vst [vmem:[#allocation90_spill] sm:$0xff] %v7645_v27  ;;  %v7657_v29 = vld [vmem:[%s6904_s19 + $0x19c] sm:$0xf]  ;;  %12248 = vst [vmem:[#allocation95_spill] sm:$0xff] %v7673_v6  ;;  %v12252_v32 = vshll.u32 %v7602_v41, 16  ;;  %v985_v5 = vsel %vm629_vm0, %v980_v58, %v984_v42  ;;  %v12255_v37 = vshll.u32 %v7607_v49, 16 }
  0x69   : > { %12245 = vst [vmem:[#allocation93_spill] sm:$0xff] %v7657_v29  ;;  %12250 = vst [vmem:[#allocation96_spill] sm:$0xff] %v7678_v26  ;;  %v996_v35 = vor.u32 %v12251_v24, %v992_v44  ;;  %v7691_v47 = vcombine.low %v7649_v11, %v7657_v29  ;;  %v11902_v24 = vshrl.u32 %v7607_v49, 16  ;;  %v977_v54 = vsel %vm629_vm0, %v972_v0, %v976_v59  ;;  %v7707_v29 = vld [vmem:[%s6904_s19 + $0x1a8] sm:$0xf] }
  0x6a   : > { %1161 = vrot.lane.b32.xlu0 %v945_v22, %s6851_s20  ;;  %v1000_v22 = vrot.slane %v12252_v32, 1  ;;  %v7700_v32 = vld [vmem:[%s6904_s19 + $0x1a4] sm:$0xf]  ;;  %v12257_v26 = vshrl.u32 %v7561_v4, 16  ;;  %12258 = vst [vmem:[#allocation100_spill] sm:$0xff] %v7707_v29  ;;  %v12260_v59 = vshll.u32 %v7645_v27, 16 }
  0x6b   : > { %12254 = vst [vmem:[#allocation98_spill] sm:$0xff] %v7691_v47  ;;  %12256 = vst [vmem:[#allocation99_spill] sm:$0xff] %v7700_v32  ;;  %v7710_v58 = vld [vmem:[%s6904_s19 + $0x1ac] sm:$0xf]  ;;  %v7743_v49 = vld [vmem:[%s6904_s19 + $0x1b8] sm:$0xf] }
  0x6c   : > { %1167 = vrot.lane.b32.xlu1 %v969_v52, %s6851_s20  ;;  %v1008_v52 = vrot.slane %v12255_v37, 1  ;;  %v988_v6 = vor.u32 %v12257_v26, %v984_v42  ;;  %12259 = vst [vmem:[#allocation101_spill] sm:$0xff] %v7710_v58  ;;  %v1001_v20 = vsel %vm629_vm0, %v996_v35, %v1000_v22  ;;  %v1016_v0 = vrot.slane %v12260_v59, 1  ;;  %v7729_v35 = vld [vmem:[%s6904_s19 + $0x1b0] sm:$0xf] }
  0x6d   : > { %v7719_v42 = vcombine.low %v7687_v36, %v7700_v32  ;;  %v7736_v59 = vcombine.low %v7707_v29, %v7710_v58  ;;  %v12267_v4 = vshll.u32 %v7668_v3, 16  ;;  %v12268_v58 = vshll.u32 %v7691_v47, 16 }
  0x6e   : > { %1165 = vrot.lane.b32.xlu0 %v961_v43, %s6851_s20  ;;  %v1012_v37 = vor.u32 %v11902_v24, %v1008_v52  ;;  %v12262_v43 = vshll.u32 %v7654_v48, 16  ;;  %v993_v26 = vsel %vm629_vm0, %v988_v6, %v992_v44  ;;  %v11915_v24 = vshrl.u32 %v7645_v27, 16 }
  0x6f   : > { %12261 = vst [vmem:[#allocation102_spill] sm:$0xff] %v7719_v42  ;;  %12264 = vst [vmem:[#allocation104_spill] sm:$0xff] %v7736_v59  ;;  %v1032_v36 = vrot.slane %v12267_v4, 1  ;;  %v1040_v29 = vrot.slane %v12268_v58, 1 }
  0x70   : > { %1171 = vrot.lane.b32.xlu1 %v985_v5, %s6851_s20  ;;  %v1024_v5 = vrot.slane %v12262_v43, 1  ;;  %v7746_v43 = vld [vmem:[%s6904_s19 + $0x1bc] sm:$0xf]  ;;  %v1017_v4 = vsel %vm629_vm0, %v1012_v37, %v1016_v0  ;;  %v1020_v6 = vor.u32 %v11915_v24, %v1016_v0  ;;  %v12273_v37 = vshll.u32 %v7719_v42, 16 }
  0x71   : > { %12266 = vst [vmem:[#allocation105_spill] sm:$0xff] %v7746_v43  ;;  %v7767_v58 = vcombine.low %v7743_v49, %v7746_v43  ;;  %v6714_v43 = vld [vmem:[%s6904_s19 + $0x1c0] ss:$0 sps:$4 sm:$0x77]   ;;  %v11921_v24 = vshrl.u32 %v7719_v42, 16 }
  0x72   : > { %1169 = vrot.lane.b32.xlu0 %v977_v54, %s6851_s20  ;;  %v12265_v54 = vshrl.u32 %v7602_v41, 16 }
  0x73   : > { %12271 = vst [vmem:[#allocation107_spill] sm:$0xff] %v7767_v58 }
  0x74   : > { %v1004_v32 = vor.u32 %v12265_v54, %v1000_v22  ;;  %1175 = vrot.lane.b32.xlu1 %v1001_v20, %s6851_s20  ;;  %v7758_v22 = vcombine.low %v7729_v35, %v7732_v53  ;;  %v12270_v54 = vshrl.u32 %v7654_v48, 16  ;;  %v1048_v48 = vrot.slane %v12273_v37, 1 }
  0x75   : > { %v1025_v37 = vsel %vm629_vm0, %v1020_v6, %v1024_v5 }
  0x76   : > { %12269 = vst [vmem:[#allocation106_spill] sm:$0xff] %v7758_v22  ;;  %1173 = vrot.lane.b32.xlu0 %v993_v26, %s6851_s20  ;;  %v1028_v11 = vor.u32 %v12270_v54, %v1024_v5  ;;  %v1009_v44 = vsel %vm629_vm0, %v1004_v32, %v1008_v52  ;;  %v12272_v26 = vshrl.u32 %v7691_v47, 16  ;;  %v12274_v54 = vshrl.u32 %v7668_v3, 16 }
  0x77   : > { %v11918_v53 = vshll.u32 %v7758_v22, 16  ;;  %v12275_v32 = vshll.u32 %v7736_v59, 16 }
  0x78   : > { %1179 = vrot.lane.b32.xlu1 %v1017_v4, %s6851_s20  ;;  %v1044_v41 = vor.u32 %v12272_v26, %v1040_v29  ;;  %v1036_v20 = vor.u32 %v12274_v54, %v1032_v36  ;;  %v1033_v52 = vsel %vm629_vm0, %v1028_v11, %v1032_v36  ;;  %v11920_v4 = vshrl.u32 %v7736_v59, 16 }
  0x79   : > { %v1056_v0 = vrot.slane %v12275_v32, 1  ;;  %v11916_v26 = vshll.u32 %v7767_v58, 16  ;;  %v7791_v54 = vcombine.low %v7225_v50, %v7241_v17  ;;  %v1078_v32 = vshll.u32 %v6714_v43, 16  ;;  %v322_v17 = vld [vmem:[%s6904_s19 + $0x4] sm:$0xe] }
  0x7a   : > { %1177 = vrot.lane.b32.xlu0 %v1009_v44, %s6851_s20  ;;  %v1049_v36 = vsel %vm629_vm0, %v1044_v41, %v1048_v48  ;;  %v1041_v11 = vsel %vm629_vm0, %v1036_v20, %v1040_v29  ;;  %v1064_v44 = vrot.slane %v11918_v53, 1  ;;  %v11917_v50 = vshrl.u32 %v7767_v58, 16  ;;  %v12328_v53 = vld [vmem:[#allocation26_spill] sm:$0xff] }
  0x7b   : > { %12276 = vst [vmem:[#allocation108_spill] sm:$0xff] %v7791_v54  ;;  %v1060_v5 = vor.u32 %v11920_v4, %v1056_v0  ;;  %v1072_v6 = vrot.slane %v11916_v26, 1  ;;  %v7807_v41 = vcombine.low %v7265_v13, %v7284_v31  ;;  %v1052_v29 = vor.u32 %v11921_v24, %v1048_v48  ;;  %v12284_v48 = vld [vmem:[#allocation75_spill] sm:$0xff] }
  0x7c   : > { %1183 = vrot.lane.b32.xlu1 %v1033_v52, %s6851_s20  ;;  %v11919_v20 = vshrl.u32 %v7758_v22, 16  ;;  %v7814_v52 = vcombine.low %v7287_v46, %v7298_v9  ;;  %v7822_v26 = vcombine.low %v7337_v63, %v7324_v56  ;;  %v7826_v31 = vcombine.low %v7327_v30, %v7341_v57 }
  0x7d   : > { %12277 = vst [vmem:[#allocation109_spill] sm:$0xff] %v7807_v41  ;;  %v7830_v13 = vcombine.low %v7350_v16, %v7357_v25  ;;  %v7834_v46 = vcombine.low %v322_v17, %v6917_v7  ;;  %v7838_v9 = vcombine.low %v7369_v38, %v7385_v14  ;;  %v1076_v57 = vor.u32 %v11917_v50, %v1072_v6  ;;  %v6803_v17 = vld [vmem:[%s6904_s19 + $0x34] sm:$0xf]  ;;  %v12327_v50 = vld [vmem:[#allocation29_spill] sm:$0xff] }
  0x7e   : > { %1181 = vrot.lane.b32.xlu0 %v1025_v37, %s6851_s20  ;;  %12278 = vst [vmem:[#allocation110_spill] sm:$0xff] %v7814_v52  ;;  %v7818_v37 = vcombine.low %v7301_v55, %v7334_v39  ;;  %12280 = vst [vmem:[#allocation112_spill] sm:$0xff] %v7822_v26  ;;  %v1065_v55 = vsel %vm629_vm0, %v1060_v5, %v1064_v44  ;;  %v1080_v30 = vrot.slane %v1078_v32, 1  ;;  %v1082_v16 = vshrl.u32 %v6714_v43, 16  ;;  %v12285_v43 = vld [vmem:[#allocation72_spill] sm:$0xff]  ;;  %v12290_v32 = vld [vmem:[#allocation79_spill] sm:$0xff] }
  0x7f   : > { %12281 = vst [vmem:[#allocation113_spill] sm:$0xff] %v7826_v31  ;;  %12282 = vst [vmem:[#allocation114_spill] sm:$0xff] %v7830_v13  ;;  %v1057_v63 = vsel %vm629_vm0, %v1052_v29, %v1056_v0  ;;  %v1068_v7 = vor.u32 %v11919_v20, %v1064_v44  ;;  %v7849_v56 = vcombine.low %v7399_v18, %v7406_v61  ;;  %v1263_v39 = vrot.slane %v7834_v46, 1  ;;  %v12292_v29 = vld [vmem:[#allocation9_spill] sm:$0xff]  ;;  %v12329_v20 = vld [vmem:[#allocation103_spill] sm:$0xff] }
  0x80   : > { %12279 = vst [vmem:[#allocation111_spill] sm:$0xff] %v7818_v37  ;;  %1187 = vrot.lane.b32.xlu1 %v1049_v36, %s6851_s20  ;;  %12283 = vst [vmem:[#allocation115_spill] sm:$0xff] %v7838_v9  ;;  %v7853_v38 = vcombine.low %v7409_v34, %v7428_v12  ;;  %v7859_v25 = vcombine.low %v7431_v8, %v7442_v60  ;;  %v7863_v14 = vcombine.low %v7445_v2, %v7461_v33  ;;  %v6800_v12 = vld [vmem:[%s6904_s19 + $0x24] sm:$0xf]  ;;  %v6801_v2 = vld [vmem:[%s6904_s19 + $0x28] sm:$0xf] }
  0x81   : > { %v1081_v18 = vsel %vm629_vm0, %v1076_v57, %v1080_v30  ;;  %v7869_v61 = vcombine.low %v7481_v1, %v7464_v28  ;;  %v7873_v34 = vcombine.low %v7467_v23, %v7484_v21  ;;  %v7877_v60 = vcombine.low %v7487_v10, %v7501_v51  ;;  %v6802_v1 = vld [vmem:[%s6904_s19 + $0x2c] sm:$0xf]  ;;  %v12287_v21 = vld [vmem:[#allocation78_spill] sm:$0xff]  ;;  %v12288_v36 = vld [vmem:[#allocation77_spill] sm:$0xff] }
  0x82   : > { %1185 = vrot.lane.b32.xlu0 %v1041_v11, %s6851_s20  ;;  %v1073_v8 = vsel %vm629_vm0, %v1068_v7, %v1072_v6  ;;  %v7882_v33 = vcombine.low %v6800_v12, %v6801_v2  ;;  %v7886_v0 = vcombine.low %v12285_v43, %v12284_v48  ;;  %v12286_v28 = vld [vmem:[#allocation7_spill] sm:$0xff]  ;;  %v7895_v10 = vcombine.low %v12288_v36, %v12287_v21  ;;  %v12293_v57 = vld [vmem:[#allocation81_spill] sm:$0xff]  ;;  %v12295_v7 = vld [vmem:[#allocation86_spill] sm:$0xff] }
  0x83   : > { %v7891_v23 = vcombine.low %v6802_v1, %v12286_v28  ;;  %v12289_v51 = vrot.slane %v6928_v15, 1  ;;  %v1084_v44 = vor.u32 %v1082_v16, %v1080_v30  ;;  %v7903_v5 = vcombine.low %v12290_v32, %v7566_v40  ;;  %v12299_v30 = vld [vmem:[#allocation12_spill] sm:$0xff]  ;;  %v12300_v40 = vld [vmem:[#allocation87_spill] sm:$0xff]  ;;  %v12305_v1 = vld [vmem:[#allocation89_spill] sm:$0xff] }
  0x84   : > { %1191 = vrot.lane.b32.xlu1 %v1065_v55, %s6851_s20  ;;  %v1270_v6 = vrot.slane %v7882_v33, 1  ;;  %v7908_v55 = vcombine.low %v6803_v17, %v12292_v29  ;;  %v7924_v12 = vcombine.low %v12300_v40, %v7622_v62  ;;  %v12302_v2 = vld [vmem:[#allocation88_spill] sm:$0xff]  ;;  %v12304_v43 = vld [vmem:[#allocation91_spill] sm:$0xff]  ;;  %v12308_v36 = vld [vmem:[#allocation14_spill] sm:$0xff]  ;;  %v7986_v4 = vcombine.low %v12329_v20, %v7743_v49 }
  0x85   : > { %v1265_v11 = vsel %vm1262_vm1, %v1263_v39, %v12289_v51  ;;  %12291 = vst [vmem:[#allocation75_spill] sm:$0xff] %v7903_v5  ;;  %v12298_v39 = vld [vmem:[#allocation13_spill] sm:$0xff]  ;;  %v7928_v48 = vcombine.low %v12302_v2, %v7634_v45  ;;  %v1272_v28 = vrot.slane %v7891_v23, 1  ;;  %v12307_v21 = vld [vmem:[#allocation15_spill] sm:$0xff]  ;;  %v12310_v62 = vld [vmem:[#allocation16_spill] sm:$0xff] }
  0x86   : > { %1189 = vrot.lane.b32.xlu0 %v1057_v63, %s6851_s20  ;;  %v7912_v63 = vcombine.low %v12293_v57, %v7582_v19  ;;  %v7920_v16 = vcombine.low %v12299_v30, %v12298_v39  ;;  %12301 = vst [vmem:[#allocation78_spill] sm:$0xff] %v7924_v12  ;;  %v7932_v19 = vcombine.low %v12305_v1, %v12304_v43  ;;  %v12309_v32 = vld [vmem:[#allocation17_spill] sm:$0xff]  ;;  %v12317_v30 = vld [vmem:[#allocation24_spill] sm:$0xff]  ;;  %v12320_v1 = vld [vmem:[#allocation99_spill] sm:$0xff] }
  0x87   : > { %12303 = vst [vmem:[#allocation77_spill] sm:$0xff] %v7928_v48  ;;  %v7938_v51 = vcombine.low %v12308_v36, %v12307_v21  ;;  %v7942_v17 = vcombine.low %v12310_v62, %v12309_v32  ;;  %v12311_v29 = vld [vmem:[#allocation97_spill] sm:$0xff]  ;;  %v12319_v43 = vld [vmem:[#allocation100_spill] sm:$0xff]  ;;  %v1274_v32 = vrot.slane %v7908_v55, 1  ;;  %v12323_v62 = vld [vmem:[#allocation95_spill] sm:$0xff] }
  0x88   : > { %1195 = vrot.lane.b32.xlu1 %v1081_v18, %s6851_s20  ;;  %12294 = vst [vmem:[#allocation72_spill] sm:$0xff] %v7912_v63  ;;  %v12296_v18 = vld [vmem:[#allocation83_spill] sm:$0xff]  ;;  %12306 = vst [vmem:[#allocation79_spill] sm:$0xff] %v7932_v19  ;;  %v12312_v45 = vld [vmem:[#allocation93_spill] sm:$0xff]  ;;  %v7961_v21 = vcombine.low %v12320_v1, %v12319_v43 }
  0x89   : > { %v7946_v57 = vcombine.low %v12312_v45, %v12311_v29  ;;  %v1273_v29 = vsel %vm1262_vm1, %v1270_v6, %v1272_v28  ;;  %v1278_v45 = vrot.slane %v7938_v51, 1  ;;  %12330 = vst [vmem:[#allocation12_spill] sm:$0xff] %v7986_v4  ;;  %v1275_v1 = vsel %vm1262_vm1, %v1272_v28, %v1274_v32 }
  0x8a   : > { %1193 = vrot.lane.b32.xlu0 %v1073_v8, %s6851_s20  ;;  %v7916_v8 = vcombine.low %v12296_v18, %v12295_v7  ;;  %v12314_v7 = vld [vmem:[#allocation23_spill] sm:$0xff]  ;;  %v12315_v18 = vld [vmem:[#allocation20_spill] sm:$0xff]  ;;  %12321 = vst [vmem:[#allocation86_spill] sm:$0xff] %v7961_v21  ;;  %v12335_v49 = vrot.slane %v7942_v17, 1 }
  0x8b   : > { %12313 = vst [vmem:[#allocation9_spill] sm:$0xff] %v7946_v57  ;;  %v7951_v39 = vcombine.low %v12315_v18, %v12314_v7  ;;  %v12324_v18 = vld [vmem:[#allocation101_spill] sm:$0xff]  ;;  %v12332_v7 = vld [vmem:[#allocation10_spill] sm:$0xff] }
  0x8c   : > { %12297 = vst [vmem:[#allocation7_spill] sm:$0xff] %v7916_v8  ;;  %1376 = vrot.lane.b32.xlu1 %v1265_v11, %s6852_s21  ;;  %v12316_v11 = vld [vmem:[#allocation25_spill] sm:$0xff] }
  0x8d   : > { %v7955_v40 = vcombine.low %v12317_v30, %v12316_v11  ;;  %v7974_v11 = vcombine.low %v12324_v18, %v7729_v35  ;;  %v12326_v30 = vld [vmem:[#allocation96_spill] sm:$0xff]  ;;  %v12333_v35 = vrot.slane %v12332_v7, 1  ;;  %v12338_v42 = vrot.slane %v7951_v39, 1 }
  0x8e   : > { %1197 = vrot.lane.b32.xlu0 %v1084_v44, %s6851_s20  ;;  %v7957_v2 = vpop.permute.xlu1 %1089  ;;  %v1276_v44 = vrot.slane %v7920_v16, 1  ;;  %s6859_s20 = smov 112  }
  0x8f   : > { %12318 = vst [vmem:[#allocation81_spill] sm:$0xff] %v7957_v2  ;;  %12325 = vst [vmem:[#allocation13_spill] sm:$0xff] %v7974_v11  ;;  %v1271_v18 = vsel %vm1262_vm1, %v12333_v35, %v1270_v6  ;;  %v12336_v6 = vld [vmem:[#allocation3_spill] sm:$0xff]  ;;  %v12337_v59 = vrot.slane %v7955_v40, 1 }
  0x90   : > { %v7963_v36 = vpop.permute.xlu0 %1085  ;;  %1380 = vrot.lane.b32.xlu1 %v12323_v62, %s6852_s21  ;;  %v7982_v62 = vcombine.low %v12328_v53, %v12327_v50  ;;  %v1277_v43 = vsel %vm1262_vm1, %v1274_v32, %v1276_v44  ;;  %v1506_v53 = vshll.u32 %v6928_v15, 16  ;;  %v1281_v50 = vsel %vm1262_vm1, %v1278_v45, %v12335_v49  ;;  %v12340_v32 = vld [vmem:[#allocation30_spill] sm:$0xff] }
  0x91   : > { %12322 = vst [vmem:[#allocation83_spill] sm:$0xff] %v7963_v36  ;;  %v1279_v20 = vsel %vm1262_vm1, %v1276_v44, %v1278_v45  ;;  %v1512_v35 = vshrl.u32 %v12336_v6, 16  ;;  %v1285_v28 = vsel %vm1262_vm1, %v12338_v42, %v12337_v59  ;;  %v1515_v45 = vshll.u32 %v12336_v6, 16  ;;  %v12344_v42 = vld [vmem:[#allocation32_spill] sm:$0xff] }
  0x92   : > { %1378 = vrot.lane.b32.xlu0 %v12326_v30, %s6852_s21  ;;  %v7988_v24 = vpop.permute.xlu1 %1091  ;;  %v1503_v30 = vshrl.u32 %v6928_v15, 16  ;;  %v12339_v15 = vld [vmem:[#allocation31_spill] sm:$0xff]  ;;  %v1508_v49 = vrot.slane %v1506_v53, 2  ;;  %v1524_v53 = vshll.u32 %v12332_v7, 16 }
  0x93   : > { %12331 = vst [vmem:[#allocation87_spill] sm:$0xff] %v7988_v24  ;;  %v1514_v44 = vrot.slane %v1512_v35, 1  ;;  %v12343_v24 = vld [vmem:[#allocation34_spill] sm:$0xff]  ;;  %v1517_v6 = vrot.slane %v1515_v45, 2  ;;  %v12347_v45 = vld [vmem:[#allocation36_spill] sm:$0xff] }
  0x94   : > { %v7994_v58 = vpop.permute.xlu0 %1087  ;;  %1384 = vrot.lane.b32.xlu1 %v1273_v29, %s6852_s21  ;;  %v1505_v22 = vrot.slane %v1503_v30, 1  ;;  %v8013_v29 = vcombine.low %v12340_v32, %v12339_v15  ;;  %v1498_v30 = vshll.u32 %v7834_v46, 16  ;;  %v8025_v59 = vcombine.low %v12344_v42, %v12343_v24 }
  0x95   : > { %12334 = vst [vmem:[#allocation88_spill] sm:$0xff] %v7994_v58  ;;  %v1521_v15 = vshrl.u32 %v12332_v7, 16  ;;  %v1533_v24 = vshll.u32 %v7882_v33, 16  ;;  %v1518_v2 = vor.u32 %v1517_v6, %v1514_v44  ;;  %v1539_v7 = vshrl.u32 %v7891_v23, 16 }
  0x96   : > { %1382 = vrot.lane.b32.xlu0 %v1271_v18, %s6852_s21  ;;  %v8016_v3 = vpop.permute.xlu1 %1095  ;;  %v1495_v18 = vshrl.u32 %v7834_v46, 16  ;;  %v1509_v35 = vor.u32 %v1508_v49, %v1505_v22  ;;  %v1500_v47 = vrot.slane %v1498_v30, 2  ;;  %v6804_v49 = vld [vmem:[%s6904_s19 + $0x7c] sm:$0xf] }
  0x97   : > { %12341 = vst [vmem:[#allocation91_spill] sm:$0xff] %v8016_v3  ;;  %v1523_v46 = vrot.slane %v1521_v15, 1  ;;  %v1526_v3 = vrot.slane %v1524_v53, 2  ;;  %v1535_v15 = vrot.slane %v1533_v24, 2 }
  0x98   : > { %v8021_v27 = vpop.permute.xlu0 %1093  ;;  %1388 = vrot.lane.b32.xlu1 %v1277_v43, %s6852_s21  ;;  %v1497_v32 = vrot.slane %v1495_v18, 1  ;;  %v1542_v43 = vshll.u32 %v7891_v23, 16  ;;  %v8041_v18 = vcombine.low %v6804_v49, %v12347_v45  ;;  %v8046_v44 = vsel %vm1493_vm2, %v1509_v35, %v1518_v2  ;;  %v6806_v49 = vld [vmem:[%s6904_s19 + $0x88] sm:$0xf] }
  0x99   : > { %12342 = vst [vmem:[#allocation89_spill] sm:$0xff] %v8021_v27  ;;  %v1530_v27 = vshrl.u32 %v7882_v33, 16  ;;  %v1288_v33 = vrot.slane %v8013_v29, 1  ;;  %v1541_v23 = vrot.slane %v1539_v7, 1 }
  0x9a   : > { %1386 = vrot.lane.b32.xlu0 %v1275_v1, %s6852_s21  ;;  %v8033_v42 = vpop.permute.xlu1 %1099  ;;  %v1501_v58 = vor.u32 %v1500_v47, %v1497_v32  ;;  %v1527_v1 = vor.u32 %v1526_v3, %v1523_v46  ;;  %v12349_v32 = vrot.slane %v7951_v39, 1  ;;  %v1551_v46 = vshll.u32 %v7908_v55, 16 }
  0x9b   : > { %12345 = vst [vmem:[#allocation15_spill] sm:$0xff] %v8033_v42  ;;  %v1532_v30 = vrot.slane %v1530_v27, 1  ;;  %v1544_v27 = vrot.slane %v1542_v43, 2  ;;  %v6805_v43 = vld [vmem:[%s6904_s19 + $0x84] sm:$0xf] }
  0x9c   : > { %v8037_v22 = vpop.permute.xlu0 %1097  ;;  %1392 = vrot.lane.b32.xlu1 %v1281_v50, %s6852_s21  ;;  %v8049_v47 = vsel %vm1493_vm2, %v1501_v58, %v1509_v35  ;;  %v8053_v3 = vsel %vm1493_vm2, %v1518_v2, %v1527_v1  ;;  %v1548_v50 = vshrl.u32 %v7908_v55, 16  ;;  %v12350_v58 = vrot.slane %v7942_v17, 1 }
  0x9d   : > { %12346 = vst [vmem:[#allocation14_spill] sm:$0xff] %v8037_v22  ;;  %v1536_v53 = vor.u32 %v1535_v15, %v1532_v30  ;;  %v1545_v2 = vor.u32 %v1544_v27, %v1541_v23  ;;  %v8072_v45 = vcombine.low %v6805_v43, %v6806_v49  ;;  %v6807_v30 = vld [vmem:[%s6904_s19 + $0x8c] sm:$0xf]  ;;  %v6808_v15 = vld [vmem:[%s6904_s19 + $0x90] sm:$0xf]  ;;  %v1553_v55 = vrot.slane %v1551_v46, 2 }
  0x9e   : > { %1390 = vrot.lane.b32.xlu0 %v1279_v20, %s6852_s21  ;;  %v8056_v6 = vpop.permute.xlu1 %1103  ;;  %v1283_v35 = vsel %vm1262_vm1, %v12350_v58, %v12349_v32  ;;  %v1550_v7 = vrot.slane %v1548_v50, 1  ;;  %v8076_v32 = vcombine.low %v6807_v30, %v6808_v15  ;;  %v1292_v27 = vrot.slane %v8041_v18, 1  ;;  %v6809_v15 = vld [vmem:[%s6904_s19 + $0x94] sm:$0xf] }
  0x9f   : > { %12348 = vst [vmem:[#allocation17_spill] sm:$0xff] %v8056_v6  ;;  %v8067_v24 = vsel %vm1493_vm2, %v1527_v1, %v1536_v53  ;;  %v12353_v1 = vrot.slane %v7982_v62, 1  ;;  %v8085_v50 = vsel %vm1493_vm2, %v1536_v53, %v1545_v2  ;;  %v12356_v49 = vrot.slane %v7955_v40, 1  ;;  %v6811_v53 = vld [vmem:[%s6904_s19 + $0x9c] sm:$0xf] }
  0xa0   : > { %v8064_v20 = vpop.permute.xlu0 %1101  ;;  %1396 = vrot.lane.b32.xlu1 %v1285_v28, %s6852_s21  ;;  %12352 = vst [vmem:[#allocation97_spill] sm:$0xff] %v8076_v32  ;;  %v1290_v28 = vrot.slane %v8025_v59, 1 }
  0xa1   : > { %12351 = vst [vmem:[#allocation16_spill] sm:$0xff] %v8064_v20  ;;  %v1289_v23 = vsel %vm1262_vm1, %v12353_v1, %v1288_v33  ;;  %v12355_v43 = vmov %v12353_v1  ;;  %v6810_v1 = vld [vmem:[%s6904_s19 + $0x98] sm:$0xf]  ;;  %v6812_v20 = vld [vmem:[%s6904_s19 + $0xa0] sm:$0xf] }
  0xa2   : > { %1394 = vrot.lane.b32.xlu0 %v1283_v35, %s6852_s21  ;;  %v8087_v58 = vpop.permute.xlu1 %1107  ;;  %v1287_v46 = vsel %vm1262_vm1, %v12356_v49, %v12355_v43  ;;  %v8094_v35 = vor.u32 %v1553_v55, %v1550_v7  ;;  %v8101_v6 = vcombine.low %v6809_v15, %v6810_v1  ;;  %v1293_v7 = vsel %vm1262_vm1, %v1290_v28, %v1292_v27  ;;  %v6813_v1 = vld [vmem:[%s6904_s19 + $0xa4] sm:$0xf] }
  0xa3   : > { %12354 = vst [vmem:[#allocation93_spill] sm:$0xff] %v8087_v58  ;;  %v8105_v58 = vcombine.low %v6811_v53, %v6812_v20  ;;  %v1294_v55 = vrot.slane %v8072_v45, 1  ;;  %v1291_v49 = vsel %vm1262_vm1, %v1288_v33, %v1290_v28  ;;  %v6814_v53 = vld [vmem:[%s6904_s19 + $0xa8] sm:$0xf]  ;;  %v6815_v33 = vld [vmem:[%s6904_s19 + $0xac] sm:$0xf] }
  0xa4   : > { %v8096_v30 = vpop.permute.xlu0 %1105  ;;  %1400 = vrot.lane.b32.xlu1 %v1289_v23, %s6852_s21  ;;  %12358 = vst [vmem:[#allocation20_spill] sm:$0xff] %v8101_v6  ;;  %v8109_v42 = vsel %vm1493_vm2, %v1545_v2, %v8094_v35  ;;  %v1296_v23 = vrot.slane %v8076_v32, 1  ;;  %v1298_v20 = vrot.slane %v8101_v6, 1  ;;  %v12363_v28 = vld [vmem:[#allocation43_spill] sm:$0xff] }
  0xa5   : > { %12357 = vst [vmem:[#allocation23_spill] sm:$0xff] %v8096_v30  ;;  %12359 = vst [vmem:[#allocation25_spill] sm:$0xff] %v8105_v58  ;;  %v1300_v2 = vrot.slane %v8105_v58, 1  ;;  %v1295_v30 = vsel %vm1262_vm1, %v1292_v27, %v1294_v55  ;;  %v12367_v58 = vld [vmem:[#allocation48_spill] sm:$0xff] }
  0xa6   : > { %1398 = vrot.lane.b32.xlu0 %v1287_v46, %s6852_s21  ;;  %v8115_v43 = vpop.permute.xlu1 %1111  ;;  %v1297_v46 = vsel %vm1262_vm1, %v1294_v55, %v1296_v23 }
  0xa7   : > { %12360 = vst [vmem:[#allocation24_spill] sm:$0xff] %v8115_v43  ;;  %v8127_v43 = vcombine.low %v6813_v1, %v6814_v53  ;;  %v6816_v53 = vld [vmem:[%s6904_s19 + $0xb4] sm:$0xf] }
  0xa8   : > { %v8118_v15 = vpop.permute.xlu0 %1109  ;;  %1404 = vrot.lane.b32.xlu1 %v1293_v7, %s6852_s21 }
  0xa9   : > { %12361 = vst [vmem:[#allocation100_spill] sm:$0xff] %v8118_v15  ;;  %12362 = vst [vmem:[#allocation99_spill] sm:$0xff] %v8127_v43  ;;  %v8131_v15 = vcombine.low %v6815_v33, %v12363_v28  ;;  %v1302_v36 = vrot.slane %v8127_v43, 1  ;;  %v6817_v33 = vld [vmem:[%s6904_s19 + $0xb8] sm:$0xf] }
  0xaa   : > { %1402 = vrot.lane.b32.xlu0 %v1291_v49, %s6852_s21  ;;  %v8133_v7 = vpop.permute.xlu1 %1115  ;;  %v1301_v49 = vsel %vm1262_vm1, %v1298_v20, %v1300_v2  ;;  %v8145_v28 = vcombine.low %v6816_v53, %v6817_v33  ;;  %v12372_v43 = vld [vmem:[#allocation49_spill] sm:$0xff] }
  0xab   : > { %12364 = vst [vmem:[#allocation95_spill] sm:$0xff] %v8131_v15  ;;  %12365 = vst [vmem:[#allocation101_spill] sm:$0xff] %v8133_v7  ;;  %v1304_v1 = vrot.slane %v8131_v15, 1  ;;  %v6818_v7 = vld [vmem:[%s6904_s19 + $0xbc] sm:$0xf] }
  0xac   : > { %v8136_v22 = vpop.permute.xlu0 %1113  ;;  %1408 = vrot.lane.b32.xlu1 %v1297_v46, %s6852_s21  ;;  %v8149_v27 = vcombine.low %v6818_v7, %v12367_v58  ;;  %v1299_v46 = vsel %vm1262_vm1, %v1296_v23, %v1298_v20  ;;  %v1306_v33 = vrot.slane %v8145_v28, 1  ;;  %v6819_v7 = vld [vmem:[%s6904_s19 + $0xcc] sm:$0xf]  ;;  %v1303_v20 = vsel %vm1262_vm1, %v1300_v2, %v1302_v36 }
  0xad   : > { %12366 = vst [vmem:[#allocation96_spill] sm:$0xff] %v8136_v22  ;;  %v1305_v53 = vsel %vm1262_vm1, %v1302_v36, %v1304_v1 }
  0xae   : > { %1406 = vrot.lane.b32.xlu0 %v1295_v30, %s6852_s21  ;;  %12368 = vst [vmem:[#allocation29_spill] sm:$0xff] %v8149_v27  ;;  %v8151_v55 = vpop.permute.xlu1 %1119  ;;  %v12371_v30 = vld [vmem:[#allocation46_spill] sm:$0xff]  ;;  %v1308_v58 = vrot.slane %v8149_v27, 1  ;;  %v12379_v27 = vld [vmem:[#allocation52_spill] sm:$0xff]  ;;  %v1307_v36 = vsel %vm1262_vm1, %v1304_v1, %v1306_v33 }
  0xaf   : > { %12369 = vst [vmem:[#allocation26_spill] sm:$0xff] %v8151_v55  ;;  %v8159_v6 = vcombine.low %v12372_v43, %v12371_v30  ;;  %v12374_v55 = vld [vmem:[#allocation50_spill] sm:$0xff] }
  0xb0   : > { %v8154_v22 = vpop.permute.xlu0 %1117  ;;  %1412 = vrot.lane.b32.xlu1 %v1301_v49, %s6852_s21  ;;  %v8167_v15 = vcombine.low %v6819_v7, %v12374_v55  ;;  %v1309_v43 = vsel %vm1262_vm1, %v1306_v33, %v1308_v58 }
  0xb1   : > { %12370 = vst [vmem:[#allocation103_spill] sm:$0xff] %v8154_v22  ;;  %12373 = vst [vmem:[#allocation10_spill] sm:$0xff] %v8159_v6  ;;  %v12378_v22 = vld [vmem:[#allocation53_spill] sm:$0xff] }
  0xb2   : > { %1410 = vrot.lane.b32.xlu0 %v1299_v46, %s6852_s21  ;;  %12375 = vst [vmem:[#allocation3_spill] sm:$0xff] %v8167_v15  ;;  %v8169_v23 = vpop.permute.xlu1 %1123  ;;  %v1310_v46 = vrot.slane %v8159_v6, 1  ;;  %v1312_v30 = vrot.slane %v8167_v15, 1  ;;  %v8181_v55 = vcombine.low %v12379_v27, %v12378_v22  ;;  %v12384_v15 = vld [vmem:[#allocation57_spill] sm:$0xff] }
  0xb3   : > { %12376 = vst [vmem:[#allocation31_spill] sm:$0xff] %v8169_v23  ;;  %v1316_v23 = vrot.slane %v7791_v54, 1 }
  0xb4   : > { %v8172_v49 = vpop.permute.xlu0 %1121  ;;  %1416 = vrot.lane.b32.xlu1 %v1305_v53, %s6852_s21  ;;  %12380 = vst [vmem:[#allocation34_spill] sm:$0xff] %v8181_v55  ;;  %v1313_v53 = vsel %vm1262_vm1, %v1310_v46, %v1312_v30  ;;  %v1311_v1 = vsel %vm1262_vm1, %v1308_v58, %v1310_v46  ;;  %v1322_v46 = vrot.slane %v7814_v52, 1 }
  0xb5   : > { %12377 = vst [vmem:[#allocation30_spill] sm:$0xff] %v8172_v49  ;;  %v12383_v49 = vld [vmem:[#allocation58_spill] sm:$0xff] }
  0xb6   : > { %1414 = vrot.lane.b32.xlu0 %v1303_v20, %s6852_s21  ;;  %v8183_v7 = vpop.permute.xlu1 %1127  ;;  %v1314_v20 = vrot.slane %v8181_v55, 1  ;;  %v8195_v22 = vcombine.low %v12384_v15, %v12383_v49 }
  0xb7   : > { %12381 = vst [vmem:[#allocation32_spill] sm:$0xff] %v8183_v7  ;;  %v1320_v7 = vrot.slane %v7807_v41, 1 }
  0xb8   : > { %v8186_v2 = vpop.permute.xlu0 %1125  ;;  %1420 = vrot.lane.b32.xlu1 %v1309_v43, %s6852_s21  ;;  %12385 = vst [vmem:[#allocation43_spill] sm:$0xff] %v8195_v22  ;;  %v1317_v43 = vsel %vm1262_vm1, %v1314_v20, %v1316_v23  ;;  %v1315_v15 = vsel %vm1262_vm1, %v1312_v30, %v1314_v20  ;;  %v1326_v20 = vrot.slane %v7822_v26, 1 }
  0xb9   : > { %12382 = vst [vmem:[#allocation36_spill] sm:$0xff] %v8186_v2 }
  0xba   : > { %1418 = vrot.lane.b32.xlu0 %v1307_v36, %s6852_s21  ;;  %v8197_v27 = vpop.permute.xlu1 %1131  ;;  %v1318_v36 = vrot.slane %v8195_v22, 1 }
  0xbb   : > { %12386 = vst [vmem:[#allocation48_spill] sm:$0xff] %v8197_v27 }
  0xbc   : > { %v8200_v33 = vpop.permute.xlu0 %1129  ;;  %1424 = vrot.lane.b32.xlu1 %v1313_v53, %s6852_s21  ;;  %v1321_v58 = vsel %vm1262_vm1, %v1318_v36, %v1320_v7  ;;  %v1324_v53 = vrot.slane %v7818_v37, 1  ;;  %v1319_v27 = vsel %vm1262_vm1, %v1316_v23, %v1318_v36  ;;  %v1332_v36 = vrot.slane %v7838_v9, 1 }
  0xbd   : > { %12387 = vst [vmem:[#allocation46_spill] sm:$0xff] %v8200_v33 }
  0xbe   : > { %1422 = vrot.lane.b32.xlu0 %v1311_v1, %s6852_s21  ;;  %v8207_v2 = vpop.permute.xlu1 %1135  ;;  %v1325_v30 = vsel %vm1262_vm1, %v1322_v46, %v1324_v53 }
  0xbf   : > { %12388 = vst [vmem:[#allocation49_spill] sm:$0xff] %v8207_v2  ;;  %v1323_v2 = vsel %vm1262_vm1, %v1320_v7, %v1322_v46  ;;  %v1336_v46 = vrot.slane %v7853_v38, 1 }
  0xc0   : > { %v8210_v49 = vpop.permute.xlu0 %1133  ;;  %1428 = vrot.lane.b32.xlu1 %v1317_v43, %s6852_s21  ;;  %v1328_v43 = vrot.slane %v7826_v31, 1 }
  0xc1   : > { %12389 = vst [vmem:[#allocation50_spill] sm:$0xff] %v8210_v49 }
  0xc2   : > { %1426 = vrot.lane.b32.xlu0 %v1315_v15, %s6852_s21  ;;  %v8217_v1 = vpop.permute.xlu1 %1139  ;;  %v1329_v23 = vsel %vm1262_vm1, %v1326_v20, %v1328_v43 }
  0xc3   : > { %12390 = vst [vmem:[#allocation53_spill] sm:$0xff] %v8217_v1  ;;  %v1327_v1 = vsel %vm1262_vm1, %v1324_v53, %v1326_v20  ;;  %v1340_v20 = vrot.slane %v7863_v14, 1 }
  0xc4   : > { %v8220_v33 = vpop.permute.xlu0 %1137  ;;  %1432 = vrot.lane.b32.xlu1 %v1321_v58, %s6852_s21 }
  0xc5   : > { %12391 = vst [vmem:[#allocation52_spill] sm:$0xff] %v8220_v33 }
  0xc6   : > { %1430 = vrot.lane.b32.xlu0 %v1319_v27, %s6852_s21  ;;  %v8227_v15 = vpop.permute.xlu1 %1143  ;;  %v1330_v27 = vrot.slane %v7830_v13, 1 }
  0xc7   : > { %12392 = vst [vmem:[#allocation58_spill] sm:$0xff] %v8227_v15 }
  0xc8   : > { %v8230_v49 = vpop.permute.xlu0 %1141  ;;  %1436 = vrot.lane.b32.xlu1 %v1325_v30, %s6852_s21  ;;  %v1333_v7 = vsel %vm1262_vm1, %v1330_v27, %v1332_v36 }
  0xc9   : > { %12393 = vst [vmem:[#allocation57_spill] sm:$0xff] %v8230_v49  ;;  %v1331_v49 = vsel %vm1262_vm1, %v1328_v43, %v1330_v27  ;;  %v1344_v27 = vrot.slane %v7873_v34, 1 }
  0xca   : > { %1434 = vrot.lane.b32.xlu0 %v1323_v2, %s6852_s21  ;;  %v8237_v58 = vpop.permute.xlu1 %1147  ;;  %v1334_v2 = vrot.slane %v7849_v56, 1 }
  0xcb   : > { %12394 = vst [vmem:[#allocation116_spill] sm:$0xff] %v8237_v58 }
  0xcc   : > { %v8240_v33 = vpop.permute.xlu0 %1145  ;;  %1440 = vrot.lane.b32.xlu1 %v1329_v23, %s6852_s21  ;;  %v1337_v53 = vsel %vm1262_vm1, %v1334_v2, %v1336_v46  ;;  %v1335_v58 = vsel %vm1262_vm1, %v1332_v36, %v1334_v2  ;;  %v1348_v2 = vrot.slane %v7886_v0, 1 }
  0xcd   : > { %12395 = vst [vmem:[#allocation117_spill] sm:$0xff] %v8240_v33 }
  0xce   : > { %1438 = vrot.lane.b32.xlu0 %v1327_v1, %s6852_s21  ;;  %v8247_v30 = vpop.permute.xlu1 %1151  ;;  %v1338_v1 = vrot.slane %v7859_v25, 1 }
  0xcf   : > { %12396 = vst [vmem:[#allocation118_spill] sm:$0xff] %v8247_v30 }
  0xd0   : > { %v8250_v15 = vpop.permute.xlu0 %1149  ;;  %1444 = vrot.lane.b32.xlu1 %v1333_v7, %s6852_s21  ;;  %v1341_v43 = vsel %vm1262_vm1, %v1338_v1, %v1340_v20  ;;  %v1339_v30 = vsel %vm1262_vm1, %v1336_v46, %v1338_v1  ;;  %v1352_v1 = vrot.slane %v7903_v5, 1 }
  0xd1   : > { %12397 = vst [vmem:[#allocation119_spill] sm:$0xff] %v8250_v15 }
  0xd2   : > { %1442 = vrot.lane.b32.xlu0 %v1331_v49, %s6852_s21  ;;  %v8257_v23 = vpop.permute.xlu1 %1155  ;;  %v1342_v49 = vrot.slane %v7869_v61, 1 }
  0xd3   : > { %12398 = vst [vmem:[#allocation120_spill] sm:$0xff] %v8257_v23 }
  0xd4   : > { %v8260_v33 = vpop.permute.xlu0 %1153  ;;  %1448 = vrot.lane.b32.xlu1 %v1337_v53, %s6852_s21  ;;  %v1345_v36 = vsel %vm1262_vm1, %v1342_v49, %v1344_v27  ;;  %v1343_v23 = vsel %vm1262_vm1, %v1340_v20, %v1342_v49  ;;  %v1356_v49 = vrot.slane %v7916_v8, 1 }
  0xd5   : > { %12399 = vst [vmem:[#allocation121_spill] sm:$0xff] %v8260_v33 }
  0xd6   : > { %1446 = vrot.lane.b32.xlu0 %v1335_v58, %s6852_s21  ;;  %v8267_v7 = vpop.permute.xlu1 %1159  ;;  %v1346_v58 = vrot.slane %v7877_v60, 1 }
  0xd7   : > { %12400 = vst [vmem:[#allocation122_spill] sm:$0xff] %v8267_v7 }
  0xd8   : > { %v8270_v15 = vpop.permute.xlu0 %1157  ;;  %1452 = vrot.lane.b32.xlu1 %v1341_v43, %s6852_s21  ;;  %v1349_v46 = vsel %vm1262_vm1, %v1346_v58, %v1348_v2  ;;  %v1347_v7 = vsel %vm1262_vm1, %v1344_v27, %v1346_v58  ;;  %v1360_v58 = vrot.slane %v7928_v48, 1 }
  0xd9   : > { %12401 = vst [vmem:[#allocation123_spill] sm:$0xff] %v8270_v15 }
  0xda   : > { %1450 = vrot.lane.b32.xlu0 %v1339_v30, %s6852_s21  ;;  %v8277_v53 = vpop.permute.xlu1 %1163  ;;  %v1350_v30 = vrot.slane %v7895_v10, 1 }
  0xdb   : > { %12402 = vst [vmem:[#allocation124_spill] sm:$0xff] %v8277_v53 }
  0xdc   : > { %v8280_v33 = vpop.permute.xlu0 %1161  ;;  %1456 = vrot.lane.b32.xlu1 %v1345_v36, %s6852_s21  ;;  %v1353_v20 = vsel %vm1262_vm1, %v1350_v30, %v1352_v1  ;;  %v1351_v53 = vsel %vm1262_vm1, %v1348_v2, %v1350_v30  ;;  %v1364_v30 = vrot.slane %v7946_v57, 1 }
  0xdd   : > { %12403 = vst [vmem:[#allocation125_spill] sm:$0xff] %v8280_v33 }
  0xde   : > { %1454 = vrot.lane.b32.xlu0 %v1343_v23, %s6852_s21  ;;  %v8287_v43 = vpop.permute.xlu1 %1167  ;;  %v1354_v23 = vrot.slane %v7912_v63, 1 }
  0xdf   : > { %12404 = vst [vmem:[#allocation126_spill] sm:$0xff] %v8287_v43 }
  0xe0   : > { %v8290_v15 = vpop.permute.xlu0 %1165  ;;  %1460 = vrot.lane.b32.xlu1 %v1349_v46, %s6852_s21  ;;  %v1357_v27 = vsel %vm1262_vm1, %v1354_v23, %v1356_v49  ;;  %v1355_v43 = vsel %vm1262_vm1, %v1352_v1, %v1354_v23  ;;  %v1368_v23 = vrot.slane %v7974_v11, 1 }
  0xe1   : > { %12405 = vst [vmem:[#allocation127_spill] sm:$0xff] %v8290_v15  ;;  %v323_v15 = vld [vmem:[%s6904_s19 + $0x1c0] sm:$0xf] }
  0xe2   : > { %1458 = vrot.lane.b32.xlu0 %v1347_v7, %s6852_s21  ;;  %v8297_v36 = vpop.permute.xlu1 %1171  ;;  %v1358_v7 = vrot.slane %v7924_v12, 1 }
  0xe3   : > { %12406 = vst [vmem:[#allocation128_spill] sm:$0xff] %v8297_v36 }
  0xe4   : > { %v8300_v33 = vpop.permute.xlu0 %1169  ;;  %1464 = vrot.lane.b32.xlu1 %v1353_v20, %s6852_s21  ;;  %v1361_v2 = vsel %vm1262_vm1, %v1358_v7, %v1360_v58 }
  0xe5   : > { %12407 = vst [vmem:[#allocation129_spill] sm:$0xff] %v8300_v33  ;;  %v1359_v33 = vsel %vm1262_vm1, %v1356_v49, %v1358_v7 }
  0xe6   : > { %1462 = vrot.lane.b32.xlu0 %v1351_v53, %s6852_s21  ;;  %v8307_v46 = vpop.permute.xlu1 %1175  ;;  %v1362_v53 = vrot.slane %v7932_v19, 1 }
  0xe7   : > { %12408 = vst [vmem:[#allocation130_spill] sm:$0xff] %v8307_v46 }
  0xe8   : > { %v8310_v36 = vpop.permute.xlu0 %1173  ;;  %1468 = vrot.lane.b32.xlu1 %v1357_v27, %s6852_s21  ;;  %v1365_v1 = vsel %vm1262_vm1, %v1362_v53, %v1364_v30  ;;  %v12412_v27 = vld [vmem:[#allocation105_spill] sm:$0xff]  ;;  %v1363_v49 = vsel %vm1262_vm1, %v1360_v58, %v1362_v53 }
  0xe9   : > { %12409 = vst [vmem:[#allocation131_spill] sm:$0xff] %v8310_v36  ;;  %v8329_v36 = vcombine.low %v12412_v27, %v323_v15  ;;  %v6771_v27 = vld [vmem:[%s6904_s19 + $0x1c4] ss:$0 sps:$4 sm:$0x77]  }
  0xea   : > { %1466 = vrot.lane.b32.xlu0 %v1355_v43, %s6852_s21  ;;  %v8317_v20 = vpop.permute.xlu1 %1179  ;;  %v1366_v43 = vrot.slane %v7961_v21, 1 }
  0xeb   : > { %12410 = vst [vmem:[#allocation132_spill] sm:$0xff] %v8317_v20  ;;  %12413 = vst [vmem:[#allocation105_spill] sm:$0xff] %v8329_v36 }
  0xec   : > { %v8321_v46 = vpop.permute.xlu0 %1177  ;;  %1472 = vrot.lane.b32.xlu1 %v1361_v2, %s6852_s21  ;;  %v1370_v2 = vrot.slane %v7986_v4, 1  ;;  %v1367_v15 = vsel %vm1262_vm1, %v1364_v30, %v1366_v43 }
  0xed   : > { %12411 = vst [vmem:[#allocation133_spill] sm:$0xff] %v8321_v46  ;;  %v1372_v46 = vrot.slane %v8329_v36, 1  ;;  %v12426_v36 = vshll.u32 %v7951_v39, 16 }
  0xee   : > { %1470 = vrot.lane.b32.xlu0 %v1359_v33, %s6852_s21  ;;  %v8331_v20 = vpop.permute.xlu1 %1183  ;;  %v1369_v33 = vsel %vm1262_vm1, %v1366_v43, %v1368_v23 }
  0xef   : > { %12414 = vst [vmem:[#allocation134_spill] sm:$0xff] %v8331_v20  ;;  %v1373_v58 = vsel %vm1262_vm1, %v1370_v2, %v1372_v46 }
  0xf0   : > { %v8334_v7 = vpop.permute.xlu0 %1181  ;;  %1476 = vrot.lane.b32.xlu1 %v1365_v1, %s6852_s21  ;;  %v1371_v1 = vsel %vm1262_vm1, %v1368_v23, %v1370_v2  ;;  %v11952_v23 = vshrl.u32 %v7938_v51, 16  ;;  %v11953_v2 = vshll.u32 %v7938_v51, 16 }
  0xf1   : > { %12415 = vst [vmem:[#allocation135_spill] sm:$0xff] %v8334_v7 }
  0xf2   : > { %1474 = vrot.lane.b32.xlu0 %v1363_v49, %s6852_s21  ;;  %v8341_v11 = vpop.permute.xlu1 %1187  ;;  %v1374_v49 = vrot.slane %v6771_v27, 1 }
  0xf3   : > { %12416 = vst [vmem:[#allocation136_spill] sm:$0xff] %v8341_v11 }
  0xf4   : > { %v8345_v20 = vpop.permute.xlu0 %1185  ;;  %1480 = vrot.lane.b32.xlu1 %v1369_v33, %s6852_s21  ;;  %v1375_v43 = vsel %vm1262_vm1, %v1372_v46, %v1374_v49  ;;  %v11950_v33 = vshrl.u32 %v7920_v16, 16 }
  0xf5   : > { %12417 = vst [vmem:[#allocation137_spill] sm:$0xff] %v8345_v20 }
  0xf6   : > { %1478 = vrot.lane.b32.xlu0 %v1367_v15, %s6852_s21  ;;  %v8350_v53 = vpop.permute.xlu1 %1191  ;;  %v11951_v15 = vshll.u32 %v7920_v16, 16 }
  0xf7   : > { %12418 = vst [vmem:[#allocation138_spill] sm:$0xff] %v8350_v53 }
  0xf8   : > { %v8353_v7 = vpop.permute.xlu0 %1189  ;;  %1484 = vrot.lane.b32.xlu1 %v1373_v58, %s6852_s21  ;;  %v1559_v58 = vrot.slane %v11950_v33, 1  ;;  %v1562_v46 = vrot.slane %v11951_v15, 2  ;;  %v1571_v33 = vrot.slane %v11953_v2, 2  ;;  %v12425_v2 = vshrl.u32 %v7951_v39, 16 }
  0xf9   : > { %12419 = vst [vmem:[#allocation139_spill] sm:$0xff] %v8353_v7 }
  0xfa   : > { %1482 = vrot.lane.b32.xlu0 %v1371_v1, %s6852_s21  ;;  %v8357_v30 = vpop.permute.xlu1 %1195  ;;  %v1586_v15 = vrot.slane %v12425_v2, 1  ;;  %v12430_v2 = vshll.u32 %v7955_v40, 16 }
  0xfb   : > { %12420 = vst [vmem:[#allocation140_spill] sm:$0xff] %v8357_v30 }
  0xfc   : > { %v8362_v11 = vpop.permute.xlu0 %1193  ;;  %1488 = vrot.lane.b32.xlu1 %v1374_v49, %s6852_s21  ;;  %v1563_v49 = vor.u32 %v1562_v46, %v1559_v58  ;;  %v12431_v58 = vshrl.u32 %v7982_v62, 16 }
  0xfd   : > { %12421 = vst [vmem:[#allocation141_spill] sm:$0xff] %v8362_v11  ;;  %v11958_v11 = vshrl.u32 %v7859_v25, 16 }
  0xfe   : > { %1486 = vrot.lane.b32.xlu0 %v1375_v43, %s6852_s21  ;;  %v8368_v27 = vpop.permute.xlu1 %1376  ;;  %v1568_v43 = vrot.slane %v11952_v23, 1  ;;  %v12424_v23 = vshll.u32 %v7942_v17, 16  ;;  %v1604_v46 = vrot.slane %v12431_v58, 1  ;;  %v12435_v58 = vshll.u32 %v8013_v29, 16 }
 0x100   : > { %v8374_v1 = vpop.permute.xlu0 %1197  ;;  %2008 = vrot.lane.b32.xlu1 %v8046_v44, %s6853_s22  ;;  %v11959_v44 = vshll.u32 %v7859_v25, 16  ;;  %v1580_v20 = vrot.slane %v12424_v23, 2  ;;  %v1572_v23 = vor.u32 %v1571_v33, %v1568_v43  ;;  %v12429_v33 = vshrl.u32 %v7955_v40, 16 }
 0x101   : > { %12422 = vst [vmem:[#allocation142_spill] sm:$0xff] %v8374_v1  ;;  %v3143_v1 = vrot.slane %v11958_v11, 3  ;;  %v1598_v43 = vrot.slane %v12430_v2, 2  ;;  %v12432_v11 = vshll.u32 %v7982_v62, 16  ;;  %v12434_v2 = vshrl.u32 %v8013_v29, 16 }
 0x102   : > { %2006 = vrot.lane.b32.xlu0 %v8049_v47, %s6853_s22  ;;  %v8388_v30 = vpop.permute.xlu1 %1380  ;;  %v12423_v47 = vshrl.u32 %v7942_v17, 16  ;;  %v1616_v48 = vrot.slane %v12435_v58, 2 }
 0x103   : > { %v1607_v57 = vrot.slane %v12432_v11, 2  ;;  %v1613_v19 = vrot.slane %v12434_v2, 1  ;;  %v12436_v11 = vshrl.u32 %v8025_v59, 16  ;;  %v11974_v2 = vshll.u32 %v8072_v45, 16 }
 0x104   : > { %v8392_v53 = vpop.permute.xlu0 %1378  ;;  %v1577_v7 = vrot.slane %v12423_v47, 1  ;;  %2012 = vrot.lane.b32.xlu1 %v8067_v24, %s6853_s22  ;;  %v3144_v47 = vrot.slane %v11959_v44, 4  ;;  %v1589_v24 = vrot.slane %v12426_v36, 2  ;;  %v1595_v36 = vrot.slane %v12429_v33, 1 }
 0x105   : > { %v1622_v12 = vrot.slane %v12436_v11, 1 }
 0x106   : > { %2010 = vrot.lane.b32.xlu0 %v8053_v3, %s6853_s22  ;;  %v8415_v4 = vpop.permute.xlu1 %1384  ;;  %v8420_v21 = vor.u32 %v3144_v47, %v3143_v1  ;;  %v1573_v1 = vsel %vm1493_vm2, %v1563_v49, %v1572_v23  ;;  %v1581_v47 = vor.u32 %v1580_v20, %v1577_v7  ;;  %v1590_v44 = vor.u32 %v1589_v24, %v1586_v15 }
 0x107   : > { %12427 = vst [vmem:[#allocation143_spill] sm:$0xff] %v8415_v4  ;;  %v11972_v20 = vshll.u32 %v8041_v18, 16  ;;  %v1599_v7 = vor.u32 %v1598_v43, %v1595_v36  ;;  %v1608_v15 = vor.u32 %v1607_v57, %v1604_v46  ;;  %v11973_v24 = vshrl.u32 %v8072_v45, 16 }
 0x108   : > { %v8422_v3 = vpop.permute.xlu0 %1382  ;;  %2016 = vrot.lane.b32.xlu1 %v8109_v42, %s6853_s22  ;;  %v1564_v42 = vsel %vm1493_vm2, %v8094_v35, %v1563_v49  ;;  %v1591_v49 = vsel %vm1493_vm2, %v1581_v47, %v1590_v44  ;;  %v1582_v11 = vsel %vm1493_vm2, %v1572_v23, %v1581_v47  ;;  %v11975_v46 = vshrl.u32 %v8076_v32, 16  ;;  %v12445_v23 = vld [vmem:[#allocation25_spill] sm:$0xff] }
 0x109   : > { %12428 = vst [vmem:[#allocation144_spill] sm:$0xff] %v8422_v3  ;;  %v1634_v57 = vrot.slane %v11972_v20, 2  ;;  %v1609_v43 = vsel %vm1493_vm2, %v1599_v7, %v1608_v15  ;;  %v12461_v3 = vld [vmem:[#allocation29_spill] sm:$0xff] }
 0x10a   : > { %2014 = vrot.lane.b32.xlu0 %v8085_v50, %s6853_s22  ;;  %v8439_v33 = vpop.permute.xlu1 %1388  ;;  %v12437_v50 = vshll.u32 %v8025_v59, 16 }
 0x10b   : > { %12433 = vst [vmem:[#allocation145_spill] sm:$0xff] %v8439_v33 }
 0x10c   : > { %v1625_v8 = vrot.slane %v12437_v50, 2  ;;  %v8449_v4 = vpop.permute.xlu0 %1386  ;;  %2020 = vrot.lane.b32.xlu1 %v1573_v1, %s6853_s22  ;;  %v1617_v50 = vor.u32 %v1616_v48, %v1613_v19  ;;  %v12441_v1 = vshrl.u32 %v8041_v18, 16  ;;  %v12442_v48 = vld [vmem:[#allocation20_spill] sm:$0xff] }
 0x10d   : > { %12438 = vst [vmem:[#allocation146_spill] sm:$0xff] %v8449_v4  ;;  %v12448_v47 = vshrl.u32 %v12442_v48, 16 }
 0x10e   : > { %2018 = vrot.lane.b32.xlu0 %v1564_v42, %s6853_s22  ;;  %v8458_v58 = vpop.permute.xlu1 %1392  ;;  %v1626_v35 = vor.u32 %v1625_v8, %v1622_v12  ;;  %v1631_v36 = vrot.slane %v12441_v1, 1  ;;  %v1600_v42 = vsel %vm1493_vm2, %v1590_v44, %v1599_v7  ;;  %v1640_v8 = vrot.slane %v11973_v24, 1 }
 0x10f   : > { %12439 = vst [vmem:[#allocation147_spill] sm:$0xff] %v8458_v58  ;;  %v1643_v12 = vrot.slane %v11974_v2, 2  ;;  %v1618_v44 = vsel %vm1493_vm2, %v1608_v15, %v1617_v50  ;;  %v11976_v7 = vshrl.u32 %v7863_v14, 16  ;;  %v1649_v2 = vrot.slane %v11975_v46, 1  ;;  %v12451_v15 = vld [vmem:[#allocation95_spill] sm:$0xff] }
 0x110   : > { %v8461_v33 = vpop.permute.xlu0 %1390  ;;  %2024 = vrot.lane.b32.xlu1 %v1591_v49, %s6853_s22  ;;  %v1627_v49 = vsel %vm1493_vm2, %v1617_v50, %v1626_v35  ;;  %v1635_v24 = vor.u32 %v1634_v57, %v1631_v36  ;;  %v12447_v57 = vshll.u32 %v8076_v32, 16  ;;  %v1658_v19 = vrot.slane %v12448_v47, 1 }
 0x111   : > { %12440 = vst [vmem:[#allocation148_spill] sm:$0xff] %v8461_v33  ;;  %v3147_v50 = vrot.slane %v11976_v7, 3  ;;  %v1644_v36 = vor.u32 %v1643_v12, %v1640_v8  ;;  %v12453_v8 = vshrl.u32 %v12445_v23, 16  ;;  %v12463_v32 = vshll.u32 %v8145_v28, 16 }
 0x112   : > { %2022 = vrot.lane.b32.xlu0 %v1582_v11, %s6853_s22  ;;  %v8479_v1 = vpop.permute.xlu1 %1396  ;;  %v11977_v11 = vshll.u32 %v7863_v14, 16  ;;  %v1652_v46 = vrot.slane %v12447_v57, 2  ;;  %v12454_v57 = vshll.u32 %v12445_v23, 16  ;;  %v12460_v23 = vshrl.u32 %v8145_v28, 16 }
 0x113   : > { %12443 = vst [vmem:[#allocation149_spill] sm:$0xff] %v8479_v1  ;;  %v12446_v1 = vld [vmem:[#allocation99_spill] sm:$0xff]  ;;  %v1667_v12 = vrot.slane %v12453_v8, 1  ;;  %v1645_v8 = vsel %vm1493_vm2, %v1635_v24, %v1644_v36 }
 0x114   : > { %v8485_v20 = vpop.permute.xlu0 %1394  ;;  %2028 = vrot.lane.b32.xlu1 %v1609_v43, %s6853_s22  ;;  %v12449_v43 = vshll.u32 %v12442_v48, 16  ;;  %v12455_v4 = vshrl.u32 %v12446_v1, 16  ;;  %v1653_v47 = vor.u32 %v1652_v46, %v1649_v2  ;;  %v1694_v48 = vrot.slane %v12460_v23, 1 }
 0x115   : > { %12444 = vst [vmem:[#allocation150_spill] sm:$0xff] %v8485_v20  ;;  %v3148_v20 = vrot.slane %v11977_v11, 4  ;;  %v12456_v11 = vshll.u32 %v12446_v1, 16 }
 0x116   : > { %2026 = vrot.lane.b32.xlu0 %v1600_v42, %s6853_s22  ;;  %v1661_v58 = vrot.slane %v12449_v43, 2  ;;  %v8505_v33 = vpop.permute.xlu1 %1400  ;;  %v1670_v43 = vrot.slane %v12454_v57, 2  ;;  %v1676_v7 = vrot.slane %v12455_v4, 1  ;;  %v12458_v4 = vshrl.u32 %v12451_v15, 16 }
 0x117   : > { %12450 = vst [vmem:[#allocation151_spill] sm:$0xff] %v8505_v33  ;;  %v8510_v63 = vor.u32 %v3148_v20, %v3147_v50  ;;  %v1679_v20 = vrot.slane %v12456_v11, 2  ;;  %v12459_v11 = vshll.u32 %v12451_v15, 16 }
 0x118   : > { %v8512_v42 = vpop.permute.xlu0 %1398  ;;  %2032 = vrot.lane.b32.xlu1 %v1627_v49, %s6853_s22  ;;  %v1636_v49 = vsel %vm1493_vm2, %v1626_v35, %v1635_v24  ;;  %v1662_v33 = vor.u32 %v1661_v58, %v1658_v19  ;;  %v1697_v35 = vrot.slane %v12463_v32, 2  ;;  %v1671_v46 = vor.u32 %v1670_v43, %v1667_v12 }
 0x119   : > { %12452 = vst [vmem:[#allocation95_spill] sm:$0xff] %v8512_v42  ;;  %v8527_v50 = vsel %vm3010_vm3, %v8420_v21, %v8510_v63  ;;  %v1685_v42 = vrot.slane %v12458_v4, 1  ;;  %v1688_v1 = vrot.slane %v12459_v11, 2  ;;  %v1680_v19 = vor.u32 %v1679_v20, %v1676_v7 }
 0x11a   : > { %2030 = vrot.lane.b32.xlu0 %v1618_v44, %s6853_s22  ;;  %v8532_v57 = vpop.permute.xlu1 %1404  ;;  %v1663_v23 = vsel %vm1493_vm2, %v1653_v47, %v1662_v33  ;;  %v1654_v11 = vsel %vm1493_vm2, %v1644_v36, %v1653_v47  ;;  %v12465_v32 = vshrl.u32 %v12461_v3, 16  ;;  %v1698_v2 = vor.u32 %v1697_v35, %v1694_v48 }
 0x11b   : > { %12457 = vst [vmem:[#allocation152_spill] sm:$0xff] %v8532_v57  ;;  %v1689_v5 = vor.u32 %v1688_v1, %v1685_v42  ;;  %v12467_v58 = vshll.u32 %v12461_v3, 16  ;;  %v12468_v7 = vshrl.u32 %v8159_v6, 16  ;;  %v12469_v43 = vshll.u32 %v8159_v6, 16  ;;  %v12470_v1 = vld [vmem:[#allocation3_spill] sm:$0xff] }
 0x11c   : > { %v8541_v44 = vpop.permute.xlu0 %1402  ;;  %2036 = vrot.lane.b32.xlu1 %v1645_v8, %s6853_s22  ;;  %v1703_v24 = vrot.slane %v12465_v32, 1  ;;  %v1681_v36 = vsel %vm1493_vm2, %v1671_v46, %v1680_v19  ;;  %v11987_v42 = vshrl.u32 %v12470_v1, 16 }
 0x11d   : > { %12462 = vst [vmem:[#allocation153_spill] sm:$0xff] %v8541_v44  ;;  %v1706_v8 = vrot.slane %v12467_v58, 2  ;;  %v1712_v12 = vrot.slane %v12468_v7, 1  ;;  %v1715_v20 = vrot.slane %v12469_v43, 2  ;;  %v1672_v58 = vsel %vm1493_vm2, %v1662_v33, %v1671_v46 }
 0x11e   : > { %2034 = vrot.lane.b32.xlu0 %v1636_v49, %s6853_s22  ;;  %v8551_v4 = vpop.permute.xlu1 %1408  ;;  %v1721_v33 = vrot.slane %v11987_v42, 1  ;;  %v12473_v46 = vshll.u32 %v12470_v1, 16  ;;  %v1690_v48 = vsel %vm1493_vm2, %v1680_v19, %v1689_v5  ;;  %v12480_v49 = vshll.u32 %v8195_v22, 16 }
 0x11f   : > { %12464 = vst [vmem:[#allocation154_spill] sm:$0xff] %v8551_v4  ;;  %v1707_v7 = vor.u32 %v1706_v8, %v1703_v24  ;;  %v1716_v43 = vor.u32 %v1715_v20, %v1712_v12  ;;  %v12474_v24 = vshrl.u32 %v8181_v55, 16  ;;  %v12475_v12 = vshll.u32 %v8181_v55, 16 }
 0x120   : > { %v8556_v57 = vpop.permute.xlu0 %1406  ;;  %2040 = vrot.lane.b32.xlu1 %v1663_v23, %s6853_s22  ;;  %v1699_v23 = vsel %vm1493_vm2, %v1689_v5, %v1698_v2  ;;  %v12479_v5 = vshrl.u32 %v8195_v22, 16 }
 0x121   : > { %12466 = vst [vmem:[#allocation155_spill] sm:$0xff] %v8556_v57  ;;  %v1730_v8 = vrot.slane %v12474_v24, 1  ;;  %v1733_v20 = vrot.slane %v12475_v12, 2  ;;  %v12478_v12 = vshll.u32 %v7791_v54, 16  ;;  %v1717_v42 = vsel %vm1493_vm2, %v1707_v7, %v1716_v43 }
 0x122   : > { %2038 = vrot.lane.b32.xlu0 %v1654_v11, %s6853_s22  ;;  %v8571_v35 = vpop.permute.xlu1 %1412  ;;  %v11988_v11 = vshrl.u32 %v7791_v54, 16  ;;  %v1748_v19 = vrot.slane %v12479_v5, 1 }
 0x123   : > { %12471 = vst [vmem:[#allocation156_spill] sm:$0xff] %v8571_v35  ;;  %v1724_v35 = vrot.slane %v12473_v46, 2  ;;  %v1734_v46 = vor.u32 %v1733_v20, %v1730_v8  ;;  %v11997_v20 = vshrl.u32 %v7822_v26, 16 }
 0x124   : > { %v8574_v32 = vpop.permute.xlu0 %1410  ;;  %2044 = vrot.lane.b32.xlu1 %v1681_v36, %s6853_s22  ;;  %v1739_v24 = vrot.slane %v11988_v11, 1  ;;  %v12482_v11 = vshrl.u32 %v7807_v41, 16 }
 0x125   : > { %12472 = vst [vmem:[#allocation157_spill] sm:$0xff] %v8574_v32 }
 0x126   : > { %2042 = vrot.lane.b32.xlu0 %v1672_v58, %s6853_s22  ;;  %v8591_v36 = vpop.permute.xlu1 %1416  ;;  %v1751_v58 = vrot.slane %v12480_v49, 2  ;;  %v1757_v4 = vrot.slane %v12482_v11, 1  ;;  %v12485_v49 = vshrl.u32 %v7814_v52, 16  ;;  %v6775_v11 = vld [vmem:[%s11749_s1 + $0x38] sm:$0xff]  }
 0x127   : > { %12476 = vst [vmem:[#allocation158_spill] sm:$0xff] %v8591_v36  ;;  %v1742_v36 = vrot.slane %v12478_v12, 2  ;;  %v12483_v12 = vshll.u32 %v7807_v41, 16 }
 0x128   : > { %v8596_v47 = vpop.permute.xlu0 %1414  ;;  %2048 = vrot.lane.b32.xlu1 %v1699_v23, %s6853_s22  ;;  %v1708_v23 = vsel %vm1493_vm2, %v1698_v2, %v1707_v7  ;;  %v1766_v22 = vrot.slane %v12485_v49, 1  ;;  %v1752_v7 = vor.u32 %v1751_v58, %v1748_v19  ;;  %v11995_v49 = vmov 0.0  }
 0x129   : > { %12477 = vst [vmem:[#allocation159_spill] sm:$0xff] %v8596_v47  ;;  %v1725_v47 = vor.u32 %v1724_v35, %v1721_v33  ;;  %v1760_v57 = vrot.slane %v12483_v12, 2  ;;  %v11994_v35 = vshrl.u32 %v7818_v37, 16  ;;  %v11993_v33 = vshll.u32 %v7818_v37, 16  ;;  %6363 = vmatprep.subr.bf16.mxu0 %v11995_v49  ;;  %6607 = vmatprep.subr.bf16.mxu1 %v11995_v49 }
 0x12a   : > { %2046 = vrot.lane.b32.xlu0 %v1690_v48, %s6853_s22  ;;  %v8611_v32 = vpop.permute.xlu1 %1420  ;;  %v12486_v48 = vshll.u32 %v7814_v52, 16  ;;  %v1743_v2 = vor.u32 %v1742_v36, %v1739_v24  ;;  %6364 = vmatpush3.bf16.msra.mxu0 %v6775_v11  ;;  %v11998_v12 = vshrl.u32 %v7826_v31, 16 }
 0x12b   : > { %12481 = vst [vmem:[#allocation160_spill] sm:$0xff] %v8611_v32  ;;  %v1735_v8 = vsel %vm1493_vm2, %v1725_v47, %v1734_v46  ;;  %v1761_v36 = vor.u32 %v1760_v57, %v1757_v4  ;;  %v1775_v19 = vrot.slane %v11994_v35, 1  ;;  %6365 = vmatprep.subr.bf16.mxu0 %v11995_v49  ;;  %6615 = vmatpush3.bf16.msra.mxu1 %v6775_v11  ;;  %v11999_v11 = vshrl.u32 %v7830_v13, 16 }
 0x12c   : > { %v8618_v5 = vpop.permute.xlu0 %1418  ;;  %v1769_v54 = vrot.slane %v12486_v48, 2  ;;  %2052 = vrot.lane.b32.xlu1 %v1717_v42, %s6853_s22  ;;  %v1726_v42 = vsel %vm1493_vm2, %v1716_v43, %v1725_v47  ;;  %v1753_v57 = vsel %vm1493_vm2, %v1743_v2, %v1752_v7  ;;  %6608 = vmatprep.subr.bf16.mxu1 %v11995_v49  ;;  %v12489_v47 = vshll.u32 %v7822_v26, 16 }
 0x12d   : > { %12484 = vst [vmem:[#allocation161_spill] sm:$0xff] %v8618_v5  ;;  %v1744_v35 = vsel %vm1493_vm2, %v1734_v46, %v1743_v2  ;;  %v1762_v2 = vsel %vm1493_vm2, %v1752_v7, %v1761_v36  ;;  %v12499_v7 = vshrl.u32 %v7849_v56, 16  ;;  %v6820_v5 = vld [vmem:[%s6904_s19 + $0x34] sm:$0xf] }
 0x12e   : > { %2050 = vrot.lane.b32.xlu0 %v1708_v23, %s6853_s22  ;;  %v8635_v48 = vpop.permute.xlu1 %1424  ;;  %v1770_v24 = vor.u32 %v1769_v54, %v1766_v22  ;;  %v1778_v23 = vrot.slane %v11993_v33, 2  ;;  %v6776_v54 = vld [vmem:[%s11749_s1 + $0x30] sm:$0xff]   ;;  %v1784_v22 = vrot.slane %v11997_v20, 1  ;;  %v1787_v43 = vrot.slane %v12489_v47, 2 }
 0x12f   : > { %12487 = vst [vmem:[#allocation162_spill] sm:$0xff] %v8635_v48  ;;  %6366 = vmatpush3.bf16.msra.mxu0 %v6776_v54  ;;  %v1793_v20 = vrot.slane %v11998_v12, 1  ;;  %v12492_v48 = vmov 0.0   ;;  %6616 = vmatpush3.bf16.msra.mxu1 %v6776_v54  ;;  %v12493_v54 = vshll.u32 %v7826_v31, 16  ;;  %v1802_v12 = vrot.slane %v11999_v11, 1 }
 0x130   : > { %v8639_v58 = vpop.permute.xlu0 %1422  ;;  %2056 = vrot.lane.b32.xlu1 %v1735_v8, %s6853_s22  ;;  %v1771_v49 = vsel %vm1493_vm2, %v1761_v36, %v1770_v24  ;;  %6367 = vmatprep.subr.bf16.mxu0 %v12492_v48  ;;  %v12494_v8 = vshll.u32 %v7830_v13, 16  ;;  %v1820_v36 = vrot.slane %v12499_v7, 1  ;;  %v12500_v11 = vshll.u32 %v7849_v56, 16 }
 0x131   : > { %12488 = vst [vmem:[#allocation163_spill] sm:$0xff] %v8639_v58  ;;  %6609 = vmatprep.subr.bf16.mxu1 %v12492_v48  ;;  %v12502_v58 = vshll.u32 %v7853_v38, 16  ;;  %6379 = vmatprep.mubr.msk.bf16.mxu0 %vm6855_vm6, %v12492_v48 }
 0x132   : > { %2054 = vrot.lane.b32.xlu0 %v1726_v42, %s6853_s22  ;;  %v8661_v33 = vpop.permute.xlu1 %1428  ;;  %v1779_v42 = vor.u32 %v1778_v23, %v1775_v19  ;;  %v6777_v19 = vld [vmem:[%s11749_s1 + $0x28] sm:$0xff]   ;;  %v1788_v23 = vor.u32 %v1787_v43, %v1784_v22  ;;  %v1805_v46 = vrot.slane %v12494_v8, 2  ;;  %v12497_v22 = vshrl.u32 %v7838_v9, 16  ;;  %6495 = vmatprep.mubr.msk.bf16.mxu1 %vm6855_vm6, %v12492_v48 }
 0x133   : > { %12490 = vst [vmem:[#allocation164_spill] sm:$0xff] %v8661_v33  ;;  %6368 = vmatpush3.bf16.msra.mxu0 %v6777_v19  ;;  %6617 = vmatpush3.bf16.msra.mxu1 %v6777_v19  ;;  %v12498_v8 = vshll.u32 %v7838_v9, 16  ;;  %v1832_v32 = vrot.slane %v12502_v58, 2 }
 0x134   : > { %v8664_v4 = vpop.permute.xlu0 %1426  ;;  %2060 = vrot.lane.b32.xlu1 %v1753_v57, %s6853_s22  ;;  %v1796_v57 = vrot.slane %v12493_v54, 2  ;;  %6369 = vmatprep.subr.bf16.mxu0 %v12492_v48  ;;  %v1811_v43 = vrot.slane %v12497_v22, 1  ;;  %v1806_v22 = vor.u32 %v1805_v46, %v1802_v12  ;;  %v12503_v46 = vshrl.u32 %v7859_v25, 16 }
 0x135   : > { %12491 = vst [vmem:[#allocation165_spill] sm:$0xff] %v8664_v4  ;;  %v1814_v54 = vrot.slane %v12498_v8, 2  ;;  %6610 = vmatprep.subr.bf16.mxu1 %v12492_v48  ;;  %v1780_v8 = vsel %vm1493_vm2, %v1770_v24, %v1779_v42 }
 0x136   : > { %2058 = vrot.lane.b32.xlu0 %v1744_v35, %s6853_s22  ;;  %v8686_v47 = vpop.permute.xlu1 %1432  ;;  %v6778_v35 = vld [vmem:[%s11749_s1 + $0x20] sm:$0xff]   ;;  %v1797_v19 = vor.u32 %v1796_v57, %v1793_v20  ;;  %v1838_v24 = vrot.slane %v12503_v46, 1  ;;  %v6779_v57 = vld [vmem:[%s11749_s1 + $0x18] sm:$0xff]  }
 0x137   : > { %12495 = vst [vmem:[#allocation166_spill] sm:$0xff] %v8686_v47  ;;  %v1823_v47 = vrot.slane %v12500_v11, 2  ;;  %6370 = vmatpush3.bf16.msra.mxu0 %v6778_v35  ;;  %v12501_v11 = vshrl.u32 %v7853_v38, 16  ;;  %6618 = vmatpush3.bf16.msra.mxu1 %v6778_v35  ;;  %v1815_v20 = vor.u32 %v1814_v54, %v1811_v43  ;;  %v12004_v35 = vshrl.u32 %v7869_v61, 16 }
 0x138   : > { %v8689_v33 = vpop.permute.xlu0 %1430  ;;  %2064 = vrot.lane.b32.xlu1 %v1771_v49, %s6853_s22  ;;  %v1789_v49 = vsel %vm1493_vm2, %v1779_v42, %v1788_v23  ;;  %6371 = vmatprep.subr.bf16.mxu0 %v12492_v48  ;;  %v12504_v42 = vshll.u32 %v7859_v25, 16  ;;  %v1807_v58 = vsel %vm1493_vm2, %v1797_v19, %v1806_v22  ;;  %v1798_v54 = vsel %vm1493_vm2, %v1788_v23, %v1797_v19 }
 0x139   : > { %12496 = vst [vmem:[#allocation167_spill] sm:$0xff] %v8689_v33  ;;  %v1829_v33 = vrot.slane %v12501_v11, 1  ;;  %v1824_v12 = vor.u32 %v1823_v47, %v1820_v36  ;;  %6611 = vmatprep.subr.bf16.mxu1 %v12492_v48  ;;  %v326_v11 = vld [vmem:[%s6904_s19 + $0x30] sm:$0xc]  ;;  %v12506_v23 = vshll.u32 %v7863_v14, 16 }
 0x13a   : > { %2062 = vrot.lane.b32.xlu0 %v1762_v2, %s6853_s22  ;;  %v8709_v4 = vpop.permute.xlu1 %1436  ;;  %v1841_v2 = vrot.slane %v12504_v42, 2  ;;  %v12505_v42 = vshrl.u32 %v7863_v14, 16  ;;  %v5708_v13 = vcombine.low %v326_v11, %v6820_v5 }
 0x13b   : > { %6372 = vmatpush3.bf16.msra.mxu0 %v6779_v57  ;;  %6619 = vmatpush3.bf16.msra.mxu1 %v6779_v57  ;;  %v1850_v19 = vrot.slane %v12506_v23, 2  ;;  %v12012_v57 = vshrl.u32 %v7873_v34, 16  ;;  %v1816_v23 = vsel %vm1493_vm2, %v1806_v22, %v1815_v20 }
 0x13c   : > { %v8712_v7 = vpop.permute.xlu0 %1434  ;;  %2068 = vrot.lane.b32.xlu1 %v1789_v49, %s6853_s22  ;;  %v1833_v49 = vor.u32 %v1832_v32, %v1829_v33  ;;  %6373 = vmatprep.subr.bf16.mxu0 %v12492_v48  ;;  %v1842_v46 = vor.u32 %v1841_v2, %v1838_v24  ;;  %v1847_v47 = vrot.slane %v12505_v42, 1  ;;  %v6780_v32 = vld [vmem:[%s11749_s1 + $0x10] sm:$0xff]   ;;  %v1856_v33 = vrot.slane %v12004_v35, 1  ;;  %v6781_v35 = vld [vmem:[%s11749_s1 + $0x8] sm:$0xff]  }
 0x13d   : > { %6612 = vmatprep.subr.bf16.mxu1 %v12492_v48  ;;  %v12507_v24 = vshll.u32 %v7869_v61, 16  ;;  %v2385_v26 = vshrl.u32 %v5708_v13, 16  ;;  %v2388_v37 = vshll.u32 %v5708_v13, 16 }
 0x13e   : > { %2066 = vrot.lane.b32.xlu0 %v1780_v8, %s6853_s22  ;;  %v8732_v43 = vpop.permute.xlu1 %1440  ;;  %v1825_v8 = vsel %vm1493_vm2, %v1815_v20, %v1824_v12  ;;  %v1843_v5 = vsel %vm1493_vm2, %v1833_v49, %v1842_v46  ;;  %v1865_v20 = vrot.slane %v12012_v57, 1 }
 0x13f   : > { %v1859_v2 = vrot.slane %v12507_v24, 2  ;;  %6374 = vmatpush3.bf16.msra.mxu0 %v6780_v32  ;;  %6620 = vmatpush3.bf16.msra.mxu1 %v6780_v32  ;;  %v1851_v24 = vor.u32 %v1850_v19, %v1847_v47  ;;  %v1834_v47 = vsel %vm1493_vm2, %v1824_v12, %v1833_v49  ;;  %v6782_v12 = vld [vmem:[%s11749_s1] sm:$0xff]   ;;  %v2387_v57 = vrot.slane %v2385_v26, 2 }
 0x140   : > { %v8735_v36 = vpop.permute.xlu0 %1438  ;;  %2072 = vrot.lane.b32.xlu1 %v1807_v58, %s6853_s22  ;;  %v12011_v58 = vshll.u32 %v7873_v34, 16  ;;  %6375 = vmatprep.subr.bf16.mxu0 %v12492_v48  ;;  %v2390_v41 = vrot.slane %v2388_v37, 3  ;;  %v2781_v37 = vrot.slane %v7920_v16, 3 }
 0x141   : > { %6613 = vmatprep.subr.bf16.mxu1 %v12492_v48  ;;  %v1860_v22 = vor.u32 %v1859_v2, %v1856_v33  ;;  %v1852_v33 = vsel %vm1493_vm2, %v1842_v46, %v1851_v24  ;;  %v2153_v2 = vrot.slane %v5708_v13, 2 }
 0x142   : > { %2070 = vrot.lane.b32.xlu0 %v1798_v54, %s6853_s22  ;;  %v8756_v42 = vpop.permute.xlu1 %1444  ;;  %v339_v54 = vld [vmem:[%s6904_s19 + $0x34] sm:$0x8]  ;;  %v1868_v11 = vrot.slane %v12011_v58, 2 }
 0x143   : > { %6376 = vmatpush3.bf16.msra.mxu0 %v6781_v35  ;;  %6621 = vmatpush3.bf16.msra.mxu1 %v6781_v35  ;;  %v1861_v49 = vsel %vm1493_vm2, %v1851_v24, %v1860_v22 }
 0x144   : > { %v8760_v31 = vpop.permute.xlu0 %1442  ;;  %2076 = vrot.lane.b32.xlu1 %v1825_v8, %s6853_s22  ;;  %v6821_v8 = vld [vmem:[%s6904_s19 + $0x38] sm:$0xf]  ;;  %6377 = vmatprep.subr.bf16.mxu0 %v12492_v48 }
 0x145   : > { %v5717_v19 = vcombine.low %v339_v54, %v6821_v8  ;;  %6614 = vmatprep.subr.bf16.mxu1 %v12492_v48  ;;  %v8791_v54 = vor.u32 %v1868_v11, %v1865_v20  ;;  %v12514_v11 = vshrl.u32 %v7920_v16, 16 }
 0x146   : > { %2074 = vrot.lane.b32.xlu0 %v1816_v23, %s6853_s22  ;;  %v8775_v32 = vpop.permute.xlu1 %1448  ;;  %v12509_v23 = vld [vmem:[#allocation18_spill] sm:$0xff] }
 0x147   : > { %12508 = vst [vmem:[#allocation168_spill] sm:$0xff] %v8775_v32  ;;  %v2154_v58 = vrot.slane %v12509_v23, 2  ;;  %v12510_v35 = vshrl.u32 %v12509_v23, 16  ;;  %v12511_v46 = vshll.u32 %v12509_v23, 16  ;;  %v3012_v44 = vshrl.u32 %v5717_v19, 16  ;;  %6378 = vmatpush3.bf16.msra.mxu0 %v6782_v12  ;;  %6622 = vmatpush3.bf16.msra.mxu1 %v6782_v12 }
 0x148   : > { %v8779_v52 = vpop.permute.xlu0 %1446  ;;  %2080 = vrot.lane.b32.xlu1 %v1843_v5, %s6853_s22  ;;  %v3015_v55 = vshll.u32 %v5717_v19, 16  ;;  %v2780_v20 = vrot.slane %v5717_v19, 3  ;;  %v1870_v26 = vsel %vm1493_vm2, %v1860_v22, %v8791_v54  ;;  %v12515_v12 = vshll.u32 %v7920_v16, 16  ;;  %v12518_v22 = vld [vmem:[#allocation19_spill] sm:$0xff] }
 0x149   : > { %v2392_v5 = vrot.slane %v12510_v35, 2  ;;  %v2393_v13 = vrot.slane %v12511_v46, 3  ;;  %v2155_v24 = vsel %vm2152_vm4, %v2153_v2, %v2154_v58  ;;  %v2391_v2 = vor.u32 %v2390_v41, %v2387_v57 }
 0x14a   : > { %2078 = vrot.lane.b32.xlu0 %v1834_v47, %s6853_s22  ;;  %v8797_v8 = vpop.permute.xlu1 %1452  ;;  %v3019_v47 = vrot.slane %v12514_v11, 3  ;;  %v3014_v46 = vrot.slane %v3012_v44, 3  ;;  %v2782_v16 = vsel %vm2779_vm5, %v2780_v20, %v2781_v37  ;;  %v2156_v11 = vrot.slane %v12518_v22, 2 }
 0x14b   : > { %12512 = vst [vmem:[#allocation18_spill] sm:$0xff] %v8797_v8  ;;  %v2394_v35 = vor.u32 %v2393_v13, %v2392_v5  ;;  %v12521_v5 = vshll.u32 %v12518_v22, 16  ;;  %v2783_v20 = vrot.slane %v7938_v51, 3 }
 0x14c   : > { %v8799_v1 = vpop.permute.xlu0 %1450  ;;  %2084 = vrot.lane.b32.xlu1 %v1861_v49, %s6853_s22  ;;  %v3020_v49 = vrot.slane %v12515_v12, 4 }
 0x14d   : > { %12513 = vst [vmem:[#allocation169_spill] sm:$0xff] %v8799_v1  ;;  %v2395_v41 = vsel %vm2383_vm7, %v2391_v2, %v2394_v35  ;;  %v2397_v13 = vrot.slane %v12521_v5, 3 }
 0x14e   : > { %2082 = vrot.lane.b32.xlu0 %v1852_v33, %s6853_s22  ;;  %v8815_v19 = vpop.permute.xlu1 %1456  ;;  %v3017_v33 = vrot.slane %v3015_v55, 4  ;;  %v3021_v12 = vor.u32 %v3020_v49, %v3019_v47  ;;  %v12520_v55 = vshrl.u32 %v12518_v22, 16  ;;  %v12524_v49 = vshll.u32 %v7938_v51, 16 }
 0x14f   : > { %12516 = vst [vmem:[#allocation170_spill] sm:$0xff] %v8815_v19 }
 0x150   : > { %v8817_v8 = vpop.permute.xlu0 %1454  ;;  %2266 = vrot.lane.b32.xlu1 %v2155_v24, %s6856_s16  ;;  %v3018_v57 = vor.u32 %v3017_v33, %v3014_v46  ;;  %v2396_v44 = vrot.slane %v12520_v55, 2  ;;  %v2157_v24 = vsel %vm2152_vm4, %v2154_v58, %v2156_v11  ;;  %v3024_v2 = vrot.slane %v12524_v49, 4  ;;  %v12528_v58 = vld [vmem:[#allocation67_spill] sm:$0xff] }
 0x151   : > { %12517 = vst [vmem:[#allocation171_spill] sm:$0xff] %v8817_v8 }
 0x152   : > { %2086 = vrot.lane.b32.xlu0 %v1870_v26, %s6853_s22  ;;  %v8823_v6 = vpop.permute.xlu1 %1460  ;;  %v12523_v26 = vshrl.u32 %v7938_v51, 16  ;;  %v3022_v33 = vsel %vm3010_vm3, %v3018_v57, %v3021_v12  ;;  %v2398_v55 = vor.u32 %v2397_v13, %v2396_v44 }
 0x153   : > { %12519 = vst [vmem:[#allocation19_spill] sm:$0xff] %v8823_v6  ;;  %v2212_v6 = vrot.slane %v12528_v58, 2 }
 0x154   : > { %v8830_v19 = vpop.permute.xlu0 %1458  ;;  %2893 = vrot.lane.b32.xlu1 %v2782_v16, %s6857_s17  ;;  %v3023_v47 = vrot.slane %v12523_v26, 3  ;;  %v12527_v16 = vld [vmem:[#allocation66_spill] sm:$0xff]  ;;  %v2784_v26 = vsel %vm2779_vm5, %v2781_v37, %v2783_v20 }
 0x155   : > { %12522 = vst [vmem:[#allocation172_spill] sm:$0xff] %v8830_v19  ;;  %v12529_v49 = vshrl.u32 %v12527_v16, 16  ;;  %v12530_v57 = vshll.u32 %v12527_v16, 16  ;;  %v12533_v19 = vshll.u32 %v12528_v58, 16  ;;  %v12535_v37 = vrot.slane %v12527_v16, 2 }
 0x156   : > { %2651 = vrot.lane.b32.xlu0 %v2395_v41, %s6858_s18  ;;  %v8840_v46 = vpop.permute.xlu1 %1464  ;;  %v3025_v51 = vor.u32 %v3024_v2, %v3023_v47  ;;  %v12532_v41 = vshrl.u32 %v12528_v58, 16 }
 0x157   : > { %12525 = vst [vmem:[#allocation173_spill] sm:$0xff] %v8840_v46  ;;  %v2504_v46 = vrot.slane %v12529_v49, 2  ;;  %v2505_v44 = vrot.slane %v12530_v57, 3  ;;  %v2509_v8 = vrot.slane %v12533_v19, 3  ;;  %v2213_v47 = vsel %vm2152_vm4, %v12535_v37, %v2212_v6 }
 0x158   : > { %v8843_v5 = vpop.permute.xlu0 %1462  ;;  %2268 = vrot.lane.b32.xlu1 %v2157_v24, %s6856_s16  ;;  %v2399_v24 = vsel %vm2383_vm7, %v2394_v35, %v2398_v55  ;;  %v3026_v35 = vsel %vm3010_vm3, %v3021_v12, %v3025_v51  ;;  %v2839_v49 = vrot.slane %v7849_v56, 3  ;;  %v12537_v19 = vshrl.u32 %v7838_v9, 16 }
 0x159   : > { %12526 = vst [vmem:[#allocation174_spill] sm:$0xff] %v8843_v5  ;;  %v2508_v5 = vrot.slane %v12532_v41, 2  ;;  %v8871_v41 = vor.u32 %v2505_v44, %v2504_v46  ;;  %v12540_v37 = vshrl.u32 %v7849_v56, 16  ;;  %v12543_v46 = vrot.slane %v7838_v9, 3 }
 0x15a   : > { %3278 = vrot.lane.b32.xlu0 %v3022_v33, %s6859_s20  ;;  %v8854_v13 = vpop.permute.xlu1 %1468  ;;  %v3131_v57 = vrot.slane %v12537_v19, 3 }
 0x15b   : > { %12531 = vst [vmem:[#allocation175_spill] sm:$0xff] %v8854_v13  ;;  %12536 = vst [vmem:[#allocation177_spill] sm:$0xff] %v8871_v41  ;;  %v3135_v2 = vrot.slane %v12540_v37, 3  ;;  %v2840_v44 = vsel %vm2779_vm5, %v12543_v46, %v2839_v49 }
 0x15c   : > { %v8861_v33 = vpop.permute.xlu0 %1466  ;;  %2895 = vrot.lane.b32.xlu1 %v2784_v26, %s6857_s17  ;;  %v2510_v26 = vor.u32 %v2509_v8, %v2508_v5  ;;  %v12544_v8 = vld [vmem:[#allocation21_spill] sm:$0xff] }
 0x15d   : > { %12534 = vst [vmem:[#allocation176_spill] sm:$0xff] %v8861_v33  ;;  %v12539_v33 = vshll.u32 %v7838_v9, 16  ;;  %v2158_v5 = vrot.slane %v12544_v8, 2 }
 0x15e   : > { %2653 = vrot.lane.b32.xlu0 %v2399_v24, %s6858_s18  ;;  %v8875_v13 = vpop.permute.xlu1 %1472  ;;  %v12541_v24 = vshll.u32 %v7849_v56, 16  ;;  %v2511_v56 = vsel %vm2383_vm7, %v8871_v41, %v2510_v26 }
 0x15f   : > { %12538 = vst [vmem:[#allocation178_spill] sm:$0xff] %v8875_v13  ;;  %v3132_v1 = vrot.slane %v12539_v33, 4  ;;  %v12545_v33 = vshrl.u32 %v12544_v8, 16  ;;  %v2159_v46 = vsel %vm2152_vm4, %v2156_v11, %v2158_v5 }
 0x160   : > { %v3136_v3 = vrot.slane %v12541_v24, 4  ;;  %v8883_v12 = vpop.permute.xlu0 %1470  ;;  %2324 = vrot.lane.b32.xlu1 %v2213_v47, %s6856_s16  ;;  %v12548_v47 = vshll.u32 %v12544_v8, 16 }
 0x161   : > { %12542 = vst [vmem:[#allocation179_spill] sm:$0xff] %v8883_v12  ;;  %v2400_v19 = vrot.slane %v12545_v33, 2  ;;  %v8897_v37 = vor.u32 %v3132_v1, %v3131_v57  ;;  %v2785_v33 = vrot.slane %v7942_v17, 3 }
 0x162   : > { %3280 = vrot.lane.b32.xlu0 %v3026_v35, %s6859_s20  ;;  %v8893_v13 = vpop.permute.xlu1 %1476  ;;  %v3137_v24 = vor.u32 %v3136_v3, %v3135_v2  ;;  %v2401_v35 = vrot.slane %v12548_v47, 3  ;;  %v12551_v3 = vshrl.u32 %v7942_v17, 16  ;;  %v12552_v47 = vshll.u32 %v7942_v17, 16 }
 0x163   : > { %12546 = vst [vmem:[#allocation180_spill] sm:$0xff] %v8893_v13  ;;  %12547 = vst [vmem:[#allocation181_spill] sm:$0xff] %v8897_v37  ;;  %v2786_v11 = vsel %vm2779_vm5, %v2783_v20, %v2785_v33 }
 0x164   : > { %v8901_v12 = vpop.permute.xlu0 %1474  ;;  %2951 = vrot.lane.b32.xlu1 %v2840_v44, %s6857_s17  ;;  %v3138_v1 = vsel %vm3010_vm3, %v8897_v37, %v3137_v24  ;;  %v2402_v57 = vor.u32 %v2401_v35, %v2400_v19  ;;  %v3027_v2 = vrot.slane %v12551_v3, 3  ;;  %v3028_v9 = vrot.slane %v12552_v47, 4  ;;  %v12554_v44 = vld [vmem:[#allocation68_spill] sm:$0xff] }
 0x165   : > { %12549 = vst [vmem:[#allocation182_spill] sm:$0xff] %v8901_v12  ;;  %v12556_v3 = vshrl.u32 %v12554_v44, 16  ;;  %v12557_v17 = vshll.u32 %v12554_v44, 16 }
 0x166   : > { %2709 = vrot.lane.b32.xlu0 %v2511_v56, %s6858_s18  ;;  %v8907_v13 = vpop.permute.xlu1 %1480  ;;  %v2214_v56 = vrot.slane %v12554_v44, 2  ;;  %v2403_v19 = vsel %vm2383_vm7, %v2398_v55, %v2402_v57  ;;  %v3029_v35 = vor.u32 %v3028_v9, %v3027_v2  ;;  %v12560_v2 = vshrl.u32 %v7853_v38, 16 }
 0x167   : > { %12550 = vst [vmem:[#allocation183_spill] sm:$0xff] %v8907_v13  ;;  %v2512_v37 = vrot.slane %v12556_v3, 2  ;;  %v2513_v47 = vrot.slane %v12557_v17, 3  ;;  %v12561_v17 = vshll.u32 %v7853_v38, 16 }
 0x168   : > { %v8915_v12 = vpop.permute.xlu0 %1478  ;;  %2270 = vrot.lane.b32.xlu1 %v2159_v46, %s6856_s16  ;;  %v2215_v20 = vsel %vm2152_vm4, %v2212_v6, %v2214_v56  ;;  %v2841_v46 = vrot.slane %v7853_v38, 3  ;;  %v3030_v9 = vsel %vm3010_vm3, %v3025_v51, %v3029_v35  ;;  %v3139_v3 = vrot.slane %v12560_v2, 3 }
 0x169   : > { %12553 = vst [vmem:[#allocation184_spill] sm:$0xff] %v8915_v12  ;;  %v2514_v55 = vor.u32 %v2513_v47, %v2512_v37 }
 0x16a   : > { %3336 = vrot.lane.b32.xlu0 %v3138_v1, %s6859_s20  ;;  %v8921_v13 = vpop.permute.xlu1 %1484  ;;  %v2842_v6 = vsel %vm2779_vm5, %v2839_v49, %v2841_v46 }
 0x16b   : > { %12555 = vst [vmem:[#allocation185_spill] sm:$0xff] %v8921_v13  ;;  %v3140_v13 = vrot.slane %v12561_v17, 4  ;;  %v2515_v51 = vsel %vm2383_vm7, %v2510_v26, %v2514_v55 }
 0x16c   : > { %v8928_v12 = vpop.permute.xlu0 %1482  ;;  %2897 = vrot.lane.b32.xlu1 %v2786_v11, %s6857_s17  ;;  %v12563_v11 = vld [vmem:[#allocation22_spill] sm:$0xff] }
 0x16d   : > { %12558 = vst [vmem:[#allocation186_spill] sm:$0xff] %v8928_v12  ;;  %v3141_v37 = vor.u32 %v3140_v13, %v3139_v3  ;;  %v12564_v47 = vshrl.u32 %v12563_v11, 16  ;;  %v12565_v38 = vshll.u32 %v12563_v11, 16  ;;  %v12566_v3 = vshrl.u32 %v7951_v39, 16 }
 0x16e   : > { %2655 = vrot.lane.b32.xlu0 %v2403_v19, %s6858_s18  ;;  %v8934_v1 = vpop.permute.xlu1 %1488  ;;  %v2160_v19 = vrot.slane %v12563_v11, 2 }
 0x16f   : > { %12559 = vst [vmem:[#allocation187_spill] sm:$0xff] %v8934_v1  ;;  %v2404_v2 = vrot.slane %v12564_v47, 2  ;;  %v2405_v17 = vrot.slane %v12565_v38, 3  ;;  %v3142_v13 = vsel %vm3010_vm3, %v3137_v24, %v3141_v37  ;;  %v3031_v47 = vrot.slane %v12566_v3, 3 }
 0x170   : > { %v8941_v12 = vpop.permute.xlu0 %1486  ;;  %2326 = vrot.lane.b32.xlu1 %v2215_v20, %s6856_s16  ;;  %v2161_v49 = vsel %vm2152_vm4, %v2158_v5, %v2160_v19  ;;  %v2787_v20 = vrot.slane %v7951_v39, 3  ;;  %v12567_v38 = vshll.u32 %v7951_v39, 16 }
 0x171   : > { %12562 = vst [vmem:[#allocation188_spill] sm:$0xff] %v8941_v12  ;;  %v2406_v26 = vor.u32 %v2405_v17, %v2404_v2 }
 0x172   : > { %3282 = vrot.lane.b32.xlu0 %v3030_v9, %s6859_s20  ;;  %v8947_v1 = vpop.permute.xlu1 %2008  ;;  %v3032_v41 = vrot.slane %v12567_v38, 4  ;;  %v2788_v5 = vsel %vm2779_vm5, %v2785_v33, %v2787_v20 }
 0x173   : > { %v2407_v24 = vsel %vm2383_vm7, %v2402_v57, %v2406_v26 }
 0x174   : > { %v8954_v12 = vpop.permute.xlu0 %2006  ;;  %2953 = vrot.lane.b32.xlu1 %v2842_v6, %s6857_s17  ;;  %v12568_v6 = vld [vmem:[#allocation69_spill] sm:$0xff]  ;;  %v3033_v2 = vor.u32 %v3032_v41, %v3031_v47 }
 0x175   : > { %v12569_v17 = vshrl.u32 %v12568_v6, 16  ;;  %v12570_v39 = vshll.u32 %v12568_v6, 16 }
 0x176   : > { %2711 = vrot.lane.b32.xlu0 %v2515_v51, %s6858_s18  ;;  %v8960_v9 = vpop.permute.xlu1 %2012  ;;  %v2216_v51 = vrot.slane %v12568_v6, 2  ;;  %v3034_v41 = vsel %vm3010_vm3, %v3029_v35, %v3033_v2 }
 0x177   : > { %v2516_v3 = vrot.slane %v12569_v17, 2  ;;  %v2517_v38 = vrot.slane %v12570_v39, 3 }
 0x178   : > { %v8967_v11 = vpop.permute.xlu0 %2010  ;;  %2272 = vrot.lane.b32.xlu1 %v2161_v49, %s6856_s16  ;;  %v2217_v33 = vsel %vm2152_vm4, %v2214_v56, %v2216_v51  ;;  %v2843_v49 = vrot.slane %v7859_v25, 3 }
 0x179   : > { %v2518_v57 = vor.u32 %v2517_v38, %v2516_v3 }
 0x17a   : > { %3338 = vrot.lane.b32.xlu0 %v3142_v13, %s6859_s20  ;;  %v8973_v44 = vpop.permute.xlu1 %2016  ;;  %v2844_v17 = vsel %vm2779_vm5, %v2841_v46, %v2843_v49 }
 0x17b   : > { %v2519_v56 = vsel %vm2383_vm7, %v2514_v55, %v2518_v57  ;;  %v3146_v55 = vsel %vm3010_vm3, %v3141_v37, %v8420_v21 }
 0x17c   : > { %v8980_v8 = vpop.permute.xlu0 %2014  ;;  %2899 = vrot.lane.b32.xlu1 %v2788_v5, %s6857_s17  ;;  %v12571_v5 = vld [vmem:[#allocation27_spill] sm:$0xff] }
 0x17d   : > { %v2162_v39 = vrot.slane %v12571_v5, 2  ;;  %v12573_v25 = vshrl.u32 %v12571_v5, 16  ;;  %v12574_v35 = vshll.u32 %v12571_v5, 16 }
 0x17e   : > { %2657 = vrot.lane.b32.xlu0 %v2407_v24, %s6858_s18  ;;  %v8986_v13 = vpop.permute.xlu1 %2020 }
 0x17f   : > { %v2408_v6 = vrot.slane %v12573_v25, 2  ;;  %v2409_v3 = vrot.slane %v12574_v35, 3  ;;  %v2163_v46 = vsel %vm2152_vm4, %v2160_v19, %v2162_v39  ;;  %v12576_v25 = vshrl.u32 %v7955_v40, 16 }
 0x180   : > { %v8989_v47 = vpop.permute.xlu0 %2018  ;;  %2328 = vrot.lane.b32.xlu1 %v2217_v33, %s6856_s16  ;;  %v2789_v33 = vrot.slane %v7955_v40, 3  ;;  %v12577_v35 = vshll.u32 %v7955_v40, 16 }
 0x181   : > { %v3035_v5 = vrot.slane %v12576_v25, 3 }
 0x182   : > { %3284 = vrot.lane.b32.xlu0 %v3034_v41, %s6859_s20  ;;  %v8995_v24 = vpop.permute.xlu1 %2024  ;;  %v3036_v32 = vrot.slane %v12577_v35, 4  ;;  %v2790_v19 = vsel %vm2779_vm5, %v2787_v20, %v2789_v33 }
 0x183   : > { %12572 = vst [vmem:[#allocation189_spill] sm:$0xff] %v8995_v24  ;;  %v2410_v24 = vor.u32 %v2409_v3, %v2408_v6 }
 0x184   : > { %v9002_v38 = vpop.permute.xlu0 %2022  ;;  %2955 = vrot.lane.b32.xlu1 %v2844_v17, %s6857_s17  ;;  %v12579_v17 = vld [vmem:[#allocation70_spill] sm:$0xff]  ;;  %v3037_v37 = vor.u32 %v3036_v32, %v3035_v5 }
 0x185   : > { %v2411_v21 = vsel %vm2383_vm7, %v2406_v26, %v2410_v24  ;;  %v12581_v6 = vshrl.u32 %v12579_v17, 16  ;;  %v12582_v40 = vshll.u32 %v12579_v17, 16 }
 0x186   : > { %2713 = vrot.lane.b32.xlu0 %v2519_v56, %s6858_s18  ;;  %v9008_v41 = vpop.permute.xlu1 %2028  ;;  %v2218_v56 = vrot.slane %v12579_v17, 2  ;;  %v3038_v32 = vsel %vm3010_vm3, %v3033_v2, %v3037_v37 }
 0x187   : > { %12575 = vst [vmem:[#allocation190_spill] sm:$0xff] %v9008_v41  ;;  %v2520_v3 = vrot.slane %v12581_v6, 2  ;;  %v2521_v25 = vrot.slane %v12582_v40, 3 }
 0x188   : > { %v9016_v58 = vpop.permute.xlu0 %2026  ;;  %2274 = vrot.lane.b32.xlu1 %v2163_v46, %s6856_s16  ;;  %v2219_v20 = vsel %vm2152_vm4, %v2216_v51, %v2218_v56  ;;  %v2845_v46 = vrot.slane %v7863_v14, 3 }
 0x189   : > { %12578 = vst [vmem:[#allocation191_spill] sm:$0xff] %v9016_v58  ;;  %v2522_v26 = vor.u32 %v2521_v25, %v2520_v3  ;;  %v6822_v58 = vld [vmem:[%s6904_s19] sm:$0xff]  }
 0x18a   : > { %3340 = vrot.lane.b32.xlu0 %v3146_v55, %s6859_s20  ;;  %v9022_v41 = vpop.permute.xlu1 %2032  ;;  %v2846_v6 = vsel %vm2779_vm5, %v2843_v49, %v2845_v46 }
 0x18b   : > { %12580 = vst [vmem:[#allocation192_spill] sm:$0xff] %v9022_v41  ;;  %v2523_v51 = vsel %vm2383_vm7, %v2518_v57, %v2522_v26  ;;  %v12592_v57 = vshrl.u32 %v7982_v62, 16 }
 0x18c   : > { %v9029_v35 = vpop.permute.xlu0 %2030  ;;  %2901 = vrot.lane.b32.xlu1 %v2790_v19, %s6857_s17  ;;  %v12586_v19 = vld [vmem:[#allocation28_spill] sm:$0xff] }
 0x18d   : > { %12583 = vst [vmem:[#allocation193_spill] sm:$0xff] %v9029_v35  ;;  %v2164_v40 = vrot.slane %v12586_v19, 2  ;;  %v12588_v14 = vshrl.u32 %v12586_v19, 16  ;;  %v12589_v2 = vshll.u32 %v12586_v19, 16 }
 0x18e   : > { %2659 = vrot.lane.b32.xlu0 %v2411_v21, %s6858_s18  ;;  %v9035_v55 = vpop.permute.xlu1 %2036 }
 0x18f   : > { %12584 = vst [vmem:[#allocation194_spill] sm:$0xff] %v9035_v55  ;;  %v2412_v55 = vrot.slane %v12588_v14, 2  ;;  %v2413_v3 = vrot.slane %v12589_v2, 3  ;;  %v2165_v49 = vsel %vm2152_vm4, %v2162_v39, %v2164_v40  ;;  %v12593_v14 = vshll.u32 %v7982_v62, 16 }
 0x190   : > { %v9038_v5 = vpop.permute.xlu0 %2034  ;;  %2330 = vrot.lane.b32.xlu1 %v2219_v20, %s6856_s16  ;;  %v2791_v20 = vrot.slane %v7982_v62, 3 }
 0x191   : > { %12585 = vst [vmem:[#allocation195_spill] sm:$0xff] %v9038_v5  ;;  %v3039_v5 = vrot.slane %v12592_v57, 3  ;;  %v3040_v41 = vrot.slane %v12593_v14, 4 }
 0x192   : > { %3286 = vrot.lane.b32.xlu0 %v3038_v32, %s6859_s20  ;;  %v9044_v21 = vpop.permute.xlu1 %2040  ;;  %v2792_v39 = vsel %vm2779_vm5, %v2789_v33, %v2791_v20  ;;  %v2847_v33 = vrot.slane %v7869_v61, 3 }
 0x193   : > { %12587 = vst [vmem:[#allocation196_spill] sm:$0xff] %v9044_v21  ;;  %v2414_v21 = vor.u32 %v2413_v3, %v2412_v55  ;;  %v3041_v3 = vor.u32 %v3040_v41, %v3039_v5  ;;  %v12601_v5 = vshrl.u32 %v7869_v61, 16 }
 0x194   : > { %v9051_v25 = vpop.permute.xlu0 %2038  ;;  %2957 = vrot.lane.b32.xlu1 %v2846_v6, %s6857_s17  ;;  %v12595_v6 = vld [vmem:[#allocation73_spill] sm:$0xff] }
 0x195   : > { %12590 = vst [vmem:[#allocation197_spill] sm:$0xff] %v9051_v25  ;;  %v2415_v55 = vsel %vm2383_vm7, %v2410_v24, %v2414_v21  ;;  %v12597_v57 = vshrl.u32 %v12595_v6, 16  ;;  %v12598_v14 = vshll.u32 %v12595_v6, 16  ;;  %v3042_v24 = vsel %vm3010_vm3, %v3037_v37, %v3041_v3 }
 0x196   : > { %2715 = vrot.lane.b32.xlu0 %v2523_v51, %s6858_s18  ;;  %v9057_v32 = vpop.permute.xlu1 %2044  ;;  %v2220_v51 = vrot.slane %v12595_v6, 2 }
 0x197   : > { %12591 = vst [vmem:[#allocation198_spill] sm:$0xff] %v9057_v32  ;;  %v2524_v62 = vrot.slane %v12597_v57, 2  ;;  %v2525_v32 = vrot.slane %v12598_v14, 3  ;;  %v3151_v57 = vrot.slane %v12601_v5, 3  ;;  %v12602_v14 = vshll.u32 %v7869_v61, 16 }
 0x198   : > { %v9063_v2 = vpop.permute.xlu0 %2042  ;;  %2276 = vrot.lane.b32.xlu1 %v2165_v49, %s6856_s16 }
 0x199   : > { %12594 = vst [vmem:[#allocation199_spill] sm:$0xff] %v9063_v2  ;;  %v2526_v41 = vor.u32 %v2525_v32, %v2524_v62 }
 0x19a   : > { %3342 = vrot.lane.b32.xlu0 %v8527_v50, %s6859_s20  ;;  %v9070_v25 = vpop.permute.xlu1 %2048  ;;  %v2221_v50 = vsel %vm2152_vm4, %v2218_v56, %v2220_v51  ;;  %v2848_v56 = vsel %vm2779_vm5, %v2845_v46, %v2847_v33 }
 0x19b   : > { %12596 = vst [vmem:[#allocation200_spill] sm:$0xff] %v9070_v25  ;;  %v3152_v25 = vrot.slane %v12602_v14, 4  ;;  %v2527_v37 = vsel %vm2383_vm7, %v2522_v26, %v2526_v41 }
 0x19c   : > { %v9077_v2 = vpop.permute.xlu0 %2046  ;;  %2903 = vrot.lane.b32.xlu1 %v2792_v39, %s6857_s17  ;;  %v12604_v39 = vld [vmem:[#allocation33_spill] sm:$0xff] }
 0x19d   : > { %12599 = vst [vmem:[#allocation201_spill] sm:$0xff] %v9077_v2  ;;  %v3153_v32 = vor.u32 %v3152_v25, %v3151_v57  ;;  %v12606_v62 = vshrl.u32 %v12604_v39, 16  ;;  %v12607_v61 = vshll.u32 %v12604_v39, 16  ;;  %v12610_v57 = vshrl.u32 %v8013_v29, 16 }
 0x19e   : > { %2661 = vrot.lane.b32.xlu0 %v2415_v55, %s6858_s18  ;;  %v9083_v49 = vpop.permute.xlu1 %2052  ;;  %v2166_v55 = vrot.slane %v12604_v39, 2 }
 0x19f   : > { %12600 = vst [vmem:[#allocation202_spill] sm:$0xff] %v9083_v49  ;;  %v2416_v5 = vrot.slane %v12606_v62, 2  ;;  %v2417_v14 = vrot.slane %v12607_v61, 3  ;;  %v3154_v26 = vsel %vm3010_vm3, %v8510_v63, %v3153_v32  ;;  %v3043_v62 = vrot.slane %v12610_v57, 3 }
 0x1a0   : > { %v9090_v2 = vpop.permute.xlu0 %2050  ;;  %2332 = vrot.lane.b32.xlu1 %v2221_v50, %s6856_s16  ;;  %v2167_v46 = vsel %vm2152_vm4, %v2164_v40, %v2166_v55  ;;  %v2793_v50 = vrot.slane %v8013_v29, 3  ;;  %v12611_v61 = vshll.u32 %v8013_v29, 16 }
 0x1a1   : > { %12603 = vst [vmem:[#allocation203_spill] sm:$0xff] %v9090_v2  ;;  %v2418_v25 = vor.u32 %v2417_v14, %v2416_v5 }
 0x1a2   : > { %3288 = vrot.lane.b32.xlu0 %v3042_v24, %s6859_s20  ;;  %v9096_v49 = vpop.permute.xlu1 %2056  ;;  %v2794_v40 = vsel %vm2779_vm5, %v2791_v20, %v2793_v50 }
 0x1a3   : > { %12605 = vst [vmem:[#allocation204_spill] sm:$0xff] %v9096_v49  ;;  %v3044_v49 = vrot.slane %v12611_v61, 4  ;;  %v2419_v63 = vsel %vm2383_vm7, %v2414_v21, %v2418_v25 }
 0x1a4   : > { %v9103_v2 = vpop.permute.xlu0 %2054  ;;  %2959 = vrot.lane.b32.xlu1 %v2848_v56, %s6857_s17  ;;  %v12613_v56 = vld [vmem:[#allocation71_spill] sm:$0xff] }
 0x1a5   : > { %12608 = vst [vmem:[#allocation205_spill] sm:$0xff] %v9103_v2  ;;  %v3045_v5 = vor.u32 %v3044_v49, %v3043_v62  ;;  %v12614_v14 = vshrl.u32 %v12613_v56, 16  ;;  %v12615_v29 = vshll.u32 %v12613_v56, 16  ;;  %v12617_v62 = vshrl.u32 %v7873_v34, 16 }
 0x1a6   : > { %2717 = vrot.lane.b32.xlu0 %v2527_v37, %s6858_s18  ;;  %v9109_v24 = vpop.permute.xlu1 %2060  ;;  %v2222_v37 = vrot.slane %v12613_v56, 2 }
 0x1a7   : > { %12609 = vst [vmem:[#allocation206_spill] sm:$0xff] %v9109_v24  ;;  %v2528_v57 = vrot.slane %v12614_v14, 2  ;;  %v2529_v61 = vrot.slane %v12615_v29, 3  ;;  %v3046_v21 = vsel %vm3010_vm3, %v3041_v3, %v3045_v5  ;;  %v3155_v14 = vrot.slane %v12617_v62, 3 }
 0x1a8   : > { %v9117_v2 = vpop.permute.xlu0 %2058  ;;  %2278 = vrot.lane.b32.xlu1 %v2167_v46, %s6856_s16  ;;  %v2223_v20 = vsel %vm2152_vm4, %v2220_v51, %v2222_v37  ;;  %v2849_v46 = vrot.slane %v7873_v34, 3  ;;  %v12618_v29 = vshll.u32 %v7873_v34, 16 }
 0x1a9   : > { %12612 = vst [vmem:[#allocation207_spill] sm:$0xff] %v9117_v2  ;;  %v2530_v49 = vor.u32 %v2529_v61, %v2528_v57 }
 0x1aa   : > { %3344 = vrot.lane.b32.xlu0 %v3154_v26, %s6859_s20  ;;  %v9123_v24 = vpop.permute.xlu1 %2064  ;;  %v3156_v56 = vrot.slane %v12618_v29, 4  ;;  %v2850_v51 = vsel %vm2779_vm5, %v2847_v33, %v2849_v46 }
 0x1ab   : > { %v2531_v3 = vsel %vm2383_vm7, %v2526_v41, %v2530_v49 }
 0x1ac   : > { %v9130_v2 = vpop.permute.xlu0 %2062  ;;  %2905 = vrot.lane.b32.xlu1 %v2794_v40, %s6857_s17  ;;  %v12619_v40 = vld [vmem:[#allocation35_spill] sm:$0xff]  ;;  %v3157_v57 = vor.u32 %v3156_v56, %v3155_v14  ;;  %v12622_v14 = vshrl.u32 %v8025_v59, 16 }
 0x1ad   : > { %12616 = vst [vmem:[#allocation208_spill] sm:$0xff] %v9130_v2  ;;  %v12620_v61 = vshrl.u32 %v12619_v40, 16  ;;  %v12621_v34 = vshll.u32 %v12619_v40, 16 }
 0x1ae   : > { %2663 = vrot.lane.b32.xlu0 %v2419_v63, %s6858_s18  ;;  %v9136_v26 = vpop.permute.xlu1 %2068  ;;  %v2168_v63 = vrot.slane %v12619_v40, 2  ;;  %v3158_v41 = vsel %vm3010_vm3, %v3153_v32, %v3157_v57 }
 0x1af   : > { %v2420_v62 = vrot.slane %v12620_v61, 2  ;;  %v2421_v29 = vrot.slane %v12621_v34, 3  ;;  %v3047_v61 = vrot.slane %v12622_v14, 3  ;;  %v12623_v34 = vshll.u32 %v8025_v59, 16 }
 0x1b0   : > { %v9143_v2 = vpop.permute.xlu0 %2066  ;;  %2334 = vrot.lane.b32.xlu1 %v2223_v20, %s6856_s16  ;;  %v2169_v33 = vsel %vm2152_vm4, %v2166_v55, %v2168_v63  ;;  %v12036_v20 = vrot.slane %v8025_v59, 3 }
 0x1b1   : > { %v9165_v56 = vor.u32 %v2421_v29, %v2420_v62  ;;  %v3048_v40 = vrot.slane %v12623_v34, 4  ;;  %v12037_v62 = vshll.u32 %v7877_v60, 16 }
 0x1b2   : > { %3290 = vrot.lane.b32.xlu0 %v3046_v21, %s6859_s20  ;;  %v9149_v39 = vpop.permute.xlu1 %2072  ;;  %v2796_v55 = vsel %vm2779_vm5, %v2793_v50, %v12036_v20 }
 0x1b3   : > { %v2423_v14 = vsel %vm2383_vm7, %v2418_v25, %v9165_v56  ;;  %v9185_v34 = vor.u32 %v3048_v40, %v3047_v61  ;;  %v12040_v25 = vrot.slane %v7877_v60, 3  ;;  %v3160_v61 = vrot.slane %v12037_v62, 4  ;;  %v12630_v62 = vld [vmem:[#allocation37_spill] sm:$0xff] }
 0x1b4   : > { %v9156_v6 = vpop.permute.xlu0 %2070  ;;  %2961 = vrot.lane.b32.xlu1 %v2850_v51, %s6857_s17  ;;  %v12624_v51 = vld [vmem:[#allocation74_spill] sm:$0xff] }
 0x1b5   : > { %v12039_v32 = vrot.slane %v12624_v51, 2  ;;  %v12627_v19 = vshll.u32 %v12624_v51, 16 }
 0x1b6   : > { %2719 = vrot.lane.b32.xlu0 %v2531_v3, %s6858_s18  ;;  %v9162_v21 = vpop.permute.xlu1 %2076  ;;  %v12038_v3 = vshrl.u32 %v7877_v60, 16 }
 0x1b7   : > { %v2533_v17 = vrot.slane %v12627_v19, 3  ;;  %v2225_v20 = vsel %vm2152_vm4, %v2222_v37, %v12039_v32  ;;  %v2852_v37 = vsel %vm2779_vm5, %v2849_v46, %v12040_v25 }
 0x1b8   : > { %v9171_v35 = vpop.permute.xlu0 %2074  ;;  %2280 = vrot.lane.b32.xlu1 %v2169_v33, %s6856_s16  ;;  %v12626_v33 = vshrl.u32 %v12624_v51, 16  ;;  %v3159_v40 = vrot.slane %v12038_v3, 3  ;;  %v12041_v3 = vrot.slane %v12630_v62, 2 }
 0x1ba   : > { %3346 = vrot.lane.b32.xlu0 %v3158_v41, %s6859_s20  ;;  %v9181_v29 = vpop.permute.xlu1 %2080  ;;  %v2532_v41 = vrot.slane %v12626_v33, 2  ;;  %v9217_v32 = vor.u32 %v3160_v61, %v3159_v40 }
 0x1bb   : > { %12625 = vst [vmem:[#allocation74_spill] sm:$0xff] %v9181_v29 }
 0x1bc   : > { %v9191_v50 = vpop.permute.xlu0 %2078  ;;  %2907 = vrot.lane.b32.xlu1 %v2796_v55, %s6857_s17  ;;  %v3050_v55 = vsel %vm3010_vm3, %v3045_v5, %v9185_v34  ;;  %v9207_v33 = vor.u32 %v2533_v17, %v2532_v41  ;;  %v12631_v5 = vshrl.u32 %v12630_v62, 16  ;;  %v3162_v61 = vsel %vm3010_vm3, %v3157_v57, %v9217_v32 }
 0x1be   : > { %2665 = vrot.lane.b32.xlu0 %v2423_v14, %s6858_s18  ;;  %v9203_v19 = vpop.permute.xlu1 %2084  ;;  %v2535_v17 = vsel %vm2383_vm7, %v2530_v49, %v9207_v33  ;;  %v2424_v41 = vrot.slane %v12631_v5, 2  ;;  %v2171_v49 = vsel %vm2152_vm4, %v2168_v63, %v12041_v3 }
 0x1bf   : > { %12628 = vst [vmem:[#allocation209_spill] sm:$0xff] %v9203_v19 }
 0x1c0   : > { %v9209_v14 = vpop.permute.xlu0 %2082  ;;  %2336 = vrot.lane.b32.xlu1 %v2225_v20, %s6856_s16  ;;  %v12632_v20 = vshll.u32 %v12630_v62, 16 }
 0x1c1   : > { %12629 = vst [vmem:[#allocation210_spill] sm:$0xff] %v9209_v14 }
 0x1c2   : > { %3292 = vrot.lane.b32.xlu0 %v3050_v55, %s6859_s20  ;;  %v2267_v19 = vpop.permute.xlu1 %2266  ;;  %v2425_v14 = vrot.slane %v12632_v20, 3  ;;  %v12633_v55 = vld [vmem:[#allocation83_spill] sm:$0xff] }
 0x1c3   : > { %v3394_v29 = vsel %vm3392_vm8, %v6822_v58, %v12633_v55  ;;  %v12042_v58 = vrot.slane %v8041_v18, 3 }
 0x1c4   : > { %v9228_v46 = vpop.permute.xlu0 %2086  ;;  %v3510_v40 = vsel %vm3508_vm9, %v3394_v29, %v8368_v27  ;;  %2963 = vrot.lane.b32.xlu1 %v2852_v37, %s6857_s17  ;;  %v9242_v27 = vor.u32 %v2425_v14, %v2424_v41  ;;  %v12634_v29 = vshrl.u32 %v8041_v18, 16  ;;  %v12637_v14 = vld [vmem:[#allocation76_spill] sm:$0xff] }
 0x1c5   : > { %v3625_v5 = vsel %vm3623_vm10, %v3510_v40, %v8954_v12  ;;  %v12636_v12 = vrot.slane %v8025_v59, 3  ;;  %v12639_v59 = vshll.u32 %v12637_v14, 16 }
 0x1c6   : > { %2721 = vrot.lane.b32.xlu0 %v2535_v17, %s6858_s18  ;;  %v2894_v20 = vpop.permute.xlu1 %2893  ;;  %v3051_v37 = vrot.slane %v12634_v29, 3  ;;  %v12635_v17 = vshll.u32 %v8041_v18, 16  ;;  %v3740_v25 = vsel %vm3738_vm11, %v3625_v5, %v2267_v19 }
 0x1c7   : > { %v2798_v57 = vsel %vm2779_vm5, %v12636_v12, %v12042_v58  ;;  %v12641_v12 = vld [vmem:[#allocation5_spill] sm:$0xff] }
 0x1c8   : > { %v3052_v55 = vrot.slane %v12635_v17, 4  ;;  %v2652_v63 = vpop.permute.xlu0 %2651  ;;  %2282 = vrot.lane.b32.xlu1 %v2171_v49, %s6856_s16  ;;  %v2537_v17 = vrot.slane %v12639_v59, 3  ;;  %v12045_v59 = vrot.slane %v7886_v0, 3 }
 0x1c9   : > { %v3855_v3 = vsel %vm3853_vm12, %v3740_v25, %v2652_v63  ;;  %v2427_v25 = vsel %vm2383_vm7, %v9165_v56, %v9242_v27  ;;  %v12640_v63 = vld [vmem:[#allocation88_spill] sm:$0xff] }
 0x1ca   : > { %3348 = vrot.lane.b32.xlu0 %v3162_v61, %s6859_s20  ;;  %v2269_v5 = vpop.permute.xlu1 %2268  ;;  %v9263_v49 = vor.u32 %v3052_v55, %v3051_v37  ;;  %v12638_v61 = vshrl.u32 %v12637_v14, 16  ;;  %v3396_v58 = vsel %vm3392_vm8, %v12641_v12, %v12640_v63  ;;  %v3970_v19 = vsel %vm3968_vm13, %v3855_v3, %v2894_v20 }
 0x1cb   : > { %v3512_v41 = vsel %vm3508_vm9, %v3396_v58, %v8392_v53  ;;  %v12642_v37 = vrot.slane %v12637_v14, 2  ;;  %v12643_v55 = vrot.slane %v12624_v51, 2  ;;  %v12644_v3 = vshrl.u32 %v7886_v0, 16 }
 0x1cc   : > { %v2536_v29 = vrot.slane %v12638_v61, 2  ;;  %v3279_v40 = vpop.permute.xlu0 %3278  ;;  %2909 = vrot.lane.b32.xlu1 %v2798_v57, %s6857_s17  ;;  %v12645_v53 = vshll.u32 %v7886_v0, 16  ;;  %v3627_v57 = vsel %vm3623_vm10, %v3512_v41, %v8947_v1  ;;  %v12646_v1 = vrot.slane %v7877_v60, 3  ;;  %v12647_v41 = vld [vmem:[#allocation38_spill] sm:$0xff] }
 0x1cd   : > { %v4085_v56 = vsel %vm4083_vm14, %v3970_v19, %v3279_v40  ;;  %v2227_v61 = vsel %vm2152_vm4, %v12643_v55, %v12642_v37  ;;  %v3163_v20 = vrot.slane %v12644_v3, 3  ;;  %v3054_v19 = vsel %vm3010_vm3, %v9185_v34, %v9263_v49 }
 0x1ce   : > { %2667 = vrot.lane.b32.xlu0 %v2427_v25, %s6858_s18  ;;  %6380 = vmatmul.mubr.bf16.vlgmr.msra.gmra.mxu0 %v4085_v56  ;;  %v3164_v58 = vrot.slane %v12645_v53, 4  ;;  %v2896_v40 = vpop.permute.xlu1 %2895  ;;  %v9295_v25 = vor.u32 %v2537_v17, %v2536_v29  ;;  %v3742_v63 = vsel %vm3738_vm11, %v3627_v57, %v2269_v5  ;;  %v2854_v34 = vsel %vm2779_vm5, %v12646_v1, %v12045_v59 }
 0x1cf   : > { %6383 = vmatprep.mubr.msk.bf16.mxu0 %vm6855_vm6, %v12492_v48  ;;  %v12044_v37 = vrot.slane %v12647_v41, 2  ;;  %v12648_v17 = vshrl.u32 %v12647_v41, 16  ;;  %v12649_v3 = vshll.u32 %v12647_v41, 16 }
 0x1d0   : > { %v2654_v12 = vpop.permute.xlu0 %2653  ;;  %2338 = vrot.lane.b32.xlu1 %v2227_v61, %s6856_s16  ;;  %v9307_v55 = vor.u32 %v3164_v58, %v3163_v20  ;;  %v2539_v5 = vsel %vm2383_vm7, %v9207_v33, %v9295_v25  ;;  %v12652_v58 = vrot.slane %v12630_v62, 2 }
 0x1d1   : > { %v3857_v56 = vsel %vm3853_vm12, %v3742_v63, %v2654_v12  ;;  %v2428_v61 = vrot.slane %v12648_v17, 2  ;;  %v2429_v53 = vrot.slane %v12649_v3, 3  ;;  %v12650_v63 = vld [vmem:[#allocation58_spill] sm:$0xff]  ;;  %v12651_v12 = vld [vmem:[#allocation60_spill] sm:$0xff] }
 0x1d2   : > { %3294 = vrot.lane.b32.xlu0 %v3054_v19, %s6859_s20  ;;  %v2325_v29 = vpop.permute.xlu1 %2324  ;;  %v3972_v19 = vsel %vm3968_vm13, %v3857_v56, %v2896_v40  ;;  %v3452_v1 = vsel %vm3392_vm8, %v12651_v12, %v12650_v63  ;;  %v2173_v40 = vsel %vm2152_vm4, %v12652_v58, %v12044_v37  ;;  %v3166_v56 = vsel %vm3010_vm3, %v9217_v32, %v9307_v55 }
 0x1d3   : > { %v3568_v33 = vsel %vm3508_vm9, %v3452_v1, %v8712_v7  ;;  %v9336_v7 = vor.u32 %v2429_v53, %v2428_v61  ;;  %v12656_v53 = vld [vmem:[#allocation80_spill] sm:$0xff]  ;;  %v12046_v58 = vshrl.u32 %v7895_v10, 16 }
 0x1d4   : > { %v3281_v57 = vpop.permute.xlu0 %3280  ;;  %2965 = vrot.lane.b32.xlu1 %v2854_v34, %s6857_s17  ;;  %v12043_v34 = vrot.slane %v8072_v45, 3  ;;  %v3683_v17 = vsel %vm3623_vm10, %v3568_v33, %v9123_v24  ;;  %v12655_v24 = vrot.slane %v8041_v18, 3  ;;  %v12050_v33 = vrot.slane %v12656_v53, 2 }
 0x1d5   : > { %v4088_v20 = vsel %vm4083_vm14, %v3972_v19, %v3281_v57  ;;  %v12654_v19 = vshll.u32 %v8072_v45, 16  ;;  %v3798_v1 = vsel %vm3738_vm11, %v3683_v17, %v2325_v29  ;;  %v2431_v17 = vsel %vm2383_vm7, %v9242_v27, %v9336_v7 }
 0x1d6   : > { %2723 = vrot.lane.b32.xlu0 %v2539_v5, %s6858_s18  ;;  %6384 = vmatmul.mubr.bf16.gmra.mxu0 %v4088_v20  ;;  %v2952_v3 = vpop.permute.xlu1 %2951  ;;  %v12653_v5 = vshrl.u32 %v8072_v45, 16  ;;  %v2800_v61 = vsel %vm2779_vm5, %v12655_v24, %v12043_v34  ;;  %v12658_v18 = vshll.u32 %v12656_v53, 16  ;;  %v12660_v24 = vld [vmem:[#allocation2_spill] sm:$0xff] }
 0x1d7   : > { %v3056_v63 = vrot.slane %v12654_v19, 4  ;;  %6387 = vmatprep.mubr.msk.bf16.mxu0 %vm6855_vm6, %v12492_v48 }
 0x1d8   : > { %v3055_v57 = vrot.slane %v12653_v5, 3  ;;  %v2710_v32 = vpop.permute.xlu0 %2709  ;;  %2284 = vrot.lane.b32.xlu1 %v2173_v40, %s6856_s16 }
 0x1d9   : > { %v3913_v20 = vsel %vm3853_vm12, %v3798_v1, %v2710_v32  ;;  %v2541_v1 = vrot.slane %v12658_v18, 3  ;;  %v12659_v32 = vld [vmem:[#allocation81_spill] sm:$0xff] }
 0x1da   : > { %3350 = vrot.lane.b32.xlu0 %v3166_v56, %s6859_s20  ;;  %v2271_v29 = vpop.permute.xlu1 %2270  ;;  %v9359_v40 = vor.u32 %v3056_v63, %v3055_v57  ;;  %v12657_v56 = vshrl.u32 %v12656_v53, 16  ;;  %v3398_v34 = vsel %vm3392_vm8, %v12660_v24, %v12659_v32  ;;  %v4028_v59 = vsel %vm3968_vm13, %v3913_v20, %v2952_v3 }
 0x1db   : > { %v3514_v5 = vsel %vm3508_vm9, %v3398_v34, %v8388_v30  ;;  %v12661_v57 = vrot.slane %v12637_v14, 2  ;;  %v3167_v3 = vrot.slane %v12046_v58, 3  ;;  %v12662_v30 = vshll.u32 %v7895_v10, 16 }
 0x1dc   : > { %v2540_v19 = vrot.slane %v12657_v56, 2  ;;  %v3337_v37 = vpop.permute.xlu0 %3336  ;;  %2911 = vrot.lane.b32.xlu1 %v2800_v61, %s6857_s17  ;;  %v12049_v56 = vrot.slane %v7895_v10, 3  ;;  %v3058_v20 = vsel %vm3010_vm3, %v9263_v49, %v9359_v40 }
 0x1dd   : > { %v4172_v27 = vsel %vm4083_vm14, %v4028_v59, %v3337_v37  ;;  %v2229_v63 = vsel %vm2152_vm4, %v12661_v57, %v12050_v33  ;;  %v3168_v34 = vrot.slane %v12662_v30, 4  ;;  %v3629_v59 = vsel %vm3623_vm10, %v3514_v5, %v8967_v11  ;;  %v12664_v5 = vld [vmem:[#allocation39_spill] sm:$0xff] }
 0x1de   : > { %2669 = vrot.lane.b32.xlu0 %v2431_v17, %s6858_s18  ;;  %6496 = vmatmul.mubr.bf16.vlgmr.msra.gmra.mxu1 %v4172_v27  ;;  %v2898_v37 = vpop.permute.xlu1 %2897  ;;  %v9389_v61 = vor.u32 %v2541_v1, %v2540_v19  ;;  %v3744_v17 = vsel %vm3738_vm11, %v3629_v59, %v2271_v29  ;;  %v12663_v11 = vrot.slane %v7886_v0, 3  ;;  %v12048_v19 = vrot.slane %v12664_v5, 2 }
 0x1df   : > { %6499 = vmatprep.mubr.msk.bf16.mxu1 %vm6855_vm6, %v12492_v48  ;;  %v9403_v1 = vor.u32 %v3168_v34, %v3167_v3  ;;  %v12665_v27 = vshrl.u32 %v12664_v5, 16  ;;  %v12669_v34 = vrot.slane %v12647_v41, 2 }
 0x1e0   : > { %v2656_v18 = vpop.permute.xlu0 %2655  ;;  %2340 = vrot.lane.b32.xlu1 %v2229_v63, %s6856_s16  ;;  %v2856_v49 = vsel %vm2779_vm5, %v12663_v11, %v12049_v56  ;;  %v2543_v29 = vsel %vm2383_vm7, %v9295_v25, %v9389_v61  ;;  %v12666_v63 = vshll.u32 %v12664_v5, 16 }
 0x1e1   : > { %v3859_v32 = vsel %vm3853_vm12, %v3744_v17, %v2656_v18  ;;  %v2432_v57 = vrot.slane %v12665_v27, 2  ;;  %v12667_v17 = vld [vmem:[#allocation117_spill] sm:$0xff] }
 0x1e2   : > { %3296 = vrot.lane.b32.xlu0 %v3058_v20, %s6859_s20  ;;  %v2327_v24 = vpop.permute.xlu1 %2326  ;;  %v2433_v30 = vrot.slane %v12666_v63, 3  ;;  %v3974_v20 = vsel %vm3968_vm13, %v3859_v32, %v2898_v37  ;;  %v12668_v18 = vld [vmem:[#allocation61_spill] sm:$0xff]  ;;  %v2175_v37 = vsel %vm2152_vm4, %v12669_v34, %v12048_v19  ;;  %v3170_v32 = vsel %vm3010_vm3, %v9307_v55, %v9403_v1 }
 0x1e3   : > { %v3454_v11 = vsel %vm3392_vm8, %v12668_v18, %v12667_v17  ;;  %v12670_v27 = vld [vmem:[#allocation97_spill] sm:$0xff] }
 0x1e4   : > { %v3283_v59 = vpop.permute.xlu0 %3282  ;;  %2967 = vrot.lane.b32.xlu1 %v2856_v49, %s6857_s17  ;;  %v3570_v25 = vsel %vm3508_vm9, %v3454_v11, %v8709_v4  ;;  %v12047_v49 = vrot.slane %v12670_v27, 3  ;;  %v9432_v4 = vor.u32 %v2433_v30, %v2432_v57  ;;  %v12672_v17 = vshll.u32 %v12670_v27, 16  ;;  %v12674_v30 = vld [vmem:[#allocation82_spill] sm:$0xff] }
 0x1e5   : > { %v4091_v3 = vsel %vm4083_vm14, %v3974_v20, %v3283_v59  ;;  %v3685_v63 = vsel %vm3623_vm10, %v3570_v25, %v9143_v2  ;;  %v12673_v2 = vrot.slane %v8072_v45, 3  ;;  %v12054_v25 = vrot.slane %v12674_v30, 2 }
 0x1e6   : > { %2725 = vrot.lane.b32.xlu0 %v2543_v29, %s6858_s18  ;;  %6388 = vmatmul.mubr.bf16.gmra.mxu0 %v4091_v3  ;;  %v2954_v59 = vpop.permute.xlu1 %2953  ;;  %v12671_v29 = vshrl.u32 %v12670_v27, 16  ;;  %v3060_v11 = vrot.slane %v12672_v17, 4  ;;  %v3800_v3 = vsel %vm3738_vm11, %v3685_v63, %v2327_v24  ;;  %v2435_v63 = vsel %vm2383_vm7, %v9336_v7, %v9432_v4  ;;  %v12680_v17 = vld [vmem:[#allocation144_spill] sm:$0xff] }
 0x1e7   : > { %6391 = vmatprep.mubr.msk.bf16.mxu0 %vm6855_vm6, %v12492_v48  ;;  %v2802_v57 = vsel %vm2779_vm5, %v12673_v2, %v12047_v49  ;;  %v12677_v45 = vshll.u32 %v12674_v30, 16  ;;  %v12678_v2 = vld [vmem:[#allocation87_spill] sm:$0xff]  ;;  %v12679_v49 = vld [vmem:[#allocation4_spill] sm:$0xff] }
 0x1e8   : > { %v3059_v20 = vrot.slane %v12671_v29, 3  ;;  %v2712_v55 = vpop.permute.xlu0 %2711  ;;  %2286 = vrot.lane.b32.xlu1 %v2175_v37, %s6856_s16  ;;  %v12675_v29 = vld [vmem:[#allocation75_spill] sm:$0xff]  ;;  %v3400_v19 = vsel %vm3392_vm8, %v12679_v49, %v12678_v2 }
 0x1e9   : > { %v3915_v34 = vsel %vm3853_vm12, %v3800_v3, %v2712_v55  ;;  %v2545_v55 = vrot.slane %v12677_v45, 3  ;;  %v3516_v33 = vsel %vm3508_vm9, %v3400_v19, %v12680_v17  ;;  %v12053_v49 = vrot.slane %v12675_v29, 3 }
 0x1ea   : > { %3352 = vrot.lane.b32.xlu0 %v3170_v32, %s6859_s20  ;;  %v2273_v24 = vpop.permute.xlu1 %2272  ;;  %v9455_v37 = vor.u32 %v3060_v11, %v3059_v20  ;;  %v12676_v32 = vshrl.u32 %v12674_v30, 16  ;;  %v4030_v58 = vsel %vm3968_vm13, %v3915_v34, %v2954_v59  ;;  %v12681_v20 = vrot.slane %v12656_v53, 2 }
 0x1eb   : > { %v12682_v59 = vshrl.u32 %v12675_v29, 16  ;;  %v12683_v19 = vshll.u32 %v12675_v29, 16 }
 0x1ec   : > { %v2544_v3 = vrot.slane %v12676_v32, 2  ;;  %v3339_v56 = vpop.permute.xlu0 %3338  ;;  %2913 = vrot.lane.b32.xlu1 %v2802_v57, %s6857_s17  ;;  %v2231_v11 = vsel %vm2152_vm4, %v12681_v20, %v12054_v25  ;;  %v3062_v57 = vsel %vm3010_vm3, %v9359_v40, %v9455_v37  ;;  %v12685_v40 = vld [vmem:[#allocation40_spill] sm:$0xff]  ;;  %v12701_v25 = vld [vmem:[#allocation143_spill] sm:$0xff] }
 0x1ed   : > { %v4175_v7 = vsel %vm4083_vm14, %v4030_v58, %v3339_v56  ;;  %v3171_v34 = vrot.slane %v12682_v59, 3  ;;  %v3172_v17 = vrot.slane %v12683_v19, 4  ;;  %v3631_v58 = vsel %vm3623_vm10, %v3516_v33, %v8960_v9 }
 0x1ee   : > { %2671 = vrot.lane.b32.xlu0 %v2435_v63, %s6858_s18  ;;  %6500 = vmatmul.mubr.bf16.gmra.mxu1 %v4175_v7  ;;  %v2900_v56 = vpop.permute.xlu1 %2899  ;;  %v9485_v63 = vor.u32 %v2545_v55, %v2544_v3  ;;  %v3746_v32 = vsel %vm3738_vm11, %v3631_v58, %v2273_v24  ;;  %v12684_v9 = vrot.slane %v7895_v10, 3  ;;  %v12051_v3 = vrot.slane %v12685_v40, 2 }
 0x1ef   : > { %6503 = vmatprep.mubr.msk.bf16.mxu1 %vm6855_vm6, %v12492_v48  ;;  %v9499_v55 = vor.u32 %v3172_v17, %v3171_v34  ;;  %v12686_v20 = vshrl.u32 %v12685_v40, 16  ;;  %v12687_v59 = vshll.u32 %v12685_v40, 16  ;;  %v12690_v17 = vrot.slane %v12664_v5, 2 }
 0x1f0   : > { %v2658_v45 = vpop.permute.xlu0 %2657  ;;  %2342 = vrot.lane.b32.xlu1 %v2231_v11, %s6856_s16  ;;  %v2858_v33 = vsel %vm2779_vm5, %v12684_v9, %v12053_v49  ;;  %v2547_v24 = vsel %vm2383_vm7, %v9389_v61, %v9485_v63 }
 0x1f1   : > { %v3861_v2 = vsel %vm3853_vm12, %v3746_v32, %v2658_v45  ;;  %v2436_v11 = vrot.slane %v12686_v20, 2  ;;  %v2437_v19 = vrot.slane %v12687_v59, 3  ;;  %v12688_v32 = vld [vmem:[#allocation116_spill] sm:$0xff]  ;;  %v12689_v45 = vld [vmem:[#allocation62_spill] sm:$0xff] }
 0x1f2   : > { %3298 = vrot.lane.b32.xlu0 %v3062_v57, %s6859_s20  ;;  %v2329_v7 = vpop.permute.xlu1 %2328  ;;  %v3976_v57 = vsel %vm3968_vm13, %v3861_v2, %v2900_v56  ;;  %v3456_v9 = vsel %vm3392_vm8, %v12689_v45, %v12688_v32  ;;  %v2177_v56 = vsel %vm2152_vm4, %v12690_v17, %v12051_v3  ;;  %v3174_v2 = vsel %vm3010_vm3, %v9403_v1, %v9499_v55  ;;  %v12691_v20 = vld [vmem:[#allocation20_spill] sm:$0xff] }
 0x1f3   : > { %v3572_v61 = vsel %vm3508_vm9, %v3456_v9, %v8735_v36  ;;  %v9528_v36 = vor.u32 %v2437_v19, %v2436_v11  ;;  %v12693_v32 = vshll.u32 %v12691_v20, 16  ;;  %v12695_v19 = vld [vmem:[#allocation84_spill] sm:$0xff] }
 0x1f4   : > { %v3285_v58 = vpop.permute.xlu0 %3284  ;;  %2969 = vrot.lane.b32.xlu1 %v2858_v33, %s6857_s17  ;;  %v12052_v33 = vrot.slane %v12691_v20, 3  ;;  %v3687_v59 = vsel %vm3623_vm10, %v3572_v61, %v9136_v26  ;;  %v12694_v26 = vrot.slane %v12670_v27, 3  ;;  %v12698_v27 = vshll.u32 %v12695_v19, 16 }
 0x1f5   : > { %v4094_v34 = vsel %vm4083_vm14, %v3976_v57, %v3285_v58  ;;  %v3064_v9 = vrot.slane %v12693_v32, 4 }
 0x1f6   : > { %2727 = vrot.lane.b32.xlu0 %v2547_v24, %s6858_s18  ;;  %6392 = vmatmul.mubr.bf16.gmra.mxu0 %v4094_v34  ;;  %v2956_v58 = vpop.permute.xlu1 %2955  ;;  %v12692_v24 = vshrl.u32 %v12691_v20, 16  ;;  %v3802_v34 = vsel %vm3738_vm11, %v3687_v59, %v2329_v7  ;;  %v2804_v11 = vsel %vm2779_vm5, %v12694_v26, %v12052_v33  ;;  %v2439_v59 = vsel %vm2383_vm7, %v9432_v4, %v9528_v36  ;;  %v12699_v26 = vld [vmem:[#allocation89_spill] sm:$0xff]  ;;  %v12700_v33 = vld [vmem:[#allocation6_spill] sm:$0xff] }
 0x1f7   : > { %6395 = vmatprep.mubr.msk.bf16.mxu0 %vm6855_vm6, %v12492_v48  ;;  %v3402_v49 = vsel %vm3392_vm8, %v12700_v33, %v12699_v26 }
 0x1f8   : > { %v3063_v57 = vrot.slane %v12692_v24, 3  ;;  %v2714_v1 = vpop.permute.xlu0 %2713  ;;  %2288 = vrot.lane.b32.xlu1 %v2177_v56, %s6856_s16  ;;  %v12696_v24 = vld [vmem:[#allocation72_spill] sm:$0xff]  ;;  %v3518_v61 = vsel %vm3508_vm9, %v3402_v49, %v12701_v25 }
 0x1f9   : > { %v3917_v17 = vsel %vm3853_vm12, %v3802_v34, %v2714_v1  ;;  %v2549_v1 = vrot.slane %v12698_v27, 3  ;;  %v12057_v33 = vrot.slane %v12696_v24, 3  ;;  %v12705_v25 = vshll.u32 %v12696_v24, 16 }
 0x1fa   : > { %3354 = vrot.lane.b32.xlu0 %v3174_v2, %s6859_s20  ;;  %v2275_v7 = vpop.permute.xlu1 %2274  ;;  %v9551_v56 = vor.u32 %v3064_v9, %v3063_v57  ;;  %v12697_v2 = vshrl.u32 %v12695_v19, 16  ;;  %v4032_v3 = vsel %vm3968_vm13, %v3917_v17, %v2956_v58  ;;  %v12702_v57 = vrot.slane %v12695_v19, 2 }
 0x1fb   : > { %v12703_v9 = vrot.slane %v12674_v30, 2  ;;  %v12704_v58 = vshrl.u32 %v12696_v24, 16  ;;  %v3176_v49 = vrot.slane %v12705_v25, 4 }
 0x1fc   : > { %v2548_v34 = vrot.slane %v12697_v2, 2  ;;  %v3341_v32 = vpop.permute.xlu0 %3340  ;;  %2915 = vrot.lane.b32.xlu1 %v2804_v11, %s6857_s17 }
 0x1fd   : > { %v4178_v4 = vsel %vm4083_vm14, %v4032_v3, %v3341_v32  ;;  %v2233_v2 = vsel %vm2152_vm4, %v12703_v9, %v12702_v57  ;;  %v3175_v17 = vrot.slane %v12704_v58, 3  ;;  %v3633_v3 = vsel %vm3623_vm10, %v3518_v61, %v8980_v8  ;;  %v12707_v61 = vld [vmem:[#allocation41_spill] sm:$0xff] }
 0x1fe   : > { %2673 = vrot.lane.b32.xlu0 %v2439_v59, %s6858_s18  ;;  %6504 = vmatmul.mubr.bf16.gmra.mxu1 %v4178_v4  ;;  %v2902_v11 = vpop.permute.xlu1 %2901  ;;  %v3066_v32 = vsel %vm3010_vm3, %v9455_v37, %v9551_v56  ;;  %v9581_v59 = vor.u32 %v2549_v1, %v2548_v34  ;;  %v3748_v27 = vsel %vm3738_vm11, %v3633_v3, %v2275_v7  ;;  %v12706_v8 = vrot.slane %v12675_v29, 3 }
 0x1ff   : > { %6507 = vmatprep.mubr.msk.bf16.mxu1 %vm6855_vm6, %v12492_v48  ;;  %v12055_v34 = vrot.slane %v12707_v61, 2  ;;  %v9595_v1 = vor.u32 %v3176_v49, %v3175_v17  ;;  %v12708_v9 = vshrl.u32 %v12707_v61, 16  ;;  %v12709_v58 = vshll.u32 %v12707_v61, 16 }
 0x200   : > { %v2660_v26 = vpop.permute.xlu0 %2659  ;;  %2344 = vrot.lane.b32.xlu1 %v2233_v2, %s6856_s16  ;;  %v2860_v37 = vsel %vm2779_vm5, %v12706_v8, %v12057_v33  ;;  %v2551_v7 = vsel %vm2383_vm7, %v9485_v63, %v9581_v59  ;;  %v12712_v49 = vrot.slane %v12685_v40, 2 }
 0x201   : > { %v3863_v4 = vsel %vm3853_vm12, %v3748_v27, %v2660_v26  ;;  %v2440_v2 = vrot.slane %v12708_v9, 2  ;;  %v2441_v25 = vrot.slane %v12709_v58, 3  ;;  %v12710_v27 = vld [vmem:[#allocation119_spill] sm:$0xff]  ;;  %v12711_v26 = vld [vmem:[#allocation64_spill] sm:$0xff]  ;;  %v12713_v9 = vld [vmem:[#allocation25_spill] sm:$0xff] }
 0x202   : > { %3300 = vrot.lane.b32.xlu0 %v3066_v32, %s6859_s20  ;;  %v2331_v57 = vpop.permute.xlu1 %2330  ;;  %v3978_v32 = vsel %vm3968_vm13, %v3863_v4, %v2902_v11  ;;  %v3458_v8 = vsel %vm3392_vm8, %v12711_v26, %v12710_v27  ;;  %v2179_v11 = vsel %vm2152_vm4, %v12712_v49, %v12055_v34  ;;  %v3178_v4 = vsel %vm3010_vm3, %v9499_v55, %v9595_v1 }
 0x203   : > { %v3574_v63 = vsel %vm3508_vm9, %v3458_v8, %v8732_v43  ;;  %v9624_v43 = vor.u32 %v2441_v25, %v2440_v2  ;;  %v12715_v27 = vshll.u32 %v12713_v9, 16  ;;  %v12717_v25 = vld [vmem:[#allocation85_spill] sm:$0xff] }
 0x204   : > { %v3287_v3 = vpop.permute.xlu0 %3286  ;;  %2971 = vrot.lane.b32.xlu1 %v2860_v37, %s6857_s17  ;;  %v12056_v37 = vrot.slane %v12713_v9, 3  ;;  %v3689_v58 = vsel %vm3623_vm10, %v3574_v63, %v9156_v6  ;;  %v12716_v6 = vrot.slane %v12691_v20, 3  ;;  %v12720_v20 = vshll.u32 %v12717_v25, 16  ;;  %v12723_v63 = vld [vmem:[#allocation146_spill] sm:$0xff] }
 0x205   : > { %v4097_v17 = vsel %vm4083_vm14, %v3978_v32, %v3287_v3  ;;  %v3068_v8 = vrot.slane %v12715_v27, 4 }
 0x206   : > { %2729 = vrot.lane.b32.xlu0 %v2551_v7, %s6858_s18  ;;  %6396 = vmatmul.mubr.bf16.gmra.mxu0 %v4097_v17  ;;  %v2958_v3 = vpop.permute.xlu1 %2957  ;;  %v12714_v7 = vshrl.u32 %v12713_v9, 16  ;;  %v3804_v17 = vsel %vm3738_vm11, %v3689_v58, %v2331_v57  ;;  %v2806_v2 = vsel %vm2779_vm5, %v12716_v6, %v12056_v37  ;;  %v2443_v58 = vsel %vm2383_vm7, %v9528_v36, %v9624_v43  ;;  %v12721_v6 = vld [vmem:[#allocation91_spill] sm:$0xff]  ;;  %v12722_v37 = vld [vmem:[#allocation8_spill] sm:$0xff] }
 0x207   : > { %6399 = vmatprep.mubr.msk.bf16.mxu0 %vm6855_vm6, %v12492_v48  ;;  %v3404_v33 = vsel %vm3392_vm8, %v12722_v37, %v12721_v6 }
 0x208   : > { %v3067_v32 = vrot.slane %v12714_v7, 3  ;;  %v2716_v55 = vpop.permute.xlu0 %2715  ;;  %2290 = vrot.lane.b32.xlu1 %v2179_v11, %s6856_s16  ;;  %v12718_v7 = vld [vmem:[#allocation7_spill] sm:$0xff]  ;;  %v3520_v26 = vsel %vm3508_vm9, %v3404_v33, %v12723_v63 }
 0x209   : > { %v3919_v49 = vsel %vm3853_vm12, %v3804_v17, %v2716_v55  ;;  %v2553_v55 = vrot.slane %v12720_v20, 3  ;;  %v12058_v37 = vrot.slane %v12718_v7, 3  ;;  %v12727_v33 = vshll.u32 %v12718_v7, 16 }
 0x20a   : > { %3356 = vrot.lane.b32.xlu0 %v3178_v4, %s6859_s20  ;;  %v2277_v57 = vpop.permute.xlu1 %2276  ;;  %v9647_v11 = vor.u32 %v3068_v8, %v3067_v32  ;;  %v12719_v4 = vshrl.u32 %v12717_v25, 16  ;;  %v4034_v34 = vsel %vm3968_vm13, %v3919_v49, %v2958_v3  ;;  %v12724_v32 = vrot.slane %v12717_v25, 2 }
 0x20b   : > { %v12725_v8 = vrot.slane %v12695_v19, 2  ;;  %v12726_v3 = vshrl.u32 %v12718_v7, 16  ;;  %v3180_v63 = vrot.slane %v12727_v33, 4 }
 0x20c   : > { %v2552_v17 = vrot.slane %v12719_v4, 2  ;;  %v3343_v27 = vpop.permute.xlu0 %3342  ;;  %2917 = vrot.lane.b32.xlu1 %v2806_v2, %s6857_s17 }
 0x20d   : > { %v4181_v36 = vsel %vm4083_vm14, %v4034_v34, %v3343_v27  ;;  %v2235_v4 = vsel %vm2152_vm4, %v12725_v8, %v12724_v32  ;;  %v3179_v49 = vrot.slane %v12726_v3, 3  ;;  %v3635_v34 = vsel %vm3623_vm10, %v3520_v26, %v8973_v44  ;;  %v12729_v26 = vld [vmem:[#allocation42_spill] sm:$0xff] }
 0x20e   : > { %2675 = vrot.lane.b32.xlu0 %v2443_v58, %s6858_s18  ;;  %6508 = vmatmul.mubr.bf16.gmra.mxu1 %v4181_v36  ;;  %v2904_v2 = vpop.permute.xlu1 %2903  ;;  %v3070_v27 = vsel %vm3010_vm3, %v9551_v56, %v9647_v11  ;;  %v9677_v58 = vor.u32 %v2553_v55, %v2552_v17  ;;  %v3750_v20 = vsel %vm3738_vm11, %v3635_v34, %v2277_v57  ;;  %v12728_v44 = vrot.slane %v12696_v24, 3  ;;  %v12732_v34 = vld [vmem:[#allocation118_spill] sm:$0xff] }
 0x20f   : > { %6511 = vmatprep.mubr.msk.bf16.mxu1 %vm6855_vm6, %v12492_v48  ;;  %v9691_v55 = vor.u32 %v3180_v63, %v3179_v49  ;;  %v12730_v8 = vshrl.u32 %v12729_v26, 16  ;;  %v12731_v3 = vshll.u32 %v12729_v26, 16  ;;  %v12734_v63 = vld [vmem:[#allocation99_spill] sm:$0xff] }
 0x210   : > { %v2662_v6 = vpop.permute.xlu0 %2661  ;;  %2346 = vrot.lane.b32.xlu1 %v2235_v4, %s6856_s16  ;;  %v2862_v56 = vsel %vm2779_vm5, %v12728_v44, %v12058_v37  ;;  %v2555_v57 = vsel %vm2383_vm7, %v9581_v59, %v9677_v58  ;;  %v12060_v37 = vrot.slane %v12734_v63, 3  ;;  %v12735_v59 = vshrl.u32 %v12734_v63, 16 }
 0x211   : > { %v3865_v36 = vsel %vm3853_vm12, %v3750_v20, %v2662_v6  ;;  %v2444_v4 = vrot.slane %v12730_v8, 2  ;;  %v2445_v33 = vrot.slane %v12731_v3, 3  ;;  %v12736_v8 = vshll.u32 %v12734_v63, 16 }
 0x212   : > { %3302 = vrot.lane.b32.xlu0 %v3070_v27, %s6859_s20  ;;  %v2333_v32 = vpop.permute.xlu1 %2332  ;;  %v12733_v27 = vld [vmem:[#allocation63_spill] sm:$0xff]  ;;  %v3980_v44 = vsel %vm3968_vm13, %v3865_v36, %v2904_v2  ;;  %v3071_v17 = vrot.slane %v12735_v59, 3  ;;  %v12737_v2 = vrot.slane %v12729_v26, 2  ;;  %v12738_v36 = vrot.slane %v12707_v61, 2 }
 0x213   : > { %v3460_v20 = vsel %vm3392_vm8, %v12733_v27, %v12732_v34  ;;  %v3072_v19 = vrot.slane %v12736_v8, 4  ;;  %v3182_v34 = vsel %vm3010_vm3, %v9595_v1, %v9691_v55  ;;  %v9724_v59 = vor.u32 %v2445_v33, %v2444_v4 }
 0x214   : > { %v3289_v6 = vpop.permute.xlu0 %3288  ;;  %2973 = vrot.lane.b32.xlu1 %v2862_v56, %s6857_s17  ;;  %v3576_v3 = vsel %vm3508_vm9, %v3460_v20, %v8760_v31  ;;  %v2181_v56 = vsel %vm2152_vm4, %v12738_v36, %v12737_v2  ;;  %v12739_v31 = vshrl.u32 %v7877_v60, 16  ;;  %v12740_v20 = vshll.u32 %v7877_v60, 16  ;;  %v12742_v60 = vld [vmem:[#allocation90_spill] sm:$0xff] }
 0x215   : > { %v4100_v49 = vsel %vm4083_vm14, %v3980_v44, %v3289_v6  ;;  %v3691_v6 = vsel %vm3623_vm10, %v3576_v3, %v9149_v39  ;;  %v12741_v39 = vrot.slane %v12713_v9, 3  ;;  %v9740_v33 = vor.u32 %v3072_v19, %v3071_v17  ;;  %v12746_v19 = vld [vmem:[#allocation14_spill] sm:$0xff]  ;;  %v12747_v17 = vld [vmem:[#allocation11_spill] sm:$0xff] }
 0x216   : > { %2731 = vrot.lane.b32.xlu0 %v2555_v57, %s6858_s18  ;;  %6400 = vmatmul.mubr.bf16.gmra.mxu0 %v4100_v49  ;;  %v2960_v44 = vpop.permute.xlu1 %2959  ;;  %v1874_v57 = vrot.slane %v12739_v31, 1  ;;  %v1877_v49 = vrot.slane %v12740_v20, 2  ;;  %v3806_v8 = vsel %vm3738_vm11, %v3691_v6, %v2333_v32  ;;  %v12743_v3 = vshrl.u32 %v12742_v60, 16  ;;  %v12745_v31 = vld [vmem:[#allocation78_spill] sm:$0xff] }
 0x217   : > { %6403 = vmatprep.mubr.msk.bf16.mxu0 %vm6855_vm6, %v12492_v48  ;;  %v2808_v4 = vsel %vm2779_vm5, %v12741_v39, %v12060_v37  ;;  %v12744_v32 = vshll.u32 %v12742_v60, 16  ;;  %v12063_v20 = vshrl.u32 %v12745_v31, 16  ;;  %v2447_v9 = vsel %vm2383_vm7, %v9624_v43, %v9724_v59  ;;  %v12748_v37 = vld [vmem:[#allocation145_spill] sm:$0xff] }
 0x218   : > { %v2718_v2 = vpop.permute.xlu0 %2717  ;;  %2292 = vrot.lane.b32.xlu1 %v2181_v56, %s6856_s16  ;;  %v2556_v36 = vrot.slane %v12743_v3, 2  ;;  %v3074_v43 = vsel %vm3010_vm3, %v9647_v11, %v9740_v33 }
 0x219   : > { %v3921_v1 = vsel %vm3853_vm12, %v3806_v8, %v2718_v2  ;;  %v2557_v6 = vrot.slane %v12744_v32, 3  ;;  %v9752_v2 = vor.u32 %v1877_v49, %v1874_v57  ;;  %v3183_v49 = vrot.slane %v12063_v20, 3  ;;  %v12778_v20 = vld [vmem:[#allocation147_spill] sm:$0xff] }
 0x21a   : > { %3358 = vrot.lane.b32.xlu0 %v3182_v34, %s6859_s20  ;;  %v2279_v8 = vpop.permute.xlu1 %2278  ;;  %v3406_v34 = vsel %vm3392_vm8, %v12747_v17, %v12746_v19  ;;  %v4036_v3 = vsel %vm3968_vm13, %v3921_v1, %v2960_v44  ;;  %v12749_v44 = vshll.u32 %v12745_v31, 16  ;;  %v12750_v19 = vld [vmem:[#allocation44_spill] sm:$0xff] }
 0x21b   : > { %v3522_v32 = vsel %vm3508_vm9, %v3406_v34, %v12748_v37  ;;  %v9766_v57 = vor.u32 %v2557_v6, %v2556_v36  ;;  %v12751_v17 = vshrl.u32 %v12750_v19, 16  ;;  %v12752_v34 = vshll.u32 %v12750_v19, 16 }
 0x21c   : > { %v3345_v39 = vpop.permute.xlu0 %3344  ;;  %2919 = vrot.lane.b32.xlu1 %v2808_v4, %s6857_s17  ;;  %v3184_v1 = vrot.slane %v12749_v44, 4  ;;  %v3637_v37 = vsel %vm3623_vm10, %v3522_v32, %v8989_v47  ;;  %v12753_v32 = vrot.slane %v12717_v25, 2  ;;  %v2863_v44 = vrot.slane %v12745_v31, 3 }
 0x21d   : > { %v4184_v56 = vsel %vm4083_vm14, %v4036_v3, %v3345_v39  ;;  %v3752_v11 = vsel %vm3738_vm11, %v3637_v37, %v2279_v8  ;;  %v2448_v47 = vrot.slane %v12751_v17, 2  ;;  %v2449_v39 = vrot.slane %v12752_v34, 3 }
 0x21e   : > { %2677 = vrot.lane.b32.xlu0 %v2447_v9, %s6858_s18  ;;  %6512 = vmatmul.mubr.bf16.gmra.mxu1 %v4184_v56  ;;  %v2906_v4 = vpop.permute.xlu1 %2905  ;;  %v1879_v56 = vsel %vm1493_vm2, %v8791_v54, %v9752_v2  ;;  %v2236_v9 = vrot.slane %v12742_v60, 2  ;;  %v2559_v54 = vsel %vm2383_vm7, %v9677_v58, %v9766_v57  ;;  %v9791_v3 = vor.u32 %v3184_v1, %v3183_v49 }
 0x21f   : > { %6515 = vmatprep.mubr.msk.bf16.mxu1 %vm6855_vm6, %v12492_v48  ;;  %v9805_v49 = vor.u32 %v2449_v39, %v2448_v47 }
 0x220   : > { %v2664_v36 = vpop.permute.xlu0 %2663  ;;  %3304 = vrot.lane.b32.xlu1 %v3074_v43, %s6859_s20  ;;  %v2237_v43 = vsel %vm2152_vm4, %v12753_v32, %v2236_v9  ;;  %v12757_v32 = vshll.u32 %v7886_v0, 16 }
 0x221   : > { %v3867_v6 = vsel %vm3853_vm12, %v3752_v11, %v2664_v36  ;;  %v12754_v36 = vld [vmem:[#allocation121_spill] sm:$0xff] }
 0x222   : > { %2088 = vrot.lane.b32.xlu0 %v1879_v56, %s6853_s22  ;;  %v2335_v8 = vpop.permute.xlu1 %2334  ;;  %v3982_v11 = vsel %vm3968_vm13, %v3867_v6, %v2906_v4  ;;  %v12755_v56 = vld [vmem:[#allocation65_spill] sm:$0xff]  ;;  %v3186_v4 = vsel %vm3010_vm3, %v9691_v55, %v9791_v3  ;;  %v12756_v6 = vshrl.u32 %v7886_v0, 16 }
 0x223   : > { %v3462_v17 = vsel %vm3392_vm8, %v12755_v56, %v12754_v36 }
 0x224   : > { %v3291_v37 = vpop.permute.xlu0 %3290  ;;  %2733 = vrot.lane.b32.xlu1 %v2559_v54, %s6858_s18  ;;  %v3578_v1 = vsel %vm3508_vm9, %v3462_v17, %v8756_v42  ;;  %v1883_v34 = vrot.slane %v12756_v6, 1  ;;  %v1886_v54 = vrot.slane %v12757_v32, 2  ;;  %v12758_v42 = vrot.slane %v12718_v7, 3  ;;  %v12761_v32 = vld [vmem:[#allocation15_spill] sm:$0xff] }
 0x225   : > { %v4103_v58 = vsel %vm4083_vm14, %v3982_v11, %v3291_v37  ;;  %v3693_v47 = vsel %vm3623_vm10, %v3578_v1, %v9171_v35  ;;  %v2182_v37 = vrot.slane %v12750_v19, 2  ;;  %v2451_v35 = vsel %vm2383_vm7, %v9724_v59, %v9805_v49 }
 0x226   : > { %2348 = vrot.lane.b32.xlu0 %v2237_v43, %s6856_s16  ;;  %6404 = vmatmul.mubr.bf16.gmra.mxu0 %v4103_v58  ;;  %v2962_v39 = vpop.permute.xlu1 %2961  ;;  %v2864_v43 = vsel %vm2779_vm5, %v12758_v42, %v2863_v44  ;;  %v3808_v55 = vsel %vm3738_vm11, %v3693_v47, %v2335_v8  ;;  %v9834_v36 = vor.u32 %v1886_v54, %v1883_v34  ;;  %v2809_v17 = vrot.slane %v12451_v15, 3  ;;  %v12763_v54 = vld [vmem:[#allocation148_spill] sm:$0xff] }
 0x227   : > { %6407 = vmatprep.mubr.msk.bf16.mxu0 %vm6855_vm6, %v12492_v48  ;;  %v12759_v58 = vshrl.u32 %v12451_v15, 16  ;;  %v12760_v8 = vshll.u32 %v12451_v15, 16  ;;  %v12762_v59 = vrot.slane %v12729_v26, 2 }
 0x228   : > { %v2720_v11 = vpop.permute.xlu0 %2719  ;;  %3360 = vrot.lane.b32.xlu1 %v3186_v4, %s6859_s20  ;;  %v3408_v4 = vsel %vm3392_vm8, %v12509_v23, %v12761_v32 }
 0x229   : > { %v3923_v0 = vsel %vm3853_vm12, %v3808_v55, %v2720_v11  ;;  %v3075_v1 = vrot.slane %v12759_v58, 3  ;;  %v3076_v6 = vrot.slane %v12760_v8, 4  ;;  %v2183_v34 = vsel %vm2152_vm4, %v12762_v59, %v2182_v37 }
 0x22a   : > { %2975 = vrot.lane.b32.xlu0 %v2864_v43, %s6857_s17  ;;  %v2281_v47 = vpop.permute.xlu1 %2280  ;;  %v3524_v42 = vsel %vm3508_vm9, %v3408_v4, %v12763_v54  ;;  %v4038_v55 = vsel %vm3968_vm13, %v3923_v0, %v2962_v39  ;;  %v1888_v58 = vsel %vm1493_vm2, %v9752_v2, %v9834_v36  ;;  %v12764_v8 = vrot.slane %v12734_v63, 3  ;;  %v12765_v0 = vld [vmem:[#allocation92_spill] sm:$0xff]  ;;  %v12768_v2 = vld [vmem:[#allocation77_spill] sm:$0xff] }
 0x22b   : > { %v3639_v11 = vsel %vm3623_vm10, %v3524_v42, %v8986_v13  ;;  %v2238_v32 = vrot.slane %v12765_v0, 2  ;;  %v9866_v13 = vor.u32 %v3076_v6, %v3075_v1  ;;  %v12766_v4 = vshrl.u32 %v12765_v0, 16 }
 0x22c   : > { %v3347_v43 = vpop.permute.xlu0 %3346  ;;  %2679 = vrot.lane.b32.xlu1 %v2451_v35, %s6858_s18  ;;  %v2810_v39 = vsel %vm2779_vm5, %v12764_v8, %v2809_v17  ;;  %v12062_v42 = vshrl.u32 %v12768_v2, 16  ;;  %v12061_v63 = vshll.u32 %v12768_v2, 16 }
 0x22d   : > { %v4187_v23 = vsel %vm4083_vm14, %v4038_v55, %v3347_v43  ;;  %v2560_v59 = vrot.slane %v12766_v4, 2  ;;  %v3754_v43 = vsel %vm3738_vm11, %v3639_v11, %v2281_v47  ;;  %v2239_v6 = vsel %vm2152_vm4, %v2236_v9, %v2238_v32  ;;  %v12769_v4 = vld [vmem:[#allocation120_spill] sm:$0xff] }
 0x22e   : > { %2294 = vrot.lane.b32.xlu0 %v2183_v34, %s6856_s16  ;;  %6516 = vmatmul.mubr.bf16.gmra.mxu1 %v4187_v23  ;;  %v2908_v35 = vpop.permute.xlu1 %2907  ;;  %v12767_v34 = vshll.u32 %v12765_v0, 16  ;;  %v2865_v23 = vrot.slane %v12768_v2, 3  ;;  %v3078_v47 = vsel %vm3010_vm3, %v9740_v33, %v9866_v13 }
 0x22f   : > { %6519 = vmatprep.mubr.msk.bf16.mxu1 %vm6855_vm6, %v12492_v48 }
 0x230   : > { %v2561_v54 = vrot.slane %v12767_v34, 3  ;;  %v2666_v55 = vpop.permute.xlu0 %2665  ;;  %2090 = vrot.lane.b32.xlu1 %v1888_v58, %s6853_s22  ;;  %v3187_v58 = vrot.slane %v12062_v42, 3  ;;  %v3464_v34 = vsel %vm3392_vm8, %v12527_v16, %v12769_v4 }
 0x231   : > { %v3869_v1 = vsel %vm3853_vm12, %v3754_v43, %v2666_v55  ;;  %v3580_v55 = vsel %vm3508_vm9, %v3464_v34, %v8779_v52 }
 0x232   : > { %2921 = vrot.lane.b32.xlu0 %v2810_v39, %s6857_s17  ;;  %v2337_v8 = vpop.permute.xlu1 %2336  ;;  %v9889_v11 = vor.u32 %v2561_v54, %v2560_v59  ;;  %v3188_v39 = vrot.slane %v12061_v63, 4  ;;  %v3984_v43 = vsel %vm3968_vm13, %v3869_v1, %v2908_v35  ;;  %v3695_v59 = vsel %vm3623_vm10, %v3580_v55, %v9162_v21  ;;  %v12770_v35 = vld [vmem:[#allocation45_spill] sm:$0xff] }
 0x233   : > { %v2866_v54 = vsel %vm2779_vm5, %v2863_v44, %v2865_v23  ;;  %v12064_v1 = vrot.slane %v12770_v35, 2  ;;  %v12771_v21 = vshrl.u32 %v12770_v35, 16  ;;  %v3810_v44 = vsel %vm3738_vm11, %v3695_v59, %v2337_v8 }
 0x234   : > { %v3293_v9 = vpop.permute.xlu0 %3292  ;;  %2350 = vrot.lane.b32.xlu1 %v2239_v6, %s6856_s16  ;;  %v2563_v52 = vsel %vm2383_vm7, %v9766_v57, %v9889_v11  ;;  %v9915_v6 = vor.u32 %v3188_v39, %v3187_v58  ;;  %v2811_v57 = vrot.slane %v8145_v28, 3  ;;  %v12773_v58 = vshrl.u32 %v8145_v28, 16 }
 0x235   : > { %v4106_v33 = vsel %vm4083_vm14, %v3984_v43, %v3293_v9  ;;  %v2452_v34 = vrot.slane %v12771_v21, 2  ;;  %v2185_v8 = vsel %vm2152_vm4, %v2182_v37, %v12064_v1 }
 0x236   : > { %3306 = vrot.lane.b32.xlu0 %v3078_v47, %s6859_s20  ;;  %6408 = vmatmul.mubr.bf16.gmra.mxu0 %v4106_v33  ;;  %v2964_v4 = vpop.permute.xlu1 %2963  ;;  %v12772_v47 = vshll.u32 %v12770_v35, 16  ;;  %v3079_v39 = vrot.slane %v12773_v58, 3  ;;  %v12774_v33 = vshll.u32 %v8145_v28, 16  ;;  %v12776_v58 = vshll.u32 %v7895_v10, 16 }
 0x237   : > { %6411 = vmatprep.mubr.msk.bf16.mxu0 %vm6855_vm6, %v12492_v48 }
 0x238   : > { %v2453_v9 = vrot.slane %v12772_v47, 3  ;;  %v2722_v43 = vpop.permute.xlu0 %2721  ;;  %2977 = vrot.lane.b32.xlu1 %v2866_v54, %s6857_s17  ;;  %v3080_v21 = vrot.slane %v12774_v33, 4  ;;  %v3190_v54 = vsel %vm3010_vm3, %v9791_v3, %v9915_v6  ;;  %v1895_v33 = vrot.slane %v12776_v58, 2 }
 0x239   : > { %v3925_v55 = vsel %vm3853_vm12, %v3810_v44, %v2722_v43  ;;  %v12775_v44 = vshrl.u32 %v7895_v10, 16  ;;  %v2812_v10 = vsel %vm2779_vm5, %v2809_v17, %v2811_v57 }
 0x23a   : > { %2735 = vrot.lane.b32.xlu0 %v2563_v52, %s6858_s18  ;;  %v2283_v59 = vpop.permute.xlu1 %2282  ;;  %v9940_v47 = vor.u32 %v2453_v9, %v2452_v34  ;;  %v12777_v52 = vld [vmem:[#allocation16_spill] sm:$0xff]  ;;  %v4040_v37 = vsel %vm3968_vm13, %v3925_v55, %v2964_v4  ;;  %v9959_v34 = vor.u32 %v3080_v21, %v3079_v39  ;;  %v12782_v55 = vld [vmem:[#allocation79_spill] sm:$0xff] }
 0x23b   : > { %v1892_v43 = vrot.slane %v12775_v44, 1  ;;  %v3410_v63 = vsel %vm3392_vm8, %v12518_v22, %v12777_v52  ;;  %v12779_v22 = vld [vmem:[#allocation94_spill] sm:$0xff] }
 0x23c   : > { %v3349_v42 = vpop.permute.xlu0 %3348  ;;  %v3526_v1 = vsel %vm3508_vm9, %v3410_v63, %v12778_v20  ;;  %2296 = vrot.lane.b32.xlu1 %v2185_v8, %s6856_s16  ;;  %v12780_v4 = vshrl.u32 %v12779_v22, 16  ;;  %v12781_v20 = vshll.u32 %v12779_v22, 16  ;;  %v12068_v8 = vshrl.u32 %v12782_v55, 16 }
 0x23d   : > { %v4190_v3 = vsel %vm4083_vm14, %v4040_v37, %v3349_v42  ;;  %v12065_v42 = vshll.u32 %v12782_v55, 16  ;;  %v3641_v15 = vsel %vm3623_vm10, %v3526_v1, %v9002_v38  ;;  %v2455_v17 = vsel %vm2383_vm7, %v9805_v49, %v9940_v47 }
 0x23e   : > { %3362 = vrot.lane.b32.xlu0 %v3190_v54, %s6859_s20  ;;  %6520 = vmatmul.mubr.bf16.gmra.mxu1 %v4190_v3  ;;  %v2564_v9 = vrot.slane %v12780_v4, 2  ;;  %v2565_v63 = vrot.slane %v12781_v20, 3  ;;  %v2910_v44 = vpop.permute.xlu1 %2909  ;;  %v9973_v39 = vor.u32 %v1895_v33, %v1892_v43  ;;  %v3756_v21 = vsel %vm3738_vm11, %v3641_v15, %v2283_v59  ;;  %v12785_v20 = vld [vmem:[#allocation47_spill] sm:$0xff] }
 0x23f   : > { %6523 = vmatprep.mubr.msk.bf16.mxu1 %vm6855_vm6, %v12492_v48  ;;  %v3082_v38 = vsel %vm3010_vm3, %v9866_v13, %v9959_v34  ;;  %v3191_v49 = vrot.slane %v12068_v8, 3  ;;  %v3192_v43 = vrot.slane %v12065_v42, 4  ;;  %v2240_v52 = vrot.slane %v12779_v22, 2  ;;  %v12784_v13 = vld [vmem:[#allocation67_spill] sm:$0xff]  ;;  %v12806_v42 = vld [vmem:[#allocation74_spill] sm:$0xff] }
 0x240   : > { %v2668_v54 = vpop.permute.xlu0 %2667  ;;  %2923 = vrot.lane.b32.xlu1 %v2812_v10, %s6857_s17  ;;  %v9984_v1 = vor.u32 %v2565_v63, %v2564_v9  ;;  %v1897_v33 = vsel %vm1493_vm2, %v9834_v36, %v9973_v39  ;;  %v12783_v10 = vld [vmem:[#allocation123_spill] sm:$0xff]  ;;  %v12786_v63 = vshrl.u32 %v12785_v20, 16  ;;  %v12788_v36 = vld [vmem:[#allocation168_spill] sm:$0xff]  ;;  %v12813_v8 = vld [vmem:[#allocation10_spill] sm:$0xff] }
 0x241   : > { %v3871_v58 = vsel %vm3853_vm12, %v3756_v21, %v2668_v54  ;;  %v3466_v4 = vsel %vm3392_vm8, %v12784_v13, %v12783_v10  ;;  %v2867_v10 = vrot.slane %v12782_v55, 3 }
 0x242   : > { %2681 = vrot.lane.b32.xlu0 %v2455_v17, %s6858_s18  ;;  %v2339_v59 = vpop.permute.xlu1 %2338  ;;  %v3986_v3 = vsel %vm3968_vm13, %v3871_v58, %v2910_v44  ;;  %v2456_v15 = vrot.slane %v12786_v63, 2  ;;  %v12787_v17 = vshll.u32 %v12785_v20, 16  ;;  %v3582_v54 = vsel %vm3508_vm9, %v3466_v4, %v12788_v36 }
 0x243   : > { %v2567_v44 = vsel %vm2383_vm7, %v9889_v11, %v9984_v1  ;;  %v10010_v58 = vor.u32 %v3192_v43, %v3191_v49  ;;  %v12789_v43 = vshrl.u32 %v12675_v29, 16  ;;  %v12790_v4 = vshll.u32 %v12675_v29, 16 }
 0x244   : > { %v3295_v37 = vpop.permute.xlu0 %3294  ;;  %3308 = vrot.lane.b32.xlu1 %v3082_v38, %s6859_s20  ;;  %v2457_v21 = vrot.slane %v12787_v17, 3  ;;  %v3697_v38 = vsel %vm3623_vm10, %v3582_v54, %v9191_v50  ;;  %v2868_v63 = vsel %vm2779_vm5, %v2865_v23, %v2867_v10  ;;  %v12791_v17 = vld [vmem:[#allocation17_spill] sm:$0xff] }
 0x245   : > { %v4109_v9 = vsel %vm4083_vm14, %v3986_v3, %v3295_v37  ;;  %v2241_v3 = vsel %vm2152_vm4, %v2238_v32, %v2240_v52  ;;  %v3194_v32 = vsel %vm3010_vm3, %v9915_v6, %v10010_v58  ;;  %v1901_v13 = vrot.slane %v12789_v43, 1 }
 0x246   : > { %2092 = vrot.lane.b32.xlu0 %v1897_v33, %s6853_s22  ;;  %6412 = vmatmul.mubr.bf16.gmra.mxu0 %v4109_v9  ;;  %v2966_v37 = vpop.permute.xlu1 %2965  ;;  %v3812_v33 = vsel %vm3738_vm11, %v3697_v38, %v2339_v59  ;;  %v10025_v50 = vor.u32 %v2457_v21, %v2456_v15  ;;  %v1904_v9 = vrot.slane %v12790_v4, 2  ;;  %v2186_v15 = vrot.slane %v12785_v20, 2  ;;  %v12792_v21 = vld [vmem:[#allocation21_spill] sm:$0xff] }
 0x247   : > { %6415 = vmatprep.mubr.msk.bf16.mxu0 %vm6855_vm6, %v12492_v48  ;;  %v3412_v36 = vsel %vm3392_vm8, %v12792_v21, %v12791_v17 }
 0x248   : > { %v2724_v11 = vpop.permute.xlu0 %2723  ;;  %2737 = vrot.lane.b32.xlu1 %v2567_v44, %s6858_s18  ;;  %v12793_v44 = vld [vmem:[#allocation150_spill] sm:$0xff]  ;;  %v2459_v23 = vsel %vm2383_vm7, %v9940_v47, %v10025_v50  ;;  %v12798_v47 = vrot.slane %v12770_v35, 2  ;;  %v12915_v35 = vshll.u32 %v12782_v55, 16 }
 0x249   : > { %v3927_v49 = vsel %vm3853_vm12, %v3812_v33, %v2724_v11  ;;  %v3528_v29 = vsel %vm3508_vm9, %v3412_v36, %v12793_v44  ;;  %v12794_v33 = vld [vmem:[#allocation29_spill] sm:$0xff]  ;;  %v12799_v44 = vld [vmem:[#allocation98_spill] sm:$0xff] }
 0x24a   : > { %2352 = vrot.lane.b32.xlu0 %v2241_v3, %s6856_s16  ;;  %v2285_v59 = vpop.permute.xlu1 %2284  ;;  %v4042_v54 = vsel %vm3968_vm13, %v3927_v49, %v2966_v37  ;;  %v10053_v3 = vor.u32 %v1904_v9, %v1901_v13  ;;  %v2813_v11 = vrot.slane %v12794_v33, 3  ;;  %v12795_v37 = vshrl.u32 %v12794_v33, 16 }
 0x24b   : > { %v12796_v43 = vshll.u32 %v12794_v33, 16  ;;  %v1949_v16 = vrot.slane %v12915_v35, 2 }
 0x24c   : > { %v3351_v6 = vpop.permute.xlu0 %3350  ;;  %3364 = vrot.lane.b32.xlu1 %v3194_v32, %s6859_s20  ;;  %v3083_v49 = vrot.slane %v12795_v37, 3  ;;  %v12797_v32 = vld [vmem:[#allocation189_spill] sm:$0xff]  ;;  %v12800_v37 = vshrl.u32 %v12799_v44, 16 }
 0x24d   : > { %v4193_v38 = vsel %vm4083_vm14, %v4042_v54, %v3351_v6  ;;  %v3084_v4 = vrot.slane %v12796_v43, 4  ;;  %v3643_v17 = vsel %vm3623_vm10, %v3528_v29, %v12797_v32  ;;  %v1906_v6 = vsel %vm1493_vm2, %v9973_v39, %v10053_v3 }
 0x24e   : > { %2979 = vrot.lane.b32.xlu0 %v2868_v63, %s6857_s17  ;;  %6524 = vmatmul.mubr.bf16.gmra.mxu1 %v4193_v38  ;;  %v2912_v21 = vpop.permute.xlu1 %2911  ;;  %v2187_v63 = vsel %vm2152_vm4, %v12798_v47, %v2186_v15  ;;  %v3758_v13 = vsel %vm3738_vm11, %v3643_v17, %v2285_v59  ;;  %v2814_v54 = vsel %vm2779_vm5, %v2811_v57, %v2813_v11  ;;  %v12070_v29 = vrot.slane %v12799_v44, 2  ;;  %v12802_v17 = vld [vmem:[#allocation9_spill] sm:$0xff] }
 0x24f   : > { %6527 = vmatprep.mubr.msk.bf16.mxu1 %vm6855_vm6, %v12492_v48  ;;  %v10082_v59 = vor.u32 %v3084_v4, %v3083_v49  ;;  %v12801_v43 = vshll.u32 %v12799_v44, 16  ;;  %v12067_v47 = vshrl.u32 %v12802_v17, 16  ;;  %v12066_v39 = vshll.u32 %v12802_v17, 16  ;;  %v12805_v49 = vld [vmem:[#allocation169_spill] sm:$0xff] }
 0x250   : > { %v2670_v9 = vpop.permute.xlu0 %2669  ;;  %2683 = vrot.lane.b32.xlu1 %v2459_v23, %s6858_s18  ;;  %v2568_v23 = vrot.slane %v12800_v37, 2 }
 0x251   : > { %v3873_v36 = vsel %vm3853_vm12, %v3758_v13, %v2670_v9  ;;  %v2569_v32 = vrot.slane %v12801_v43, 3  ;;  %v12804_v13 = vld [vmem:[#allocation68_spill] sm:$0xff] }
 0x252   : > { %2298 = vrot.lane.b32.xlu0 %v2187_v63, %s6856_s16  ;;  %v2341_v38 = vpop.permute.xlu1 %2340  ;;  %v12803_v63 = vld [vmem:[#allocation122_spill] sm:$0xff]  ;;  %v3988_v9 = vsel %vm3968_vm13, %v3873_v36, %v2912_v21  ;;  %v12069_v21 = vrot.slane %v12802_v17, 3 }
 0x253   : > { %v3468_v28 = vsel %vm3392_vm8, %v12804_v13, %v12803_v63  ;;  %v2243_v63 = vsel %vm2152_vm4, %v2240_v52, %v12070_v29  ;;  %v10110_v13 = vor.u32 %v2569_v32, %v2568_v23  ;;  %v12816_v29 = vld [vmem:[#allocation191_spill] sm:$0xff] }
 0x254   : > { %v3297_v57 = vpop.permute.xlu0 %3296  ;;  %v3584_v4 = vsel %vm3508_vm9, %v3468_v28, %v12805_v49  ;;  %2094 = vrot.lane.b32.xlu1 %v1906_v6, %s6853_s22  ;;  %v3086_v6 = vsel %vm3010_vm3, %v9959_v34, %v10082_v59  ;;  %v12808_v34 = vld [vmem:[#allocation22_spill] sm:$0xff]  ;;  %v2870_v32 = vsel %vm2779_vm5, %v2867_v10, %v12069_v21 }
 0x255   : > { %v4112_v37 = vsel %vm4083_vm14, %v3988_v9, %v3297_v57  ;;  %v3699_v43 = vsel %vm3623_vm10, %v3584_v4, %v12806_v42  ;;  %v3195_v42 = vrot.slane %v12067_v47, 3  ;;  %v12807_v9 = vld [vmem:[#allocation23_spill] sm:$0xff]  ;;  %v12809_v49 = vld [vmem:[#allocation54_spill] sm:$0xff] }
 0x256   : > { %2925 = vrot.lane.b32.xlu0 %v2814_v54, %s6857_s17  ;;  %6416 = vmatmul.mubr.bf16.gmra.mxu0 %v4112_v37  ;;  %v2968_v36 = vpop.permute.xlu1 %2967  ;;  %v3196_v54 = vrot.slane %v12066_v39, 4  ;;  %v3814_v52 = vsel %vm3738_vm11, %v3699_v43, %v2341_v38  ;;  %v3414_v23 = vsel %vm3392_vm8, %v12808_v34, %v12807_v9  ;;  %v2188_v4 = vrot.slane %v12809_v49, 2  ;;  %v12812_v9 = vld [vmem:[#allocation149_spill] sm:$0xff] }
 0x257   : > { %6419 = vmatprep.mubr.msk.bf16.mxu0 %vm6855_vm6, %v12492_v48  ;;  %v2571_v37 = vsel %vm2383_vm7, %v9984_v1, %v10110_v13  ;;  %v3530_v34 = vsel %vm3508_vm9, %v3414_v23, %v12812_v9  ;;  %v2815_v1 = vrot.slane %v12813_v8, 3 }
 0x258   : > { %v2726_v28 = vpop.permute.xlu0 %2725  ;;  %2354 = vrot.lane.b32.xlu1 %v2243_v63, %s6856_s16  ;;  %v10134_v43 = vor.u32 %v3196_v54, %v3195_v42  ;;  %v12810_v63 = vshrl.u32 %v12809_v49, 16  ;;  %v12814_v42 = vshrl.u32 %v12813_v8, 16 }
 0x259   : > { %v3929_v57 = vsel %vm3853_vm12, %v3814_v52, %v2726_v28 }
 0x25a   : > { %3310 = vrot.lane.b32.xlu0 %v3086_v6, %s6859_s20  ;;  %v2287_v38 = vpop.permute.xlu1 %2286  ;;  %v2460_v52 = vrot.slane %v12810_v63, 2  ;;  %v12811_v6 = vshll.u32 %v12809_v49, 16  ;;  %v4044_v10 = vsel %vm3968_vm13, %v3929_v57, %v2968_v36  ;;  %v3087_v54 = vrot.slane %v12814_v42, 3 }
 0x25b   : > { %v12815_v63 = vshll.u32 %v12813_v8, 16  ;;  %v3198_v57 = vsel %vm3010_vm3, %v10010_v58, %v10134_v43  ;;  %v2816_v58 = vsel %vm2779_vm5, %v2813_v11, %v2815_v1 }
 0x25c   : > { %v2461_v28 = vrot.slane %v12811_v6, 3  ;;  %v3353_v39 = vpop.permute.xlu0 %3352  ;;  %2981 = vrot.lane.b32.xlu1 %v2870_v32, %s6857_s17  ;;  %v3645_v6 = vsel %vm3623_vm10, %v3530_v34, %v12816_v29  ;;  %v12817_v32 = vshrl.u32 %v12696_v24, 16  ;;  %v12818_v29 = vshll.u32 %v12696_v24, 16  ;;  %v12819_v24 = vld [vmem:[#allocation102_spill] sm:$0xff] }
 0x25d   : > { %v4196_v47 = vsel %vm4083_vm14, %v4044_v10, %v3353_v39  ;;  %v3088_v21 = vrot.slane %v12815_v63, 4  ;;  %v2189_v39 = vsel %vm2152_vm4, %v2186_v15, %v2188_v4  ;;  %v12822_v63 = vld [vmem:[#allocation86_spill] sm:$0xff] }
 0x25e   : > { %2739 = vrot.lane.b32.xlu0 %v2571_v37, %s6858_s18  ;;  %6528 = vmatmul.mubr.bf16.gmra.mxu1 %v4196_v47  ;;  %v2914_v36 = vpop.permute.xlu1 %2913  ;;  %v10161_v23 = vor.u32 %v2461_v28, %v2460_v52  ;;  %v1910_v9 = vrot.slane %v12817_v32, 1  ;;  %v1913_v37 = vrot.slane %v12818_v29, 2  ;;  %v3760_v47 = vsel %vm3738_vm11, %v3645_v6, %v2287_v38 }
 0x25f   : > { %6531 = vmatprep.mubr.msk.bf16.mxu1 %vm6855_vm6, %v12492_v48  ;;  %v10177_v52 = vor.u32 %v3088_v21, %v3087_v54  ;;  %v12820_v28 = vshrl.u32 %v12819_v24, 16  ;;  %v12821_v38 = vshll.u32 %v12819_v24, 16  ;;  %v12072_v6 = vshrl.u32 %v12822_v63, 16  ;;  %v12823_v21 = vld [vmem:[#allocation125_spill] sm:$0xff] }
 0x260   : > { %v2672_v34 = vpop.permute.xlu0 %2671  ;;  %2300 = vrot.lane.b32.xlu1 %v2189_v39, %s6856_s16  ;;  %v12071_v39 = vshll.u32 %v12822_v63, 16  ;;  %v2463_v33 = vsel %vm2383_vm7, %v10025_v50, %v10161_v23  ;;  %v10189_v11 = vor.u32 %v1913_v37, %v1910_v9  ;;  %v12824_v54 = vld [vmem:[#allocation69_spill] sm:$0xff] }
 0x261   : > { %v3875_v15 = vsel %vm3853_vm12, %v3760_v47, %v2672_v34  ;;  %v2572_v10 = vrot.slane %v12820_v28, 2  ;;  %v2573_v42 = vrot.slane %v12821_v38, 3  ;;  %v12825_v34 = vld [vmem:[#allocation18_spill] sm:$0xff]  ;;  %v3090_v50 = vsel %vm3010_vm3, %v10082_v59, %v10177_v52 }
 0x262   : > { %3366 = vrot.lane.b32.xlu0 %v3198_v57, %s6859_s20  ;;  %v2343_v32 = vpop.permute.xlu1 %2342  ;;  %v3470_v57 = vsel %vm3392_vm8, %v12824_v54, %v12823_v21  ;;  %v3990_v47 = vsel %vm3968_vm13, %v3875_v15, %v2914_v36  ;;  %v3199_v37 = vrot.slane %v12072_v6, 3  ;;  %v3200_v36 = vrot.slane %v12071_v39, 4  ;;  %v12826_v15 = vld [vmem:[#allocation210_spill] sm:$0xff]  ;;  %v12844_v6 = vld [vmem:[#allocation209_spill] sm:$0xff] }
 0x263   : > { %v3586_v28 = vsel %vm3508_vm9, %v3470_v57, %v12825_v34  ;;  %v10203_v9 = vor.u32 %v2573_v42, %v2572_v10  ;;  %v2244_v54 = vrot.slane %v12819_v24, 2  ;;  %v12827_v57 = vld [vmem:[#allocation51_spill] sm:$0xff] }
 0x264   : > { %v3299_v29 = vpop.permute.xlu0 %3298  ;;  %2927 = vrot.lane.b32.xlu1 %v2816_v58, %s6857_s17  ;;  %v3701_v58 = vsel %vm3623_vm10, %v3586_v28, %v12826_v15  ;;  %v12829_v34 = vshll.u32 %v12827_v57, 16  ;;  %v12830_v15 = vrot.slane %v12799_v44, 2 }
 0x265   : > { %v4115_v38 = vsel %vm4083_vm14, %v3990_v47, %v3299_v29  ;;  %v3816_v59 = vsel %vm3738_vm11, %v3701_v58, %v2343_v32  ;;  %v12828_v29 = vshrl.u32 %v12827_v57, 16  ;;  %v2871_v58 = vrot.slane %v12822_v63, 3 }
 0x266   : > { %2685 = vrot.lane.b32.xlu0 %v2463_v33, %s6858_s18  ;;  %6420 = vmatmul.mubr.bf16.gmra.mxu0 %v4115_v38  ;;  %v2970_v21 = vpop.permute.xlu1 %2969  ;;  %v1915_v33 = vsel %vm1493_vm2, %v10053_v3, %v10189_v11  ;;  %v2465_v28 = vrot.slane %v12829_v34, 3  ;;  %v2575_v3 = vsel %vm2383_vm7, %v10110_v13, %v10203_v9  ;;  %v10228_v38 = vor.u32 %v3200_v36, %v3199_v37  ;;  %v12833_v36 = vld [vmem:[#allocation95_spill] sm:$0xff] }
 0x267   : > { %6423 = vmatprep.mubr.msk.bf16.mxu0 %vm6855_vm6, %v12492_v48  ;;  %v2464_v47 = vrot.slane %v12828_v29, 2  ;;  %v12831_v29 = vld [vmem:[#allocation93_spill] sm:$0xff] }
 0x268   : > { %v2728_v10 = vpop.permute.xlu0 %2727  ;;  %3312 = vrot.lane.b32.xlu1 %v3090_v50, %s6859_s20  ;;  %v2245_v50 = vsel %vm2152_vm4, %v12830_v15, %v2244_v54 }
 0x269   : > { %v3931_v42 = vsel %vm3853_vm12, %v3816_v59, %v2728_v10  ;;  %v10242_v37 = vor.u32 %v2465_v28, %v2464_v47 }
 0x26a   : > { %2096 = vrot.lane.b32.xlu0 %v1915_v33, %s6853_s22  ;;  %v2289_v32 = vpop.permute.xlu1 %2288  ;;  %v4046_v10 = vsel %vm3968_vm13, %v3931_v42, %v2970_v21  ;;  %v12832_v33 = vld [vmem:[#allocation27_spill] sm:$0xff]  ;;  %v3202_v21 = vsel %vm3010_vm3, %v10134_v43, %v10228_v38  ;;  %v12834_v42 = vshrl.u32 %v12718_v7, 16 }
 0x26b   : > { %v3416_v34 = vsel %vm3392_vm8, %v12832_v33, %v12831_v29  ;;  %v12835_v29 = vshll.u32 %v12718_v7, 16  ;;  %v12836_v33 = vld [vmem:[#allocation190_spill] sm:$0xff] }
 0x26c   : > { %v3355_v59 = vpop.permute.xlu0 %3354  ;;  %2741 = vrot.lane.b32.xlu1 %v2575_v3, %s6858_s18  ;;  %v3532_v39 = vsel %vm3508_vm9, %v3416_v34, %v12833_v36  ;;  %v1919_v15 = vrot.slane %v12834_v42, 1  ;;  %v12838_v36 = vld [vmem:[#allocation3_spill] sm:$0xff] }
 0x26d   : > { %v4199_v13 = vsel %vm4083_vm14, %v4046_v10, %v3355_v59  ;;  %v1922_v3 = vrot.slane %v12835_v29, 2  ;;  %v3647_v47 = vsel %vm3623_vm10, %v3532_v39, %v12836_v33  ;;  %v12837_v59 = vrot.slane %v12802_v17, 3 }
 0x26e   : > { %2356 = vrot.lane.b32.xlu0 %v2245_v50, %s6856_s16  ;;  %6532 = vmatmul.mubr.bf16.gmra.mxu1 %v4199_v13  ;;  %v2916_v28 = vpop.permute.xlu1 %2915  ;;  %v12075_v10 = vrot.slane %v12827_v57, 2  ;;  %v3762_v43 = vsel %vm3738_vm11, %v3647_v47, %v2289_v32  ;;  %v2467_v39 = vsel %vm2383_vm7, %v10161_v23, %v10242_v37  ;;  %v12074_v42 = vrot.slane %v12838_v36, 3 }
 0x26f   : > { %v2872_v50 = vsel %vm2779_vm5, %v12837_v59, %v2871_v58  ;;  %6535 = vmatprep.mubr.msk.bf16.mxu1 %vm6855_vm6, %v12492_v48  ;;  %v10271_v13 = vor.u32 %v1922_v3, %v1919_v15  ;;  %v12839_v29 = vshrl.u32 %v12838_v36, 16  ;;  %v12840_v32 = vshll.u32 %v12838_v36, 16  ;;  %v12841_v59 = vld [vmem:[#allocation124_spill] sm:$0xff]  ;;  %v12843_v15 = vld [vmem:[#allocation171_spill] sm:$0xff] }
 0x270   : > { %v2674_v34 = vpop.permute.xlu0 %2673  ;;  %3368 = vrot.lane.b32.xlu1 %v3202_v21, %s6859_s20  ;;  %v2191_v23 = vsel %vm2152_vm4, %v2188_v4, %v12075_v10 }
 0x271   : > { %v3877_v7 = vsel %vm3853_vm12, %v3762_v43, %v2674_v34  ;;  %v3091_v33 = vrot.slane %v12839_v29, 3  ;;  %v3092_v47 = vrot.slane %v12840_v32, 4  ;;  %v12842_v43 = vld [vmem:[#allocation70_spill] sm:$0xff]  ;;  %v1924_v4 = vsel %vm1493_vm2, %v10189_v11, %v10271_v13  ;;  %v12848_v11 = vld [vmem:[#allocation13_spill] sm:$0xff] }
 0x272   : > { %2983 = vrot.lane.b32.xlu0 %v2872_v50, %s6857_s17  ;;  %v3472_v21 = vsel %vm3392_vm8, %v12842_v43, %v12841_v59  ;;  %v2345_v34 = vpop.permute.xlu1 %2344  ;;  %v3992_v29 = vsel %vm3968_vm13, %v3877_v7, %v2916_v28  ;;  %v2818_v28 = vsel %vm2779_vm5, %v2815_v1, %v12074_v42  ;;  %v12845_v7 = vld [vmem:[#allocation104_spill] sm:$0xff]  ;;  %v12076_v8 = vshll.u32 %v12848_v11, 16  ;;  %v12851_v42 = vld [vmem:[#allocation151_spill] sm:$0xff] }
 0x273   : > { %v3588_v3 = vsel %vm3508_vm9, %v3472_v21, %v12843_v15  ;;  %v12073_v43 = vrot.slane %v12845_v7, 2  ;;  %v12846_v21 = vshrl.u32 %v12845_v7, 16 }
 0x274   : > { %v3301_v50 = vpop.permute.xlu0 %3300  ;;  %v3703_v32 = vsel %vm3623_vm10, %v3588_v3, %v12844_v6  ;;  %2687 = vrot.lane.b32.xlu1 %v2467_v39, %s6858_s18  ;;  %v10303_v6 = vor.u32 %v3092_v47, %v3091_v33 }
 0x275   : > { %v4118_v59 = vsel %vm4083_vm14, %v3992_v29, %v3301_v50  ;;  %v2576_v15 = vrot.slane %v12846_v21, 2  ;;  %v12077_v50 = vshrl.u32 %v12848_v11, 16  ;;  %v3818_v1 = vsel %vm3738_vm11, %v3703_v32, %v2345_v34 }
 0x276   : > { %2302 = vrot.lane.b32.xlu0 %v2191_v23, %s6856_s16  ;;  %6424 = vmatmul.mubr.bf16.gmra.mxu0 %v4118_v59  ;;  %v2972_v39 = vpop.permute.xlu1 %2971  ;;  %v12847_v23 = vshll.u32 %v12845_v7, 16  ;;  %v2247_v47 = vsel %vm2152_vm4, %v2244_v54, %v12073_v43  ;;  %v12078_v59 = vrot.slane %v12848_v11, 3  ;;  %v3094_v34 = vsel %vm3010_vm3, %v10177_v52, %v10303_v6 }
 0x277   : > { %6427 = vmatprep.mubr.msk.bf16.mxu0 %vm6855_vm6, %v12492_v48 }
 0x278   : > { %v2577_v3 = vrot.slane %v12847_v23, 3  ;;  %v2730_v29 = vpop.permute.xlu0 %2729  ;;  %2098 = vrot.lane.b32.xlu1 %v1924_v4, %s6853_s22  ;;  %v3203_v4 = vrot.slane %v12077_v50, 3  ;;  %v12849_v23 = vld [vmem:[#allocation100_spill] sm:$0xff] }
 0x279   : > { %v3933_v33 = vsel %vm3853_vm12, %v3818_v1, %v2730_v29  ;;  %v12850_v1 = vld [vmem:[#allocation28_spill] sm:$0xff] }
 0x27a   : > { %2929 = vrot.lane.b32.xlu0 %v2818_v28, %s6857_s17  ;;  %v2291_v21 = vpop.permute.xlu1 %2290  ;;  %v10326_v32 = vor.u32 %v2577_v3, %v2576_v15  ;;  %v3204_v28 = vrot.slane %v12076_v8, 4  ;;  %v3418_v29 = vsel %vm3392_vm8, %v12850_v1, %v12849_v23  ;;  %v4048_v43 = vsel %vm3968_vm13, %v3933_v33, %v2972_v39  ;;  %v12852_v15 = vld [vmem:[#allocation193_spill] sm:$0xff]  ;;  %v12853_v39 = vld [vmem:[#allocation55_spill] sm:$0xff] }
 0x27b   : > { %v3534_v10 = vsel %vm3508_vm9, %v3418_v29, %v12851_v42  ;;  %v2874_v23 = vsel %vm2779_vm5, %v2871_v58, %v12078_v59  ;;  %v12080_v33 = vrot.slane %v12853_v39, 2  ;;  %v12863_v59 = vld [vmem:[#allocation73_spill] sm:$0xff] }
 0x27c   : > { %v3357_v54 = vpop.permute.xlu0 %3356  ;;  %2358 = vrot.lane.b32.xlu1 %v2247_v47, %s6856_s16  ;;  %v3649_v3 = vsel %vm3623_vm10, %v3534_v10, %v12852_v15  ;;  %v2579_v42 = vsel %vm2383_vm7, %v10203_v9, %v10326_v32  ;;  %v12854_v10 = vshrl.u32 %v12853_v39, 16  ;;  %v12856_v15 = vld [vmem:[#allocation34_spill] sm:$0xff] }
 0x27d   : > { %v4202_v52 = vsel %vm4083_vm14, %v4048_v43, %v3357_v54  ;;  %v10352_v43 = vor.u32 %v3204_v28, %v3203_v4  ;;  %v3764_v58 = vsel %vm3738_vm11, %v3649_v3, %v2291_v21  ;;  %v12857_v4 = vshrl.u32 %v12856_v15, 16 }
 0x27e   : > { %3314 = vrot.lane.b32.xlu0 %v3094_v34, %s6859_s20  ;;  %6536 = vmatmul.mubr.bf16.gmra.mxu1 %v4202_v52  ;;  %v2918_v1 = vpop.permute.xlu1 %2917  ;;  %v2468_v47 = vrot.slane %v12854_v10, 2  ;;  %v12855_v34 = vshll.u32 %v12853_v39, 16  ;;  %v12858_v10 = vshll.u32 %v12856_v15, 16 }
 0x27f   : > { %6539 = vmatprep.mubr.msk.bf16.mxu1 %vm6855_vm6, %v12492_v48  ;;  %v3095_v28 = vrot.slane %v12857_v4, 3 }
 0x280   : > { %v2469_v29 = vrot.slane %v12855_v34, 3  ;;  %v2676_v54 = vpop.permute.xlu0 %2675  ;;  %2985 = vrot.lane.b32.xlu1 %v2874_v23, %s6857_s17  ;;  %v3096_v8 = vrot.slane %v12858_v10, 4  ;;  %v12859_v34 = vrot.slane %v12827_v57, 2  ;;  %v3206_v23 = vsel %vm3010_vm3, %v10228_v38, %v10352_v43 }
 0x281   : > { %v3879_v52 = vsel %vm3853_vm12, %v3764_v58, %v2676_v54  ;;  %v12860_v54 = vshrl.u32 %v12745_v31, 16  ;;  %v12861_v10 = vshll.u32 %v12745_v31, 16 }
 0x282   : > { %2743 = vrot.lane.b32.xlu0 %v2579_v42, %s6858_s18  ;;  %v2193_v21 = vsel %vm2152_vm4, %v12859_v34, %v12080_v33  ;;  %v2347_v3 = vpop.permute.xlu1 %2346  ;;  %v10377_v58 = vor.u32 %v2469_v29, %v2468_v47  ;;  %v12862_v42 = vld [vmem:[#allocation127_spill] sm:$0xff]  ;;  %v3994_v34 = vsel %vm3968_vm13, %v3879_v52, %v2918_v1  ;;  %v12864_v33 = vld [vmem:[#allocation170_spill] sm:$0xff]  ;;  %v12865_v47 = vrot.slane %v12856_v15, 3 }
 0x283   : > { %v1928_v4 = vrot.slane %v12860_v54, 1  ;;  %v1931_v50 = vrot.slane %v12861_v10, 2  ;;  %v3474_v9 = vsel %vm3392_vm8, %v12863_v59, %v12862_v42  ;;  %v12866_v29 = vrot.slane %v12838_v36, 3  ;;  %v12867_v59 = vld [vmem:[#allocation106_spill] sm:$0xff] }
 0x284   : > { %v3303_v57 = vpop.permute.xlu0 %3302  ;;  %v3590_v24 = vsel %vm3508_vm9, %v3474_v9, %v12864_v33  ;;  %2304 = vrot.lane.b32.xlu1 %v2193_v21, %s6856_s16  ;;  %v10396_v54 = vor.u32 %v3096_v8, %v3095_v28  ;;  %v12868_v1 = vshrl.u32 %v12867_v59, 16  ;;  %v12869_v33 = vshll.u32 %v12867_v59, 16  ;;  %v12870_v21 = vld [vmem:[#allocation12_spill] sm:$0xff] }
 0x285   : > { %v4121_v38 = vsel %vm4083_vm14, %v3994_v34, %v3303_v57  ;;  %v2820_v31 = vsel %vm2779_vm5, %v12866_v29, %v12865_v47  ;;  %v12083_v10 = vshrl.u32 %v12870_v21, 16  ;;  %v12082_v57 = vshll.u32 %v12870_v21, 16  ;;  %v12871_v29 = vld [vmem:[#allocation24_spill] sm:$0xff] }
 0x286   : > { %3370 = vrot.lane.b32.xlu0 %v3206_v23, %s6859_s20  ;;  %6428 = vmatmul.mubr.bf16.gmra.mxu0 %v4121_v38  ;;  %v2580_v52 = vrot.slane %v12868_v1, 2  ;;  %v2581_v9 = vrot.slane %v12869_v33, 3  ;;  %v3705_v36 = vsel %vm3623_vm10, %v3590_v24, %v9228_v46  ;;  %v2974_v42 = vpop.permute.xlu1 %2973  ;;  %v2471_v8 = vsel %vm2383_vm7, %v10242_v37, %v10377_v58  ;;  %v12873_v33 = vld [vmem:[#allocation153_spill] sm:$0xff] }
 0x287   : > { %v10410_v28 = vor.u32 %v1931_v50, %v1928_v4  ;;  %6431 = vmatprep.mubr.msk.bf16.mxu0 %vm6855_vm6, %v12492_v48  ;;  %v3820_v23 = vsel %vm3738_vm11, %v3705_v36, %v2347_v3  ;;  %v3098_v46 = vsel %vm3010_vm3, %v10303_v6, %v10396_v54  ;;  %v3207_v37 = vrot.slane %v12083_v10, 3  ;;  %v12882_v10 = vld [vmem:[#allocation126_spill] sm:$0xff] }
 0x288   : > { %v2732_v34 = vpop.permute.xlu0 %2731  ;;  %2931 = vrot.lane.b32.xlu1 %v2820_v31, %s6857_s17  ;;  %v10421_v24 = vor.u32 %v2581_v9, %v2580_v52  ;;  %v3208_v50 = vrot.slane %v12082_v57, 4  ;;  %v12084_v47 = vrot.slane %v12867_v59, 2  ;;  %v12872_v31 = vld [vmem:[#allocation33_spill] sm:$0xff] }
 0x289   : > { %v3935_v38 = vsel %vm3853_vm12, %v3820_v23, %v2732_v34  ;;  %v1933_v4 = vsel %vm1493_vm2, %v10271_v13, %v10410_v28  ;;  %v3420_v1 = vsel %vm3392_vm8, %v12872_v31, %v12871_v29  ;;  %v10442_v13 = vld [vmem:[%s11750_s2] ss:$0 sm:$0xff]  ;;  %v12874_v34 = vld [vmem:[#allocation56_spill] sm:$0xff] }
 0x28a   : > { %2689 = vrot.lane.b32.xlu0 %v2471_v8, %s6858_s18  ;;  %v2293_v3 = vpop.permute.xlu1 %2292  ;;  %v4050_v52 = vsel %vm3968_vm13, %v3935_v38, %v2974_v42  ;;  %v3536_v9 = vsel %vm3508_vm9, %v3420_v1, %v12873_v33  ;;  %v2583_v42 = vsel %vm2383_vm7, %v10326_v32, %v10421_v24  ;;  %v10448_v23 = vor.u32 %v3208_v50, %v3207_v37  ;;  %v12877_v1 = vld [vmem:[#allocation192_spill] sm:$0xff] }
 0x28b   : > { %v12875_v38 = vshrl.u32 %v12874_v34, 16  ;;  %v12876_v29 = vshll.u32 %v12874_v34, 16  ;;  %v12086_v32 = vrot.slane %v12870_v21, 3 }
 0x28c   : > { %v3359_v6 = vpop.permute.xlu0 %3358  ;;  %3316 = vrot.lane.b32.xlu1 %v3098_v46, %s6859_s20 }
 0x28d   : > { %v4205_v36 = vsel %vm4083_vm14, %v4050_v52, %v3359_v6  ;;  %v2472_v46 = vrot.slane %v12875_v38, 2  ;;  %v2473_v31 = vrot.slane %v12876_v29, 3  ;;  %v3651_v6 = vsel %vm3623_vm10, %v3536_v9, %v12877_v1 }
 0x28e   : > { %v4360_v8 = vpop.f32.mrf.mxu0  ;;  %2100 = vrot.lane.b32.xlu0 %v1933_v4, %s6853_s22  ;;  %6540 = vmatmul.mubr.bf16.gmra.mxu1 %v4205_v36  ;;  %v2920_v52 = vpop.permute.xlu1 %2919  ;;  %v12878_v4 = vrot.slane %v12845_v7, 2  ;;  %v3766_v37 = vsel %vm3738_vm11, %v3651_v6, %v2293_v3  ;;  %v3210_v1 = vsel %vm3010_vm3, %v10352_v43, %v10448_v23  ;;  %v12879_v3 = vshrl.u32 %v12768_v2, 16  ;;  %v12884_v7 = vld [vmem:[#allocation172_spill] sm:$0xff] }
 0x28f   : > { %6543 = vmatprep.mubr.msk.bf16.mxu1 %vm6855_vm6, %v12492_v48  ;;  %v4361_v38 = vadd.f32 %v10442_v13, %v4360_v8  ;;  %v12087_v43 = vrot.slane %v12874_v34, 2 }
 0x290   : > { %v2249_v33 = vsel %vm2152_vm4, %v12878_v4, %v12084_v47  ;;  %v6381_v50 = vpop.f32.mrf.mxu0  ;;  %v2678_v36 = vpop.permute.xlu0 %2677  ;;  %2745 = vrot.lane.b32.xlu1 %v2583_v42, %s6858_s18  ;;  %v10473_v4 = vor.u32 %v2473_v31, %v2472_v46  ;;  %v1937_v6 = vrot.slane %v12879_v3, 1  ;;  %v12881_v42 = vrot.slane %v12848_v11, 3 }
 0x291   : > { %v3881_v9 = vsel %vm3853_vm12, %v3766_v37, %v2678_v36  ;;  %v12880_v50 = vshll.u32 %v12768_v2, 16  ;;  %v12883_v2 = vld [vmem:[#allocation71_spill] sm:$0xff] }
 0x292   : > { %v4363_v29 = vpop.f32.mrf.mxu0  ;;  %2360 = vrot.lane.b32.xlu0 %v2249_v33, %s6856_s16  ;;  %v3305_v36 = vpop.permute.xlu1 %3304  ;;  %v2876_v33 = vsel %vm2779_vm5, %v12881_v42, %v12086_v32  ;;  %v3996_v57 = vsel %vm3968_vm13, %v3881_v9, %v2920_v52 }
 0x293   : > { %v1940_v8 = vrot.slane %v12880_v50, 2  ;;  %v4364_v37 = vadd.f32 %v10442_v13, %v4363_v29  ;;  %v4124_v3 = vsel %vm4083_vm14, %v3996_v57, %v3305_v36  ;;  %v3476_v50 = vsel %vm3392_vm8, %v12883_v2, %v12882_v10 }
 0x294   : > { %v6382_v46 = vpop.f32.mrf.mxu0  ;;  %v2089_v31 = vpop.permute.xlu0 %2088  ;;  %v4814_v29 = vmax.f32 %v4361_v38, 0.0  ;;  %3372 = vrot.lane.b32.xlu1 %v3210_v1, %s6859_s20  ;;  %6432 = vmatmul.mubr.bf16.gmra.mxu0 %v4124_v3  ;;  %v3592_v42 = vsel %vm3508_vm9, %v3476_v50, %v12884_v7  ;;  %v2475_v10 = vsel %vm2383_vm7, %v10377_v58, %v10473_v4  ;;  %v12885_v38 = vld [vmem:[#allocation108_spill] sm:$0xff]  ;;  %v12889_v50 = vld [vmem:[#allocation105_spill] sm:$0xff] }
 0x295   : > { %v4815_v47 = vmax.f32 %v4364_v37, 0.0  ;;  %v10503_v57 = vor.u32 %v1940_v8, %v1937_v6  ;;  %6435 = vmatprep.mubr.msk.bf16.mxu0 %vm6855_vm6, %v12492_v48  ;;  %v12886_v37 = vrot.slane %v12853_v39, 2  ;;  %v12888_v58 = vshll.u32 %v12885_v38, 16 }
 0x296   : > { %v4368_v52 = vpop.f32.mrf.mxu0  ;;  %2987 = vrot.lane.b32.xlu0 %v2876_v33, %s6857_s17  ;;  %v2734_v1 = vpop.permute.xlu1 %2733  ;;  %v12887_v33 = vshrl.u32 %v12885_v38, 16  ;;  %v3707_v8 = vsel %vm3623_vm10, %v3592_v42, %v2089_v31  ;;  %v12890_v42 = vrot.slane %v12885_v38, 3 }
 0x297   : > { %v5966_v7 = vpack.c.bf16 %v4815_v47, %v4814_v29  ;;  %v2195_v36 = vsel %vm2152_vm4, %v12886_v37, %v12087_v43  ;;  %v3100_v6 = vrot.slane %v12888_v58, 4  ;;  %v4369_v29 = vadd.f32 %v10442_v13, %v4368_v52 }
 0x298   : > { %v3099_v46 = vrot.slane %v12887_v33, 3  ;;  %v6385_v3 = vpop.f32.mrf.mxu0  ;;  %v2349_v2 = vpop.permute.xlu0 %2348  ;;  %2691 = vrot.lane.b32.xlu1 %v2475_v10, %s6858_s18  ;;  %v1942_v31 = vsel %vm1493_vm2, %v10410_v28, %v10503_v57  ;;  %v12891_v33 = vrot.slane %v12856_v15, 3  ;;  %v12895_v15 = vshrl.u32 %v12889_v50, 16 }
 0x299   : > { %5967 = vst [vmem:[%s10497_s26] sm:$0xff] %v5966_v7   ;;  %v3822_v9 = vsel %vm3738_vm11, %v3707_v8, %v2349_v2  ;;  %v12892_v7 = vld [vmem:[#allocation107_spill] sm:$0xff]  ;;  %v4816_v3 = vmax.f32 %v4369_v29, 0.0 }
 0x29a   : > { %v4371_v37 = vpop.f32.mrf.mxu0  ;;  %2306 = vrot.lane.b32.xlu0 %v2195_v36, %s6856_s16  ;;  %v2822_v58 = vsel %vm2779_vm5, %v12891_v33, %v12890_v42  ;;  %v3361_v8 = vpop.permute.xlu1 %3360  ;;  %v10535_v2 = vor.u32 %v3100_v6, %v3099_v46  ;;  %v12893_v10 = vshrl.u32 %v12892_v7, 16  ;;  %v12894_v43 = vshll.u32 %v12892_v7, 16 }
 0x29b   : > { %v4372_v52 = vadd.f32 %v10442_v13, %v4371_v37  ;;  %v3937_v32 = vsel %vm3853_vm12, %v3822_v9, %v2734_v1  ;;  %v3211_v42 = vrot.slane %v12895_v15, 3  ;;  %v12896_v33 = vshll.u32 %v12889_v50, 16 }
 0x29c   : > { %v2584_v36 = vrot.slane %v12893_v10, 2  ;;  %v2585_v47 = vrot.slane %v12894_v43, 3  ;;  %v6386_v28 = vpop.f32.mrf.mxu0  ;;  %v2976_v39 = vpop.permute.xlu0 %2975  ;;  %2102 = vrot.lane.b32.xlu1 %v1942_v31, %s6853_s22  ;;  %v12897_v9 = vrot.slane %v12892_v7, 2  ;;  %v12898_v1 = vrot.slane %v12867_v59, 2  ;;  %v325_v31 = vld [vmem:[%s6904_s19 + $0x1c4] sm:$0xf] }
 0x29d   : > { %v3212_v37 = vrot.slane %v12896_v33, 4  ;;  %v4817_v46 = vmax.f32 %v4372_v52, 0.0  ;;  %v4052_v6 = vsel %vm3968_vm13, %v3937_v32, %v2976_v39  ;;  %v3102_v39 = vsel %vm3010_vm3, %v10396_v54, %v10535_v2 }
 0x29e   : > { %v4592_v10 = vpop.f32.mrf.mxu1  ;;  %2933 = vrot.lane.b32.xlu0 %v2822_v58, %s6857_s17  ;;  %v4208_v43 = vsel %vm4083_vm14, %v4052_v6, %v3361_v8  ;;  %v2251_v28 = vsel %vm2152_vm4, %v12898_v1, %v12897_v9  ;;  %v2680_v52 = vpop.permute.xlu1 %2679  ;;  %v10559_v32 = vor.u32 %v2585_v47, %v2584_v36  ;;  %v12899_v58 = vld [vmem:[#allocation96_spill] sm:$0xff]  ;;  %v12900_v8 = vld [vmem:[#allocation35_spill] sm:$0xff] }
 0x29f   : > { %v5971_v29 = vpack.c.bf16 %v4817_v46, %v4816_v3  ;;  %6544 = vmatmul.mubr.bf16.gmra.mxu1 %v4208_v43  ;;  %v3422_v33 = vsel %vm3392_vm8, %v12900_v8, %v12899_v58  ;;  %v12901_v9 = vld [vmem:[#allocation59_spill] sm:$0xff]  ;;  %v10566_v15 = vor.u32 %v3212_v37, %v3211_v42  ;;  %v12902_v3 = vld [vmem:[#allocation152_spill] sm:$0xff]  ;;  %v4593_v47 = vadd.f32 %v10442_v13, %v4592_v10  ;;  %v12907_v10 = vld [vmem:[#allocation129_spill] sm:$0xff] }
 0x2a0   : > { %v6497_v6 = vpop.f32.mrf.mxu1  ;;  %v2295_v59 = vpop.permute.xlu0 %2294  ;;  %6547 = vmatprep.mubr.msk.bf16.mxu1 %vm6855_vm6, %v12492_v48  ;;  %v3538_v54 = vsel %vm3508_vm9, %v3422_v33, %v12902_v3  ;;  %2362 = vrot.lane.b32.xlu1 %v2251_v28, %s6856_s16  ;;  %v12903_v46 = vrot.slane %v12889_v50, 3  ;;  %v12904_v42 = vrot.slane %v12870_v21, 3  ;;  %v12905_v43 = vshrl.u32 %v12901_v9, 16 }
 0x2a1   : > { %6243 = vst [vmem:[%s10497_s26 + $0x8] sm:$0xff] %v5971_v29   ;;  %v12906_v8 = vshll.u32 %v12901_v9, 16  ;;  %v6823_v29 = vld [vmem:[%s6904_s19 + $0x1c0] sm:$0xf]  ;;  %v3478_v28 = vsel %vm3392_vm8, %v12624_v51, %v12907_v10  ;;  %v12909_v44 = vrot.slane %v12901_v9, 2  ;;  %v12910_v51 = vrot.slane %v12874_v34, 2 }
 0x2a2   : > { %v4595_v36 = vpop.f32.mrf.mxu1  ;;  %3318 = vrot.lane.b32.xlu0 %v3102_v39, %s6859_s20  ;;  %v2878_v37 = vsel %vm2779_vm5, %v12904_v42, %v12903_v46  ;;  %v2476_v58 = vrot.slane %v12905_v43, 2  ;;  %v10586_v6 = vcombine.low %v6823_v29, %v325_v31  ;;  %v12908_v39 = vld [vmem:[#allocation195_spill] sm:$0xff]  ;;  %v2091_v49 = vpop.permute.xlu1 %2090  ;;  %v2587_v46 = vsel %vm2383_vm7, %v10421_v24, %v10559_v32 }
 0x2a3   : > { %v2477_v33 = vrot.slane %v12906_v8, 3  ;;  %v3653_v3 = vsel %vm3623_vm10, %v3538_v54, %v12908_v39  ;;  %v4596_v1 = vadd.f32 %v10442_v13, %v4595_v36  ;;  %v10598_v42 = vld [vmem:[%s6904_s19 + $0x1c8] sm:$0xf]  ;;  %v2197_v10 = vsel %vm2152_vm4, %v12910_v51, %v12909_v44 }
 0x2a4   : > { %v3768_v43 = vsel %vm3738_vm11, %v3653_v3, %v2295_v59  ;;  %v6498_v8 = vpop.f32.mrf.mxu1  ;;  %v2922_v29 = vpop.permute.xlu0 %2921  ;;  %v3214_v54 = vsel %vm3010_vm3, %v10448_v23, %v10566_v15  ;;  %v12911_v36 = vld [vmem:[#allocation43_spill] sm:$0xff]  ;;  %v4872_v20 = vmax.f32 %v4593_v47, 0.0  ;;  %2989 = vrot.lane.b32.xlu1 %v2878_v37, %s6857_s17  ;;  %v2589_v23 = vshrl.u32 %v10586_v6, 16 }
 0x2a5   : > { %v4873_v24 = vmax.f32 %v4596_v1, 0.0  ;;  %v12912_v59 = vshrl.u32 %v12911_v36, 16  ;;  %v12913_v8 = vshll.u32 %v12911_v36, 16  ;;  %v10616_v44 = vor.u32 %v2477_v33, %v2476_v58 }
 0x2a6   : > { %v4376_v34 = vpop.f32.mrf.mxu0  ;;  %2747 = vrot.lane.b32.xlu0 %v2587_v46, %s6858_s18  ;;  %v2592_v51 = vshll.u32 %v10586_v6, 16  ;;  %v10621_v1 = vcombine.low %v325_v31, %v10598_v42  ;;  %v3883_v37 = vsel %vm3853_vm12, %v3768_v43, %v2680_v52  ;;  %v12914_v39 = vshrl.u32 %v12782_v55, 16  ;;  %v12916_v46 = vld [vmem:[#allocation19_spill] sm:$0xff] }
 0x2a7   : > { %v3103_v3 = vrot.slane %v12912_v59, 3  ;;  %v3104_v22 = vrot.slane %v12913_v8, 4  ;;  %v6111_v47 = vpack.c.bf16 %v4873_v24, %v4872_v20  ;;  %v2351_v59 = vpop.permute.xlu1 %2350  ;;  %v3594_v58 = vsel %vm3508_vm9, %v3478_v28, %v12916_v46 }
 0x2a8   : > { %v1946_v8 = vrot.slane %v12914_v39, 1  ;;  %v3998_v33 = vsel %vm3968_vm13, %v3883_v37, %v2922_v29  ;;  %v6389_v0 = vpop.f32.mrf.mxu0  ;;  %v3307_v19 = vpop.permute.xlu0 %3306  ;;  %v4377_v31 = vadd.f32 %v10442_v13, %v4376_v34  ;;  %2308 = vrot.lane.b32.xlu1 %v2197_v10, %s6856_s16  ;;  %v12917_v52 = vrot.slane %v12911_v36, 3 }
 0x2a9   : > { %6271 = vst [vmem:[%s10497_s26 + $0xe8] sm:$0xff] %v6111_v47   ;;  %v4127_v20 = vsel %vm4083_vm14, %v3998_v33, %v3307_v19  ;;  %v12918_v43 = vrot.slane %v12885_v38, 3  ;;  %v10640_v55 = vor.u32 %v3104_v22, %v3103_v3  ;;  %v2591_v0 = vrot.slane %v2589_v23, 2 }
 0x2aa   : > { %v4379_v28 = vpop.f32.mrf.mxu0  ;;  %3374 = vrot.lane.b32.xlu0 %v3214_v54, %s6859_s20  ;;  %6436 = vmatmul.mubr.bf16.gmra.mxu0 %v4127_v20  ;;  %v2594_v29 = vrot.slane %v2592_v51, 3  ;;  %v3216_v34 = vshrl.u32 %v10621_v1, 16  ;;  %v3219_v10 = vshll.u32 %v10621_v1, 16  ;;  %v3709_v19 = vsel %vm3623_vm10, %v3594_v58, %v2091_v49  ;;  %v12919_v20 = vld [vmem:[#allocation101_spill] sm:$0xff] }
 0x2ab   : > { %v2824_v35 = vsel %vm2779_vm5, %v12918_v43, %v12917_v52  ;;  %v4380_v39 = vadd.f32 %v10442_v13, %v4379_v28  ;;  %v2978_v24 = vpop.permute.xlu1 %2977  ;;  %v2479_v22 = vsel %vm2383_vm7, %v10473_v4, %v10616_v44  ;;  %v10650_v38 = vor.u32 %v1949_v16, %v1946_v8  ;;  %6439 = vmatprep.mubr.msk.bf16.mxu0 %vm6855_vm6, %v12492_v48  ;;  %v12920_v28 = vld [vmem:[#allocation155_spill] sm:$0xff] }
 0x2ac   : > { %v3824_v54 = vsel %vm3738_vm11, %v3709_v19, %v2351_v59  ;;  %v6390_v3 = vpop.f32.mrf.mxu0  ;;  %v2736_v23 = vpop.permute.xlu0 %2735  ;;  %v4818_v51 = vmax.f32 %v4377_v31, 0.0  ;;  %2935 = vrot.lane.b32.xlu1 %v2824_v35, %s6857_s17  ;;  %v3106_v16 = vsel %vm3010_vm3, %v10535_v2, %v10640_v55  ;;  %v10661_v4 = vor.u32 %v2594_v29, %v2591_v0 }
 0x2ad   : > { %v4819_v47 = vmax.f32 %v4380_v39, 0.0  ;;  %v3939_v49 = vsel %vm3853_vm12, %v3824_v54, %v2736_v23  ;;  %v3218_v8 = vrot.slane %v3216_v34, 3  ;;  %v3221_v59 = vrot.slane %v3219_v10, 4  ;;  %v12923_v54 = vld [vmem:[#allocation194_spill] sm:$0xff] }
 0x2ae   : > { %v4600_v37 = vpop.f32.mrf.mxu1  ;;  %2693 = vrot.lane.b32.xlu0 %v2479_v22, %s6858_s18  ;;  %v1951_v33 = vsel %vm1493_vm2, %v10503_v57, %v10650_v38  ;;  %v2252_v31 = vrot.slane %v10586_v6, 2  ;;  %v3424_v52 = vsel %vm3392_vm8, %v12630_v62, %v12919_v20  ;;  %v4054_v2 = vsel %vm3968_vm13, %v3939_v49, %v2978_v24 }
 0x2af   : > { %v5976_v46 = vpack.c.bf16 %v4819_v47, %v4818_v51  ;;  %v2297_v58 = vpop.permute.xlu1 %2296  ;;  %v3540_v0 = vsel %vm3508_vm9, %v3424_v52, %v12920_v28  ;;  %v4601_v29 = vadd.f32 %v10442_v13, %v4600_v37  ;;  %v2596_v62 = vsel %vm2383_vm7, %v10559_v32, %v10661_v4 }
 0x2b0   : > { %v6501_v43 = vpop.f32.mrf.mxu1  ;;  %v3363_v35 = vpop.permute.xlu0 %3362  ;;  %3320 = vrot.lane.b32.xlu1 %v3106_v16, %s6859_s20  ;;  %v10681_v10 = vor.u32 %v3221_v59, %v3218_v8  ;;  %v12921_v19 = vshrl.u32 %v12651_v12, 16  ;;  %v12922_v24 = vshll.u32 %v12651_v12, 16  ;;  %v3655_v3 = vsel %vm3623_vm10, %v3540_v0, %v12923_v54  ;;  %v328_v59 = vld [vmem:[%s6904_s19 + $0x1cc] sm:$0xf] }
 0x2b1   : > { %6244 = vst [vmem:[%s10497_s26 + $0x10] sm:$0xff] %v5976_v46   ;;  %v4211_v57 = vsel %vm4083_vm14, %v4054_v2, %v3363_v35  ;;  %v12924_v47 = vrot.slane %v12892_v7, 2  ;;  %v2879_v49 = vrot.slane %v10621_v1, 3  ;;  %v3770_v37 = vsel %vm3738_vm11, %v3655_v3, %v2297_v58  ;;  %v10704_v43 = vld [vmem:[%s6904_s19 + $0x1d0] sm:$0xf]  ;;  %v12940_v1 = vld [vmem:[#allocation131_spill] sm:$0xff] }
 0x2b2   : > { %v4603_v34 = vpop.f32.mrf.mxu1  ;;  %2104 = vrot.lane.b32.xlu0 %v1951_v33, %s6853_s22  ;;  %6548 = vmatmul.mubr.bf16.gmra.mxu1 %v4211_v57  ;;  %v2480_v39 = vrot.slane %v12921_v19, 2  ;;  %v2481_v22 = vrot.slane %v12922_v24, 3  ;;  %v4874_v46 = vmax.f32 %v4601_v29, 0.0  ;;  %v2198_v52 = vrot.slane %v12651_v12, 2 }
 0x2b3   : > { %v4604_v23 = vadd.f32 %v10442_v13, %v4603_v34  ;;  %v2924_v51 = vpop.permute.xlu1 %2923  ;;  %v2253_v32 = vsel %vm2152_vm4, %v12924_v47, %v2252_v31  ;;  %6551 = vmatprep.mubr.msk.bf16.mxu1 %vm6855_vm6, %v12492_v48  ;;  %v3223_v58 = vsel %vm3010_vm3, %v10566_v15, %v10681_v10  ;;  %v12925_v28 = vshrl.u32 %v12802_v17, 16 }
 0x2b4   : > { %v6502_v16 = vpop.f32.mrf.mxu1  ;;  %v2682_v8 = vpop.permute.xlu0 %2681  ;;  %2749 = vrot.lane.b32.xlu1 %v2596_v62, %s6858_s18  ;;  %v10710_v2 = vor.u32 %v2481_v22, %v2480_v39  ;;  %v12926_v29 = vshll.u32 %v12802_v17, 16  ;;  %v12927_v19 = vrot.slane %v12889_v50, 3  ;;  %v10723_v15 = vcombine.low %v10598_v42, %v328_v59  ;;  %v12928_v39 = vld [vmem:[#allocation128_spill] sm:$0xff] }
 0x2b5   : > { %v4875_v33 = vmax.f32 %v4604_v23, 0.0  ;;  %v3885_v20 = vsel %vm3853_vm12, %v3770_v37, %v2682_v8  ;;  %v1955_v0 = vrot.slane %v12925_v28, 1  ;;  %v3480_v22 = vsel %vm3392_vm8, %v12637_v14, %v12928_v39 }
 0x2b6   : > { %v4384_v35 = vpop.f32.mrf.mxu0  ;;  %2364 = vrot.lane.b32.xlu0 %v2253_v32, %s6856_s16  ;;  %v1958_v57 = vrot.slane %v12926_v29, 2  ;;  %v2880_v24 = vsel %vm2779_vm5, %v12927_v19, %v2879_v49  ;;  %v4000_v54 = vsel %vm3968_vm13, %v3885_v20, %v2924_v51  ;;  %v10730_v47 = vcombine.low %v328_v59, %v10704_v43  ;;  %v12929_v32 = vld [vmem:[#allocation174_spill] sm:$0xff] }
 0x2b7   : > { %v6116_v34 = vpack.c.bf16 %v4875_v33, %v4874_v46  ;;  %v3309_v62 = vpop.permute.xlu1 %3308  ;;  %v3596_v37 = vsel %vm3508_vm9, %v3480_v22, %v12929_v32  ;;  %v4385_v51 = vadd.f32 %v10442_v13, %v4384_v35  ;;  %v12930_v14 = vrot.slane %v12901_v9, 2  ;;  %v12931_v46 = vld [vmem:[#allocation109_spill] sm:$0xff] }
 0x2b8   : > { %v6393_v3 = vpop.f32.mrf.mxu0  ;;  %v2093_v17 = vpop.permute.xlu0 %2092  ;;  %v4130_v23 = vsel %vm4083_vm14, %v4000_v54, %v3309_v62  ;;  %3376 = vrot.lane.b32.xlu1 %v3223_v58, %s6859_s20  ;;  %v2483_v8 = vsel %vm2383_vm7, %v10616_v44, %v10710_v2  ;;  %v10746_v59 = vor.u32 %v1958_v57, %v1955_v0  ;;  %v2825_v33 = vrot.slane %v12931_v46, 3 }
 0x2b9   : > { %6272 = vst [vmem:[%s10497_s26 + $0xf0] sm:$0xff] %v6116_v34   ;;  %6440 = vmatmul.mubr.bf16.gmra.mxu0 %v4130_v23  ;;  %v2199_v42 = vsel %vm2152_vm4, %v12930_v14, %v2198_v52  ;;  %v12932_v20 = vshrl.u32 %v12931_v46, 16  ;;  %v12933_v29 = vshll.u32 %v12931_v46, 16  ;;  %v2598_v62 = vshrl.u32 %v10723_v15, 16 }
 0x2ba   : > { %v4387_v16 = vpop.f32.mrf.mxu0  ;;  %2991 = vrot.lane.b32.xlu0 %v2880_v24, %s6857_s17  ;;  %6443 = vmatprep.mubr.msk.bf16.mxu0 %vm6855_vm6, %v12492_v48  ;;  %v2601_v44 = vshll.u32 %v10723_v15, 16  ;;  %v3711_v0 = vsel %vm3623_vm10, %v3596_v37, %v2093_v17  ;;  %v3225_v24 = vshrl.u32 %v10730_v47, 16  ;;  %v3228_v54 = vshll.u32 %v10730_v47, 16 }
 0x2bb   : > { %v3107_v35 = vrot.slane %v12932_v20, 3  ;;  %v4388_v58 = vadd.f32 %v10442_v13, %v4387_v16  ;;  %v2738_v28 = vpop.permute.xlu1 %2737  ;;  %v3108_v34 = vrot.slane %v12933_v29, 4  ;;  %v4820_v39 = vmax.f32 %v4385_v51, 0.0 }
 0x2bc   : > { %v6394_v57 = vpop.f32.mrf.mxu0  ;;  %v2353_v19 = vpop.permute.xlu0 %2352  ;;  %2695 = vrot.lane.b32.xlu1 %v2483_v8, %s6858_s18  ;;  %v1960_v17 = vsel %vm1493_vm2, %v10650_v38, %v10746_v59  ;;  %v12934_v32 = vrot.slane %v12911_v36, 3  ;;  %v2254_v51 = vrot.slane %v10723_v15, 2  ;;  %v2600_v8 = vrot.slane %v2598_v62, 2 }
 0x2bd   : > { %v4821_v22 = vmax.f32 %v4388_v58, 0.0  ;;  %v3826_v3 = vsel %vm3738_vm11, %v3711_v0, %v2353_v19  ;;  %v10773_v20 = vor.u32 %v3108_v34, %v3107_v35  ;;  %v2603_v58 = vrot.slane %v2601_v44, 3 }
 0x2be   : > { %v4608_v23 = vpop.f32.mrf.mxu1  ;;  %2310 = vrot.lane.b32.xlu0 %v2199_v42, %s6856_s16  ;;  %v2826_v37 = vsel %vm2779_vm5, %v12934_v32, %v2825_v33  ;;  %v3941_v42 = vsel %vm3853_vm12, %v3826_v3, %v2738_v28  ;;  %v3227_v38 = vrot.slane %v3225_v24, 3  ;;  %v3230_v57 = vrot.slane %v3228_v54, 4  ;;  %v330_v54 = vld [vmem:[%s6904_s19 + $0x1d4] sm:$0xf]  ;;  %v12935_v3 = vld [vmem:[#allocation103_spill] sm:$0xff]  ;;  %v12936_v32 = vld [vmem:[#allocation154_spill] sm:$0xff] }
 0x2bf   : > { %v5981_v14 = vpack.c.bf16 %v4821_v22, %v4820_v39  ;;  %v3365_v16 = vpop.permute.xlu1 %3364  ;;  %v4609_v36 = vadd.f32 %v10442_v13, %v4608_v23  ;;  %v2255_v28 = vsel %vm2152_vm4, %v2252_v31, %v2254_v51  ;;  %v2881_v34 = vrot.slane %v10730_v47, 3 }
 0x2c0   : > { %v6505_v29 = vpop.f32.mrf.mxu1  ;;  %v2980_v0 = vpop.permute.xlu0 %2979  ;;  %2106 = vrot.lane.b32.xlu1 %v1960_v17, %s6853_s22  ;;  %v3110_v24 = vsel %vm3010_vm3, %v10640_v55, %v10773_v20  ;;  %v10793_v22 = vor.u32 %v2603_v58, %v2600_v8  ;;  %v3426_v23 = vsel %vm3392_vm8, %v12647_v41, %v12935_v3  ;;  %v10798_v31 = vor.u32 %v3230_v57, %v3227_v38  ;;  %v12939_v57 = vld [vmem:[#allocation197_spill] sm:$0xff] }
 0x2c1   : > { %6245 = vst [vmem:[%s10497_s26 + $0x18] sm:$0xff] %v5981_v14   ;;  %v4056_v19 = vsel %vm3968_vm13, %v3941_v42, %v2980_v0  ;;  %v4876_v14 = vmax.f32 %v4609_v36, 0.0  ;;  %v10808_v41 = vcombine.low %v10704_v43, %v330_v54  ;;  %v2882_v58 = vsel %vm2779_vm5, %v2879_v49, %v2881_v34 }
 0x2c2   : > { %v4611_v39 = vpop.f32.mrf.mxu1  ;;  %2937 = vrot.lane.b32.xlu0 %v2826_v37, %s6857_s17  ;;  %v4214_v35 = vsel %vm4083_vm14, %v4056_v19, %v3365_v16  ;;  %v3542_v37 = vsel %vm3508_vm9, %v3426_v23, %v12936_v32  ;;  %v2200_v16 = vrot.slane %v12668_v18, 2  ;;  %v12937_v29 = vshrl.u32 %v12668_v18, 16  ;;  %v12941_v23 = vld [vmem:[#allocation110_spill] sm:$0xff] }
 0x2c3   : > { %v4612_v62 = vadd.f32 %v10442_v13, %v4611_v39  ;;  %6552 = vmatmul.mubr.bf16.gmra.mxu1 %v4214_v35  ;;  %v2684_v44 = vpop.permute.xlu1 %2683  ;;  %v12938_v0 = vshll.u32 %v12668_v18, 16  ;;  %v3657_v36 = vsel %vm3623_vm10, %v3542_v37, %v12939_v57  ;;  %v2605_v43 = vsel %vm2383_vm7, %v10661_v4, %v10793_v22  ;;  %v10825_v35 = vld [vmem:[%s6904_s19 + $0x1d8] sm:$0xf] }
 0x2c4   : > { %v6506_v6 = vpop.f32.mrf.mxu1  ;;  %v2299_v17 = vpop.permute.xlu0 %2298  ;;  %6555 = vmatprep.mubr.msk.bf16.mxu1 %vm6855_vm6, %v12492_v48  ;;  %2366 = vrot.lane.b32.xlu1 %v2255_v28, %s6856_s16  ;;  %v2484_v42 = vrot.slane %v12937_v29, 2  ;;  %v3482_v49 = vsel %vm3392_vm8, %v12656_v53, %v12940_v1  ;;  %v3232_v3 = vsel %vm3010_vm3, %v10681_v10, %v10798_v31  ;;  %v2201_v53 = vsel %vm2152_vm4, %v2198_v52, %v2200_v16 }
 0x2c5   : > { %v4877_v55 = vmax.f32 %v4612_v62, 0.0  ;;  %v2485_v38 = vrot.slane %v12938_v0, 3  ;;  %v3772_v28 = vsel %vm3738_vm11, %v3657_v36, %v2299_v17  ;;  %v2827_v6 = vrot.slane %v12941_v23, 3 }
 0x2c6   : > { %v4392_v8 = vpop.f32.mrf.mxu0  ;;  %3322 = vrot.lane.b32.xlu0 %v3110_v24, %s6859_s20  ;;  %v12942_v4 = vshrl.u32 %v12941_v23, 16  ;;  %v12943_v37 = vshll.u32 %v12941_v23, 16  ;;  %v10853_v29 = vcombine.low %v330_v54, %v10825_v35  ;;  %v3887_v12 = vsel %vm3853_vm12, %v3772_v28, %v2684_v44 }
 0x2c7   : > { %v6121_v19 = vpack.c.bf16 %v4877_v55, %v4876_v14  ;;  %v2095_v39 = vpop.permute.xlu1 %2094  ;;  %v4393_v32 = vadd.f32 %v10442_v13, %v4392_v8  ;;  %v10848_v55 = vor.u32 %v2485_v38, %v2484_v42  ;;  %v2607_v8 = vshrl.u32 %v10808_v41, 16  ;;  %v12946_v42 = vld [vmem:[#allocation173_spill] sm:$0xff] }
 0x2c8   : > { %v6397_v62 = vpop.f32.mrf.mxu0  ;;  %v2926_v24 = vpop.permute.xlu0 %2925  ;;  %2993 = vrot.lane.b32.xlu1 %v2882_v58, %s6857_s17  ;;  %v3111_v17 = vrot.slane %v12942_v4, 3  ;;  %v3112_v14 = vrot.slane %v12943_v37, 4  ;;  %v2610_v58 = vshll.u32 %v10808_v41, 16  ;;  %v12944_v57 = vshrl.u32 %v12822_v63, 16 }
 0x2c9   : > { %6273 = vst [vmem:[%s10497_s26 + $0xf8] sm:$0xff] %v6121_v19   ;;  %v12945_v19 = vshll.u32 %v12822_v63, 16  ;;  %v3598_v38 = vsel %vm3508_vm9, %v3482_v49, %v12946_v42  ;;  %v4002_v1 = vsel %vm3968_vm13, %v3887_v12, %v2926_v24  ;;  %v2828_v44 = vsel %vm2779_vm5, %v2825_v33, %v2827_v6 }
 0x2ca   : > { %v4395_v10 = vpop.f32.mrf.mxu0  ;;  %2751 = vrot.lane.b32.xlu0 %v2605_v43, %s6858_s18  ;;  %v1964_v36 = vrot.slane %v12944_v57, 1  ;;  %v4822_v54 = vmax.f32 %v4393_v32, 0.0  ;;  %v10871_v37 = vor.u32 %v3112_v14, %v3111_v17  ;;  %v2609_v49 = vrot.slane %v2607_v8, 2 }
 0x2cb   : > { %v4396_v52 = vadd.f32 %v10442_v13, %v4395_v10  ;;  %v2355_v0 = vpop.permute.xlu1 %2354  ;;  %v1967_v43 = vrot.slane %v12945_v19, 2  ;;  %v2612_v24 = vrot.slane %v2610_v58, 3  ;;  %v3234_v12 = vshrl.u32 %v10853_v29, 16 }
 0x2cc   : > { %v6398_v62 = vpop.f32.mrf.mxu0  ;;  %v3311_v4 = vpop.permute.xlu0 %3310  ;;  %2312 = vrot.lane.b32.xlu1 %v2201_v53, %s6856_s16  ;;  %v3237_v46 = vshll.u32 %v10853_v29, 16  ;;  %v3713_v33 = vsel %vm3623_vm10, %v3598_v38, %v2095_v39  ;;  %v2487_v53 = vsel %vm2383_vm7, %v10710_v2, %v10848_v55  ;;  %v3114_v2 = vsel %vm3010_vm3, %v10773_v20, %v10871_v37 }
 0x2cd   : > { %v4823_v28 = vmax.f32 %v4396_v52, 0.0  ;;  %v4133_v63 = vsel %vm4083_vm14, %v4002_v1, %v3311_v4  ;;  %v10880_v17 = vor.u32 %v1967_v43, %v1964_v36  ;;  %v10893_v36 = vor.u32 %v2612_v24, %v2609_v49  ;;  %v12947_v62 = vld [vmem:[#allocation26_spill] sm:$0xff] }
 0x2ce   : > { %v4616_v10 = vpop.f32.mrf.mxu1  ;;  %3378 = vrot.lane.b32.xlu0 %v3232_v3, %s6859_s20  ;;  %6444 = vmatmul.mubr.bf16.gmra.mxu0 %v4133_v63  ;;  %v3828_v3 = vsel %vm3738_vm11, %v3713_v33, %v2355_v0  ;;  %v3236_v19 = vrot.slane %v3234_v12, 3  ;;  %v3239_v0 = vrot.slane %v3237_v46, 4  ;;  %v2256_v1 = vrot.slane %v10808_v41, 2 }
 0x2cf   : > { %v5986_v32 = vpack.c.bf16 %v4823_v28, %v4822_v54  ;;  %v2982_v52 = vpop.permute.xlu1 %2981  ;;  %6447 = vmatprep.mubr.msk.bf16.mxu0 %vm6855_vm6, %v12492_v48  ;;  %v4617_v58 = vadd.f32 %v10442_v13, %v4616_v10  ;;  %v1969_v38 = vsel %vm1493_vm2, %v10746_v59, %v10880_v17  ;;  %v3428_v4 = vsel %vm3392_vm8, %v12664_v5, %v12947_v62  ;;  %v12948_v28 = vld [vmem:[#allocation157_spill] sm:$0xff] }
 0x2d0   : > { %v6509_v14 = vpop.f32.mrf.mxu1  ;;  %v2740_v8 = vpop.permute.xlu0 %2739  ;;  %2939 = vrot.lane.b32.xlu1 %v2828_v44, %s6857_s17  ;;  %v3544_v63 = vsel %vm3508_vm9, %v3428_v4, %v12948_v28  ;;  %v2614_v5 = vsel %vm2383_vm7, %v10793_v22, %v10893_v36  ;;  %v10912_v12 = vor.u32 %v3239_v0, %v3236_v19  ;;  %v12949_v46 = vshrl.u32 %v12689_v45, 16  ;;  %v332_v19 = vld [vmem:[%s6904_s19 + $0x1dc] sm:$0xf] }
 0x2d1   : > { %6246 = vst [vmem:[%s10497_s26 + $0x20] sm:$0xff] %v5986_v32   ;;  %v3943_v39 = vsel %vm3853_vm12, %v3828_v3, %v2740_v8  ;;  %v4878_v10 = vmax.f32 %v4617_v58, 0.0  ;;  %v12950_v32 = vshll.u32 %v12689_v45, 16  ;;  %v2257_v22 = vsel %vm2152_vm4, %v2254_v51, %v2256_v1  ;;  %v10936_v51 = vld [vmem:[%s6904_s19 + $0x1e0] sm:$0xf] }
 0x2d2   : > { %v4619_v57 = vpop.f32.mrf.mxu1  ;;  %2697 = vrot.lane.b32.xlu0 %v2487_v53, %s6858_s18  ;;  %v4058_v20 = vsel %vm3968_vm13, %v3943_v39, %v2982_v52  ;;  %v2488_v33 = vrot.slane %v12949_v46, 2  ;;  %v12951_v53 = vld [vmem:[#allocation196_spill] sm:$0xff]  ;;  %v2883_v58 = vrot.slane %v10853_v29, 3  ;;  %v2202_v15 = vrot.slane %v12689_v45, 2 }
 0x2d3   : > { %v4620_v43 = vadd.f32 %v10442_v13, %v4619_v57  ;;  %v2301_v42 = vpop.permute.xlu1 %2300  ;;  %v2489_v52 = vrot.slane %v12950_v32, 3  ;;  %v3659_v3 = vsel %vm3623_vm10, %v3544_v63, %v12951_v53  ;;  %v12952_v4 = vshrl.u32 %v12848_v11, 16  ;;  %v12955_v32 = vld [vmem:[#allocation176_spill] sm:$0xff] }
 0x2d4   : > { %v6510_v44 = vpop.f32.mrf.mxu1  ;;  %v3367_v54 = vpop.permute.xlu0 %3366  ;;  %3324 = vrot.lane.b32.xlu1 %v3114_v2, %s6859_s20  ;;  %v3774_v39 = vsel %vm3738_vm11, %v3659_v3, %v2301_v42  ;;  %v3241_v42 = vsel %vm3010_vm3, %v10798_v31, %v10912_v12  ;;  %v10956_v31 = vcombine.low %v10825_v35, %v332_v19 }
 0x2d5   : > { %v4879_v49 = vmax.f32 %v4620_v43, 0.0  ;;  %v4217_v24 = vsel %vm4083_vm14, %v4058_v20, %v3367_v54  ;;  %v10942_v62 = vor.u32 %v2489_v52, %v2488_v33  ;;  %v1973_v44 = vrot.slane %v12952_v4, 1 }
 0x2d6   : > { %v4400_v59 = vpop.f32.mrf.mxu0  ;;  %2108 = vrot.lane.b32.xlu0 %v1969_v38, %s6853_s22  ;;  %6556 = vmatmul.mubr.bf16.gmra.mxu1 %v4217_v24  ;;  %v12953_v54 = vshll.u32 %v12848_v11, 16  ;;  %v12954_v24 = vld [vmem:[#allocation130_spill] sm:$0xff]  ;;  %v10963_v33 = vcombine.low %v332_v19, %v10936_v51  ;;  %v2616_v19 = vshrl.u32 %v10956_v31, 16 }
 0x2d7   : > { %v6126_v14 = vpack.c.bf16 %v4879_v49, %v4878_v10  ;;  %v2928_v8 = vpop.permute.xlu1 %2927  ;;  %6559 = vmatprep.mubr.msk.bf16.mxu1 %vm6855_vm6, %v12492_v48  ;;  %v4401_v0 = vadd.f32 %v10442_v13, %v4400_v59  ;;  %v2884_v10 = vsel %vm2779_vm5, %v2881_v34, %v2883_v58  ;;  %v3484_v59 = vsel %vm3392_vm8, %v12674_v30, %v12954_v24 }
 0x2d8   : > { %v6401_v57 = vpop.f32.mrf.mxu0  ;;  %v2686_v2 = vpop.permute.xlu0 %2685  ;;  %2753 = vrot.lane.b32.xlu1 %v2614_v5, %s6858_s18  ;;  %v1976_v20 = vrot.slane %v12953_v54, 2  ;;  %v3600_v47 = vsel %vm3508_vm9, %v3484_v59, %v12955_v32  ;;  %v2203_v30 = vsel %vm2152_vm4, %v2200_v16, %v2202_v15  ;;  %v2491_v53 = vsel %vm2383_vm7, %v10848_v55, %v10942_v62 }
 0x2d9   : > { %6274 = vst [vmem:[%s10497_s26 + $0x100] sm:$0xff] %v6126_v14   ;;  %v3889_v43 = vsel %vm3853_vm12, %v3774_v39, %v2686_v2  ;;  %v4824_v34 = vmax.f32 %v4401_v0, 0.0  ;;  %v12956_v14 = vld [vmem:[#allocation111_spill] sm:$0xff]  ;;  %v2619_v0 = vshll.u32 %v10956_v31, 16  ;;  %v3246_v4 = vshll.u32 %v10963_v33, 16 }
 0x2da   : > { %v4403_v38 = vpop.f32.mrf.mxu0  ;;  %2368 = vrot.lane.b32.xlu0 %v2257_v22, %s6856_s16  ;;  %v4004_v49 = vsel %vm3968_vm13, %v3889_v43, %v2928_v8  ;;  %v10977_v3 = vor.u32 %v1976_v20, %v1973_v44  ;;  %v2829_v8 = vrot.slane %v12956_v14, 3  ;;  %v12957_v22 = vshrl.u32 %v12956_v14, 16 }
 0x2db   : > { %v4404_v28 = vadd.f32 %v10442_v13, %v4403_v38  ;;  %v3313_v63 = vpop.permute.xlu1 %3312  ;;  %v12958_v57 = vshll.u32 %v12956_v14, 16 }
 0x2dc   : > { %v6402_v11 = vpop.f32.mrf.mxu0  ;;  %v2097_v5 = vpop.permute.xlu0 %2096  ;;  %v4136_v46 = vsel %vm4083_vm14, %v4004_v49, %v3313_v63  ;;  %3380 = vrot.lane.b32.xlu1 %v3241_v42, %s6859_s20  ;;  %v3115_v39 = vrot.slane %v12957_v22, 3  ;;  %v3243_v42 = vshrl.u32 %v10963_v33, 16  ;;  %v2830_v63 = vsel %vm2779_vm5, %v2827_v6, %v2829_v8 }
 0x2dd   : > { %v4825_v52 = vmax.f32 %v4404_v28, 0.0  ;;  %6448 = vmatmul.mubr.bf16.gmra.mxu0 %v4136_v46  ;;  %v3116_v2 = vrot.slane %v12958_v57, 4  ;;  %v3715_v55 = vsel %vm3623_vm10, %v3600_v47, %v2097_v5  ;;  %v1978_v28 = vsel %vm1493_vm2, %v10880_v17, %v10977_v3  ;;  %v334_v57 = vld [vmem:[%s6904_s19 + $0x1e4] sm:$0xf] }
 0x2de   : > { %v4624_v35 = vpop.f32.mrf.mxu1  ;;  %2995 = vrot.lane.b32.xlu0 %v2884_v10, %s6857_s17  ;;  %6451 = vmatprep.mubr.msk.bf16.mxu0 %vm6855_vm6, %v12492_v48  ;;  %v2258_v10 = vrot.slane %v10956_v31, 2  ;;  %v2618_v11 = vrot.slane %v2616_v19, 2  ;;  %v2621_v5 = vrot.slane %v2619_v0, 3  ;;  %v3245_v17 = vrot.slane %v3243_v42, 3  ;;  %v12959_v19 = vld [vmem:[#allocation30_spill] sm:$0xff]  ;;  %v12961_v42 = vld [vmem:[#allocation156_spill] sm:$0xff] }
 0x2df   : > { %v5991_v18 = vpack.c.bf16 %v4825_v52, %v4824_v34  ;;  %v2742_v16 = vpop.permute.xlu1 %2741  ;;  %v4625_v44 = vadd.f32 %v10442_v13, %v4624_v35  ;;  %v11006_v59 = vor.u32 %v3116_v2, %v3115_v39  ;;  %v3248_v34 = vrot.slane %v3246_v4, 4 }
 0x2e0   : > { %v6513_v43 = vpop.f32.mrf.mxu1  ;;  %v2357_v38 = vpop.permute.xlu0 %2356  ;;  %2699 = vrot.lane.b32.xlu1 %v2491_v53, %s6858_s18  ;;  %v2259_v53 = vsel %vm2152_vm4, %v2256_v1, %v2258_v10  ;;  %v2885_v22 = vrot.slane %v10963_v33, 3  ;;  %v11023_v2 = vor.u32 %v2621_v5, %v2618_v11  ;;  %v3430_v0 = vsel %vm3392_vm8, %v12685_v40, %v12959_v19  ;;  %v12965_v11 = vld [vmem:[#allocation84_spill] sm:$0xff] }
 0x2e1   : > { %6247 = vst [vmem:[%s10497_s26 + $0x28] sm:$0xff] %v5991_v18   ;;  %v3830_v54 = vsel %vm3738_vm11, %v3715_v55, %v2357_v38  ;;  %v4880_v52 = vmax.f32 %v4625_v44, 0.0  ;;  %v12960_v43 = vld [vmem:[#allocation64_spill] sm:$0xff]  ;;  %v11029_v38 = vor.u32 %v3248_v34, %v3245_v17  ;;  %v11040_v40 = vcombine.low %v10936_v51, %v334_v57 }
 0x2e2   : > { %v4627_v20 = vpop.f32.mrf.mxu1  ;;  %2314 = vrot.lane.b32.xlu0 %v2203_v30, %s6856_s16  ;;  %v3945_v32 = vsel %vm3853_vm12, %v3830_v54, %v2742_v16  ;;  %v3118_v16 = vsel %vm3010_vm3, %v10871_v37, %v11006_v59  ;;  %v2204_v1 = vrot.slane %v12960_v43, 2  ;;  %v3546_v37 = vsel %vm3508_vm9, %v3430_v0, %v12961_v42 }
 0x2e3   : > { %v4628_v49 = vadd.f32 %v10442_v13, %v4627_v20  ;;  %v3369_v24 = vpop.permute.xlu1 %3368  ;;  %v2886_v54 = vsel %vm2779_vm5, %v2883_v58, %v2885_v22  ;;  %v12962_v20 = vshrl.u32 %v12960_v43, 16  ;;  %v2623_v29 = vsel %vm2383_vm7, %v10893_v36, %v11023_v2  ;;  %v11061_v58 = vld [vmem:[%s6904_s19 + $0x1e8] sm:$0xf] }
 0x2e4   : > { %v6514_v46 = vpop.f32.mrf.mxu1  ;;  %v2984_v47 = vpop.permute.xlu0 %2983  ;;  %2110 = vrot.lane.b32.xlu1 %v1978_v28, %s6853_s22  ;;  %v2628_v0 = vshll.u32 %v11040_v40, 16 }
 0x2e5   : > { %v4881_v23 = vmax.f32 %v4628_v49, 0.0  ;;  %v4060_v6 = vsel %vm3968_vm13, %v3945_v32, %v2984_v47  ;;  %v2492_v28 = vrot.slane %v12962_v20, 2  ;;  %v12966_v46 = vld [vmem:[#allocation199_spill] sm:$0xff] }
 0x2e6   : > { %v4408_v30 = vpop.f32.mrf.mxu0  ;;  %2941 = vrot.lane.b32.xlu0 %v2830_v63, %s6857_s17  ;;  %v4220_v35 = vsel %vm4083_vm14, %v4060_v6, %v3369_v24  ;;  %v12963_v63 = vshll.u32 %v12960_v43, 16  ;;  %v12964_v24 = vld [vmem:[#allocation133_spill] sm:$0xff]  ;;  %v3661_v51 = vsel %vm3623_vm10, %v3546_v37, %v12966_v46  ;;  %v12967_v6 = vld [vmem:[#allocation112_spill] sm:$0xff] }
 0x2e7   : > { %v6131_v39 = vpack.c.bf16 %v4881_v23, %v4880_v52  ;;  %6560 = vmatmul.mubr.bf16.gmra.mxu1 %v4220_v35  ;;  %v2688_v18 = vpop.permute.xlu1 %2687  ;;  %v4409_v4 = vadd.f32 %v10442_v13, %v4408_v30  ;;  %v3486_v5 = vsel %vm3392_vm8, %v12965_v11, %v12964_v24  ;;  %v2205_v23 = vsel %vm2152_vm4, %v2202_v15, %v2204_v1 }
 0x2e8   : > { %v6405_v41 = vpop.f32.mrf.mxu0  ;;  %v2303_v55 = vpop.permute.xlu0 %2302  ;;  %6563 = vmatprep.mubr.msk.bf16.mxu1 %vm6855_vm6, %v12492_v48  ;;  %2370 = vrot.lane.b32.xlu1 %v2259_v53, %s6856_s16  ;;  %v2493_v49 = vrot.slane %v12963_v63, 3  ;;  %v2831_v30 = vrot.slane %v12967_v6, 3  ;;  %v12968_v53 = vshrl.u32 %v12967_v6, 16  ;;  %v12972_v63 = vld [vmem:[#allocation175_spill] sm:$0xff] }
 0x2e9   : > { %6275 = vst [vmem:[%s10497_s26 + $0x108] sm:$0xff] %v6131_v39   ;;  %v3776_v17 = vsel %vm3738_vm11, %v3661_v51, %v2303_v55  ;;  %v4826_v35 = vmax.f32 %v4409_v4, 0.0  ;;  %v11084_v41 = vcombine.low %v334_v57, %v11061_v58  ;;  %v12970_v4 = vshrl.u32 %v12870_v21, 16  ;;  %v11098_v57 = vld [vmem:[%s11750_s2] ss:$0 sm:$0xff] }
 0x2ea   : > { %v4411_v44 = vpop.f32.mrf.mxu0  ;;  %3326 = vrot.lane.b32.xlu0 %v3118_v16, %s6859_s20  ;;  %v3119_v39 = vrot.slane %v12968_v53, 3  ;;  %v12969_v16 = vshll.u32 %v12967_v6, 16  ;;  %v11079_v15 = vor.u32 %v2493_v49, %v2492_v28  ;;  %v3891_v42 = vsel %vm3853_vm12, %v3776_v17, %v2688_v18 }
 0x2eb   : > { %v4412_v32 = vadd.f32 %v10442_v13, %v4411_v44  ;;  %v2099_v47 = vpop.permute.xlu1 %2098  ;;  %v3250_v13 = vsel %vm3010_vm3, %v10912_v12, %v11029_v38  ;;  %v2625_v12 = vshrl.u32 %v11040_v40, 16  ;;  %v1982_v44 = vrot.slane %v12970_v4, 1 }
 0x2ec   : > { %v6406_v34 = vpop.f32.mrf.mxu0  ;;  %v2930_v52 = vpop.permute.xlu0 %2929  ;;  %2997 = vrot.lane.b32.xlu1 %v2886_v54, %s6857_s17  ;;  %v3120_v19 = vrot.slane %v12969_v16, 4  ;;  %v12971_v54 = vshll.u32 %v12870_v21, 16  ;;  %v3602_v28 = vsel %vm3508_vm9, %v3486_v5, %v12972_v63  ;;  %v2832_v5 = vsel %vm2779_vm5, %v2829_v8, %v2831_v30 }
 0x2ed   : > { %v4827_v36 = vmax.f32 %v4412_v32, 0.0  ;;  %v4006_v49 = vsel %vm3968_vm13, %v3891_v42, %v2930_v52  ;;  %v2627_v32 = vrot.slane %v2625_v12, 2  ;;  %v3252_v17 = vshrl.u32 %v11084_v41, 16 }
 0x2ee   : > { %v4632_v45 = vpop.f32.mrf.mxu1  ;;  %2755 = vrot.lane.b32.xlu0 %v2623_v29, %s6858_s18  ;;  %v1985_v20 = vrot.slane %v12971_v54, 2  ;;  %v11108_v46 = vor.u32 %v3120_v19, %v3119_v39  ;;  %v2630_v29 = vrot.slane %v2628_v0, 3  ;;  %v3255_v34 = vshll.u32 %v11084_v41, 16 }
 0x2ef   : > { %v5996_v55 = vpack.c.bf16 %v4827_v36, %v4826_v35  ;;  %v2359_v37 = vpop.permute.xlu1 %2358  ;;  %v4633_v18 = vadd.f32 %v11098_v57, %v4632_v45  ;;  %v3717_v52 = vsel %vm3623_vm10, %v3602_v28, %v2099_v47  ;;  %v2495_v14 = vsel %vm2383_vm7, %v10942_v62, %v11079_v15 }
 0x2f0   : > { %v6517_v24 = vpop.f32.mrf.mxu1  ;;  %v3315_v11 = vpop.permute.xlu0 %3314  ;;  %2316 = vrot.lane.b32.xlu1 %v2205_v23, %s6856_s16  ;;  %v11118_v8 = vor.u32 %v1985_v20, %v1982_v44  ;;  %v3122_v62 = vsel %vm3010_vm3, %v11006_v59, %v11108_v46  ;;  %v11129_v45 = vor.u32 %v2630_v29, %v2627_v32  ;;  %v3254_v12 = vrot.slane %v3252_v17, 3  ;;  %v12973_v44 = vld [vmem:[#allocation31_spill] sm:$0xff]  ;;  %v12977_v29 = vld [vmem:[#allocation198_spill] sm:$0xff] }
 0x2f1   : > { %6248 = vst [vmem:[%s10497_s26 + $0x30] sm:$0xff] %v5996_v55   ;;  %v4139_v21 = vsel %vm4083_vm14, %v4006_v49, %v3315_v11  ;;  %v4882_v39 = vmax.f32 %v4633_v18, 0.0  ;;  %v3257_v0 = vrot.slane %v3255_v34, 4  ;;  %v2260_v4 = vrot.slane %v11040_v40, 2 }
 0x2f2   : > { %v4635_v51 = vpop.f32.mrf.mxu1  ;;  %3382 = vrot.lane.b32.xlu0 %v3250_v13, %s6859_s20  ;;  %6452 = vmatmul.mubr.bf16.gmra.mxu0 %v4139_v21  ;;  %v3832_v13 = vsel %vm3738_vm11, %v3717_v52, %v2359_v37  ;;  %v1987_v37 = vsel %vm1493_vm2, %v10977_v3, %v11118_v8  ;;  %v3432_v54 = vsel %vm3392_vm8, %v12707_v61, %v12973_v44  ;;  %v12974_v24 = vshrl.u32 %v12733_v27, 16  ;;  %v12976_v21 = vld [vmem:[#allocation159_spill] sm:$0xff] }
 0x2f3   : > { %v4636_v23 = vadd.f32 %v11098_v57, %v4635_v51  ;;  %v2986_v35 = vpop.permute.xlu1 %2985  ;;  %6455 = vmatprep.mubr.msk.bf16.mxu0 %vm6855_vm6, %v12492_v48  ;;  %v12975_v11 = vshll.u32 %v12733_v27, 16  ;;  %v3548_v61 = vsel %vm3508_vm9, %v3432_v54, %v12976_v21  ;;  %v2632_v51 = vsel %vm2383_vm7, %v11023_v2, %v11129_v45 }
 0x2f4   : > { %v6518_v36 = vpop.f32.mrf.mxu1  ;;  %v2744_v53 = vpop.permute.xlu0 %2743  ;;  %2943 = vrot.lane.b32.xlu1 %v2832_v5, %s6857_s17  ;;  %v2496_v3 = vrot.slane %v12974_v24, 2  ;;  %v11153_v32 = vor.u32 %v3257_v0, %v3254_v12  ;;  %v3663_v17 = vsel %vm3623_vm10, %v3548_v61, %v12977_v29  ;;  %v12979_v0 = vshrl.u32 %v12889_v50, 16 }
 0x2f5   : > { %v4883_v16 = vmax.f32 %v4636_v23, 0.0  ;;  %v3947_v47 = vsel %vm3853_vm12, %v3832_v13, %v2744_v53  ;;  %v2497_v18 = vrot.slane %v12975_v11, 3  ;;  %v2261_v23 = vsel %vm2152_vm4, %v2258_v10, %v2260_v4  ;;  %v336_v53 = vld [vmem:[%s6904_s19 + $0x1ec] sm:$0xf]  ;;  %v12978_v10 = vld [vmem:[#allocation132_spill] sm:$0xff] }
 0x2f6   : > { %v4416_v19 = vpop.f32.mrf.mxu0  ;;  %2701 = vrot.lane.b32.xlu0 %v2495_v14, %s6858_s18  ;;  %v4062_v59 = vsel %vm3968_vm13, %v3947_v47, %v2986_v35  ;;  %v2887_v35 = vrot.slane %v11084_v41, 3  ;;  %v2206_v36 = vrot.slane %v12733_v27, 2  ;;  %v3259_v12 = vsel %vm3010_vm3, %v11029_v38, %v11153_v32  ;;  %v11194_v38 = vld [vmem:[%s6904_s19 + $0x1f0] sm:$0xf] }
 0x2f7   : > { %v6136_v55 = vpack.c.bf16 %v4883_v16, %v4882_v39  ;;  %v2305_v42 = vpop.permute.xlu1 %2304  ;;  %v4417_v28 = vadd.f32 %v11098_v57, %v4416_v19  ;;  %v11171_v31 = vor.u32 %v2497_v18, %v2496_v3  ;;  %v3488_v19 = vsel %vm3392_vm8, %v12717_v25, %v12978_v10  ;;  %v12982_v18 = vld [vmem:[#allocation113_spill] sm:$0xff] }
 0x2f8   : > { %v6409_v20 = vpop.f32.mrf.mxu0  ;;  %v3371_v63 = vpop.permute.xlu0 %3370  ;;  %3328 = vrot.lane.b32.xlu1 %v3122_v62, %s6859_s20  ;;  %v3778_v2 = vsel %vm3738_vm11, %v3663_v17, %v2305_v42  ;;  %v12980_v42 = vshll.u32 %v12889_v50, 16  ;;  %v2888_v25 = vsel %vm2779_vm5, %v2885_v22, %v2887_v35  ;;  %v2207_v22 = vsel %vm2152_vm4, %v2204_v1, %v2206_v36 }
 0x2f9   : > { %6276 = vst [vmem:[%s10497_s26 + $0x110] sm:$0xff] %v6136_v55   ;;  %v4223_v49 = vsel %vm4083_vm14, %v4062_v59, %v3371_v63  ;;  %v4828_v39 = vmax.f32 %v4417_v28, 0.0  ;;  %v1991_v55 = vrot.slane %v12979_v0, 1  ;;  %v11191_v63 = vcombine.low %v11061_v58, %v336_v53  ;;  %v12981_v59 = vld [vmem:[#allocation179_spill] sm:$0xff] }
 0x2fa   : > { %v4419_v5 = vpop.f32.mrf.mxu0  ;;  %2112 = vrot.lane.b32.xlu0 %v1987_v37, %s6853_s22  ;;  %6564 = vmatmul.mubr.bf16.gmra.mxu1 %v4223_v49  ;;  %v1994_v37 = vrot.slane %v12980_v42, 2  ;;  %v3604_v28 = vsel %vm3508_vm9, %v3488_v19, %v12981_v59  ;;  %v2499_v33 = vsel %vm2383_vm7, %v11079_v15, %v11171_v31  ;;  %v2833_v21 = vrot.slane %v12982_v18, 3 }
 0x2fb   : > { %v4420_v34 = vadd.f32 %v11098_v57, %v4419_v5  ;;  %v2932_v52 = vpop.permute.xlu1 %2931  ;;  %6567 = vmatprep.mubr.msk.bf16.mxu1 %vm6855_vm6, %v12492_v48  ;;  %v12983_v61 = vshrl.u32 %v12982_v18, 16  ;;  %v12984_v1 = vshll.u32 %v12982_v18, 16  ;;  %v2634_v17 = vshrl.u32 %v11191_v63, 16 }
 0x2fc   : > { %v6410_v14 = vpop.f32.mrf.mxu0  ;;  %v2690_v13 = vpop.permute.xlu0 %2689  ;;  %2757 = vrot.lane.b32.xlu1 %v2632_v51, %s6858_s18  ;;  %v11211_v11 = vor.u32 %v1994_v37, %v1991_v55  ;;  %v11217_v51 = vcombine.low %v336_v53, %v11194_v38  ;;  %v2834_v10 = vsel %vm2779_vm5, %v2831_v30, %v2833_v21 }
 0x2fd   : > { %v4829_v16 = vmax.f32 %v4420_v34, 0.0  ;;  %v3893_v47 = vsel %vm3853_vm12, %v3778_v2, %v2690_v13  ;;  %v3123_v5 = vrot.slane %v12983_v61, 3  ;;  %v3124_v29 = vrot.slane %v12984_v1, 4  ;;  %v12985_v61 = vld [vmem:[#allocation36_spill] sm:$0xff] }
 0x2fe   : > { %v4640_v62 = vpop.f32.mrf.mxu1  ;;  %2372 = vrot.lane.b32.xlu0 %v2261_v23, %s6856_s16  ;;  %v4008_v20 = vsel %vm3968_vm13, %v3893_v47, %v2932_v52  ;;  %v2637_v34 = vshll.u32 %v11191_v63, 16  ;;  %v1996_v47 = vsel %vm1493_vm2, %v11118_v8, %v11211_v11  ;;  %v3261_v19 = vshrl.u32 %v11217_v51, 16 }
 0x2ff   : > { %v6001_v44 = vpack.c.bf16 %v4829_v16, %v4828_v39  ;;  %v3317_v54 = vpop.permute.xlu1 %3316  ;;  %v4641_v3 = vadd.f32 %v11098_v57, %v4640_v62  ;;  %v2262_v39 = vrot.slane %v11191_v63, 2  ;;  %v3264_v62 = vshll.u32 %v11217_v51, 16 }
 0x300   : > { %v6521_v50 = vpop.f32.mrf.mxu1  ;;  %v2101_v49 = vpop.permute.xlu0 %2100  ;;  %v4142_v24 = vsel %vm4083_vm14, %v4008_v20, %v3317_v54  ;;  %3384 = vrot.lane.b32.xlu1 %v3259_v12, %s6859_s20  ;;  %v11241_v55 = vor.u32 %v3124_v29, %v3123_v5  ;;  %v2636_v42 = vrot.slane %v2634_v17, 2  ;;  %v2639_v37 = vrot.slane %v2637_v34, 3 }
 0x301   : > { %6249 = vst [vmem:[%s10497_s26 + $0x38] sm:$0xff] %v6001_v44   ;;  %6456 = vmatmul.mubr.bf16.gmra.mxu0 %v4142_v24  ;;  %v3719_v52 = vsel %vm3623_vm10, %v3604_v28, %v2101_v49  ;;  %v4884_v14 = vmax.f32 %v4641_v3, 0.0  ;;  %v2889_v28 = vrot.slane %v11217_v51, 3  ;;  %v3263_v50 = vrot.slane %v3261_v19, 3  ;;  %v13001_v51 = vld [vmem:[#allocation177_spill] sm:$0xff] }
 0x302   : > { %v4643_v58 = vpop.f32.mrf.mxu1  ;;  %2999 = vrot.lane.b32.xlu0 %v2888_v25, %s6857_s17  ;;  %6459 = vmatprep.mubr.msk.bf16.mxu0 %vm6855_vm6, %v12492_v48  ;;  %v2263_v25 = vsel %vm2152_vm4, %v2260_v4, %v2262_v39  ;;  %v3266_v49 = vrot.slane %v3264_v62, 4  ;;  %v11260_v40 = vor.u32 %v2639_v37, %v2636_v42  ;;  %v6825_v4 = vld [vmem:[%s6904_s19 + $0x1c4] sm:$0xf]  ;;  %v3434_v5 = vsel %vm3392_vm8, %v12729_v26, %v12985_v61  ;;  %v11292_v37 = vld [vmem:[%s6904_s19 + $0x1f4] sm:$0xf] }
 0x303   : > { %v4644_v43 = vadd.f32 %v11098_v57, %v4643_v58  ;;  %v2746_v15 = vpop.permute.xlu1 %2745  ;;  %v338_v58 = vld [vmem:[%s6904_s19 + $0x1f4] sm:$0x1]  ;;  %v12986_v1 = vshrl.u32 %v12755_v56, 16  ;;  %v12987_v17 = vshll.u32 %v12755_v56, 16  ;;  %v2208_v26 = vrot.slane %v12755_v56, 2  ;;  %v13005_v56 = vld [vmem:[#allocation115_spill] sm:$0xff] }
 0x304   : > { %v6522_v23 = vpop.f32.mrf.mxu1  ;;  %v2361_v2 = vpop.permute.xlu0 %2360  ;;  %2703 = vrot.lane.b32.xlu1 %v2499_v33, %s6858_s18  ;;  %v3126_v33 = vsel %vm3010_vm3, %v11108_v46, %v11241_v55  ;;  %v12988_v46 = vld [vmem:[#allocation158_spill] sm:$0xff] }
 0x305   : > { %v4885_v13 = vmax.f32 %v4644_v43, 0.0  ;;  %v3834_v53 = vsel %vm3738_vm11, %v3719_v52, %v2361_v2  ;;  %v2500_v29 = vrot.slane %v12986_v1, 2  ;;  %v2501_v34 = vrot.slane %v12987_v17, 3  ;;  %v12994_v1 = vld [vmem:[#allocation178_spill] sm:$0xff] }
 0x306   : > { %v4424_v16 = vpop.f32.mrf.mxu0  ;;  %2318 = vrot.lane.b32.xlu0 %v2207_v22, %s6856_s16  ;;  %v3949_v54 = vsel %vm3853_vm12, %v3834_v53, %v2746_v15  ;;  %v5707_v22 = vcombine.low %v6825_v4, %v6825_v4  ;;  %v3550_v52 = vsel %vm3508_vm9, %v3434_v5, %v12988_v46 }
 0x307   : > { %v6141_v12 = vpack.c.bf16 %v4885_v13, %v4884_v14  ;;  %v3373_v0 = vpop.permute.xlu1 %3372  ;;  %v4425_v6 = vadd.f32 %v11098_v57, %v4424_v16  ;;  %v12989_v14 = vld [vmem:[#allocation201_spill] sm:$0xff]  ;;  %v2890_v16 = vsel %vm2779_vm5, %v2887_v35, %v2889_v28 }
 0x308   : > { %v6413_v44 = vpop.f32.mrf.mxu0  ;;  %v2988_v8 = vpop.permute.xlu0 %2987  ;;  %2114 = vrot.lane.b32.xlu1 %v1996_v47, %s6853_s22  ;;  %v3665_v13 = vsel %vm3623_vm10, %v3550_v52, %v12989_v14  ;;  %v11285_v47 = vor.u32 %v3266_v49, %v3263_v50  ;;  %v2001_v42 = vshll.u32 %v5707_v22, 16 }
 0x309   : > { %6277 = vst [vmem:[%s10497_s26 + $0x118] sm:$0xff] %v6141_v12   ;;  %v4064_v30 = vsel %vm3968_vm13, %v3949_v54, %v2988_v8  ;;  %v4830_v23 = vmax.f32 %v4425_v6, 0.0  ;;  %v2641_v12 = vsel %vm2383_vm7, %v11129_v45, %v11260_v40  ;;  %v342_v44 = vld [vmem:[%s6904_s19 + $0x1f8] sm:$0x3]  ;;  %v12990_v54 = vld [vmem:[#allocation135_spill] sm:$0xff] }
 0x30a   : > { %v4427_v20 = vpop.f32.mrf.mxu0  ;;  %2945 = vrot.lane.b32.xlu0 %v2834_v10, %s6857_s17  ;;  %v4226_v59 = vsel %vm4083_vm14, %v4064_v30, %v3373_v0  ;;  %v5716_v10 = vcombine.low %v11194_v38, %v338_v58  ;;  %v1998_v0 = vshrl.u32 %v5707_v22, 16  ;;  %v3490_v41 = vsel %vm3392_vm8, %v12742_v60, %v12990_v54  ;;  %v12991_v30 = vld [vmem:[#allocation114_spill] sm:$0xff] }
 0x30b   : > { %v4428_v24 = vadd.f32 %v11098_v57, %v4427_v20  ;;  %6568 = vmatmul.mubr.bf16.gmra.mxu1 %v4226_v59  ;;  %v2692_v3 = vpop.permute.xlu1 %2691  ;;  %v11300_v20 = vor.u32 %v2501_v34, %v2500_v29  ;;  %v2209_v59 = vsel %vm2152_vm4, %v2206_v36, %v2208_v26  ;;  %v12992_v60 = vshrl.u32 %v12991_v30, 16 }
 0x30c   : > { %v6414_v43 = vpop.f32.mrf.mxu0  ;;  %v2307_v15 = vpop.permute.xlu0 %2306  ;;  %6571 = vmatprep.mubr.msk.bf16.mxu1 %vm6855_vm6, %v12492_v48  ;;  %2374 = vrot.lane.b32.xlu1 %v2263_v25, %s6856_s16  ;;  %v2835_v25 = vrot.slane %v12991_v30, 3  ;;  %v12993_v49 = vshll.u32 %v12991_v30, 16  ;;  %v3268_v4 = vsel %vm3010_vm3, %v11153_v32, %v11285_v47  ;;  %v2643_v22 = vshrl.u32 %v5716_v10, 16 }
 0x30d   : > { %v4831_v2 = vmax.f32 %v4428_v24, 0.0  ;;  %v3780_v35 = vsel %vm3738_vm11, %v3665_v13, %v2307_v15  ;;  %v3127_v50 = vrot.slane %v12992_v60, 3  ;;  %v2646_v58 = vshll.u32 %v5716_v10, 16 }
 0x30e   : > { %v4648_v53 = vpop.f32.mrf.mxu1  ;;  %3330 = vrot.lane.b32.xlu0 %v3126_v33, %s6859_s20  ;;  %v3128_v24 = vrot.slane %v12993_v49, 4  ;;  %v5725_v61 = vcombine.low %v11292_v37, %v342_v44  ;;  %v3895_v27 = vsel %vm3853_vm12, %v3780_v35, %v2692_v3  ;;  %v2000_v43 = vrot.slane %v1998_v0, 1 }
 0x30f   : > { %v6006_v19 = vpack.c.bf16 %v4831_v2, %v4830_v23  ;;  %v2103_v62 = vpop.permute.xlu1 %2102  ;;  %v4649_v45 = vadd.f32 %v11098_v57, %v4648_v53  ;;  %v2003_v15 = vrot.slane %v2001_v42, 2  ;;  %v3606_v29 = vsel %vm3508_vm9, %v3490_v41, %v12994_v1  ;;  %v341_v41 = vld [vmem:[%s6904_s19 + $0x1f8] sm:$0x1] }
 0x310   : > { %v6525_v8 = vpop.f32.mrf.mxu1  ;;  %v2934_v6 = vpop.permute.xlu0 %2933  ;;  %3001 = vrot.lane.b32.xlu1 %v2890_v16, %s6857_s17  ;;  %v2836_v32 = vsel %vm2779_vm5, %v2833_v21, %v2835_v25  ;;  %v2503_v3 = vsel %vm2383_vm7, %v11171_v31, %v11300_v20  ;;  %v11334_v14 = vor.u32 %v3128_v24, %v3127_v50  ;;  %v2645_v18 = vrot.slane %v2643_v22, 2 }
 0x311   : > { %6250 = vst [vmem:[%s10497_s26 + $0x40] sm:$0xff] %v6006_v19   ;;  %v4010_v17 = vsel %vm3968_vm13, %v3895_v27, %v2934_v6  ;;  %v4886_v52 = vmax.f32 %v4649_v45, 0.0  ;;  %v2648_v21 = vrot.slane %v2646_v58, 3  ;;  %v3270_v53 = vshrl.u32 %v5725_v61, 16 }
 0x312   : > { %v4651_v33 = vpop.f32.mrf.mxu1  ;;  %2759 = vrot.lane.b32.xlu0 %v2641_v12, %s6858_s18  ;;  %v3273_v16 = vshll.u32 %v5725_v61, 16  ;;  %v3721_v31 = vsel %vm3623_vm10, %v3606_v29, %v2103_v62  ;;  %v11338_v12 = vor.u32 %v2003_v15, %v2000_v43  ;;  %v5715_v0 = vcombine.low %v11194_v38, %v11194_v38  ;;  %v12996_v61 = vld [vmem:[#allocation44_spill] sm:$0xff]  ;;  %v12997_v15 = vld [vmem:[#allocation161_spill] sm:$0xff] }
 0x313   : > { %v4652_v36 = vadd.f32 %v11098_v57, %v4651_v33  ;;  %v2363_v5 = vpop.permute.xlu1 %2362  ;;  %v3130_v38 = vsel %vm3010_vm3, %v11241_v55, %v11334_v14  ;;  %v11354_v6 = vor.u32 %v2648_v21, %v2645_v18  ;;  %v3272_v45 = vrot.slane %v3270_v53, 3  ;;  %v12995_v55 = vld [vmem:[#allocation32_spill] sm:$0xff] }
 0x314   : > { %v6526_v34 = vpop.f32.mrf.mxu1  ;;  %v3319_v46 = vpop.permute.xlu0 %3318  ;;  %2320 = vrot.lane.b32.xlu1 %v2209_v59, %s6856_s16  ;;  %v3836_v42 = vsel %vm3738_vm11, %v3721_v31, %v2363_v5  ;;  %v3275_v59 = vrot.slane %v3273_v16, 4  ;;  %v2005_v49 = vsel %vm1493_vm2, %v11211_v11, %v11338_v12  ;;  %v11360_v24 = vrot.slane %v5715_v0, 2 }
 0x315   : > { %v4887_v23 = vmax.f32 %v4652_v36, 0.0  ;;  %v4145_v2 = vsel %vm4083_vm14, %v4010_v17, %v3319_v46  ;;  %v5724_v33 = vcombine.low %v11292_v37, %v341_v41  ;;  %v3436_v27 = vsel %vm3392_vm8, %v12996_v61, %v12995_v55  ;;  %v12998_v17 = vld [vmem:[#allocation200_spill] sm:$0xff] }
 0x316   : > { %v4432_v13 = vpop.f32.mrf.mxu0  ;;  %3386 = vrot.lane.b32.xlu0 %v3268_v4, %s6859_s20  ;;  %6460 = vmatmul.mubr.bf16.gmra.mxu0 %v4145_v2  ;;  %v3552_v11 = vsel %vm3508_vm9, %v3436_v27, %v12997_v15  ;;  %v2650_v37 = vsel %vm2383_vm7, %v11260_v40, %v11354_v6  ;;  %v11375_v29 = vor.u32 %v3275_v59, %v3272_v45  ;;  %v13003_v59 = vld [vmem:[#allocation66_spill] sm:$0xff]  ;;  %v13006_v27 = vrot.slane %v13005_v56, 3 }
 0x317   : > { %v6146_v10 = vpack.c.bf16 %v4887_v23, %v4886_v52  ;;  %v2990_v19 = vpop.permute.xlu1 %2989  ;;  %6463 = vmatprep.mubr.msk.bf16.mxu0 %vm6855_vm6, %v12492_v48  ;;  %v4433_v35 = vadd.f32 %v11098_v57, %v4432_v13  ;;  %v3667_v34 = vsel %vm3623_vm10, %v3552_v11, %v12998_v17  ;;  %v11383_v52 = vrot.slane %v5724_v33, 3 }
 0x318   : > { %v6417_v44 = vpop.f32.mrf.mxu0  ;;  %v2748_v54 = vpop.permute.xlu0 %2747  ;;  %2947 = vrot.lane.b32.xlu1 %v2836_v32, %s6857_s17  ;;  %v3277_v63 = vsel %vm3010_vm3, %v11285_v47, %v11375_v29  ;;  %v12999_v47 = vld [vmem:[#allocation134_spill] sm:$0xff] }
 0x319   : > { %6278 = vst [vmem:[%s10497_s26 + $0x120] sm:$0xff] %v6146_v10   ;;  %v3951_v62 = vsel %vm3853_vm12, %v3836_v42, %v2748_v54  ;;  %v4832_v36 = vmax.f32 %v4433_v35, 0.0  ;;  %v2892_v16 = vsel %vm2779_vm5, %v2889_v28, %v11383_v52  ;;  %v13000_v54 = vld [vmem:[#allocation92_spill] sm:$0xff]  ;;  %v2507_v28 = vsel %vm2383_vm7, %v11300_v20, %v13001_v51  ;;  %v13012_v51 = vld [vmem:[#allocation137_spill] sm:$0xff] }
 0x31a   : > { %v4435_v8 = vpop.f32.mrf.mxu0  ;;  %2705 = vrot.lane.b32.xlu0 %v2503_v3, %s6858_s18  ;;  %v4066_v58 = vsel %vm3968_vm13, %v3951_v62, %v2990_v19  ;;  %v2265_v3 = vsel %vm2152_vm4, %v2262_v39, %v11360_v24  ;;  %v3492_v41 = vsel %vm3392_vm8, %v13000_v54, %v12999_v47  ;;  %v13002_v62 = vld [vmem:[#allocation182_spill] sm:$0xff] }
 0x31b   : > { %v4436_v60 = vadd.f32 %v11098_v57, %v4435_v8  ;;  %v2309_v50 = vpop.permute.xlu1 %2308  ;;  %v3608_v8 = vsel %vm3508_vm9, %v3492_v41, %v13002_v62 }
 0x31c   : > { %v6418_v4 = vpop.f32.mrf.mxu0  ;;  %v3375_v22 = vpop.permute.xlu0 %3374  ;;  %3332 = vrot.lane.b32.xlu1 %v3130_v38, %s6859_s20  ;;  %v3782_v23 = vsel %vm3738_vm11, %v3667_v34, %v2309_v50  ;;  %v13007_v34 = vld [vmem:[#allocation181_spill] sm:$0xff] }
 0x31d   : > { %v4833_v5 = vmax.f32 %v4436_v60, 0.0  ;;  %v4229_v43 = vsel %vm4083_vm14, %v4066_v58, %v3375_v22  ;;  %v13004_v60 = vrot.slane %v13003_v59, 2 }
 0x31e   : > { %v4656_v1 = vpop.f32.mrf.mxu1  ;;  %2116 = vrot.lane.b32.xlu0 %v2005_v49, %s6853_s22  ;;  %6572 = vmatmul.mubr.bf16.gmra.mxu1 %v4229_v43 }
 0x31f   : > { %v6011_v46 = vpack.c.bf16 %v4833_v5, %v4832_v36  ;;  %v2936_v32 = vpop.permute.xlu1 %2935  ;;  %6575 = vmatprep.mubr.msk.bf16.mxu1 %vm6855_vm6, %v12492_v48  ;;  %v4657_v13 = vadd.f32 %v11098_v57, %v4656_v1  ;;  %v2211_v50 = vsel %vm2152_vm4, %v2208_v26, %v13004_v60  ;;  %v2838_v26 = vsel %vm2779_vm5, %v2835_v25, %v13006_v27 }
 0x320   : > { %v6529_v40 = vpop.f32.mrf.mxu1  ;;  %v2694_v2 = vpop.permute.xlu0 %2693  ;;  %2761 = vrot.lane.b32.xlu1 %v2650_v37, %s6858_s18 }
 0x321   : > { %6251 = vst [vmem:[%s10497_s26 + $0x48] sm:$0xff] %v6011_v46   ;;  %v3897_v18 = vsel %vm3853_vm12, %v3782_v23, %v2694_v2  ;;  %v4888_v42 = vmax.f32 %v4657_v13, 0.0  ;;  %v3134_v46 = vsel %vm3010_vm3, %v11334_v14, %v13007_v34  ;;  %v13008_v23 = vld [vmem:[#allocation46_spill] sm:$0xff]  ;;  %v13009_v40 = vld [vmem:[#allocation45_spill] sm:$0xff]  ;;  %v13010_v13 = vld [vmem:[#allocation160_spill] sm:$0xff] }
 0x322   : > { %v4659_v21 = vpop.f32.mrf.mxu1  ;;  %2376 = vrot.lane.b32.xlu0 %v2265_v3, %s6856_s16  ;;  %v4012_v31 = vsel %vm3968_vm13, %v3897_v18, %v2936_v32  ;;  %v13011_v14 = vld [vmem:[#allocation203_spill] sm:$0xff] }
 0x323   : > { %v4660_v39 = vadd.f32 %v11098_v57, %v4659_v21  ;;  %v3321_v53 = vpop.permute.xlu1 %3320 }
 0x324   : > { %v6530_v10 = vpop.f32.mrf.mxu1  ;;  %v2105_v19 = vpop.permute.xlu0 %2104  ;;  %v4148_v0 = vsel %vm4083_vm14, %v4012_v31, %v3321_v53  ;;  %3388 = vrot.lane.b32.xlu1 %v3277_v63, %s6859_s20 }
 0x325   : > { %v4889_v44 = vmax.f32 %v4660_v39, 0.0  ;;  %6464 = vmatmul.mubr.bf16.gmra.mxu0 %v4148_v0  ;;  %v3723_v49 = vsel %vm3623_vm10, %v3608_v8, %v2105_v19 }
 0x326   : > { %v4440_v35 = vpop.f32.mrf.mxu0  ;;  %3003 = vrot.lane.b32.xlu0 %v2892_v16, %s6857_s17  ;;  %6467 = vmatprep.mubr.msk.bf16.mxu0 %vm6855_vm6, %v12492_v48 }
 0x327   : > { %v6151_v38 = vpack.c.bf16 %v4889_v44, %v4888_v42  ;;  %v2750_v45 = vpop.permute.xlu1 %2749  ;;  %v4441_v20 = vadd.f32 %v11098_v57, %v4440_v35 }
 0x328   : > { %v6421_v33 = vpop.f32.mrf.mxu0  ;;  %v2365_v4 = vpop.permute.xlu0 %2364  ;;  %2707 = vrot.lane.b32.xlu1 %v2507_v28, %s6858_s18  ;;  %v13013_v28 = vld [vmem:[#allocation94_spill] sm:$0xff] }
 0x329   : > { %6279 = vst [vmem:[%s10497_s26 + $0x128] sm:$0xff] %v6151_v38   ;;  %v3838_v22 = vsel %vm3738_vm11, %v3723_v49, %v2365_v4  ;;  %v4834_v15 = vmax.f32 %v4441_v20, 0.0  ;;  %v3494_v62 = vsel %vm3392_vm8, %v13013_v28, %v13012_v51  ;;  %v13014_v38 = vld [vmem:[#allocation180_spill] sm:$0xff] }
 0x32a   : > { %v4443_v58 = vpop.f32.mrf.mxu0  ;;  %2322 = vrot.lane.b32.xlu0 %v2211_v50, %s6856_s16  ;;  %v3953_v5 = vsel %vm3853_vm12, %v3838_v22, %v2750_v45 }
 0x32b   : > { %v4444_v55 = vadd.f32 %v11098_v57, %v4443_v58  ;;  %v3377_v61 = vpop.permute.xlu1 %3376 }
 0x32c   : > { %v6422_v36 = vpop.f32.mrf.mxu0  ;;  %v2992_v43 = vpop.permute.xlu0 %2991  ;;  %2118 = vrot.lane.b32.xlu1 %v11338_v12, %s6853_s22  ;;  %v3438_v12 = vsel %vm3392_vm8, %v13009_v40, %v13008_v23 }
 0x32d   : > { %v4835_v11 = vmax.f32 %v4444_v55, 0.0  ;;  %v4068_v1 = vsel %vm3968_vm13, %v3953_v5, %v2992_v43  ;;  %v3554_v18 = vsel %vm3508_vm9, %v3438_v12, %v13010_v13  ;;  %v13015_v36 = vld [vmem:[#allocation48_spill] sm:$0xff]  ;;  %v13016_v5 = vld [vmem:[#allocation47_spill] sm:$0xff] }
 0x32e   : > { %v4664_v37 = vpop.f32.mrf.mxu1  ;;  %2949 = vrot.lane.b32.xlu0 %v2838_v26, %s6857_s17  ;;  %v4232_v17 = vsel %vm4083_vm14, %v4068_v1, %v3377_v61  ;;  %v3669_v63 = vsel %vm3623_vm10, %v3554_v18, %v13011_v14  ;;  %v3440_v43 = vsel %vm3392_vm8, %v13016_v5, %v13015_v36  ;;  %v13017_v1 = vld [vmem:[#allocation163_spill] sm:$0xff]  ;;  %v13024_v36 = vld [vmem:[#allocation162_spill] sm:$0xff] }
 0x32f   : > { %v6016_v30 = vpack.c.bf16 %v4835_v11, %v4834_v15  ;;  %6576 = vmatmul.mubr.bf16.gmra.mxu1 %v4232_v17  ;;  %v2696_v25 = vpop.permute.xlu1 %2695  ;;  %v4665_v2 = vadd.f32 %v11098_v57, %v4664_v37  ;;  %v3556_v37 = vsel %vm3508_vm9, %v3440_v43, %v13017_v1  ;;  %v13025_v43 = vld [vmem:[#allocation205_spill] sm:$0xff] }
 0x330   : > { %v6533_v32 = vpop.f32.mrf.mxu1  ;;  %v2311_v3 = vpop.permute.xlu0 %2310  ;;  %6579 = vmatprep.mubr.msk.bf16.mxu1 %vm6855_vm6, %v12492_v48  ;;  %2378 = vrot.lane.b32.xlu1 %v11360_v24, %s6856_s16 }
 0x331   : > { %6252 = vst [vmem:[%s10497_s26 + $0x50] sm:$0xff] %v6016_v30   ;;  %v3784_v16 = vsel %vm3738_vm11, %v3669_v63, %v2311_v3  ;;  %v4890_v19 = vmax.f32 %v4665_v2, 0.0  ;;  %v13018_v30 = vld [vmem:[#allocation202_spill] sm:$0xff] }
 0x332   : > { %v4667_v21 = vpop.f32.mrf.mxu1  ;;  %3334 = vrot.lane.b32.xlu0 %v3134_v46, %s6859_s20  ;;  %v3899_v44 = vsel %vm3853_vm12, %v3784_v16, %v2696_v25  ;;  %v3671_v25 = vsel %vm3623_vm10, %v3556_v37, %v13018_v30 }
 0x333   : > { %v4668_v39 = vadd.f32 %v11098_v57, %v4667_v21  ;;  %v2107_v53 = vpop.permute.xlu1 %2106 }
 0x334   : > { %v6534_v31 = vpop.f32.mrf.mxu1  ;;  %v2938_v10 = vpop.permute.xlu0 %2937  ;;  %3005 = vrot.lane.b32.xlu1 %v11383_v52, %s6857_s17 }
 0x335   : > { %v4891_v0 = vmax.f32 %v4668_v39, 0.0  ;;  %v4014_v54 = vsel %vm3968_vm13, %v3899_v44, %v2938_v10  ;;  %v13019_v31 = vld [vmem:[#allocation136_spill] sm:$0xff]  ;;  %v13020_v10 = vld [vmem:[#allocation98_spill] sm:$0xff] }
 0x336   : > { %v4448_v24 = vpop.f32.mrf.mxu0  ;;  %2763 = vrot.lane.b32.xlu0 %v11354_v6, %s6858_s18  ;;  %v3610_v6 = vsel %vm3508_vm9, %v3494_v62, %v13014_v38 }
 0x337   : > { %v6156_v42 = vpack.c.bf16 %v4891_v0, %v4890_v19  ;;  %v2367_v47 = vpop.permute.xlu1 %2366  ;;  %v4449_v8 = vadd.f32 %v11098_v57, %v4448_v24  ;;  %v3725_v59 = vsel %vm3623_vm10, %v3610_v6, %v2107_v53  ;;  %v3496_v19 = vsel %vm3392_vm8, %v13020_v10, %v13019_v31  ;;  %v13021_v24 = vld [vmem:[#allocation184_spill] sm:$0xff] }
 0x338   : > { %v6425_v41 = vpop.f32.mrf.mxu0  ;;  %v3323_v35 = vpop.permute.xlu0 %3322  ;;  %v3840_v49 = vsel %vm3738_vm11, %v3725_v59, %v2367_v47 }
 0x339   : > { %6280 = vst [vmem:[%s10497_s26 + $0x130] sm:$0xff] %v6156_v42   ;;  %v4151_v52 = vsel %vm4083_vm14, %v4014_v54, %v3323_v35  ;;  %v4836_v20 = vmax.f32 %v4449_v8, 0.0  ;;  %v3612_v42 = vsel %vm3508_vm9, %v3496_v19, %v13021_v24 }
 0x33a   : > { %v4451_v45 = vpop.f32.mrf.mxu0  ;;  %3390 = vrot.lane.b32.xlu0 %v11375_v29, %s6859_s20  ;;  %6468 = vmatmul.mubr.bf16.gmra.mxu0 %v4151_v52 }
 0x33b   : > { %v4452_v60 = vadd.f32 %v11098_v57, %v4451_v45  ;;  %v2994_v50 = vpop.permute.xlu1 %2993  ;;  %6471 = vmatprep.mubr.msk.bf16.mxu0 %vm6855_vm6, %v12492_v48 }
 0x33c   : > { %v6426_v33 = vpop.f32.mrf.mxu0  ;;  %v2752_v4 = vpop.permute.xlu0 %2751 }
 0x33d   : > { %v4837_v22 = vmax.f32 %v4452_v60, 0.0  ;;  %v3955_v58 = vsel %vm3853_vm12, %v3840_v49, %v2752_v4 }
 0x33e   : > { %v4672_v55 = vpop.f32.mrf.mxu1  ;;  %v4070_v26 = vsel %vm3968_vm13, %v3955_v58, %v2994_v50 }
 0x33f   : > { %v6021_v29 = vpack.c.bf16 %v4837_v22, %v4836_v20  ;;  %v2313_v61 = vpop.permute.xlu1 %2312  ;;  %v4673_v15 = vadd.f32 %v11098_v57, %v4672_v55  ;;  %v13022_v55 = vld [vmem:[#allocation50_spill] sm:$0xff] }
 0x340   : > { %v6537_v56 = vpop.f32.mrf.mxu1  ;;  %v3379_v27 = vpop.permute.xlu0 %3378  ;;  %v3786_v32 = vsel %vm3738_vm11, %v3671_v25, %v2313_v61 }
 0x341   : > { %6253 = vst [vmem:[%s10497_s26 + $0x58] sm:$0xff] %v6021_v29   ;;  %v4235_v11 = vsel %vm4083_vm14, %v4070_v26, %v3379_v27  ;;  %v4892_v40 = vmax.f32 %v4673_v15, 0.0  ;;  %v13023_v29 = vld [vmem:[#allocation54_spill] sm:$0xff] }
 0x342   : > { %v4675_v17 = vpop.f32.mrf.mxu1  ;;  %6580 = vmatmul.mubr.bf16.gmra.mxu1 %v4235_v11  ;;  %v3442_v61 = vsel %vm3392_vm8, %v13023_v29, %v13022_v55 }
 0x343   : > { %v4676_v34 = vadd.f32 %v11098_v57, %v4675_v17  ;;  %v2940_v46 = vpop.permute.xlu1 %2939  ;;  %6583 = vmatprep.mubr.msk.bf16.mxu1 %vm6855_vm6, %v12492_v48  ;;  %v3558_v5 = vsel %vm3508_vm9, %v3442_v61, %v13024_v36 }
 0x344   : > { %v6538_v3 = vpop.f32.mrf.mxu1  ;;  %v2698_v23 = vpop.permute.xlu0 %2697  ;;  %v3673_v15 = vsel %vm3623_vm10, %v3558_v5, %v13025_v43  ;;  %v13033_v43 = vld [vmem:[#allocation138_spill] sm:$0xff] }
 0x345   : > { %v4893_v12 = vmax.f32 %v4676_v34, 0.0  ;;  %v3901_v2 = vsel %vm3853_vm12, %v3786_v32, %v2698_v23 }
 0x346   : > { %v4456_v13 = vpop.f32.mrf.mxu0  ;;  %v4016_v14 = vsel %vm3968_vm13, %v3901_v2, %v2940_v46 }
 0x347   : > { %v6161_v18 = vpack.c.bf16 %v4893_v12, %v4892_v40  ;;  %v3325_v21 = vpop.permute.xlu1 %3324  ;;  %v4457_v16 = vadd.f32 %v11098_v57, %v4456_v13 }
 0x348   : > { %v6429_v63 = vpop.f32.mrf.mxu0  ;;  %v2109_v39 = vpop.permute.xlu0 %2108  ;;  %v4154_v53 = vsel %vm4083_vm14, %v4016_v14, %v3325_v21  ;;  %v13027_v21 = vld [vmem:[#allocation102_spill] sm:$0xff] }
 0x349   : > { %6281 = vst [vmem:[%s10497_s26 + $0x138] sm:$0xff] %v6161_v18   ;;  %6472 = vmatmul.mubr.bf16.gmra.mxu0 %v4154_v53  ;;  %v3727_v54 = vsel %vm3623_vm10, %v3612_v42, %v2109_v39  ;;  %v4838_v51 = vmax.f32 %v4457_v16, 0.0  ;;  %v13026_v18 = vld [vmem:[#allocation139_spill] sm:$0xff] }
 0x34a   : > { %v4459_v0 = vpop.f32.mrf.mxu0  ;;  %6475 = vmatprep.mubr.msk.bf16.mxu0 %vm6855_vm6, %v12492_v48  ;;  %v3498_v14 = vsel %vm3392_vm8, %v13027_v21, %v13026_v18  ;;  %v13028_v39 = vld [vmem:[#allocation183_spill] sm:$0xff] }
 0x34b   : > { %v4460_v44 = vadd.f32 %v11098_v57, %v4459_v0  ;;  %v2754_v47 = vpop.permute.xlu1 %2753  ;;  %v3614_v53 = vsel %vm3508_vm9, %v3498_v14, %v13028_v39 }
 0x34c   : > { %v6430_v41 = vpop.f32.mrf.mxu0  ;;  %v2369_v35 = vpop.permute.xlu0 %2368 }
 0x34d   : > { %v4839_v28 = vmax.f32 %v4460_v44, 0.0  ;;  %v3842_v62 = vsel %vm3738_vm11, %v3727_v54, %v2369_v35 }
 0x34e   : > { %v4680_v8 = vpop.f32.mrf.mxu1  ;;  %v3957_v45 = vsel %vm3853_vm12, %v3842_v62, %v2754_v47  ;;  %v13029_v62 = vld [vmem:[#allocation49_spill] sm:$0xff] }
 0x34f   : > { %v6026_v52 = vpack.c.bf16 %v4839_v28, %v4838_v51  ;;  %v3381_v38 = vpop.permute.xlu1 %3380  ;;  %v4681_v60 = vadd.f32 %v11098_v57, %v4680_v8  ;;  %v13030_v8 = vld [vmem:[#allocation51_spill] sm:$0xff] }
 0x350   : > { %v6541_v6 = vpop.f32.mrf.mxu1  ;;  %v2996_v59 = vpop.permute.xlu0 %2995 }
 0x351   : > { %6254 = vst [vmem:[%s10497_s26 + $0x60] sm:$0xff] %v6026_v52   ;;  %v4072_v50 = vsel %vm3968_vm13, %v3957_v45, %v2996_v59  ;;  %v4894_v56 = vmax.f32 %v4681_v60, 0.0  ;;  %v3444_v52 = vsel %vm3392_vm8, %v13030_v8, %v13029_v62  ;;  %v13031_v45 = vld [vmem:[#allocation165_spill] sm:$0xff] }
 0x352   : > { %v4683_v49 = vpop.f32.mrf.mxu1  ;;  %v4238_v33 = vsel %vm4083_vm14, %v4072_v50, %v3381_v38  ;;  %v3560_v59 = vsel %vm3508_vm9, %v3444_v52, %v13031_v45 }
 0x353   : > { %v4684_v4 = vadd.f32 %v11098_v57, %v4683_v49  ;;  %6584 = vmatmul.mubr.bf16.gmra.mxu1 %v4238_v33  ;;  %v2700_v20 = vpop.permute.xlu1 %2699  ;;  %v13032_v49 = vld [vmem:[#allocation204_spill] sm:$0xff] }
 0x354   : > { %v6542_v22 = vpop.f32.mrf.mxu1  ;;  %v2315_v58 = vpop.permute.xlu0 %2314  ;;  %6587 = vmatprep.mubr.msk.bf16.mxu1 %vm6855_vm6, %v12492_v48  ;;  %v3675_v33 = vsel %vm3623_vm10, %v3560_v59, %v13032_v49 }
 0x355   : > { %v4895_v27 = vmax.f32 %v4684_v4, 0.0  ;;  %v4464_v26 = vpop.f32.mrf.mxu0  ;;  %v3788_v17 = vsel %vm3738_vm11, %v3673_v15, %v2315_v58  ;;  %v13034_v15 = vld [vmem:[#allocation104_spill] sm:$0xff] }
 0x356   : > { %v4465_v30 = vadd.f32 %v11098_v57, %v4464_v26  ;;  %v3903_v32 = vsel %vm3853_vm12, %v3788_v17, %v2700_v20 }
 0x357   : > { %v6166_v11 = vpack.c.bf16 %v4895_v27, %v4894_v56  ;;  %v2111_v1 = vpop.permute.xlu1 %2110  ;;  %v6433_v37 = vpop.f32.mrf.mxu0 }
 0x358   : > { %v2942_v25 = vpop.permute.xlu0 %2941  ;;  %v4840_v40 = vmax.f32 %v4465_v30, 0.0  ;;  %v3729_v31 = vsel %vm3623_vm10, %v3614_v53, %v2111_v1  ;;  %v13035_v37 = vld [vmem:[#allocation186_spill] sm:$0xff] }
 0x359   : > { %6282 = vst [vmem:[%s10497_s26 + $0x140] sm:$0xff] %v6166_v11   ;;  %v4467_v34 = vpop.f32.mrf.mxu0  ;;  %v4018_v12 = vsel %vm3968_vm13, %v3903_v32, %v2942_v25  ;;  %v3500_v11 = vsel %vm3392_vm8, %v13034_v15, %v13033_v43 }
 0x35a   : > { %v4468_v46 = vadd.f32 %v11098_v57, %v4467_v34  ;;  %v3616_v17 = vsel %vm3508_vm9, %v3500_v11, %v13035_v37 }
 0x35b   : > { %v2371_v3 = vpop.permute.xlu1 %2370  ;;  %v6434_v23 = vpop.f32.mrf.mxu0 }
 0x35c   : > { %v4841_v2 = vmax.f32 %v4468_v46, 0.0  ;;  %v3327_v13 = vpop.permute.xlu0 %3326  ;;  %v3844_v0 = vsel %vm3738_vm11, %v3729_v31, %v2371_v3 }
 0x35d   : > { %v4157_v63 = vsel %vm4083_vm14, %v4018_v12, %v3327_v13 }
 0x35e   : > { %v6031_v16 = vpack.c.bf16 %v4841_v2, %v4840_v40  ;;  %6476 = vmatmul.mubr.bf16.gmra.mxu0 %v4157_v63 }
 0x35f   : > { %v4688_v10 = vpop.f32.mrf.mxu1  ;;  %v2998_v19 = vpop.permute.xlu1 %2997  ;;  %6479 = vmatprep.mubr.msk.bf16.mxu0 %vm6855_vm6, %v12492_v48 }
 0x360   : > { %6255 = vst [vmem:[%s10497_s26 + $0x68] sm:$0xff] %v6031_v16   ;;  %v2756_v24 = vpop.permute.xlu0 %2755  ;;  %v4689_v47 = vadd.f32 %v11098_v57, %v4688_v10 }
 0x361   : > { %v3959_v42 = vsel %vm3853_vm12, %v3844_v0, %v2756_v24  ;;  %v6545_v44 = vpop.f32.mrf.mxu1  ;;  %v13036_v24 = vld [vmem:[#allocation52_spill] sm:$0xff] }
 0x362   : > { %v4074_v28 = vsel %vm3968_vm13, %v3959_v42, %v2998_v19  ;;  %v4896_v60 = vmax.f32 %v4689_v47, 0.0  ;;  %v13037_v42 = vld [vmem:[#allocation55_spill] sm:$0xff] }
 0x363   : > { %v4691_v54 = vpop.f32.mrf.mxu1  ;;  %v2317_v41 = vpop.permute.xlu1 %2316  ;;  %v3446_v44 = vsel %vm3392_vm8, %v13037_v42, %v13036_v24 }
 0x364   : > { %v4692_v35 = vadd.f32 %v11098_v57, %v4691_v54  ;;  %v3383_v51 = vpop.permute.xlu0 %3382  ;;  %v3790_v22 = vsel %vm3738_vm11, %v3675_v33, %v2317_v41 }
 0x365   : > { %v6546_v38 = vpop.f32.mrf.mxu1  ;;  %v4241_v6 = vsel %vm4083_vm14, %v4074_v28, %v3383_v51  ;;  %v13039_v28 = vld [vmem:[#allocation207_spill] sm:$0xff] }
 0x366   : > { %v4897_v50 = vmax.f32 %v4692_v35, 0.0  ;;  %6588 = vmatmul.mubr.bf16.gmra.mxu1 %v4241_v6  ;;  %v13038_v35 = vld [vmem:[#allocation164_spill] sm:$0xff]  ;;  %v11590_v6 = vld [vmem:[%s11750_s2] ss:$0 sm:$0xff] }
 0x367   : > { %v2944_v4 = vpop.permute.xlu1 %2943  ;;  %6591 = vmatprep.mubr.msk.bf16.mxu1 %vm6855_vm6, %v12492_v48  ;;  %v3562_v51 = vsel %vm3508_vm9, %v3446_v44, %v13038_v35 }
 0x368   : > { %v6171_v20 = vpack.c.bf16 %v4897_v50, %v4896_v60  ;;  %v2702_v58 = vpop.permute.xlu0 %2701 }
 0x369   : > { %v3905_v55 = vsel %vm3853_vm12, %v3790_v22, %v2702_v58 }
 0x36a   : > { %6283 = vst [vmem:[%s10497_s26 + $0x148] sm:$0xff] %v6171_v20   ;;  %v4472_v29 = vpop.f32.mrf.mxu0  ;;  %v4020_v56 = vsel %vm3968_vm13, %v3905_v55, %v2944_v4 }
 0x36b   : > { %v3329_v61 = vpop.permute.xlu1 %3328  ;;  %v4473_v5 = vadd.f32 %v11098_v57, %v4472_v29  ;;  %v13040_v29 = vld [vmem:[#allocation141_spill] sm:$0xff] }
 0x36c   : > { %v6437_v27 = vpop.f32.mrf.mxu0  ;;  %v2113_v26 = vpop.permute.xlu0 %2112  ;;  %v4160_v36 = vsel %vm4083_vm14, %v4020_v56, %v3329_v61  ;;  %v13041_v61 = vld [vmem:[#allocation106_spill] sm:$0xff] }
 0x36d   : > { %6480 = vmatmul.mubr.bf16.gmra.mxu0 %v4160_v36  ;;  %v3731_v34 = vsel %vm3623_vm10, %v3616_v17, %v2113_v26  ;;  %v4842_v3 = vmax.f32 %v4473_v5, 0.0  ;;  %v3502_v56 = vsel %vm3392_vm8, %v13041_v61, %v13040_v29  ;;  %v13042_v26 = vld [vmem:[#allocation185_spill] sm:$0xff] }
 0x36e   : > { %v4475_v1 = vpop.f32.mrf.mxu0  ;;  %6483 = vmatprep.mubr.msk.bf16.mxu0 %vm6855_vm6, %v12492_v48  ;;  %v3618_v36 = vsel %vm3508_vm9, %v3502_v56, %v13042_v26 }
 0x36f   : > { %v4476_v30 = vadd.f32 %v11098_v57, %v4475_v1  ;;  %v2758_v25 = vpop.permute.xlu1 %2757 }
 0x370   : > { %v6438_v46 = vpop.f32.mrf.mxu0  ;;  %v2373_v32 = vpop.permute.xlu0 %2372 }
 0x371   : > { %v4843_v23 = vmax.f32 %v4476_v30, 0.0  ;;  %v3846_v40 = vsel %vm3738_vm11, %v3731_v34, %v2373_v32 }
 0x372   : > { %v4696_v12 = vpop.f32.mrf.mxu1  ;;  %v3961_v21 = vsel %vm3853_vm12, %v3846_v40, %v2758_v25  ;;  %v13043_v40 = vld [vmem:[#allocation53_spill] sm:$0xff] }
 0x373   : > { %v6036_v2 = vpack.c.bf16 %v4843_v23, %v4842_v3  ;;  %v3385_v13 = vpop.permute.xlu1 %3384  ;;  %v4697_v63 = vadd.f32 %v11098_v57, %v4696_v12  ;;  %v13044_v12 = vld [vmem:[#allocation56_spill] sm:$0xff] }
 0x374   : > { %v6549_v18 = vpop.f32.mrf.mxu1  ;;  %v3000_v14 = vpop.permute.xlu0 %2999 }
 0x375   : > { %6256 = vst [vmem:[%s10497_s26 + $0x70] sm:$0xff] %v6036_v2   ;;  %v4076_v39 = vsel %vm3968_vm13, %v3961_v21, %v3000_v14  ;;  %v4898_v47 = vmax.f32 %v4697_v63, 0.0  ;;  %v3448_v2 = vsel %vm3392_vm8, %v13044_v12, %v13043_v40  ;;  %v13045_v21 = vld [vmem:[#allocation167_spill] sm:$0xff] }
 0x376   : > { %v4699_v53 = vpop.f32.mrf.mxu1  ;;  %v4244_v16 = vsel %vm4083_vm14, %v4076_v39, %v3385_v13  ;;  %v3564_v14 = vsel %vm3508_vm9, %v3448_v2, %v13045_v21 }
 0x377   : > { %v4700_v31 = vadd.f32 %v11098_v57, %v4699_v53  ;;  %6592 = vmatmul.mubr.bf16.gmra.mxu1 %v4244_v16  ;;  %v2704_v10 = vpop.permute.xlu1 %2703  ;;  %v3677_v57 = vsel %vm3623_vm10, %v3562_v51, %v13039_v28  ;;  %v13046_v53 = vld [vmem:[#allocation206_spill] sm:$0xff]  ;;  %v13047_v28 = vld [vmem:[#allocation140_spill] sm:$0xff] }
 0x378   : > { %v6550_v19 = vpop.f32.mrf.mxu1  ;;  %v2319_v0 = vpop.permute.xlu0 %2318  ;;  %6595 = vmatprep.mubr.msk.bf16.mxu1 %vm6855_vm6, %v12492_v48  ;;  %v3679_v16 = vsel %vm3623_vm10, %v3564_v14, %v13046_v53 }
 0x379   : > { %v4899_v54 = vmax.f32 %v4700_v31, 0.0  ;;  %v4480_v41 = vpop.f32.mrf.mxu0  ;;  %v3792_v38 = vsel %vm3738_vm11, %v3677_v57, %v2319_v0  ;;  %v3504_v57 = vsel %vm3392_vm8, %v12892_v7, %v13047_v28 }
 0x37a   : > { %v4481_v45 = vadd.f32 %v11590_v6, %v4480_v41  ;;  %v3907_v49 = vsel %vm3853_vm12, %v3792_v38, %v2704_v10 }
 0x37b   : > { %v6176_v62 = vpack.c.bf16 %v4899_v54, %v4898_v47  ;;  %v2115_v8 = vpop.permute.xlu1 %2114  ;;  %v6441_v52 = vpop.f32.mrf.mxu0 }
 0x37c   : > { %v2946_v59 = vpop.permute.xlu0 %2945  ;;  %v4844_v20 = vmax.f32 %v4481_v45, 0.0  ;;  %v3733_v43 = vsel %vm3623_vm10, %v3618_v36, %v2115_v8  ;;  %v13048_v8 = vld [vmem:[#allocation188_spill] sm:$0xff] }
 0x37d   : > { %6284 = vst [vmem:[%s10497_s26 + $0x150] sm:$0xff] %v6176_v62   ;;  %v4483_v60 = vpop.f32.mrf.mxu0  ;;  %v4022_v22 = vsel %vm3968_vm13, %v3907_v49, %v2946_v59  ;;  %v3620_v52 = vsel %vm3508_vm9, %v3504_v57, %v13048_v8 }
 0x37e   : > { %v4484_v50 = vadd.f32 %v11590_v6, %v4483_v60 }
 0x37f   : > { %v2375_v33 = vpop.permute.xlu1 %2374  ;;  %v6442_v4 = vpop.f32.mrf.mxu0 }
 0x380   : > { %v4845_v58 = vmax.f32 %v4484_v50, 0.0  ;;  %v3331_v55 = vpop.permute.xlu0 %3330  ;;  %v3848_v1 = vsel %vm3738_vm11, %v3733_v43, %v2375_v33 }
 0x381   : > { %v4163_v27 = vsel %vm4083_vm14, %v4022_v22, %v3331_v55 }
 0x382   : > { %v6041_v5 = vpack.c.bf16 %v4845_v58, %v4844_v20  ;;  %6484 = vmatmul.mubr.bf16.gmra.mxu0 %v4163_v27 }
 0x383   : > { %v4704_v15 = vpop.f32.mrf.mxu1  ;;  %v3002_v11 = vpop.permute.xlu1 %3001  ;;  %6487 = vmatprep.mubr.msk.bf16.mxu0 %vm6855_vm6, %v12492_v48 }
 0x384   : > { %6257 = vst [vmem:[%s10497_s26 + $0x78] sm:$0xff] %v6041_v5   ;;  %v2760_v37 = vpop.permute.xlu0 %2759  ;;  %v4705_v25 = vadd.f32 %v11590_v6, %v4704_v15 }
 0x385   : > { %v3963_v17 = vsel %vm3853_vm12, %v3848_v1, %v2760_v37  ;;  %v6553_v30 = vpop.f32.mrf.mxu1 }
 0x386   : > { %v4078_v23 = vsel %vm3968_vm13, %v3963_v17, %v3002_v11  ;;  %v4900_v63 = vmax.f32 %v4705_v25, 0.0  ;;  %v13049_v11 = vld [vmem:[#allocation57_spill] sm:$0xff]  ;;  %v13050_v25 = vld [vmem:[#allocation166_spill] sm:$0xff] }
 0x387   : > { %v4707_v34 = vpop.f32.mrf.mxu1  ;;  %v2321_v46 = vpop.permute.xlu1 %2320  ;;  %v3450_v1 = vsel %vm3392_vm8, %v12901_v9, %v13049_v11 }
 0x388   : > { %v4708_v32 = vadd.f32 %v11590_v6, %v4707_v34  ;;  %v3387_v3 = vpop.permute.xlu0 %3386  ;;  %v3794_v19 = vsel %vm3738_vm11, %v3679_v16, %v2321_v46  ;;  %v3566_v34 = vsel %vm3508_vm9, %v3450_v1, %v13050_v25  ;;  %v13051_v46 = vld [vmem:[#allocation208_spill] sm:$0xff] }
 0x389   : > { %v6554_v13 = vpop.f32.mrf.mxu1  ;;  %v4247_v18 = vsel %vm4083_vm14, %v4078_v23, %v3387_v3 }
 0x38a   : > { %v4901_v39 = vmax.f32 %v4708_v32, 0.0  ;;  %6596 = vmatmul.mubr.bf16.gmra.mxu1 %v4247_v18  ;;  %v3681_v32 = vsel %vm3623_vm10, %v3566_v34, %v13051_v46  ;;  %v6772_v13 = vld [vmem:[%s6904_s19 + $0x1c0] ss:$0 sps:$4 sm:$0x33]  }
 0x38b   : > { %v2948_v31 = vpop.permute.xlu1 %2947  ;;  %6599 = vmatprep.mubr.msk.bf16.mxu1 %vm6855_vm6, %v12492_v48 }
 0x38c   : > { %v6181_v10 = vpack.c.bf16 %v4901_v39, %v4900_v63  ;;  %v2706_v0 = vpop.permute.xlu0 %2705 }
 0x38d   : > { %v3909_v24 = vsel %vm3853_vm12, %v3794_v19, %v2706_v0 }
 0x38e   : > { %6285 = vst [vmem:[%s10497_s26 + $0x158] sm:$0xff] %v6181_v10   ;;  %v4488_v42 = vpop.f32.mrf.mxu0  ;;  %v4024_v47 = vsel %vm3968_vm13, %v3909_v24, %v2948_v31  ;;  %v13052_v10 = vld [vmem:[#allocation142_spill] sm:$0xff]  ;;  %v13053_v24 = vld [vmem:[#allocation187_spill] sm:$0xff] }
 0x38f   : > { %v3333_v44 = vpop.permute.xlu1 %3332  ;;  %v4489_v51 = vadd.f32 %v11590_v6, %v4488_v42  ;;  %v3507_v19 = vsel %vm3392_vm8, %v6772_v13, %v13052_v10 }
 0x390   : > { %v6445_v54 = vpop.f32.mrf.mxu0  ;;  %v2117_v41 = vpop.permute.xlu0 %2116  ;;  %v4166_v35 = vsel %vm4083_vm14, %v4024_v47, %v3333_v44  ;;  %v3622_v42 = vsel %vm3508_vm9, %v3507_v19, %v13053_v24 }
 0x391   : > { %6488 = vmatmul.mubr.bf16.gmra.mxu0 %v4166_v35  ;;  %v3735_v59 = vsel %vm3623_vm10, %v3620_v52, %v2117_v41  ;;  %v4846_v49 = vmax.f32 %v4489_v51, 0.0 }
 0x392   : > { %v4491_v62 = vpop.f32.mrf.mxu0  ;;  %6491 = vmatprep.mubr.msk.bf16.mxu0 %vm6855_vm6, %v12492_v48 }
 0x393   : > { %v4492_v38 = vadd.f32 %v11590_v6, %v4491_v62  ;;  %v2762_v45 = vpop.permute.xlu1 %2761 }
 0x394   : > { %v6446_v60 = vpop.f32.mrf.mxu0  ;;  %v2377_v50 = vpop.permute.xlu0 %2376 }
 0x395   : > { %v4847_v33 = vmax.f32 %v4492_v38, 0.0  ;;  %v3850_v4 = vsel %vm3738_vm11, %v3735_v59, %v2377_v50 }
 0x396   : > { %v4712_v7 = vpop.f32.mrf.mxu1  ;;  %v3965_v55 = vsel %vm3853_vm12, %v3850_v4, %v2762_v45 }
 0x397   : > { %v6046_v20 = vpack.c.bf16 %v4847_v33, %v4846_v49  ;;  %v3389_v22 = vpop.permute.xlu1 %3388  ;;  %v4713_v61 = vadd.f32 %v11590_v6, %v4712_v7 }
 0x398   : > { %v6557_v58 = vpop.f32.mrf.mxu1  ;;  %v3004_v29 = vpop.permute.xlu0 %3003 }
 0x399   : > { %6258 = vst [vmem:[%s10497_s26 + $0x80] sm:$0xff] %v6046_v20   ;;  %v4080_v56 = vsel %vm3968_vm13, %v3965_v55, %v3004_v29  ;;  %v4902_v37 = vmax.f32 %v4713_v61, 0.0 }
 0x39a   : > { %v4715_v27 = vpop.f32.mrf.mxu1  ;;  %v4250_v26 = vsel %vm4083_vm14, %v4080_v56, %v3389_v22 }
 0x39b   : > { %v4716_v36 = vadd.f32 %v11590_v6, %v4715_v27  ;;  %6600 = vmatmul.mubr.bf16.gmra.mxu1 %v4250_v26  ;;  %v2708_v5 = vpop.permute.xlu1 %2707 }
 0x39c   : > { %v6558_v43 = vpop.f32.mrf.mxu1  ;;  %v2323_v15 = vpop.permute.xlu0 %2322  ;;  %6603 = vmatprep.mubr.msk.bf16.mxu1 %vm6855_vm6, %v12492_v48 }
 0x39d   : > { %v4903_v17 = vmax.f32 %v4716_v36, 0.0  ;;  %v4496_v30 = vpop.f32.mrf.mxu0  ;;  %v3796_v12 = vsel %vm3738_vm11, %v3681_v32, %v2323_v15 }
 0x39e   : > { %v4497_v48 = vadd.f32 %v11590_v6, %v4496_v30  ;;  %v3911_v21 = vsel %vm3853_vm12, %v3796_v12, %v2708_v5 }
 0x39f   : > { %v6186_v3 = vpack.c.bf16 %v4903_v17, %v4902_v37  ;;  %v2119_v23 = vpop.permute.xlu1 %2118  ;;  %v6449_v40 = vpop.f32.mrf.mxu0 }
 0x3a0   : > { %v2950_v2 = vpop.permute.xlu0 %2949  ;;  %v4848_v39 = vmax.f32 %v4497_v48, 0.0  ;;  %v3737_v47 = vsel %vm3623_vm10, %v3622_v42, %v2119_v23 }
 0x3a1   : > { %6286 = vst [vmem:[%s10497_s26 + $0x160] sm:$0xff] %v6186_v3   ;;  %v4499_v9 = vpop.f32.mrf.mxu0  ;;  %v4026_v53 = vsel %vm3968_vm13, %v3911_v21, %v2950_v2 }
 0x3a2   : > { %v4500_v18 = vadd.f32 %v11590_v6, %v4499_v9 }
 0x3a3   : > { %v2379_v14 = vpop.permute.xlu1 %2378  ;;  %v6450_v63 = vpop.f32.mrf.mxu0 }
 0x3a4   : > { %v4849_v16 = vmax.f32 %v4500_v18, 0.0  ;;  %v3335_v31 = vpop.permute.xlu0 %3334  ;;  %v3852_v41 = vsel %vm3738_vm11, %v3737_v47, %v2379_v14 }
 0x3a5   : > { %v4169_v0 = vsel %vm4083_vm14, %v4026_v53, %v3335_v31 }
 0x3a6   : > { %v6051_v44 = vpack.c.bf16 %v4849_v16, %v4848_v39  ;;  %6492 = vmatmul.mubr.bf16.gmra.mxu0 %v4169_v0 }
 0x3a7   : > { %v4720_v54 = vpop.f32.mrf.mxu1  ;;  %v3006_v28 = vpop.permute.xlu1 %3005 }
 0x3a8   : > { %6259 = vst [vmem:[%s10497_s26 + $0x88] sm:$0xff] %v6051_v44   ;;  %v2764_v35 = vpop.permute.xlu0 %2763  ;;  %v4721_v62 = vadd.f32 %v11590_v6, %v4720_v54 }
 0x3a9   : > { %v3967_v51 = vsel %vm3853_vm12, %v3852_v41, %v2764_v35  ;;  %v6561_v57 = vpop.f32.mrf.mxu1 }
 0x3aa   : > { %v4082_v52 = vsel %vm3968_vm13, %v3967_v51, %v3006_v28  ;;  %v4904_v50 = vmax.f32 %v4721_v62, 0.0 }
 0x3ab   : > { %v4723_v8 = vpop.f32.mrf.mxu1 }
 0x3ac   : > { %v4724_v38 = vadd.f32 %v11590_v6, %v4723_v8  ;;  %v3391_v45 = vpop.permute.xlu0 %3390 }
 0x3ad   : > { %v6562_v59 = vpop.f32.mrf.mxu1  ;;  %v4253_v60 = vsel %vm4083_vm14, %v4082_v52, %v3391_v45 }
 0x3ae   : > { %v4905_v49 = vmax.f32 %v4724_v38, 0.0  ;;  %6604 = vmatmul.mubr.bf16.gmra.mxu1 %v4253_v60 }
 0x3b0   : > { %v6191_v33 = vpack.c.bf16 %v4905_v49, %v4904_v50 }
 0x3b2   : > { %6287 = vst [vmem:[%s10497_s26 + $0x168] sm:$0xff] %v6191_v33   ;;  %v4504_v4 = vpop.f32.mrf.mxu0 }
 0x3b3   : > { %v4505_v20 = vadd.f32 %v11590_v6, %v4504_v4 }
 0x3b4   : > { %v6453_v7 = vpop.f32.mrf.mxu0 }
 0x3b5   : > { %v4850_v29 = vmax.f32 %v4505_v20, 0.0 }
 0x3b6   : > { %v4507_v22 = vpop.f32.mrf.mxu0 }
 0x3b7   : > { %v4508_v58 = vadd.f32 %v11590_v6, %v4507_v22 }
 0x3b8   : > { %v6454_v55 = vpop.f32.mrf.mxu0 }
 0x3b9   : > { %v4851_v61 = vmax.f32 %v4508_v58, 0.0 }
 0x3ba   : > { %v4728_v56 = vpop.f32.mrf.mxu1 }
 0x3bb   : > { %v6056_v27 = vpack.c.bf16 %v4851_v61, %v4850_v29  ;;  %v4729_v36 = vadd.f32 %v11590_v6, %v4728_v56 }
 0x3bc   : > { %v6565_v26 = vpop.f32.mrf.mxu1 }
 0x3bd   : > { %6260 = vst [vmem:[%s10497_s26 + $0x90] sm:$0xff] %v6056_v27   ;;  %v4906_v11 = vmax.f32 %v4729_v36, 0.0 }
 0x3be   : > { %v4731_v5 = vpop.f32.mrf.mxu1 }
 0x3bf   : > { %v4732_v43 = vadd.f32 %v11590_v6, %v4731_v5 }
 0x3c0   : > { %v6566_v15 = vpop.f32.mrf.mxu1 }
 0x3c1   : > { %v4907_v1 = vmax.f32 %v4732_v43, 0.0  ;;  %v4512_v37 = vpop.f32.mrf.mxu0 }
 0x3c2   : > { %v4513_v25 = vadd.f32 %v11590_v6, %v4512_v37 }
 0x3c3   : > { %v6196_v17 = vpack.c.bf16 %v4907_v1, %v4906_v11  ;;  %v6457_v30 = vpop.f32.mrf.mxu0 }
 0x3c4   : > { %v4852_v3 = vmax.f32 %v4513_v25, 0.0 }
 0x3c5   : > { %6288 = vst [vmem:[%s10497_s26 + $0x170] sm:$0xff] %v6196_v17   ;;  %v4515_v34 = vpop.f32.mrf.mxu0 }
 0x3c6   : > { %v4516_v46 = vadd.f32 %v11590_v6, %v4515_v34 }
 0x3c7   : > { %v6458_v32 = vpop.f32.mrf.mxu0 }
 0x3c8   : > { %v4853_v23 = vmax.f32 %v4516_v46, 0.0 }
 0x3ca   : > { %v6061_v40 = vpack.c.bf16 %v4853_v23, %v4852_v3 }
 0x3cb   : > { %v4736_v12 = vpop.f32.mrf.mxu1 }
 0x3cc   : > { %6261 = vst [vmem:[%s10497_s26 + $0x98] sm:$0xff] %v6061_v40   ;;  %v4737_v2 = vadd.f32 %v11590_v6, %v4736_v12 }
 0x3cd   : > { %v6569_v48 = vpop.f32.mrf.mxu1 }
 0x3ce   : > { %v4908_v21 = vmax.f32 %v4737_v2, 0.0 }
 0x3cf   : > { %v4739_v13 = vpop.f32.mrf.mxu1 }
 0x3d0   : > { %v4740_v9 = vadd.f32 %v11590_v6, %v4739_v13 }
 0x3d1   : > { %v6570_v18 = vpop.f32.mrf.mxu1 }
 0x3d2   : > { %v4909_v14 = vmax.f32 %v4740_v9, 0.0 }
 0x3d4   : > { %v6201_v63 = vpack.c.bf16 %v4909_v14, %v4908_v21 }
 0x3d6   : > { %6289 = vst [vmem:[%s10497_s26 + $0x178] sm:$0xff] %v6201_v63   ;;  %v4520_v39 = vpop.f32.mrf.mxu0 }
 0x3d7   : > { %v4521_v16 = vadd.f32 %v11590_v6, %v4520_v39 }
 0x3d8   : > { %v6461_v53 = vpop.f32.mrf.mxu0 }
 0x3d9   : > { %v4854_v0 = vmax.f32 %v4521_v16, 0.0 }
 0x3da   : > { %v4523_v31 = vpop.f32.mrf.mxu0 }
 0x3db   : > { %v4524_v10 = vadd.f32 %v11590_v6, %v4523_v31 }
 0x3dc   : > { %v6462_v19 = vpop.f32.mrf.mxu0 }
 0x3dd   : > { %v4855_v24 = vmax.f32 %v4524_v10, 0.0 }
 0x3de   : > { %v4744_v42 = vpop.f32.mrf.mxu1 }
 0x3df   : > { %v6066_v44 = vpack.c.bf16 %v4855_v24, %v4854_v0  ;;  %v4745_v54 = vadd.f32 %v11590_v6, %v4744_v42 }
 0x3e0   : > { %v6573_v47 = vpop.f32.mrf.mxu1 }
 0x3e1   : > { %6262 = vst [vmem:[%s10497_s26 + $0xa0] sm:$0xff] %v6066_v44   ;;  %v4910_v28 = vmax.f32 %v4745_v54, 0.0 }
 0x3e2   : > { %v4747_v41 = vpop.f32.mrf.mxu1 }
 0x3e3   : > { %v4748_v35 = vadd.f32 %v11590_v6, %v4747_v41 }
 0x3e4   : > { %v6574_v51 = vpop.f32.mrf.mxu1 }
 0x3e5   : > { %v4911_v57 = vmax.f32 %v4748_v35, 0.0  ;;  %v4528_v62 = vpop.f32.mrf.mxu0 }
 0x3e6   : > { %v4529_v38 = vadd.f32 %v11590_v6, %v4528_v62 }
 0x3e7   : > { %v6206_v8 = vpack.c.bf16 %v4911_v57, %v4910_v28  ;;  %v6465_v52 = vpop.f32.mrf.mxu0 }
 0x3e8   : > { %v4856_v50 = vmax.f32 %v4529_v38, 0.0 }
 0x3e9   : > { %6290 = vst [vmem:[%s10497_s26 + $0x180] sm:$0xff] %v6206_v8   ;;  %v4531_v45 = vpop.f32.mrf.mxu0 }
 0x3ea   : > { %v4532_v59 = vadd.f32 %v11590_v6, %v4531_v45 }
 0x3eb   : > { %v6466_v60 = vpop.f32.mrf.mxu0 }
 0x3ec   : > { %v4857_v49 = vmax.f32 %v4532_v59, 0.0 }
 0x3ee   : > { %v6071_v33 = vpack.c.bf16 %v4857_v49, %v4856_v50 }
 0x3ef   : > { %v4752_v4 = vpop.f32.mrf.mxu1 }
 0x3f0   : > { %6263 = vst [vmem:[%s10497_s26 + $0xa8] sm:$0xff] %v6071_v33   ;;  %v4753_v20 = vadd.f32 %v11590_v6, %v4752_v4 }
 0x3f1   : > { %v6577_v7 = vpop.f32.mrf.mxu1 }
 0x3f2   : > { %v4912_v29 = vmax.f32 %v4753_v20, 0.0 }
 0x3f3   : > { %v4755_v22 = vpop.f32.mrf.mxu1 }
 0x3f4   : > { %v4756_v58 = vadd.f32 %v11590_v6, %v4755_v22 }
 0x3f5   : > { %v6578_v55 = vpop.f32.mrf.mxu1 }
 0x3f6   : > { %v4913_v61 = vmax.f32 %v4756_v58, 0.0 }
 0x3f8   : > { %v6211_v56 = vpack.c.bf16 %v4913_v61, %v4912_v29 }
 0x3fa   : > { %6291 = vst [vmem:[%s10497_s26 + $0x188] sm:$0xff] %v6211_v56   ;;  %v4536_v27 = vpop.f32.mrf.mxu0 }
 0x3fb   : > { %v4537_v36 = vadd.f32 %v11590_v6, %v4536_v27 }
 0x3fc   : > { %v6469_v26 = vpop.f32.mrf.mxu0 }
 0x3fd   : > { %v4858_v11 = vmax.f32 %v4537_v36, 0.0 }
 0x3fe   : > { %v4539_v5 = vpop.f32.mrf.mxu0 }
 0x3ff   : > { %v4540_v43 = vadd.f32 %v11590_v6, %v4539_v5 }
 0x400   : > { %v6470_v15 = vpop.f32.mrf.mxu0 }
 0x401   : > { %v4859_v1 = vmax.f32 %v4540_v43, 0.0 }
 0x402   : > { %v4760_v37 = vpop.f32.mrf.mxu1 }
 0x403   : > { %v6076_v17 = vpack.c.bf16 %v4859_v1, %v4858_v11  ;;  %v4761_v25 = vadd.f32 %v11590_v6, %v4760_v37 }
 0x404   : > { %v6581_v30 = vpop.f32.mrf.mxu1 }
 0x405   : > { %6264 = vst [vmem:[%s10497_s26 + $0xb0] sm:$0xff] %v6076_v17   ;;  %v4914_v3 = vmax.f32 %v4761_v25, 0.0 }
 0x406   : > { %v4763_v34 = vpop.f32.mrf.mxu1 }
 0x407   : > { %v4764_v46 = vadd.f32 %v11590_v6, %v4763_v34 }
 0x408   : > { %v6582_v32 = vpop.f32.mrf.mxu1 }
 0x409   : > { %v4915_v23 = vmax.f32 %v4764_v46, 0.0  ;;  %v4544_v40 = vpop.f32.mrf.mxu0 }
 0x40a   : > { %v4545_v2 = vadd.f32 %v11590_v6, %v4544_v40 }
 0x40b   : > { %v6216_v12 = vpack.c.bf16 %v4915_v23, %v4914_v3  ;;  %v6473_v48 = vpop.f32.mrf.mxu0 }
 0x40c   : > { %v4860_v21 = vmax.f32 %v4545_v2, 0.0 }
 0x40d   : > { %6292 = vst [vmem:[%s10497_s26 + $0x190] sm:$0xff] %v6216_v12   ;;  %v4547_v13 = vpop.f32.mrf.mxu0 }
 0x40e   : > { %v4548_v9 = vadd.f32 %v11590_v6, %v4547_v13 }
 0x40f   : > { %v6474_v18 = vpop.f32.mrf.mxu0 }
 0x410   : > { %v4861_v14 = vmax.f32 %v4548_v9, 0.0 }
 0x412   : > { %v6081_v63 = vpack.c.bf16 %v4861_v14, %v4860_v21 }
 0x413   : > { %v4768_v39 = vpop.f32.mrf.mxu1 }
 0x414   : > { %6265 = vst [vmem:[%s10497_s26 + $0xb8] sm:$0xff] %v6081_v63   ;;  %v4769_v16 = vadd.f32 %v11590_v6, %v4768_v39 }
 0x415   : > { %v6585_v53 = vpop.f32.mrf.mxu1 }
 0x416   : > { %v4916_v0 = vmax.f32 %v4769_v16, 0.0 }
 0x417   : > { %v4771_v31 = vpop.f32.mrf.mxu1 }
 0x418   : > { %v4772_v10 = vadd.f32 %v11590_v6, %v4771_v31 }
 0x419   : > { %v6586_v19 = vpop.f32.mrf.mxu1 }
 0x41a   : > { %v4917_v24 = vmax.f32 %v4772_v10, 0.0 }
 0x41c   : > { %v6221_v42 = vpack.c.bf16 %v4917_v24, %v4916_v0 }
 0x41e   : > { %6293 = vst [vmem:[%s10497_s26 + $0x198] sm:$0xff] %v6221_v42   ;;  %v4552_v44 = vpop.f32.mrf.mxu0 }
 0x41f   : > { %v4553_v54 = vadd.f32 %v11590_v6, %v4552_v44 }
 0x420   : > { %v6477_v47 = vpop.f32.mrf.mxu0 }
 0x421   : > { %v4862_v28 = vmax.f32 %v4553_v54, 0.0 }
 0x422   : > { %v4555_v41 = vpop.f32.mrf.mxu0 }
 0x423   : > { %v4556_v35 = vadd.f32 %v11590_v6, %v4555_v41 }
 0x424   : > { %v6478_v51 = vpop.f32.mrf.mxu0 }
 0x425   : > { %v4863_v57 = vmax.f32 %v4556_v35, 0.0 }
 0x426   : > { %v4776_v62 = vpop.f32.mrf.mxu1 }
 0x427   : > { %v6086_v8 = vpack.c.bf16 %v4863_v57, %v4862_v28  ;;  %v4777_v38 = vadd.f32 %v11590_v6, %v4776_v62 }
 0x428   : > { %v6589_v52 = vpop.f32.mrf.mxu1 }
 0x429   : > { %6266 = vst [vmem:[%s10497_s26 + $0xc0] sm:$0xff] %v6086_v8   ;;  %v4918_v50 = vmax.f32 %v4777_v38, 0.0 }
 0x42a   : > { %v4779_v45 = vpop.f32.mrf.mxu1 }
 0x42b   : > { %v4780_v59 = vadd.f32 %v11590_v6, %v4779_v45 }
 0x42c   : > { %v6590_v60 = vpop.f32.mrf.mxu1 }
 0x42d   : > { %v4919_v49 = vmax.f32 %v4780_v59, 0.0  ;;  %v4560_v33 = vpop.f32.mrf.mxu0 }
 0x42e   : > { %v4561_v20 = vadd.f32 %v11590_v6, %v4560_v33 }
 0x42f   : > { %v6226_v4 = vpack.c.bf16 %v4919_v49, %v4918_v50  ;;  %v6481_v7 = vpop.f32.mrf.mxu0 }
 0x430   : > { %v4864_v29 = vmax.f32 %v4561_v20, 0.0 }
 0x431   : > { %6294 = vst [vmem:[%s10497_s26 + $0x1a0] sm:$0xff] %v6226_v4   ;;  %v4563_v22 = vpop.f32.mrf.mxu0 }
 0x432   : > { %v4564_v58 = vadd.f32 %v11590_v6, %v4563_v22 }
 0x433   : > { %v6482_v55 = vpop.f32.mrf.mxu0 }
 0x434   : > { %v4865_v61 = vmax.f32 %v4564_v58, 0.0 }
 0x436   : > { %v6091_v56 = vpack.c.bf16 %v4865_v61, %v4864_v29 }
 0x437   : > { %v4784_v27 = vpop.f32.mrf.mxu1 }
 0x438   : > { %6267 = vst [vmem:[%s10497_s26 + $0xc8] sm:$0xff] %v6091_v56   ;;  %v4785_v36 = vadd.f32 %v11590_v6, %v4784_v27 }
 0x439   : > { %v6593_v26 = vpop.f32.mrf.mxu1 }
 0x43a   : > { %v4920_v11 = vmax.f32 %v4785_v36, 0.0 }
 0x43b   : > { %v4787_v5 = vpop.f32.mrf.mxu1 }
 0x43c   : > { %v4788_v43 = vadd.f32 %v11590_v6, %v4787_v5 }
 0x43d   : > { %v6594_v15 = vpop.f32.mrf.mxu1 }
 0x43e   : > { %v4921_v1 = vmax.f32 %v4788_v43, 0.0 }
 0x440   : > { %v6231_v37 = vpack.c.bf16 %v4921_v1, %v4920_v11 }
 0x442   : > { %6295 = vst [vmem:[%s10497_s26 + $0x1a8] sm:$0xff] %v6231_v37   ;;  %v4568_v17 = vpop.f32.mrf.mxu0 }
 0x443   : > { %v4569_v25 = vadd.f32 %v11590_v6, %v4568_v17 }
 0x444   : > { %v6485_v30 = vpop.f32.mrf.mxu0 }
 0x445   : > { %v4866_v3 = vmax.f32 %v4569_v25, 0.0 }
 0x446   : > { %v4571_v34 = vpop.f32.mrf.mxu0 }
 0x447   : > { %v4572_v46 = vadd.f32 %v11590_v6, %v4571_v34 }
 0x448   : > { %v6486_v32 = vpop.f32.mrf.mxu0 }
 0x449   : > { %v4867_v23 = vmax.f32 %v4572_v46, 0.0 }
 0x44a   : > { %v4792_v40 = vpop.f32.mrf.mxu1 }
 0x44b   : > { %v6096_v12 = vpack.c.bf16 %v4867_v23, %v4866_v3  ;;  %v4793_v2 = vadd.f32 %v11590_v6, %v4792_v40 }
 0x44c   : > { %v6597_v48 = vpop.f32.mrf.mxu1 }
 0x44d   : > { %6268 = vst [vmem:[%s10497_s26 + $0xd0] sm:$0xff] %v6096_v12   ;;  %v4922_v21 = vmax.f32 %v4793_v2, 0.0 }
 0x44e   : > { %v4795_v13 = vpop.f32.mrf.mxu1 }
 0x44f   : > { %v4796_v9 = vadd.f32 %v11590_v6, %v4795_v13 }
 0x450   : > { %v6598_v18 = vpop.f32.mrf.mxu1 }
 0x451   : > { %v4923_v14 = vmax.f32 %v4796_v9, 0.0  ;;  %v4576_v63 = vpop.f32.mrf.mxu0 }
 0x452   : > { %v4577_v16 = vadd.f32 %v11590_v6, %v4576_v63 }
 0x453   : > { %v6236_v39 = vpack.c.bf16 %v4923_v14, %v4922_v21  ;;  %v6489_v53 = vpop.f32.mrf.mxu0 }
 0x454   : > { %v4868_v0 = vmax.f32 %v4577_v16, 0.0 }
 0x455   : > { %6296 = vst [vmem:[%s10497_s26 + $0x1b0] sm:$0xff] %v6236_v39   ;;  %v4579_v31 = vpop.f32.mrf.mxu0 }
 0x456   : > { %v4580_v10 = vadd.f32 %v11590_v6, %v4579_v31 }
 0x457   : > { %v6490_v19 = vpop.f32.mrf.mxu0 }
 0x458   : > { %v4869_v24 = vmax.f32 %v4580_v10, 0.0 }
 0x45a   : > { %v6101_v42 = vpack.c.bf16 %v4869_v24, %v4868_v0 }
 0x45b   : > { %v4800_v44 = vpop.f32.mrf.mxu1 }
 0x45c   : > { %6269 = vst [vmem:[%s10497_s26 + $0xd8] sm:$0xff] %v6101_v42   ;;  %v4801_v54 = vadd.f32 %v11590_v6, %v4800_v44 }
 0x45d   : > { %v6601_v47 = vpop.f32.mrf.mxu1 }
 0x45e   : > { %v4924_v28 = vmax.f32 %v4801_v54, 0.0 }
 0x45f   : > { %v4803_v41 = vpop.f32.mrf.mxu1 }
 0x460   : > { %v4804_v35 = vadd.f32 %v11590_v6, %v4803_v41 }
 0x461   : > { %v6602_v51 = vpop.f32.mrf.mxu1 }
 0x462   : > { %v4925_v57 = vmax.f32 %v4804_v35, 0.0 }
 0x464   : > { %v6241_v62 = vpack.c.bf16 %v4925_v57, %v4924_v28 }
 0x466   : > { %6297 = vst [vmem:[%s10497_s26 + $0x1b8] sm:$0xff] %v6241_v62   ;;  %v4584_v8 = vpop.f32.mrf.mxu0 }
 0x467   : > { %v4585_v38 = vadd.f32 %v11590_v6, %v4584_v8 }
 0x468   : > { %v6493_v52 = vpop.f32.mrf.mxu0 }
 0x469   : > { %v4870_v50 = vmax.f32 %v4585_v38, 0.0 }
 0x46a   : > { %v4587_v45 = vpop.f32.mrf.mxu0 }
 0x46b   : > { %v4588_v59 = vadd.f32 %v11590_v6, %v4587_v45 }
 0x46c   : > { %v6494_v60 = vpop.f32.mrf.mxu0 }
 0x46d   : > { %v4871_v49 = vmax.f32 %v4588_v59, 0.0 }
 0x46e   : > { %v4808_v33 = vpop.f32.mrf.mxu1 }
 0x46f   : > { %v6106_v4 = vpack.c.bf16 %v4871_v49, %v4870_v50  ;;  %v4809_v7 = vadd.f32 %v11590_v6, %v4808_v33 }
 0x470   : > { %v6605_v20 = vpop.f32.mrf.mxu1 }
 0x471   : > { %6270 = vst [vmem:[%s10497_s26 + $0xe0] sm:$0xff] %v6106_v4   ;;  %v4926_v22 = vmax.f32 %v4809_v7, 0.0 }
 0x472   : > { %v4811_v58 = vpop.f32.mrf.mxu1 }
 0x473   : > { %v5962_v55 = vpack.c.bf16 %v4926_v22, %v4926_v22 }
 0x474   : > { %v6606_v29 = vpop.f32.mrf.mxu1 }
 0x475   : > { %5492 = vst [vmem:[%s10497_s26 + $0x1c0] sm:$0x3] %v5962_v55 }
 0x476 PF: > { %s13_s14 = sadd.s32 1, %s6849_s14   ;;  %s13054_s12 = smov %s6845_s13 }
 0x477   : > { %p10_p5 = scmp.ge.s32.totalorder %s13_s14, 4   ;;  %s13055_s13 = smov %s13057_s15 }
 0x479   :  { %12 = sbr.rel (!%p10_p5) target bundleno = 2 (0x2), region = 62 }

</bundles_post_ra>
